<compile_context>
chip_gen: v6e
topology: v6e:2x2x1
jax: 0.10.0
libtpu: 0.0.40
codegen_flags: <defaults>
</compile_context>

<pallas_src>
import functools

import jax
import jax.numpy as jnp
from jax.experimental import pallas as pl
from jax.experimental.pallas import tpu as pltpu


def _round_up(n, m):
    return ((n + m - 1) // m) * m


# ----------------------------------------------------------------------------
# Pallas kernels
# ----------------------------------------------------------------------------
def _fused_matmul_kernel(x_ref, w_ref, shift_ref, o_ref, *, relu):
    """out = relu?(x @ w + shift)   (BN scale already folded into w columns)."""
    acc = jnp.dot(x_ref[...], w_ref[...], preferred_element_type=jnp.float32)
    y = acc + shift_ref[...]
    if relu:
        y = jnp.maximum(y, 0.0)
    o_ref[...] = y.astype(o_ref.dtype)


def fused_matmul(x, w, shift, relu=False, out_dtype=jnp.bfloat16, tm=512):
    """GEMM + folded BN/bias (+ReLU), tiled over M with a parallel grid axis.

    x: (M, K) any float dtype (cast to bf16), w: (K, N) with BN scale folded
    into columns, shift: (N,) f32.  Weight / shift stay resident (constant
    block index); the M axis is pipelined.
    """
    M, K = x.shape
    K2, N = w.shape
    assert K == K2
    tm = min(tm, _round_up(M, 8))
    M_pad = _round_up(M, tm)
    if M_pad != M:
        x = jnp.pad(x, ((0, M_pad - M), (0, 0)))
    shift2 = shift.reshape(1, N).astype(jnp.float32)

    out = pl.pallas_call(
        functools.partial(_fused_matmul_kernel, relu=relu),
        out_shape=jax.ShapeDtypeStruct((M_pad, N), out_dtype),
        grid=(M_pad // tm,),
        in_specs=[
            pl.BlockSpec((tm, K), lambda i: (i, 0)),
            pl.BlockSpec((K, N), lambda i: (0, 0)),
            pl.BlockSpec((1, N), lambda i: (0, 0)),
        ],
        out_specs=pl.BlockSpec((tm, N), lambda i: (i, 0)),
        compiler_params=pltpu.CompilerParams(
            dimension_semantics=("parallel",)),
    )(x.astype(jnp.bfloat16), w.astype(jnp.bfloat16), shift2)
    return out[:M] if M_pad != M else out


def _maxpool_reduce_kernel(x_ref, o_ref):
    # x: (9, R, L) stacked 3x3 pooling windows; reduce max over window axis.
    o_ref[...] = jnp.max(x_ref[...], axis=0)


def maxpool_3x3_s2_nhwc(x):
    """MaxPool2d(kernel=3, stride=2), no padding, NHWC layout.

    Window extraction (strided slicing) is glue; the max reduction runs in a
    Pallas kernel on a lane-dense (rows, 128) slab whenever the element count
    allows it (always true here: C=64, even total)."""
    N, H, W, C = x.shape
    oh = (H - 3) // 2 + 1
    ow = (W - 3) // 2 + 1
    wins = [x[:, di:di + 2 * oh - 1:2, dj:dj + 2 * ow - 1:2, :]
            for di in range(3) for dj in range(3)]
    stacked = jnp.stack(wins, axis=0)                     # (9, N, oh, ow, C)
    total = N * oh * ow * C
    if total % 128 == 0:
        rows, lanes = total // 128, 128                   # lane-dense slab
    else:
        rows, lanes = N * oh * ow, C
    stacked = stacked.reshape(9, rows, lanes)

    out = pl.pallas_call(
        _maxpool_reduce_kernel,
        out_shape=jax.ShapeDtypeStruct((rows, lanes), x.dtype),
        grid=(1,),
        in_specs=[pl.BlockSpec((9, rows, lanes), lambda i: (0, 0, 0))],
        out_specs=pl.BlockSpec((rows, lanes), lambda i: (0, 0)),
        compiler_params=pltpu.CompilerParams(
            dimension_semantics=("arbitrary",)),
    )(stacked)
    return out.reshape(N, oh, ow, C)


def _heads_kernel(x_ref, w1_ref, b1_ref, w2_ref, b2_ref, w3_ref, b3_ref, o_ref):
    """Both MLP heads (classifier + discriminator) fused in one kernel.

    fc1 weights are column-concatenated (128,2048); fc2/fc3 are block-diagonal
    so the two head chains stay independent while sharing one GEMM each.
    Output is a lane-dense (M,128) slab: cols [0:10]=class, [10:12]=domain.
    """
    x = x_ref[...]
    z1 = jnp.dot(x, w1_ref[...], preferred_element_type=jnp.float32) + b1_ref[...]
    z1 = jnp.maximum(z1, 0.0).astype(jnp.bfloat16)
    z2 = jnp.dot(z1, w2_ref[...], preferred_element_type=jnp.float32) + b2_ref[...]
    z2 = jnp.maximum(z2, 0.0).astype(jnp.bfloat16)
    z3 = jnp.dot(z2, w3_ref[...], preferred_element_type=jnp.float32) + b3_ref[...]
    o_ref[...] = z3


def fused_heads(feat, w1, b1, w2, b2, w3, b3, tm=512):
    """feat: (M,128).  Runs both 3-layer heads in a single pallas_call.
    Weights (~2.6 MB bf16) stay VMEM-resident; M is tiled with a parallel axis."""
    M, K = feat.shape
    assert K == 128
    tm = min(tm, _round_up(M, 8))
    M_pad = _round_up(M, tm)
    if M_pad != M:
        feat = jnp.pad(feat, ((0, M_pad - M), (0, 0)))

    out = pl.pallas_call(
        _heads_kernel,
        out_shape=jax.ShapeDtypeStruct((M_pad, 128), jnp.float32),
        grid=(M_pad // tm,),
        in_specs=[
            pl.BlockSpec((tm, 128), lambda i: (i, 0)),
            pl.BlockSpec((128, 2048), lambda i: (0, 0)),
            pl.BlockSpec((1, 2048), lambda i: (0, 0)),
            pl.BlockSpec((2048, 512), lambda i: (0, 0)),
            pl.BlockSpec((1, 512), lambda i: (0, 0)),
            pl.BlockSpec((512, 128), lambda i: (0, 0)),
            pl.BlockSpec((1, 128), lambda i: (0, 0)),
        ],
        out_specs=pl.BlockSpec((tm, 128), lambda i: (i, 0)),
        compiler_params=pltpu.CompilerParams(
            dimension_semantics=("parallel",)),
    )(feat.astype(jnp.bfloat16),
      w1.astype(jnp.bfloat16), b1.reshape(1, -1).astype(jnp.float32),
      w2.astype(jnp.bfloat16), b2.reshape(1, -1).astype(jnp.float32),
      w3.astype(jnp.bfloat16), b3.reshape(1, -1).astype(jnp.float32))
    return out[:M]


# ----------------------------------------------------------------------------
# Glue: im2col (NHWC), conv wrapper, BN folding
# ----------------------------------------------------------------------------
def _im2col_nhwc(x, kh, kw):
    """x: (N,H,W,C) -> (N*OH*OW, kh*kw*C), feature order (kh, kw, C)."""
    N, H, W, C = x.shape
    oh, ow = H - kh + 1, W - kw + 1
    patches = [x[:, di:di + oh, dj:dj + ow, :]
               for di in range(kh) for dj in range(kw)]
    p = jnp.stack(patches, axis=3)                        # (N, oh, ow, kh*kw, C)
    return p.reshape(N * oh * ow, kh * kw * C), (N, oh, ow)


def conv2d_fused(x_nhwc, w, scale, shift, relu, out_dtype=jnp.bfloat16):
    """Valid conv (stride 1) via im2col + Pallas fused GEMM, NHWC in/out.
    w is PyTorch layout (O, Cin, kh, kw); BN scale folded into weight columns."""
    O, C, kh, kw = w.shape
    cols, (N, oh, ow) = _im2col_nhwc(x_nhwc, kh, kw)
    # (O, C, kh, kw) -> (kh, kw, C, O) -> (kh*kw*C, O) to match im2col order.
    wmat = w.transpose(2, 3, 1, 0).reshape(kh * kw * C, O) * scale[None, :]
    y = fused_matmul(cols, wmat, shift, relu=relu, out_dtype=out_dtype)
    return y.reshape(N, oh, ow, O)                        # NHWC, no relayout


def bn_fold(gamma, beta, mean, var, bias, eps=1e-5):
    """Fold inference-mode BatchNorm + preceding bias into scale/shift."""
    scale = gamma / jnp.sqrt(var + eps)
    shift = beta + (bias - mean) * scale
    return scale, shift


def fold_linear(w, b, gamma, beta, mean, var, eps=1e-5):
    """Linear (in,out) followed by BN: fold scale into weight columns."""
    scale, shift = bn_fold(gamma, beta, mean, var, b, eps)
    return w * scale[None, :], shift


# ----------------------------------------------------------------------------
# Parameter construction (deterministic, PyTorch-shaped)
# ----------------------------------------------------------------------------
def init_params(key):
    p = {}

    def nrm(k, shape, s=0.05):
        return s * jax.random.normal(k, shape, jnp.float32)

    keys = iter(jax.random.split(key, 32))

    # feature extractor
    p["conv1_w"] = nrm(next(keys), (64, 3, 5, 5));   p["conv1_b"] = nrm(next(keys), (64,))
    p["conv2_w"] = nrm(next(keys), (64, 64, 5, 5));  p["conv2_b"] = nrm(next(keys), (64,))
    p["conv3_w"] = nrm(next(keys), (128, 64, 4, 4)); p["conv3_b"] = nrm(next(keys), (128,))
    for name, c in (("bn1", 64), ("bn2", 64)):
        p[f"{name}_g"] = jnp.ones((c,), jnp.float32)
        p[f"{name}_b"] = jnp.zeros((c,), jnp.float32)
        p[f"{name}_m"] = jnp.zeros((c,), jnp.float32)
        p[f"{name}_v"] = jnp.ones((c,), jnp.float32)

    # classifier / discriminator heads (linear weights stored (in, out),
    # i.e. PyTorch weight.T)
    def head(prefix, out_dim):
        p[f"{prefix}_fc1_w"] = nrm(next(keys), (128, 1024));  p[f"{prefix}_fc1_b"] = nrm(next(keys), (1024,))
        p[f"{prefix}_fc2_w"] = nrm(next(keys), (1024, 256));  p[f"{prefix}_fc2_b"] = nrm(next(keys), (256,))
        p[f"{prefix}_fc3_w"] = nrm(next(keys), (256, out_dim)); p[f"{prefix}_fc3_b"] = nrm(next(keys), (out_dim,))
        for name, c in ((f"{prefix}_bn1", 1024), (f"{prefix}_bn2", 256)):
            p[f"{name}_g"] = jnp.ones((c,), jnp.float32)
            p[f"{name}_b"] = jnp.zeros((c,), jnp.float32)
            p[f"{name}_m"] = jnp.zeros((c,), jnp.float32)
            p[f"{name}_v"] = jnp.ones((c,), jnp.float32)

    head("cls", 10)
    head("dom", 2)
    return p


# ----------------------------------------------------------------------------
# Forward pass
# ----------------------------------------------------------------------------
def svhn_forward(params, x, alpha=1.0):
    N = x.shape[0]
    x = jnp.broadcast_to(x, (N, 3, 32, 32)).astype(jnp.float32)
    x = jnp.transpose(x, (0, 2, 3, 1))                   # single NCHW->NHWC relayout

    # ---- feature extractor (channels-last throughout) ----
    s, b = bn_fold(params["bn1_g"], params["bn1_b"], params["bn1_m"],
                   params["bn1_v"], params["conv1_b"])
    h = conv2d_fused(x, params["conv1_w"], s, b, relu=True)      # (N,28,28,64)
    h = maxpool_3x3_s2_nhwc(h)                                   # (N,13,13,64)

    s, b = bn_fold(params["bn2_g"], params["bn2_b"], params["bn2_m"],
                   params["bn2_v"], params["conv2_b"])
    # Dropout2d is identity in eval mode.
    h = conv2d_fused(h, params["conv2_w"], s, b, relu=True)      # (N,9,9,64)
    h = maxpool_3x3_s2_nhwc(h)                                   # (N,4,4,64)
    # (The extra ReLU in the PyTorch graph is a no-op here: inputs are already
    #  >= 0 after ReLU + max-pool, so it is intentionally omitted.)

    h = conv2d_fused(h, params["conv3_w"], jnp.ones((128,), jnp.float32),
                     params["conv3_b"], relu=False)              # (N,1,1,128)
    feature = h.reshape(N, 128)

    # ReverseLayerF: identity in the forward pass (alpha only affects backward).
    # -> both heads consume the same tensor, so they are fused into one kernel.

    # ---- fused dual-head MLP: concat fc1, block-diag fc2/fc3 ----
    w1c, b1c = fold_linear(params["cls_fc1_w"], params["cls_fc1_b"],
                           params["cls_bn1_g"], params["cls_bn1_b"],
                           params["cls_bn1_m"], params["cls_bn1_v"])
    w1d, b1d = fold_linear(params["dom_fc1_w"], params["dom_fc1_b"],
                           params["dom_bn1_g"], params["dom_bn1_b"],
                           params["dom_bn1_m"], params["dom_bn1_v"])
    W1 = jnp.concatenate([w1c, w1d], axis=1)                     # (128, 2048)
    B1 = jnp.concatenate([b1c, b1d], axis=0)                     # (2048,)

    w2c, b2c = fold_linear(params["cls_fc2_w"], params["cls_fc2_b"],
                           params["cls_bn2_g"], params["cls_bn2_b"],
                           params["cls_bn2_m"], params["cls_bn2_v"])
    w2d, b2d = fold_linear(params["dom_fc2_w"], params["dom_fc2_b"],
                           params["dom_bn2_g"], params["dom_bn2_b"],
                           params["dom_bn2_m"], params["dom_bn2_v"])
    W2 = jnp.zeros((2048, 512), jnp.float32)
    W2 = W2.at[:1024, :256].set(w2c).at[1024:, 256:].set(w2d)    # block-diag
    B2 = jnp.concatenate([b2c, b2d], axis=0)                     # (512,)

    W3 = jnp.zeros((512, 128), jnp.float32)
    W3 = W3.at[:256, :10].set(params["cls_fc3_w"])               # class cols 0:10
    W3 = W3.at[256:, 10:12].set(params["dom_fc3_w"])             # domain cols 10:12
    B3 = jnp.zeros((128,), jnp.float32)
    B3 = B3.at[:10].set(params["cls_fc3_b"]).at[10:12].set(params["dom_fc3_b"])

    out = fused_heads(feature, W1, B1, W2, B2, W3, B3)           # (N, 128) f32
    class_output = out[:, :10]
    domain_output = out[:, 10:12]
    return class_output, domain_output


# ----------------------------------------------------------------------------
if __name__ == "__main__":
    key = jax.random.PRNGKey(0)
    pkey, xkey = jax.random.split(key)
    params = init_params(pkey)

    # small batch; model requires 3x32x32 spatial input (forward expands to it)
    x = jax.random.normal(xkey, (2, 3, 32, 32), jnp.float32)

    class_out, domain_out = jax.jit(svhn_forward)(params, x)
    jax.block_until_ready((class_out, domain_out))

    assert class_out.shape == (2, 10), class_out.shape
    assert domain_out.shape == (2, 2), domain_out.shape
    assert bool(jnp.isfinite(class_out).all()) and bool(jnp.isfinite(domain_out).all())
    print("KERNEL_OK")
</pallas_src>

<mosaic_0001>
module attributes {stable_mosaic.version = 11 : i64} {
  func.func @_fused_matmul_kernel(%arg0: i32, %arg1: memref<512x75xbf16, #tpu.memory_space<vmem>>, %arg2: memref<75x64xbf16, #tpu.memory_space<vmem>>, %arg3: memref<1x64xf32, #tpu.memory_space<vmem>>, %arg4: memref<512x64xbf16, #tpu.memory_space<vmem>>) attributes {dimension_semantics = [#tpu.dimension_semantics<parallel>], iteration_bounds = array<i64: 4>, scalar_prefetch = 0 : i64, scratch_operands = 0 : i64, tpu.core_type = #tpu.core_type<tc>, window_params = [{transform_indices = @transform_0, window_bounds = array<i64: 512, 75>}, {pipeline_mode = #tpu.pipeline_mode<synchronous>, transform_indices = @transform_1, window_bounds = array<i64: 75, 64>}, {pipeline_mode = #tpu.pipeline_mode<synchronous>, transform_indices = @transform_2, window_bounds = array<i64: 1, 64>}, {transform_indices = @transform_3, window_bounds = array<i64: 512, 64>}]} {
    %c0 = arith.constant 0 : index
    %c0_0 = arith.constant 0 : index
    %0 = vector.load %arg1[%c0, %c0_0] : memref<512x75xbf16, #tpu.memory_space<vmem>>, vector<512x75xbf16>
    %c0_1 = arith.constant 0 : index
    %c0_2 = arith.constant 0 : index
    %1 = vector.load %arg2[%c0_1, %c0_2] : memref<75x64xbf16, #tpu.memory_space<vmem>>, vector<75x64xbf16>
    %cst = arith.constant dense<0.000000e+00> : vector<512x64xf32>
    %2 = tpu.matmul %0, %1, %cst {dimension_numbers = #tpu.dot_dimension_numbers<[1], [0], [0], [1], [0, 0, 1, 1], [], []>} : vector<512x75xbf16>, vector<75x64xbf16>, vector<512x64xf32> -> vector<512x64xf32>
    %c0_3 = arith.constant 0 : index
    %c0_4 = arith.constant 0 : index
    %3 = vector.load %arg3[%c0_3, %c0_4] : memref<1x64xf32, #tpu.memory_space<vmem>>, vector<1x64xf32>
    %4 = vector.broadcast %3 : vector<1x64xf32> to vector<512x64xf32>
    %5 = arith.addf %2, %4 : vector<512x64xf32>
    %cst_5 = arith.constant 0.000000e+00 : f32
    %6 = vector.broadcast %cst_5 : f32 to vector<512x64xf32>
    %7 = arith.maximumf %5, %6 : vector<512x64xf32>
    %8 = arith.truncf %7 : vector<512x64xf32> to vector<512x64xbf16>
    %c0_6 = arith.constant 0 : index
    %c0_7 = arith.constant 0 : index
    %9 = vector.load %arg4[%c0_6, %c0_7] : memref<512x64xbf16, #tpu.memory_space<vmem>>, vector<512x64xbf16>
    tpu.vector_store %arg4[%c0_6, %c0_7], %8 {strides = array<i32>} : memref<512x64xbf16, #tpu.memory_space<vmem>>, vector<512x64xbf16>,
    return
  }
  func.func @transform_0(%arg0: i32) -> (i32, i32) {
    %c0_i32 = arith.constant 0 : i32
    %c0_i32_0 = arith.constant 0 : i32
    return %arg0, %c0_i32 : i32, i32
  }
  func.func @transform_1(%arg0: i32) -> (i32, i32) {
    %c0_i32 = arith.constant 0 : i32
    %c0_i32_0 = arith.constant 0 : i32
    %c0_i32_1 = arith.constant 0 : i32
    return %c0_i32, %c0_i32_0 : i32, i32
  }
  func.func @transform_2(%arg0: i32) -> (i32, i32) {
    %c0_i32 = arith.constant 0 : i32
    %c0_i32_0 = arith.constant 0 : i32
    %c0_i32_1 = arith.constant 0 : i32
    return %c0_i32, %c0_i32_0 : i32, i32
  }
  func.func @transform_3(%arg0: i32) -> (i32, i32) {
    %c0_i32 = arith.constant 0 : i32
    %c0_i32_0 = arith.constant 0 : i32
    return %arg0, %c0_i32 : i32, i32
  }
}

module attributes {stable_mosaic.version = 11 : i64} {
  func.func @_maxpool_reduce_kernel(%arg0: i32, %arg1: memref<9x169x128xbf16, #tpu.memory_space<vmem>>, %arg2: memref<169x128xbf16, #tpu.memory_space<vmem>>) attributes {dimension_semantics = [#tpu.dimension_semantics<arbitrary>], iteration_bounds = array<i64: 1>, scalar_prefetch = 0 : i64, scratch_operands = 0 : i64, tpu.core_type = #tpu.core_type<tc>, window_params = [{pipeline_mode = #tpu.pipeline_mode<synchronous>, transform_indices = @transform_0, window_bounds = array<i64: 9, 169, 128>}, {pipeline_mode = #tpu.pipeline_mode<synchronous>, transform_indices = @transform_1, window_bounds = array<i64: 169, 128>}]} {
    %c0 = arith.constant 0 : index
    %c0_0 = arith.constant 0 : index
    %c0_1 = arith.constant 0 : index
    %0 = vector.load %arg1[%c0, %c0_0, %c0_1] : memref<9x169x128xbf16, #tpu.memory_space<vmem>>, vector<9x169x128xbf16>
    %cst = arith.constant dense<0xFF80> : vector<169x128xbf16>
    %1 = vector.multi_reduction <maximumf>, %0, %cst [0] : vector<9x169x128xbf16> to vector<169x128xbf16>
    %c0_2 = arith.constant 0 : index
    %c0_3 = arith.constant 0 : index
    %2 = vector.load %arg2[%c0_2, %c0_3] : memref<169x128xbf16, #tpu.memory_space<vmem>>, vector<169x128xbf16>
    tpu.vector_store %arg2[%c0_2, %c0_3], %1 {strides = array<i32>} : memref<169x128xbf16, #tpu.memory_space<vmem>>, vector<169x128xbf16>,
    return
  }
  func.func @transform_0(%arg0: i32) -> (i32, i32, i32) {
    %c0_i32 = arith.constant 0 : i32
    %c0_i32_0 = arith.constant 0 : i32
    %c0_i32_1 = arith.constant 0 : i32
    %c0_i32_2 = arith.constant 0 : i32
    return %c0_i32, %c0_i32_0, %c0_i32_1 : i32, i32, i32
  }
  func.func @transform_1(%arg0: i32) -> (i32, i32) {
    %c0_i32 = arith.constant 0 : i32
    %c0_i32_0 = arith.constant 0 : i32
    %c0_i32_1 = arith.constant 0 : i32
    return %c0_i32, %c0_i32_0 : i32, i32
  }
}

module attributes {stable_mosaic.version = 11 : i64} {
  func.func @_fused_matmul_kernel(%arg0: i32, %arg1: memref<168x1600xbf16, #tpu.memory_space<vmem>>, %arg2: memref<1600x64xbf16, #tpu.memory_space<vmem>>, %arg3: memref<1x64xf32, #tpu.memory_space<vmem>>, %arg4: memref<168x64xbf16, #tpu.memory_space<vmem>>) attributes {dimension_semantics = [#tpu.dimension_semantics<parallel>], iteration_bounds = array<i64: 1>, scalar_prefetch = 0 : i64, scratch_operands = 0 : i64, tpu.core_type = #tpu.core_type<tc>, window_params = [{transform_indices = @transform_0, window_bounds = array<i64: 168, 1600>}, {pipeline_mode = #tpu.pipeline_mode<synchronous>, transform_indices = @transform_1, window_bounds = array<i64: 1600, 64>}, {pipeline_mode = #tpu.pipeline_mode<synchronous>, transform_indices = @transform_2, window_bounds = array<i64: 1, 64>}, {transform_indices = @transform_3, window_bounds = array<i64: 168, 64>}]} {
    %c0 = arith.constant 0 : index
    %c0_0 = arith.constant 0 : index
    %0 = vector.load %arg1[%c0, %c0_0] : memref<168x1600xbf16, #tpu.memory_space<vmem>>, vector<168x1600xbf16>
    %c0_1 = arith.constant 0 : index
    %c0_2 = arith.constant 0 : index
    %1 = vector.load %arg2[%c0_1, %c0_2] : memref<1600x64xbf16, #tpu.memory_space<vmem>>, vector<1600x64xbf16>
    %cst = arith.constant dense<0.000000e+00> : vector<168x64xf32>
    %2 = tpu.matmul %0, %1, %cst {dimension_numbers = #tpu.dot_dimension_numbers<[1], [0], [0], [1], [0, 0, 1, 1], [], []>} : vector<168x1600xbf16>, vector<1600x64xbf16>, vector<168x64xf32> -> vector<168x64xf32>
    %c0_3 = arith.constant 0 : index
    %c0_4 = arith.constant 0 : index
    %3 = vector.load %arg3[%c0_3, %c0_4] : memref<1x64xf32, #tpu.memory_space<vmem>>, vector<1x64xf32>
    %4 = vector.broadcast %3 : vector<1x64xf32> to vector<168x64xf32>
    %5 = arith.addf %2, %4 : vector<168x64xf32>
    %cst_5 = arith.constant 0.000000e+00 : f32
    %6 = vector.broadcast %cst_5 : f32 to vector<168x64xf32>
    %7 = arith.maximumf %5, %6 : vector<168x64xf32>
    %8 = arith.truncf %7 : vector<168x64xf32> to vector<168x64xbf16>
    %c0_6 = arith.constant 0 : index
    %c0_7 = arith.constant 0 : index
    %9 = vector.load %arg4[%c0_6, %c0_7] : memref<168x64xbf16, #tpu.memory_space<vmem>>, vector<168x64xbf16>
    tpu.vector_store %arg4[%c0_6, %c0_7], %8 {strides = array<i32>} : memref<168x64xbf16, #tpu.memory_space<vmem>>, vector<168x64xbf16>,
    return
  }
  func.func @transform_0(%arg0: i32) -> (i32, i32) {
    %c0_i32 = arith.constant 0 : i32
    %c0_i32_0 = arith.constant 0 : i32
    return %arg0, %c0_i32 : i32, i32
  }
  func.func @transform_1(%arg0: i32) -> (i32, i32) {
    %c0_i32 = arith.constant 0 : i32
    %c0_i32_0 = arith.constant 0 : i32
    %c0_i32_1 = arith.constant 0 : i32
    return %c0_i32, %c0_i32_0 : i32, i32
  }
  func.func @transform_2(%arg0: i32) -> (i32, i32) {
    %c0_i32 = arith.constant 0 : i32
    %c0_i32_0 = arith.constant 0 : i32
    %c0_i32_1 = arith.constant 0 : i32
    return %c0_i32, %c0_i32_0 : i32, i32
  }
  func.func @transform_3(%arg0: i32) -> (i32, i32) {
    %c0_i32 = arith.constant 0 : i32
    %c0_i32_0 = arith.constant 0 : i32
    return %arg0, %c0_i32 : i32, i32
  }
}

module attributes {stable_mosaic.version = 11 : i64} {
  func.func @_maxpool_reduce_kernel(%arg0: i32, %arg1: memref<9x16x128xbf16, #tpu.memory_space<vmem>>, %arg2: memref<16x128xbf16, #tpu.memory_space<vmem>>) attributes {dimension_semantics = [#tpu.dimension_semantics<arbitrary>], iteration_bounds = array<i64: 1>, scalar_prefetch = 0 : i64, scratch_operands = 0 : i64, tpu.core_type = #tpu.core_type<tc>, window_params = [{pipeline_mode = #tpu.pipeline_mode<synchronous>, transform_indices = @transform_0, window_bounds = array<i64: 9, 16, 128>}, {pipeline_mode = #tpu.pipeline_mode<synchronous>, transform_indices = @transform_1, window_bounds = array<i64: 16, 128>}]} {
    %c0 = arith.constant 0 : index
    %c0_0 = arith.constant 0 : index
    %c0_1 = arith.constant 0 : index
    %0 = vector.load %arg1[%c0, %c0_0, %c0_1] : memref<9x16x128xbf16, #tpu.memory_space<vmem>>, vector<9x16x128xbf16>
    %cst = arith.constant dense<0xFF80> : vector<16x128xbf16>
    %1 = vector.multi_reduction <maximumf>, %0, %cst [0] : vector<9x16x128xbf16> to vector<16x128xbf16>
    %c0_2 = arith.constant 0 : index
    %c0_3 = arith.constant 0 : index
    %2 = vector.load %arg2[%c0_2, %c0_3] : memref<16x128xbf16, #tpu.memory_space<vmem>>, vector<16x128xbf16>
    tpu.vector_store %arg2[%c0_2, %c0_3], %1 {strides = array<i32>} : memref<16x128xbf16, #tpu.memory_space<vmem>>, vector<16x128xbf16>,
    return
  }
  func.func @transform_0(%arg0: i32) -> (i32, i32, i32) {
    %c0_i32 = arith.constant 0 : i32
    %c0_i32_0 = arith.constant 0 : i32
    %c0_i32_1 = arith.constant 0 : i32
    %c0_i32_2 = arith.constant 0 : i32
    return %c0_i32, %c0_i32_0, %c0_i32_1 : i32, i32, i32
  }
  func.func @transform_1(%arg0: i32) -> (i32, i32) {
    %c0_i32 = arith.constant 0 : i32
    %c0_i32_0 = arith.constant 0 : i32
    %c0_i32_1 = arith.constant 0 : i32
    return %c0_i32, %c0_i32_0 : i32, i32
  }
}

module attributes {stable_mosaic.version = 11 : i64} {
  func.func @_fused_matmul_kernel(%arg0: i32, %arg1: memref<8x1024xbf16, #tpu.memory_space<vmem>>, %arg2: memref<1024x128xbf16, #tpu.memory_space<vmem>>, %arg3: memref<1x128xf32, #tpu.memory_space<vmem>>, %arg4: memref<8x128xbf16, #tpu.memory_space<vmem>>) attributes {dimension_semantics = [#tpu.dimension_semantics<parallel>], iteration_bounds = array<i64: 1>, scalar_prefetch = 0 : i64, scratch_operands = 0 : i64, tpu.core_type = #tpu.core_type<tc>, window_params = [{transform_indices = @transform_0, window_bounds = array<i64: 8, 1024>}, {pipeline_mode = #tpu.pipeline_mode<synchronous>, transform_indices = @transform_1, window_bounds = array<i64: 1024, 128>}, {pipeline_mode = #tpu.pipeline_mode<synchronous>, transform_indices = @transform_2, window_bounds = array<i64: 1, 128>}, {transform_indices = @transform_3, window_bounds = array<i64: 8, 128>}]} {
    %c0 = arith.constant 0 : index
    %c0_0 = arith.constant 0 : index
    %0 = vector.load %arg1[%c0, %c0_0] : memref<8x1024xbf16, #tpu.memory_space<vmem>>, vector<8x1024xbf16>
    %c0_1 = arith.constant 0 : index
    %c0_2 = arith.constant 0 : index
    %1 = vector.load %arg2[%c0_1, %c0_2] : memref<1024x128xbf16, #tpu.memory_space<vmem>>, vector<1024x128xbf16>
    %cst = arith.constant dense<0.000000e+00> : vector<8x128xf32>
    %2 = tpu.matmul %0, %1, %cst {dimension_numbers = #tpu.dot_dimension_numbers<[1], [0], [0], [1], [0, 0, 1, 1], [], []>} : vector<8x1024xbf16>, vector<1024x128xbf16>, vector<8x128xf32> -> vector<8x128xf32>
    %c0_3 = arith.constant 0 : index
    %c0_4 = arith.constant 0 : index
    %3 = vector.load %arg3[%c0_3, %c0_4] : memref<1x128xf32, #tpu.memory_space<vmem>>, vector<1x128xf32>
    %4 = vector.broadcast %3 : vector<1x128xf32> to vector<8x128xf32>
    %5 = arith.addf %2, %4 : vector<8x128xf32>
    %6 = arith.truncf %5 : vector<8x128xf32> to vector<8x128xbf16>
    %c0_5 = arith.constant 0 : index
    %c0_6 = arith.constant 0 : index
    %7 = vector.load %arg4[%c0_5, %c0_6] : memref<8x128xbf16, #tpu.memory_space<vmem>>, vector<8x128xbf16>
    tpu.vector_store %arg4[%c0_5, %c0_6], %6 {strides = array<i32>} : memref<8x128xbf16, #tpu.memory_space<vmem>>, vector<8x128xbf16>,
    return
  }
  func.func @transform_0(%arg0: i32) -> (i32, i32) {
    %c0_i32 = arith.constant 0 : i32
    %c0_i32_0 = arith.constant 0 : i32
    return %arg0, %c0_i32 : i32, i32
  }
  func.func @transform_1(%arg0: i32) -> (i32, i32) {
    %c0_i32 = arith.constant 0 : i32
    %c0_i32_0 = arith.constant 0 : i32
    %c0_i32_1 = arith.constant 0 : i32
    return %c0_i32, %c0_i32_0 : i32, i32
  }
  func.func @transform_2(%arg0: i32) -> (i32, i32) {
    %c0_i32 = arith.constant 0 : i32
    %c0_i32_0 = arith.constant 0 : i32
    %c0_i32_1 = arith.constant 0 : i32
    return %c0_i32, %c0_i32_0 : i32, i32
  }
  func.func @transform_3(%arg0: i32) -> (i32, i32) {
    %c0_i32 = arith.constant 0 : i32
    %c0_i32_0 = arith.constant 0 : i32
    return %arg0, %c0_i32 : i32, i32
  }
}

module attributes {stable_mosaic.version = 11 : i64} {
  func.func @_heads_kernel(%arg0: i32, %arg1: memref<8x128xbf16, #tpu.memory_space<vmem>>, %arg2: memref<128x2048xbf16, #tpu.memory_space<vmem>>, %arg3: memref<1x2048xf32, #tpu.memory_space<vmem>>, %arg4: memref<2048x512xbf16, #tpu.memory_space<vmem>>, %arg5: memref<1x512xf32, #tpu.memory_space<vmem>>, %arg6: memref<512x128xbf16, #tpu.memory_space<vmem>>, %arg7: memref<1x128xf32, #tpu.memory_space<vmem>>, %arg8: memref<8x128xf32, #tpu.memory_space<vmem>>) attributes {dimension_semantics = [#tpu.dimension_semantics<parallel>], iteration_bounds = array<i64: 1>, scalar_prefetch = 0 : i64, scratch_operands = 0 : i64, tpu.core_type = #tpu.core_type<tc>, window_params = [{transform_indices = @transform_0, window_bounds = array<i64: 8, 128>}, {pipeline_mode = #tpu.pipeline_mode<synchronous>, transform_indices = @transform_1, window_bounds = array<i64: 128, 2048>}, {pipeline_mode = #tpu.pipeline_mode<synchronous>, transform_indices = @transform_2, window_bounds = array<i64: 1, 2048>}, {pipeline_mode = #tpu.pipeline_mode<synchronous>, transform_indices = @transform_3, window_bounds = array<i64: 2048, 512>}, {pipeline_mode = #tpu.pipeline_mode<synchronous>, transform_indices = @transform_4, window_bounds = array<i64: 1, 512>}, {pipeline_mode = #tpu.pipeline_mode<synchronous>, transform_indices = @transform_5, window_bounds = array<i64: 512, 128>}, {pipeline_mode = #tpu.pipeline_mode<synchronous>, transform_indices = @transform_6, window_bounds = array<i64: 1, 128>}, {transform_indices = @transform_7, window_bounds = array<i64: 8, 128>}]} {
    %c0 = arith.constant 0 : index
    %c0_0 = arith.constant 0 : index
    %0 = vector.load %arg1[%c0, %c0_0] : memref<8x128xbf16, #tpu.memory_space<vmem>>, vector<8x128xbf16>
    %c0_1 = arith.constant 0 : index
    %c0_2 = arith.constant 0 : index
    %1 = vector.load %arg2[%c0_1, %c0_2] : memref<128x2048xbf16, #tpu.memory_space<vmem>>, vector<128x2048xbf16>
    %cst = arith.constant dense<0.000000e+00> : vector<8x2048xf32>
    %2 = tpu.matmul %0, %1, %cst {dimension_numbers = #tpu.dot_dimension_numbers<[1], [0], [0], [1], [0, 0, 1, 1], [], []>} : vector<8x128xbf16>, vector<128x2048xbf16>, vector<8x2048xf32> -> vector<8x2048xf32>
    %c0_3 = arith.constant 0 : index
    %c0_4 = arith.constant 0 : index
    %3 = vector.load %arg3[%c0_3, %c0_4] : memref<1x2048xf32, #tpu.memory_space<vmem>>, vector<1x2048xf32>
    %4 = vector.broadcast %3 : vector<1x2048xf32> to vector<8x2048xf32>
    %5 = arith.addf %2, %4 : vector<8x2048xf32>
    %cst_5 = arith.constant 0.000000e+00 : f32
    %6 = vector.broadcast %cst_5 : f32 to vector<8x2048xf32>
    %7 = arith.maximumf %5, %6 : vector<8x2048xf32>
    %8 = arith.truncf %7 : vector<8x2048xf32> to vector<8x2048xbf16>
    %c0_6 = arith.constant 0 : index
    %c0_7 = arith.constant 0 : index
    %9 = vector.load %arg4[%c0_6, %c0_7] : memref<2048x512xbf16, #tpu.memory_space<vmem>>, vector<2048x512xbf16>
    %cst_8 = arith.constant dense<0.000000e+00> : vector<8x512xf32>
    %10 = tpu.matmul %8, %9, %cst_8 {dimension_numbers = #tpu.dot_dimension_numbers<[1], [0], [0], [1], [0, 0, 1, 1], [], []>} : vector<8x2048xbf16>, vector<2048x512xbf16>, vector<8x512xf32> -> vector<8x512xf32>
    %c0_9 = arith.constant 0 : index
    %c0_10 = arith.constant 0 : index
    %11 = vector.load %arg5[%c0_9, %c0_10] : memref<1x512xf32, #tpu.memory_space<vmem>>, vector<1x512xf32>
    %12 = vector.broadcast %11 : vector<1x512xf32> to vector<8x512xf32>
    %13 = arith.addf %10, %12 : vector<8x512xf32>
    %cst_11 = arith.constant 0.000000e+00 : f32
    %14 = vector.broadcast %cst_11 : f32 to vector<8x512xf32>
    %15 = arith.maximumf %13, %14 : vector<8x512xf32>
    %16 = arith.truncf %15 : vector<8x512xf32> to vector<8x512xbf16>
    %c0_12 = arith.constant 0 : index
    %c0_13 = arith.constant 0 : index
    %17 = vector.load %arg6[%c0_12, %c0_13] : memref<512x128xbf16, #tpu.memory_space<vmem>>, vector<512x128xbf16>
    %cst_14 = arith.constant dense<0.000000e+00> : vector<8x128xf32>
    %18 = tpu.matmul %16, %17, %cst_14 {dimension_numbers = #tpu.dot_dimension_numbers<[1], [0], [0], [1], [0, 0, 1, 1], [], []>} : vector<8x512xbf16>, vector<512x128xbf16>, vector<8x128xf32> -> vector<8x128xf32>
    %c0_15 = arith.constant 0 : index
    %c0_16 = arith.constant 0 : index
    %19 = vector.load %arg7[%c0_15, %c0_16] : memref<1x128xf32, #tpu.memory_space<vmem>>, vector<1x128xf32>
    %20 = vector.broadcast %19 : vector<1x128xf32> to vector<8x128xf32>
    %21 = arith.addf %18, %20 : vector<8x128xf32>
    %c0_17 = arith.constant 0 : index
    %c0_18 = arith.constant 0 : index
    %22 = vector.load %arg8[%c0_17, %c0_18] : memref<8x128xf32, #tpu.memory_space<vmem>>, vector<8x128xf32>
    tpu.vector_store %arg8[%c0_17, %c0_18], %21 {strides = array<i32>} : memref<8x128xf32, #tpu.memory_space<vmem>>, vector<8x128xf32>,
    return
  }
  func.func @transform_0(%arg0: i32) -> (i32, i32) {
    %c0_i32 = arith.constant 0 : i32
    %c0_i32_0 = arith.constant 0 : i32
    return %arg0, %c0_i32 : i32, i32
  }
  func.func @transform_1(%arg0: i32) -> (i32, i32) {
    %c0_i32 = arith.constant 0 : i32
    %c0_i32_0 = arith.constant 0 : i32
    %c0_i32_1 = arith.constant 0 : i32
    return %c0_i32, %c0_i32_0 : i32, i32
  }
  func.func @transform_2(%arg0: i32) -> (i32, i32) {
    %c0_i32 = arith.constant 0 : i32
    %c0_i32_0 = arith.constant 0 : i32
    %c0_i32_1 = arith.constant 0 : i32
    return %c0_i32, %c0_i32_0 : i32, i32
  }
  func.func @transform_3(%arg0: i32) -> (i32, i32) {
    %c0_i32 = arith.constant 0 : i32
    %c0_i32_0 = arith.constant 0 : i32
    %c0_i32_1 = arith.constant 0 : i32
    return %c0_i32, %c0_i32_0 : i32, i32
  }
  func.func @transform_4(%arg0: i32) -> (i32, i32) {
    %c0_i32 = arith.constant 0 : i32
    %c0_i32_0 = arith.constant 0 : i32
    %c0_i32_1 = arith.constant 0 : i32
    return %c0_i32, %c0_i32_0 : i32, i32
  }
  func.func @transform_5(%arg0: i32) -> (i32, i32) {
    %c0_i32 = arith.constant 0 : i32
    %c0_i32_0 = arith.constant 0 : i32
    %c0_i32_1 = arith.constant 0 : i32
    return %c0_i32, %c0_i32_0 : i32, i32
  }
  func.func @transform_6(%arg0: i32) -> (i32, i32) {
    %c0_i32 = arith.constant 0 : i32
    %c0_i32_0 = arith.constant 0 : i32
    %c0_i32_1 = arith.constant 0 : i32
    return %c0_i32, %c0_i32_0 : i32, i32
  }
  func.func @transform_7(%arg0: i32) -> (i32, i32) {
    %c0_i32 = arith.constant 0 : i32
    %c0_i32_0 = arith.constant 0 : i32
    return %arg0, %c0_i32 : i32, i32
  }
}

</mosaic_0001>

<bundles_post_ra>
// kernel: svhn_forward.6
= control target key start
LH: loop header
LB: loop body
LE: loop exit
PB: predicated region body
PF: predicated region fallthrough
CT: control target
= control target key end

     0   :  { %s1684_s12 = smov 0   ;;  %s1988_s0 = inlined_call_operand.vmem [shape: bf16[2048,75], index: 0, kind: input, shape index: {}]   ;;  %s1989_s1 = inlined_call_operand.vmem [shape: bf16[75,64], index: 1, kind: input, shape index: {}]   ;;  %s1990_s2 = inlined_call_operand.vmem [shape: f32[1,64], index: 2, kind: input, shape index: {}]   ;;  %s1991_s3 = inlined_call_operand.vmem [shape: bf16[2048,64], index: 3, kind: output, shape index: {}]  }
   0x1 LB: > { %s1279_s13 = sadd.s32 4294967295, %s1661_s12   ;;  %p1283_p0 = scmp.ge.s32.totalorder %s1661_s12, 1  ;;  %s1661_s12 = sphi %s1684_s12, %s13_s12  }
   0x2   : > { %p138_p1 = scmp.lt.s32.totalorder %s1661_s12, 5 }
   0x4   : > { %p139_p2 = pnand %p1283_p0, %p138_p1 }
   0x5   : > { %s1284_s18 = sshll.u32 (!%p139_p2), %s1279_s13, 6 }
   0x6   : > { %142 = sbr.rel (%p139_p2) target bundleno = 298 (0x12a), region = 32  ;;  %p163_p3 = scmp.lt.s32.totalorder (!%p139_p2), %s1284_s18, 255 }
   0xb   : > { %v1618_v0 = vld [vmem:[%s1989_s1 + $0x20] sm:$0x3f]   ;;  %vm542_vm0 = vcmask 1044480   ;;  %vm543_vm1 = vcmask 1045504   ;;  %v1663_v1 = vmov 65535   ;;  %v1619_v4 = vld [vmem:[%s1989_s1 + $0x18] sm:$0xff]  }
   0xc   : > { %v544_v2 = vsel %vm542_vm0, 4294967295, %v1663_v1  ;;  %v1620_v6 = vld [vmem:[%s1989_s1 + $0x10] sm:$0xff]   ;;  %s1993_s18 = smov (!%p163_p3, %s1284_s18), 255  ;;  %v1621_v7 = vld [vmem:[%s1989_s1 + $0x8] sm:$0xff]   ;;  %vm445_vm2 = vcmask 613376   ;;  %v1622_v10 = vld [vmem:[%s1989_s1] sm:$0xff]  }
   0xd   : > { %v545_v3 = vsel %vm543_vm1, %v544_v2, 0  ;;  %s1285_s21 = sshll.u32 %s1993_s18, 2  ;;  %v1784_v41 = vld [vmem:[%s1990_s2] ss:$0 sm:$0xff]  ;;  %vm1158_vm3 = vcmask 519168  }
   0xe   : > { %v547_v5 = vand.u32 %v1618_v0, %v545_v3  ;;  %s1712_s26 = scalar_lea.vmem %s1988_s0, %s1285_s21  ;;  %s1795_s6 = scalar_lea.vmem %s1991_s3, %s1285_s21 }
   0xf   : > { %v1623_v8 = vld [vmem:[%s1712_s26] sm:$0xff]   ;;  %v1625_v11 = vld [vmem:[%s1712_s26 + $0x8] sm:$0xff]   ;;  %v1627_v13 = vld [vmem:[%s1712_s26 + $0x10] sm:$0xff]  }
  0x10   : > { %1525 = vmatprep.subr.bf16.mxu0 %v547_v5  ;;  %1599 = vmatprep.subr.bf16.mxu1 %v547_v5  ;;  %v1624_v9 = vld [vmem:[%s1712_s26 + $0x80] sm:$0xff]   ;;  %v1626_v12 = vld [vmem:[%s1712_s26 + $0x88] sm:$0xff]   ;;  %v1628_v14 = vld [vmem:[%s1712_s26 + $0x90] sm:$0xff]  }
  0x11   : > { %1526 = vmatpush3.bf16.msra.mxu0 %v547_v5  ;;  %1604 = vmatpush3.bf16.msra.mxu1 %v547_v5  ;;  %v1629_v15 = vld [vmem:[%s1712_s26 + $0x18] sm:$0xff]   ;;  %v1631_v17 = vld [vmem:[%s1712_s26 + $0x20] sm:$0xff]   ;;  %v1633_v19 = vld [vmem:[%s1712_s26 + $0x28] sm:$0xff]  }
  0x12   : > { %1527 = vmatprep.subr.bf16.mxu0 %v1619_v4  ;;  %1600 = vmatprep.subr.bf16.mxu1 %v1619_v4  ;;  %v1630_v16 = vld [vmem:[%s1712_s26 + $0x98] sm:$0xff]   ;;  %v1632_v18 = vld [vmem:[%s1712_s26 + $0xa0] sm:$0xff]   ;;  %v1634_v20 = vld [vmem:[%s1712_s26 + $0xa8] sm:$0xff]  }
  0x13   : > { %1535 = vmatprep.mubr.msk.bf16.mxu0 %vm445_vm2, %v1623_v8  ;;  %1567 = vmatprep.mubr.msk.bf16.mxu1 %vm445_vm2, %v1624_v9  ;;  %v1635_v21 = vld [vmem:[%s1712_s26 + $0x30] sm:$0xff]   ;;  %v1637_v23 = vld [vmem:[%s1712_s26 + $0x38] sm:$0xff]   ;;  %v1639_v25 = vld [vmem:[%s1712_s26 + $0x40] sm:$0xff]  }
  0x14   : > { %v1636_v22 = vld [vmem:[%s1712_s26 + $0xb0] sm:$0xff]   ;;  %v1638_v24 = vld [vmem:[%s1712_s26 + $0xb8] sm:$0xff]   ;;  %v1640_v26 = vld [vmem:[%s1712_s26 + $0xc0] sm:$0xff]  }
  0x15   : > { %1528 = vmatpush3.bf16.msra.mxu0 %v1619_v4  ;;  %1605 = vmatpush3.bf16.msra.mxu1 %v1619_v4  ;;  %v1641_v27 = vld [vmem:[%s1712_s26 + $0x48] sm:$0xff]   ;;  %v1643_v29 = vld [vmem:[%s1712_s26 + $0x50] sm:$0xff]   ;;  %v1645_v31 = vld [vmem:[%s1712_s26 + $0x58] sm:$0xff]  }
  0x16   : > { %1529 = vmatprep.subr.bf16.mxu0 %v1620_v6  ;;  %1601 = vmatprep.subr.bf16.mxu1 %v1620_v6  ;;  %v1642_v28 = vld [vmem:[%s1712_s26 + $0xc8] sm:$0xff]   ;;  %v1644_v30 = vld [vmem:[%s1712_s26 + $0xd0] sm:$0xff]   ;;  %v1646_v32 = vld [vmem:[%s1712_s26 + $0xd8] sm:$0xff]  }
  0x17   : > { %v1647_v33 = vld [vmem:[%s1712_s26 + $0x60] sm:$0xff]   ;;  %v1649_v35 = vld [vmem:[%s1712_s26 + $0x68] sm:$0xff]   ;;  %v1651_v37 = vld [vmem:[%s1712_s26 + $0x70] sm:$0xff]  }
  0x18   : > { %v1648_v34 = vld [vmem:[%s1712_s26 + $0xe0] sm:$0xff]   ;;  %v1650_v36 = vld [vmem:[%s1712_s26 + $0xe8] sm:$0xff]   ;;  %v1652_v38 = vld [vmem:[%s1712_s26 + $0xf0] sm:$0xff]  }
  0x19   : > { %1530 = vmatpush3.bf16.msra.mxu0 %v1620_v6  ;;  %1606 = vmatpush3.bf16.msra.mxu1 %v1620_v6  ;;  %v1653_v39 = vld [vmem:[%s1712_s26 + $0x78] sm:$0xff]  }
  0x1a   : > { %1531 = vmatprep.subr.bf16.mxu0 %v1621_v7  ;;  %1602 = vmatprep.subr.bf16.mxu1 %v1621_v7  ;;  %v1654_v40 = vld [vmem:[%s1712_s26 + $0xf8] sm:$0xff]  }
  0x1d   : > { %1532 = vmatpush3.bf16.msra.mxu0 %v1621_v7  ;;  %1607 = vmatpush3.bf16.msra.mxu1 %v1621_v7 }
  0x1e   : > { %1533 = vmatprep.subr.bf16.mxu0 %v1622_v10  ;;  %1603 = vmatprep.subr.bf16.mxu1 %v1622_v10 }
  0x21   : > { %1534 = vmatpush3.bf16.msra.mxu0 %v1622_v10  ;;  %1608 = vmatpush3.bf16.msra.mxu1 %v1622_v10 }
  0x24   : > { %1536 = vmatmul.mubr.msk.bf16.vlgmr.msra.gmra.mxu0 %vm445_vm2, %v1625_v11  ;;  %1568 = vmatmul.mubr.msk.bf16.vlgmr.msra.gmra.mxu1 %vm445_vm2, %v1626_v12 }
  0x25   : > { %1539 = vmatprep.mubr.msk.bf16.mxu0 %vm445_vm2, %v1627_v13  ;;  %1571 = vmatprep.mubr.msk.bf16.mxu1 %vm445_vm2, %v1628_v14 }
  0x2c   : > { %1540 = vmatmul.mubr.msk.bf16.gmra.mxu0 %vm445_vm2, %v1629_v15  ;;  %1572 = vmatmul.mubr.msk.bf16.gmra.mxu1 %vm445_vm2, %v1630_v16 }
  0x2d   : > { %1543 = vmatprep.mubr.msk.bf16.mxu0 %vm445_vm2, %v1631_v17  ;;  %1575 = vmatprep.mubr.msk.bf16.mxu1 %vm445_vm2, %v1632_v18 }
  0x34   : > { %1544 = vmatmul.mubr.msk.bf16.gmra.mxu0 %vm445_vm2, %v1633_v19  ;;  %1576 = vmatmul.mubr.msk.bf16.gmra.mxu1 %vm445_vm2, %v1634_v20 }
  0x35   : > { %1547 = vmatprep.mubr.msk.bf16.mxu0 %vm445_vm2, %v1635_v21  ;;  %1579 = vmatprep.mubr.msk.bf16.mxu1 %vm445_vm2, %v1636_v22 }
  0x3c   : > { %1548 = vmatmul.mubr.msk.bf16.gmra.mxu0 %vm445_vm2, %v1637_v23  ;;  %1580 = vmatmul.mubr.msk.bf16.gmra.mxu1 %vm445_vm2, %v1638_v24 }
  0x3d   : > { %1551 = vmatprep.mubr.msk.bf16.mxu0 %vm445_vm2, %v1639_v25  ;;  %1583 = vmatprep.mubr.msk.bf16.mxu1 %vm445_vm2, %v1640_v26 }
  0x44   : > { %1552 = vmatmul.mubr.msk.bf16.gmra.mxu0 %vm445_vm2, %v1641_v27  ;;  %1584 = vmatmul.mubr.msk.bf16.gmra.mxu1 %vm445_vm2, %v1642_v28 }
  0x45   : > { %1555 = vmatprep.mubr.msk.bf16.mxu0 %vm445_vm2, %v1643_v29  ;;  %1587 = vmatprep.mubr.msk.bf16.mxu1 %vm445_vm2, %v1644_v30 }
  0x4c   : > { %1556 = vmatmul.mubr.msk.bf16.gmra.mxu0 %vm445_vm2, %v1645_v31  ;;  %1588 = vmatmul.mubr.msk.bf16.gmra.mxu1 %vm445_vm2, %v1646_v32 }
  0x4d   : > { %1559 = vmatprep.mubr.msk.bf16.mxu0 %vm445_vm2, %v1647_v33  ;;  %1591 = vmatprep.mubr.msk.bf16.mxu1 %vm445_vm2, %v1648_v34 }
  0x54   : > { %1560 = vmatmul.mubr.msk.bf16.gmra.mxu0 %vm445_vm2, %v1649_v35  ;;  %1592 = vmatmul.mubr.msk.bf16.gmra.mxu1 %vm445_vm2, %v1650_v36 }
  0x55   : > { %1563 = vmatprep.mubr.msk.bf16.mxu0 %vm445_vm2, %v1651_v37  ;;  %1595 = vmatprep.mubr.msk.bf16.mxu1 %vm445_vm2, %v1652_v38 }
  0x5c   : > { %1564 = vmatmul.mubr.msk.bf16.gmra.mxu0 %vm445_vm2, %v1653_v39  ;;  %1596 = vmatmul.mubr.msk.bf16.gmra.mxu1 %vm445_vm2, %v1654_v40 }
  0xe4   : > { %v1537_v42 = vpop.f32.mrf.mxu0  ;;  %v1569_v43 = vpop.f32.mrf.mxu1 }
  0xe5   : > { %v592_v44 = vadd.f32 %v1537_v42, %v1784_v41  ;;  %v720_v45 = vadd.f32 %v1569_v43, %v1784_v41 }
  0xe6   : > { %v583_v46 = vpop.f32.mrf.mxu0  ;;  %v711_v47 = vpop.f32.mrf.mxu1 }
  0xe7   : > { %v840_v48 = vmax.f32 %v592_v44, 0.0  ;;  %v872_v49 = vmax.f32 %v720_v45, 0.0  ;;  %v584_v50 = vadd.f32 %v1784_v41, %v583_v46  ;;  %v712_v51 = vadd.f32 %v1784_v41, %v711_v47 }
  0xe8   : > { %v1538_v52 = vpop.f32.mrf.mxu0  ;;  %v1570_v53 = vpop.f32.mrf.mxu1 }
  0xe9   : > { %v1426_v54 = vpack.c.bf16 %v840_v48, %v840_v48  ;;  %v1458_v55 = vpack.c.bf16 %v872_v49, %v872_v49  ;;  %v838_v56 = vmax.f32 %v584_v50, 0.0  ;;  %v870_v57 = vmax.f32 %v712_v51, 0.0 }
  0xea   : > { %v595_v58 = vadd.f32 %v1538_v52, %v1784_v41  ;;  %v723_v59 = vadd.f32 %v1570_v53, %v1784_v41  ;;  %v586_v60 = vpop.f32.mrf.mxu0  ;;  %v714_v61 = vpop.f32.mrf.mxu1 }
  0xeb   : > { %1161 = vst.msk [vmem:[%s1795_s6 + $0x8] sm:$0xf] %vm1158_vm3, %v1426_v54  ;;  %1193 = vst.msk [vmem:[%s1795_s6 + $0x88] sm:$0xf] %vm1158_vm3, %v1458_v55  ;;  %v1424_v62 = vpack.c.bf16 %v838_v56, %v838_v56  ;;  %v1456_v63 = vpack.c.bf16 %v870_v57, %v870_v57  ;;  %v587_v0 = vadd.f32 %v1784_v41, %v586_v60 }
  0xec   : > { %v715_v1 = vadd.f32 %v1784_v41, %v714_v61  ;;  %v841_v2 = vmax.f32 %v595_v58, 0.0  ;;  %v873_v3 = vmax.f32 %v723_v59, 0.0  ;;  %v1541_v4 = vpop.f32.mrf.mxu0  ;;  %v1573_v5 = vpop.f32.mrf.mxu1 }
  0xed   : > { %1159 = vst.msk [vmem:[%s1795_s6] sm:$0xf] %vm1158_vm3, %v1424_v62  ;;  %1191 = vst.msk [vmem:[%s1795_s6 + $0x80] sm:$0xf] %vm1158_vm3, %v1456_v63  ;;  %v839_v6 = vmax.f32 %v587_v0, 0.0  ;;  %v608_v8 = vadd.f32 %v1541_v4, %v1784_v41  ;;  %v736_v9 = vadd.f32 %v1573_v5, %v1784_v41 }
  0xee   : > { %v871_v7 = vmax.f32 %v715_v1, 0.0  ;;  %v1427_v10 = vpack.c.bf16 %v841_v2, %v841_v2  ;;  %v1459_v11 = vpack.c.bf16 %v873_v3, %v873_v3  ;;  %v599_v12 = vpop.f32.mrf.mxu0  ;;  %v727_v13 = vpop.f32.mrf.mxu1 }
  0xef   : > { %v1425_v14 = vpack.c.bf16 %v839_v6, %v839_v6  ;;  %v844_v16 = vmax.f32 %v608_v8, 0.0  ;;  %v876_v17 = vmax.f32 %v736_v9, 0.0  ;;  %v600_v18 = vadd.f32 %v1784_v41, %v599_v12 }
  0xf0   : > { %v1457_v15 = vpack.c.bf16 %v871_v7, %v871_v7  ;;  %1162 = vst.msk [vmem:[%s1795_s6 + $0xc] sm:$0xf] %vm1158_vm3, %v1427_v10  ;;  %1194 = vst.msk [vmem:[%s1795_s6 + $0x8c] sm:$0xf] %vm1158_vm3, %v1459_v11  ;;  %v728_v19 = vadd.f32 %v1784_v41, %v727_v13  ;;  %v1542_v20 = vpop.f32.mrf.mxu0  ;;  %v1574_v21 = vpop.f32.mrf.mxu1 }
  0xf1   : > { %1160 = vst.msk [vmem:[%s1795_s6 + $0x4] sm:$0xf] %vm1158_vm3, %v1425_v14  ;;  %v1430_v22 = vpack.c.bf16 %v844_v16, %v844_v16  ;;  %v1462_v23 = vpack.c.bf16 %v876_v17, %v876_v17  ;;  %v611_v24 = vadd.f32 %v1542_v20, %v1784_v41  ;;  %v739_v25 = vadd.f32 %v1574_v21, %v1784_v41 }
  0xf2   : > { %1192 = vst.msk [vmem:[%s1795_s6 + $0x84] sm:$0xf] %vm1158_vm3, %v1457_v15  ;;  %v842_v26 = vmax.f32 %v600_v18, 0.0  ;;  %v874_v27 = vmax.f32 %v728_v19, 0.0  ;;  %v602_v28 = vpop.f32.mrf.mxu0  ;;  %v730_v29 = vpop.f32.mrf.mxu1 }
  0xf3   : > { %1165 = vst.msk [vmem:[%s1795_s6 + $0x18] sm:$0xf] %vm1158_vm3, %v1430_v22  ;;  %1197 = vst.msk [vmem:[%s1795_s6 + $0x98] sm:$0xf] %vm1158_vm3, %v1462_v23  ;;  %v845_v30 = vmax.f32 %v611_v24, 0.0  ;;  %v877_v31 = vmax.f32 %v739_v25, 0.0  ;;  %v603_v32 = vadd.f32 %v1784_v41, %v602_v28  ;;  %v731_v33 = vadd.f32 %v1784_v41, %v730_v29 }
  0xf4   : > { %v1428_v34 = vpack.c.bf16 %v842_v26, %v842_v26  ;;  %v1460_v35 = vpack.c.bf16 %v874_v27, %v874_v27  ;;  %v1545_v36 = vpop.f32.mrf.mxu0  ;;  %v1577_v37 = vpop.f32.mrf.mxu1 }
  0xf5   : > { %v1431_v38 = vpack.c.bf16 %v845_v30, %v845_v30  ;;  %v1463_v39 = vpack.c.bf16 %v877_v31, %v877_v31  ;;  %v843_v40 = vmax.f32 %v603_v32, 0.0  ;;  %v875_v42 = vmax.f32 %v731_v33, 0.0 }
  0xf6   : > { %1163 = vst.msk [vmem:[%s1795_s6 + $0x10] sm:$0xf] %vm1158_vm3, %v1428_v34  ;;  %1195 = vst.msk [vmem:[%s1795_s6 + $0x90] sm:$0xf] %vm1158_vm3, %v1460_v35  ;;  %v624_v43 = vadd.f32 %v1545_v36, %v1784_v41  ;;  %v752_v44 = vadd.f32 %v1577_v37, %v1784_v41  ;;  %v615_v45 = vpop.f32.mrf.mxu0  ;;  %v743_v46 = vpop.f32.mrf.mxu1 }
  0xf7   : > { %1166 = vst.msk [vmem:[%s1795_s6 + $0x1c] sm:$0xf] %vm1158_vm3, %v1431_v38  ;;  %1198 = vst.msk [vmem:[%s1795_s6 + $0x9c] sm:$0xf] %vm1158_vm3, %v1463_v39  ;;  %v1429_v47 = vpack.c.bf16 %v843_v40, %v843_v40  ;;  %v1461_v48 = vpack.c.bf16 %v875_v42, %v875_v42  ;;  %v616_v49 = vadd.f32 %v1784_v41, %v615_v45 }
  0xf8   : > { %v744_v50 = vadd.f32 %v1784_v41, %v743_v46  ;;  %v848_v51 = vmax.f32 %v624_v43, 0.0  ;;  %v880_v52 = vmax.f32 %v752_v44, 0.0  ;;  %v1546_v53 = vpop.f32.mrf.mxu0  ;;  %v1578_v54 = vpop.f32.mrf.mxu1 }
  0xf9   : > { %1164 = vst.msk [vmem:[%s1795_s6 + $0x14] sm:$0xf] %vm1158_vm3, %v1429_v47  ;;  %1196 = vst.msk [vmem:[%s1795_s6 + $0x94] sm:$0xf] %vm1158_vm3, %v1461_v48  ;;  %v846_v55 = vmax.f32 %v616_v49, 0.0  ;;  %v627_v57 = vadd.f32 %v1546_v53, %v1784_v41  ;;  %v755_v58 = vadd.f32 %v1578_v54, %v1784_v41 }
  0xfa   : > { %v878_v56 = vmax.f32 %v744_v50, 0.0  ;;  %v1434_v59 = vpack.c.bf16 %v848_v51, %v848_v51  ;;  %v1466_v60 = vpack.c.bf16 %v880_v52, %v880_v52  ;;  %v618_v61 = vpop.f32.mrf.mxu0  ;;  %v746_v62 = vpop.f32.mrf.mxu1 }
  0xfb   : > { %v1432_v63 = vpack.c.bf16 %v846_v55, %v846_v55  ;;  %v849_v1 = vmax.f32 %v627_v57, 0.0  ;;  %v881_v2 = vmax.f32 %v755_v58, 0.0  ;;  %v619_v3 = vadd.f32 %v1784_v41, %v618_v61 }
  0xfc   : > { %v1464_v0 = vpack.c.bf16 %v878_v56, %v878_v56  ;;  %1169 = vst.msk [vmem:[%s1795_s6 + $0x28] sm:$0xf] %vm1158_vm3, %v1434_v59  ;;  %1201 = vst.msk [vmem:[%s1795_s6 + $0xa8] sm:$0xf] %vm1158_vm3, %v1466_v60  ;;  %v747_v4 = vadd.f32 %v1784_v41, %v746_v62  ;;  %v1549_v5 = vpop.f32.mrf.mxu0  ;;  %v1581_v6 = vpop.f32.mrf.mxu1 }
  0xfd   : > { %1167 = vst.msk [vmem:[%s1795_s6 + $0x20] sm:$0xf] %vm1158_vm3, %v1432_v63  ;;  %v1435_v7 = vpack.c.bf16 %v849_v1, %v849_v1  ;;  %v1467_v8 = vpack.c.bf16 %v881_v2, %v881_v2  ;;  %v640_v9 = vadd.f32 %v1549_v5, %v1784_v41  ;;  %v768_v10 = vadd.f32 %v1581_v6, %v1784_v41 }
  0xfe   : > { %1199 = vst.msk [vmem:[%s1795_s6 + $0xa0] sm:$0xf] %vm1158_vm3, %v1464_v0  ;;  %v847_v11 = vmax.f32 %v619_v3, 0.0  ;;  %v879_v12 = vmax.f32 %v747_v4, 0.0  ;;  %v631_v13 = vpop.f32.mrf.mxu0  ;;  %v759_v14 = vpop.f32.mrf.mxu1 }
  0xff   : > { %1170 = vst.msk [vmem:[%s1795_s6 + $0x2c] sm:$0xf] %vm1158_vm3, %v1435_v7  ;;  %1202 = vst.msk [vmem:[%s1795_s6 + $0xac] sm:$0xf] %vm1158_vm3, %v1467_v8  ;;  %v852_v15 = vmax.f32 %v640_v9, 0.0  ;;  %v884_v16 = vmax.f32 %v768_v10, 0.0  ;;  %v632_v17 = vadd.f32 %v1784_v41, %v631_v13  ;;  %v760_v18 = vadd.f32 %v1784_v41, %v759_v14 }
 0x100   : > { %v1433_v19 = vpack.c.bf16 %v847_v11, %v847_v11  ;;  %v1465_v20 = vpack.c.bf16 %v879_v12, %v879_v12  ;;  %v1550_v21 = vpop.f32.mrf.mxu0  ;;  %v1582_v22 = vpop.f32.mrf.mxu1 }
 0x101   : > { %v1438_v23 = vpack.c.bf16 %v852_v15, %v852_v15  ;;  %v1470_v24 = vpack.c.bf16 %v884_v16, %v884_v16  ;;  %v850_v25 = vmax.f32 %v632_v17, 0.0  ;;  %v882_v26 = vmax.f32 %v760_v18, 0.0 }
 0x102   : > { %1168 = vst.msk [vmem:[%s1795_s6 + $0x24] sm:$0xf] %vm1158_vm3, %v1433_v19  ;;  %1200 = vst.msk [vmem:[%s1795_s6 + $0xa4] sm:$0xf] %vm1158_vm3, %v1465_v20  ;;  %v643_v27 = vadd.f32 %v1550_v21, %v1784_v41  ;;  %v771_v28 = vadd.f32 %v1582_v22, %v1784_v41  ;;  %v634_v29 = vpop.f32.mrf.mxu0  ;;  %v762_v30 = vpop.f32.mrf.mxu1 }
 0x103   : > { %1173 = vst.msk [vmem:[%s1795_s6 + $0x38] sm:$0xf] %vm1158_vm3, %v1438_v23  ;;  %1205 = vst.msk [vmem:[%s1795_s6 + $0xb8] sm:$0xf] %vm1158_vm3, %v1470_v24  ;;  %v1436_v31 = vpack.c.bf16 %v850_v25, %v850_v25  ;;  %v1468_v32 = vpack.c.bf16 %v882_v26, %v882_v26  ;;  %v635_v33 = vadd.f32 %v1784_v41, %v634_v29 }
 0x104   : > { %v763_v34 = vadd.f32 %v1784_v41, %v762_v30  ;;  %v853_v35 = vmax.f32 %v643_v27, 0.0  ;;  %v885_v36 = vmax.f32 %v771_v28, 0.0  ;;  %v1553_v37 = vpop.f32.mrf.mxu0  ;;  %v1585_v38 = vpop.f32.mrf.mxu1 }
 0x105   : > { %1171 = vst.msk [vmem:[%s1795_s6 + $0x30] sm:$0xf] %vm1158_vm3, %v1436_v31  ;;  %1203 = vst.msk [vmem:[%s1795_s6 + $0xb0] sm:$0xf] %vm1158_vm3, %v1468_v32  ;;  %v851_v39 = vmax.f32 %v635_v33, 0.0  ;;  %v656_v42 = vadd.f32 %v1553_v37, %v1784_v41  ;;  %v784_v43 = vadd.f32 %v1585_v38, %v1784_v41 }
 0x106   : > { %v883_v40 = vmax.f32 %v763_v34, 0.0  ;;  %v1439_v44 = vpack.c.bf16 %v853_v35, %v853_v35  ;;  %v1471_v45 = vpack.c.bf16 %v885_v36, %v885_v36  ;;  %v647_v46 = vpop.f32.mrf.mxu0  ;;  %v775_v47 = vpop.f32.mrf.mxu1 }
 0x107   : > { %v1437_v48 = vpack.c.bf16 %v851_v39, %v851_v39  ;;  %v856_v50 = vmax.f32 %v656_v42, 0.0  ;;  %v888_v51 = vmax.f32 %v784_v43, 0.0  ;;  %v648_v52 = vadd.f32 %v1784_v41, %v647_v46 }
 0x108   : > { %v1469_v49 = vpack.c.bf16 %v883_v40, %v883_v40  ;;  %1174 = vst.msk [vmem:[%s1795_s6 + $0x3c] sm:$0xf] %vm1158_vm3, %v1439_v44  ;;  %1206 = vst.msk [vmem:[%s1795_s6 + $0xbc] sm:$0xf] %vm1158_vm3, %v1471_v45  ;;  %v776_v53 = vadd.f32 %v1784_v41, %v775_v47  ;;  %v1554_v54 = vpop.f32.mrf.mxu0  ;;  %v1586_v55 = vpop.f32.mrf.mxu1 }
 0x109   : > { %1172 = vst.msk [vmem:[%s1795_s6 + $0x34] sm:$0xf] %vm1158_vm3, %v1437_v48  ;;  %v1442_v56 = vpack.c.bf16 %v856_v50, %v856_v50  ;;  %v1474_v57 = vpack.c.bf16 %v888_v51, %v888_v51  ;;  %v659_v58 = vadd.f32 %v1554_v54, %v1784_v41  ;;  %v787_v59 = vadd.f32 %v1586_v55, %v1784_v41 }
 0x10a   : > { %1204 = vst.msk [vmem:[%s1795_s6 + $0xb4] sm:$0xf] %vm1158_vm3, %v1469_v49  ;;  %v854_v60 = vmax.f32 %v648_v52, 0.0  ;;  %v886_v61 = vmax.f32 %v776_v53, 0.0  ;;  %v650_v62 = vpop.f32.mrf.mxu0  ;;  %v778_v63 = vpop.f32.mrf.mxu1 }
 0x10b   : > { %1177 = vst.msk [vmem:[%s1795_s6 + $0x48] sm:$0xf] %vm1158_vm3, %v1442_v56  ;;  %1209 = vst.msk [vmem:[%s1795_s6 + $0xc8] sm:$0xf] %vm1158_vm3, %v1474_v57  ;;  %v857_v0 = vmax.f32 %v659_v58, 0.0  ;;  %v889_v1 = vmax.f32 %v787_v59, 0.0  ;;  %v651_v2 = vadd.f32 %v1784_v41, %v650_v62  ;;  %v779_v3 = vadd.f32 %v1784_v41, %v778_v63 }
 0x10c   : > { %v1440_v4 = vpack.c.bf16 %v854_v60, %v854_v60  ;;  %v1472_v5 = vpack.c.bf16 %v886_v61, %v886_v61  ;;  %v1557_v6 = vpop.f32.mrf.mxu0  ;;  %v1589_v7 = vpop.f32.mrf.mxu1 }
 0x10d   : > { %v1443_v8 = vpack.c.bf16 %v857_v0, %v857_v0  ;;  %v1475_v9 = vpack.c.bf16 %v889_v1, %v889_v1  ;;  %v855_v10 = vmax.f32 %v651_v2, 0.0  ;;  %v887_v11 = vmax.f32 %v779_v3, 0.0 }
 0x10e   : > { %1175 = vst.msk [vmem:[%s1795_s6 + $0x40] sm:$0xf] %vm1158_vm3, %v1440_v4  ;;  %1207 = vst.msk [vmem:[%s1795_s6 + $0xc0] sm:$0xf] %vm1158_vm3, %v1472_v5  ;;  %v672_v12 = vadd.f32 %v1557_v6, %v1784_v41  ;;  %v800_v13 = vadd.f32 %v1589_v7, %v1784_v41  ;;  %v663_v14 = vpop.f32.mrf.mxu0  ;;  %v791_v15 = vpop.f32.mrf.mxu1 }
 0x10f   : > { %1178 = vst.msk [vmem:[%s1795_s6 + $0x4c] sm:$0xf] %vm1158_vm3, %v1443_v8  ;;  %1210 = vst.msk [vmem:[%s1795_s6 + $0xcc] sm:$0xf] %vm1158_vm3, %v1475_v9  ;;  %v1441_v16 = vpack.c.bf16 %v855_v10, %v855_v10  ;;  %v1473_v17 = vpack.c.bf16 %v887_v11, %v887_v11  ;;  %v664_v18 = vadd.f32 %v1784_v41, %v663_v14 }
 0x110   : > { %v792_v19 = vadd.f32 %v1784_v41, %v791_v15  ;;  %v860_v20 = vmax.f32 %v672_v12, 0.0  ;;  %v892_v21 = vmax.f32 %v800_v13, 0.0  ;;  %v1558_v22 = vpop.f32.mrf.mxu0  ;;  %v1590_v23 = vpop.f32.mrf.mxu1 }
 0x111   : > { %1176 = vst.msk [vmem:[%s1795_s6 + $0x44] sm:$0xf] %vm1158_vm3, %v1441_v16  ;;  %1208 = vst.msk [vmem:[%s1795_s6 + $0xc4] sm:$0xf] %vm1158_vm3, %v1473_v17  ;;  %v858_v24 = vmax.f32 %v664_v18, 0.0  ;;  %v675_v26 = vadd.f32 %v1558_v22, %v1784_v41  ;;  %v803_v27 = vadd.f32 %v1590_v23, %v1784_v41 }
 0x112   : > { %v890_v25 = vmax.f32 %v792_v19, 0.0  ;;  %v1446_v28 = vpack.c.bf16 %v860_v20, %v860_v20  ;;  %v1478_v29 = vpack.c.bf16 %v892_v21, %v892_v21  ;;  %v666_v30 = vpop.f32.mrf.mxu0  ;;  %v794_v31 = vpop.f32.mrf.mxu1 }
 0x113   : > { %v1444_v32 = vpack.c.bf16 %v858_v24, %v858_v24  ;;  %v861_v34 = vmax.f32 %v675_v26, 0.0  ;;  %v893_v35 = vmax.f32 %v803_v27, 0.0  ;;  %v667_v36 = vadd.f32 %v1784_v41, %v666_v30 }
 0x114   : > { %v1476_v33 = vpack.c.bf16 %v890_v25, %v890_v25  ;;  %1181 = vst.msk [vmem:[%s1795_s6 + $0x58] sm:$0xf] %vm1158_vm3, %v1446_v28  ;;  %1213 = vst.msk [vmem:[%s1795_s6 + $0xd8] sm:$0xf] %vm1158_vm3, %v1478_v29  ;;  %v795_v37 = vadd.f32 %v1784_v41, %v794_v31  ;;  %v1561_v38 = vpop.f32.mrf.mxu0  ;;  %v1593_v39 = vpop.f32.mrf.mxu1 }
 0x115   : > { %1179 = vst.msk [vmem:[%s1795_s6 + $0x50] sm:$0xf] %vm1158_vm3, %v1444_v32  ;;  %v1447_v40 = vpack.c.bf16 %v861_v34, %v861_v34  ;;  %v1479_v42 = vpack.c.bf16 %v893_v35, %v893_v35  ;;  %v688_v43 = vadd.f32 %v1561_v38, %v1784_v41  ;;  %v816_v44 = vadd.f32 %v1593_v39, %v1784_v41 }
 0x116   : > { %1211 = vst.msk [vmem:[%s1795_s6 + $0xd0] sm:$0xf] %vm1158_vm3, %v1476_v33  ;;  %v859_v45 = vmax.f32 %v667_v36, 0.0  ;;  %v891_v46 = vmax.f32 %v795_v37, 0.0  ;;  %v679_v47 = vpop.f32.mrf.mxu0  ;;  %v807_v48 = vpop.f32.mrf.mxu1 }
 0x117   : > { %1182 = vst.msk [vmem:[%s1795_s6 + $0x5c] sm:$0xf] %vm1158_vm3, %v1447_v40  ;;  %1214 = vst.msk [vmem:[%s1795_s6 + $0xdc] sm:$0xf] %vm1158_vm3, %v1479_v42  ;;  %v864_v49 = vmax.f32 %v688_v43, 0.0  ;;  %v896_v50 = vmax.f32 %v816_v44, 0.0  ;;  %v680_v51 = vadd.f32 %v1784_v41, %v679_v47  ;;  %v808_v52 = vadd.f32 %v1784_v41, %v807_v48 }
 0x118   : > { %v1445_v53 = vpack.c.bf16 %v859_v45, %v859_v45  ;;  %v1477_v54 = vpack.c.bf16 %v891_v46, %v891_v46  ;;  %v1562_v55 = vpop.f32.mrf.mxu0  ;;  %v1594_v56 = vpop.f32.mrf.mxu1 }
 0x119   : > { %v1450_v57 = vpack.c.bf16 %v864_v49, %v864_v49  ;;  %v1482_v58 = vpack.c.bf16 %v896_v50, %v896_v50  ;;  %v862_v59 = vmax.f32 %v680_v51, 0.0  ;;  %v894_v60 = vmax.f32 %v808_v52, 0.0 }
 0x11a   : > { %1180 = vst.msk [vmem:[%s1795_s6 + $0x54] sm:$0xf] %vm1158_vm3, %v1445_v53  ;;  %1212 = vst.msk [vmem:[%s1795_s6 + $0xd4] sm:$0xf] %vm1158_vm3, %v1477_v54  ;;  %v691_v61 = vadd.f32 %v1562_v55, %v1784_v41  ;;  %v819_v62 = vadd.f32 %v1594_v56, %v1784_v41  ;;  %v682_v63 = vpop.f32.mrf.mxu0  ;;  %v810_v0 = vpop.f32.mrf.mxu1 }
 0x11b   : > { %1185 = vst.msk [vmem:[%s1795_s6 + $0x68] sm:$0xf] %vm1158_vm3, %v1450_v57  ;;  %1217 = vst.msk [vmem:[%s1795_s6 + $0xe8] sm:$0xf] %vm1158_vm3, %v1482_v58  ;;  %v1448_v1 = vpack.c.bf16 %v862_v59, %v862_v59  ;;  %v1480_v2 = vpack.c.bf16 %v894_v60, %v894_v60  ;;  %v683_v3 = vadd.f32 %v1784_v41, %v682_v63 }
 0x11c   : > { %v811_v4 = vadd.f32 %v1784_v41, %v810_v0  ;;  %v865_v5 = vmax.f32 %v691_v61, 0.0  ;;  %v897_v6 = vmax.f32 %v819_v62, 0.0  ;;  %v1565_v7 = vpop.f32.mrf.mxu0  ;;  %v1597_v8 = vpop.f32.mrf.mxu1 }
 0x11d   : > { %1183 = vst.msk [vmem:[%s1795_s6 + $0x60] sm:$0xf] %vm1158_vm3, %v1448_v1  ;;  %1215 = vst.msk [vmem:[%s1795_s6 + $0xe0] sm:$0xf] %vm1158_vm3, %v1480_v2  ;;  %v863_v9 = vmax.f32 %v683_v3, 0.0  ;;  %v704_v11 = vadd.f32 %v1565_v7, %v1784_v41  ;;  %v832_v12 = vadd.f32 %v1597_v8, %v1784_v41 }
 0x11e   : > { %v895_v10 = vmax.f32 %v811_v4, 0.0  ;;  %v1451_v13 = vpack.c.bf16 %v865_v5, %v865_v5  ;;  %v1483_v14 = vpack.c.bf16 %v897_v6, %v897_v6  ;;  %v695_v15 = vpop.f32.mrf.mxu0  ;;  %v823_v16 = vpop.f32.mrf.mxu1 }
 0x11f   : > { %v1449_v17 = vpack.c.bf16 %v863_v9, %v863_v9  ;;  %v868_v19 = vmax.f32 %v704_v11, 0.0  ;;  %v900_v20 = vmax.f32 %v832_v12, 0.0  ;;  %v696_v21 = vadd.f32 %v1784_v41, %v695_v15 }
 0x120   : > { %v1481_v18 = vpack.c.bf16 %v895_v10, %v895_v10  ;;  %1186 = vst.msk [vmem:[%s1795_s6 + $0x6c] sm:$0xf] %vm1158_vm3, %v1451_v13  ;;  %1218 = vst.msk [vmem:[%s1795_s6 + $0xec] sm:$0xf] %vm1158_vm3, %v1483_v14  ;;  %v824_v22 = vadd.f32 %v1784_v41, %v823_v16  ;;  %v1566_v23 = vpop.f32.mrf.mxu0  ;;  %v1598_v24 = vpop.f32.mrf.mxu1 }
 0x121   : > { %1184 = vst.msk [vmem:[%s1795_s6 + $0x64] sm:$0xf] %vm1158_vm3, %v1449_v17  ;;  %v1454_v25 = vpack.c.bf16 %v868_v19, %v868_v19  ;;  %v1486_v26 = vpack.c.bf16 %v900_v20, %v900_v20  ;;  %v707_v27 = vadd.f32 %v1566_v23, %v1784_v41  ;;  %v835_v28 = vadd.f32 %v1598_v24, %v1784_v41 }
 0x122   : > { %1216 = vst.msk [vmem:[%s1795_s6 + $0xe4] sm:$0xf] %vm1158_vm3, %v1481_v18  ;;  %v866_v29 = vmax.f32 %v696_v21, 0.0  ;;  %v898_v30 = vmax.f32 %v824_v22, 0.0  ;;  %v698_v31 = vpop.f32.mrf.mxu0  ;;  %v826_v32 = vpop.f32.mrf.mxu1 }
 0x123   : > { %1189 = vst.msk [vmem:[%s1795_s6 + $0x78] sm:$0xf] %vm1158_vm3, %v1454_v25  ;;  %1221 = vst.msk [vmem:[%s1795_s6 + $0xf8] sm:$0xf] %vm1158_vm3, %v1486_v26  ;;  %v869_v33 = vmax.f32 %v707_v27, 0.0  ;;  %v901_v34 = vmax.f32 %v835_v28, 0.0  ;;  %v699_v35 = vadd.f32 %v1784_v41, %v698_v31  ;;  %v827_v36 = vadd.f32 %v1784_v41, %v826_v32 }
 0x124   : > { %v1452_v37 = vpack.c.bf16 %v866_v29, %v866_v29  ;;  %v1484_v38 = vpack.c.bf16 %v898_v30, %v898_v30 }
 0x125   : > { %v1455_v39 = vpack.c.bf16 %v869_v33, %v869_v33  ;;  %v1487_v40 = vpack.c.bf16 %v901_v34, %v901_v34  ;;  %v867_v42 = vmax.f32 %v699_v35, 0.0  ;;  %v899_v43 = vmax.f32 %v827_v36, 0.0 }
 0x126   : > { %1187 = vst.msk [vmem:[%s1795_s6 + $0x70] sm:$0xf] %vm1158_vm3, %v1452_v37  ;;  %1219 = vst.msk [vmem:[%s1795_s6 + $0xf0] sm:$0xf] %vm1158_vm3, %v1484_v38 }
 0x127   : > { %1190 = vst.msk [vmem:[%s1795_s6 + $0x7c] sm:$0xf] %vm1158_vm3, %v1455_v39  ;;  %1222 = vst.msk [vmem:[%s1795_s6 + $0xfc] sm:$0xf] %vm1158_vm3, %v1487_v40  ;;  %v1453_v44 = vpack.c.bf16 %v867_v42, %v867_v42  ;;  %v1485_v45 = vpack.c.bf16 %v899_v43, %v899_v43 }
 0x129   : > { %1188 = vst.msk [vmem:[%s1795_s6 + $0x74] sm:$0xf] %vm1158_vm3, %v1453_v44  ;;  %1220 = vst.msk [vmem:[%s1795_s6 + $0xf4] sm:$0xf] %vm1158_vm3, %v1485_v45 }
 0x12a PF: > { %s13_s12 = sadd.s32 1, %s1661_s12  }
 0x12b   : > { %p10_p4 = scmp.ge.s32.totalorder %s13_s12, 6  }
 0x12d   :  { %12 = sbr.rel (!%p10_p4) target bundleno = 1 (0x1), region = 62 }

// kernel: svhn_forward.7
= control target key start
LH: loop header
LB: loop body
LE: loop exit
PB: predicated region body
PF: predicated region fallthrough
CT: control target
= control target key end

     0   :  { %vm207_vm0 = vcmask 1043456   ;;  %vm944_vm1 = vcmask 1040384   ;;  %vm945_vm2 = vsmask.f32 256  ;;  %s1919_s0 = inlined_call_operand.vmem [shape: bf16[9,169,128], index: 0, kind: input, shape index: {}]   ;;  %s1920_s1 = inlined_call_operand.vmem [shape: bf16[169,128], index: 1, kind: output, shape index: {}]  }
   0x1   :  { %v9_v0 = vld [vmem:[%s1919_s0] sm:$0xf]  ;;  %v31_v1 = vld [vmem:[%s1919_s0 + $0x58] sm:$0xf]  ;;  %v53_v2 = vld [vmem:[%s1919_s0 + $0xb0] sm:$0xf] }
   0x2   :  { %v10_v3 = vld [vmem:[%s1919_s0 + $0x4] sm:$0xf]  ;;  %v32_v4 = vld [vmem:[%s1919_s0 + $0x5c] sm:$0xf]  ;;  %v54_v5 = vld [vmem:[%s1919_s0 + $0xb4] sm:$0xf] }
   0x3   :  { %v75_v6 = vld [vmem:[%s1919_s0 + $0x108] sm:$0xf]  ;;  %v210_v7 = vsel %vm207_vm0, %v9_v0, 4286644096  ;;  %v213_v8 = vsel %vm207_vm0, %v31_v1, 4286644096  ;;  %vm1840_vm3 = vmand %vm944_vm1, %vm945_vm2 }
   0x4   :  { %v217_v9 = vsel %vm207_vm0, %v53_v2, 4286644096  ;;  %v97_v10 = vld [vmem:[%s1919_s0 + $0x160] sm:$0xf]  ;;  %v215_v11 = vmax.bf16 %v213_v8, %v210_v7  ;;  %v76_v12 = vld [vmem:[%s1919_s0 + $0x10c] sm:$0xf] }
   0x5   :  { %v119_v13 = vld [vmem:[%s1919_s0 + $0x1b8] sm:$0xf]  ;;  %v221_v14 = vsel %vm207_vm0, %v75_v6, 4286644096  ;;  %v245_v16 = vsel %vm207_vm0, %v10_v3, 4286644096 }
   0x6   :  { %v219_v15 = vmax.bf16 %v217_v9, %v215_v11  ;;  %v248_v17 = vsel %vm207_vm0, %v32_v4, 4286644096  ;;  %v252_v18 = vsel %vm207_vm0, %v54_v5, 4286644096  ;;  %v98_v19 = vld [vmem:[%s1919_s0 + $0x164] sm:$0xf] }
   0x7   :  { %v225_v20 = vsel %vm207_vm0, %v97_v10, 4286644096  ;;  %v250_v21 = vmax.bf16 %v248_v17, %v245_v16  ;;  %v120_v22 = vld [vmem:[%s1919_s0 + $0x1bc] sm:$0xf]  ;;  %v141_v23 = vld [vmem:[%s1919_s0 + $0x210] sm:$0xf] }
   0x8   :  { %v223_v24 = vmax.bf16 %v221_v14, %v219_v15  ;;  %v256_v25 = vsel %vm207_vm0, %v76_v12, 4286644096  ;;  %v142_v26 = vld [vmem:[%s1919_s0 + $0x214] sm:$0xf]  ;;  %v229_v27 = vsel %vm207_vm0, %v119_v13, 4286644096 }
   0x9   :  { %v254_v28 = vmax.bf16 %v252_v18, %v250_v21  ;;  %v163_v29 = vld [vmem:[%s1919_s0 + $0x268] sm:$0xf]  ;;  %v185_v30 = vld [vmem:[%s1919_s0 + $0x2c0] sm:$0xf]  ;;  %v260_v32 = vsel %vm207_vm0, %v98_v19, 4286644096 }
   0xa   :  { %v227_v31 = vmax.bf16 %v225_v20, %v223_v24  ;;  %v164_v33 = vld [vmem:[%s1919_s0 + $0x26c] sm:$0xf]  ;;  %v233_v34 = vsel %vm207_vm0, %v141_v23, 4286644096  ;;  %v264_v36 = vsel %vm207_vm0, %v120_v22, 4286644096 }
   0xb   :  { %v258_v35 = vmax.bf16 %v256_v25, %v254_v28  ;;  %v186_v37 = vld [vmem:[%s1919_s0 + $0x2c4] sm:$0xf]  ;;  %v11_v39 = vld [vmem:[%s1919_s0 + $0x8] sm:$0xf]  ;;  %v33_v40 = vld [vmem:[%s1919_s0 + $0x60] sm:$0xf] }
   0xc   :  { %v231_v38 = vmax.bf16 %v229_v27, %v227_v31  ;;  %v55_v41 = vld [vmem:[%s1919_s0 + $0xb8] sm:$0xf]  ;;  %v237_v42 = vsel %vm207_vm0, %v163_v29, 4286644096  ;;  %v241_v43 = vsel %vm207_vm0, %v185_v30, 4286644096 }
   0xd   :  { %v262_v44 = vmax.bf16 %v260_v32, %v258_v35  ;;  %v268_v45 = vsel %vm207_vm0, %v142_v26, 4286644096  ;;  %v12_v47 = vld [vmem:[%s1919_s0 + $0xc] sm:$0xf]  ;;  %v77_v48 = vld [vmem:[%s1919_s0 + $0x110] sm:$0xf] }
   0xe   :  { %v235_v46 = vmax.bf16 %v233_v34, %v231_v38  ;;  %v99_v49 = vld [vmem:[%s1919_s0 + $0x168] sm:$0xf]  ;;  %v280_v51 = vsel %vm207_vm0, %v11_v39, 4286644096  ;;  %v283_v52 = vsel %vm207_vm0, %v33_v40, 4286644096 }
   0xf   :  { %v266_v50 = vmax.bf16 %v264_v36, %v262_v44  ;;  %v287_v53 = vsel %vm207_vm0, %v55_v41, 4286644096  ;;  %v272_v55 = vsel %vm207_vm0, %v164_v33, 4286644096  ;;  %v34_v56 = vld [vmem:[%s1919_s0 + $0x64] sm:$0xf]  ;;  %v285_v58 = vmax.bf16 %v283_v52, %v280_v51 }
  0x10   :  { %v239_v54 = vmax.bf16 %v237_v42, %v235_v46  ;;  %v56_v57 = vld [vmem:[%s1919_s0 + $0xbc] sm:$0xf]  ;;  %v276_v60 = vsel %vm207_vm0, %v186_v37, 4286644096  ;;  %v78_v61 = vld [vmem:[%s1919_s0 + $0x114] sm:$0xf] }
  0x11   :  { %v270_v59 = vmax.bf16 %v268_v45, %v266_v50  ;;  %v291_v62 = vsel %vm207_vm0, %v77_v48, 4286644096  ;;  %v121_v63 = vld [vmem:[%s1919_s0 + $0x1c0] sm:$0xf]  ;;  %v289_v0 = vmax.bf16 %v287_v53, %v285_v58  ;;  %v295_v1 = vsel %vm207_vm0, %v99_v49, 4286644096 }
  0x12   :  { %v315_v2 = vsel %vm207_vm0, %v12_v47, 4286644096  ;;  %v243_v3 = vmax.bf16 %v241_v43, %v239_v54  ;;  %v318_v5 = vsel %vm207_vm0, %v34_v56, 4286644096  ;;  %v322_v6 = vsel %vm207_vm0, %v56_v57, 4286644096 }
  0x13   :  { %v274_v4 = vmax.bf16 %v272_v55, %v270_v59  ;;  %v100_v7 = vld [vmem:[%s1919_s0 + $0x16c] sm:$0xf]  ;;  %v143_v8 = vld [vmem:[%s1919_s0 + $0x218] sm:$0xf]  ;;  %v293_v9 = vmax.bf16 %v291_v62, %v289_v0  ;;  %v320_v10 = vmax.bf16 %v318_v5, %v315_v2  ;;  %v299_v12 = vsel %vm207_vm0, %v121_v63, 4286644096 }
  0x14   :  { %v326_v13 = vsel %vm207_vm0, %v78_v61, 4286644096  ;;  %v122_v14 = vld [vmem:[%s1919_s0 + $0x1c4] sm:$0xf]  ;;  %v144_v15 = vld [vmem:[%s1919_s0 + $0x21c] sm:$0xf] }
  0x15   :  { %v278_v11 = vmax.bf16 %v276_v60, %v274_v4  ;;  %v165_v16 = vld [vmem:[%s1919_s0 + $0x270] sm:$0xf]  ;;  %v297_v17 = vmax.bf16 %v295_v1, %v293_v9  ;;  %v324_v18 = vmax.bf16 %v322_v6, %v320_v10  ;;  %v187_v20 = vld [vmem:[%s1919_s0 + $0x2c8] sm:$0xf]  ;;  %v303_v21 = vsel %vm207_vm0, %v143_v8, 4286644096 }
  0x16   :  { %v330_v22 = vsel %vm207_vm0, %v100_v7, 4286644096  ;;  %v166_v23 = vld [vmem:[%s1919_s0 + $0x274] sm:$0xf]  ;;  %v13_v26 = vld [vmem:[%s1919_s0 + $0x10] sm:$0xf] }
  0x17   :  { %v1042_v19 = vcombine.low %v243_v3, %v278_v11  ;;  %v301_v24 = vmax.bf16 %v299_v12, %v297_v17  ;;  %v328_v25 = vmax.bf16 %v326_v13, %v324_v18  ;;  %v35_v27 = vld [vmem:[%s1919_s0 + $0x68] sm:$0xf]  ;;  %v57_v28 = vld [vmem:[%s1919_s0 + $0xc0] sm:$0xf]  ;;  %v188_v29 = vld [vmem:[%s1919_s0 + $0x2cc] sm:$0xf] }
  0x18   :  { %v307_v30 = vsel %vm207_vm0, %v165_v16, 4286644096  ;;  %v334_v31 = vsel %vm207_vm0, %v122_v14, 4286644096  ;;  %v311_v33 = vsel %vm207_vm0, %v187_v20, 4286644096 }
  0x19   :  { %996 = vst [vmem:[%s1920_s1] sm:$0xff] %v1042_v19   ;;  %v305_v32 = vmax.bf16 %v303_v21, %v301_v24  ;;  %v332_v34 = vmax.bf16 %v330_v22, %v328_v25  ;;  %v338_v35 = vsel %vm207_vm0, %v144_v15, 4286644096  ;;  %v79_v36 = vld [vmem:[%s1919_s0 + $0x118] sm:$0xf]  ;;  %v350_v37 = vsel %vm207_vm0, %v13_v26, 4286644096 }
  0x1a   :  { %v353_v38 = vsel %vm207_vm0, %v35_v27, 4286644096  ;;  %v357_v39 = vsel %vm207_vm0, %v57_v28, 4286644096  ;;  %v14_v42 = vld [vmem:[%s1919_s0 + $0x14] sm:$0xf] }
  0x1b   :  { %v309_v40 = vmax.bf16 %v307_v30, %v305_v32  ;;  %v336_v41 = vmax.bf16 %v334_v31, %v332_v34  ;;  %v36_v43 = vld [vmem:[%s1919_s0 + $0x6c] sm:$0xf]  ;;  %v101_v44 = vld [vmem:[%s1919_s0 + $0x170] sm:$0xf]  ;;  %v355_v45 = vmax.bf16 %v353_v38, %v350_v37  ;;  %v342_v46 = vsel %vm207_vm0, %v166_v23, 4286644096 }
  0x1c   :  { %v58_v47 = vld [vmem:[%s1919_s0 + $0xc4] sm:$0xf]  ;;  %v361_v48 = vsel %vm207_vm0, %v79_v36, 4286644096  ;;  %v346_v50 = vsel %vm207_vm0, %v188_v29, 4286644096 }
  0x1d   :  { %v340_v49 = vmax.bf16 %v338_v35, %v336_v41  ;;  %v80_v51 = vld [vmem:[%s1919_s0 + $0x11c] sm:$0xf]  ;;  %v123_v52 = vld [vmem:[%s1919_s0 + $0x1c8] sm:$0xf]  ;;  %v359_v53 = vmax.bf16 %v357_v39, %v355_v45  ;;  %v313_v54 = vmax.bf16 %v311_v33, %v309_v40  ;;  %v365_v55 = vsel %vm207_vm0, %v101_v44, 4286644096 }
  0x1e   :  { %v385_v56 = vsel %vm207_vm0, %v14_v42, 4286644096  ;;  %v388_v57 = vsel %vm207_vm0, %v36_v43, 4286644096  ;;  %v102_v59 = vld [vmem:[%s1919_s0 + $0x174] sm:$0xf] }
  0x1f   :  { %v344_v58 = vmax.bf16 %v342_v46, %v340_v49  ;;  %v145_v60 = vld [vmem:[%s1919_s0 + $0x220] sm:$0xf]  ;;  %v363_v61 = vmax.bf16 %v361_v48, %v359_v53  ;;  %v390_v62 = vmax.bf16 %v388_v57, %v385_v56  ;;  %v392_v63 = vsel %vm207_vm0, %v58_v47, 4286644096  ;;  %v124_v3 = vld [vmem:[%s1919_s0 + $0x1cc] sm:$0xf] }
  0x20   :  { %v369_v0 = vsel %vm207_vm0, %v123_v52, 4286644096  ;;  %v396_v1 = vsel %vm207_vm0, %v80_v51, 4286644096  ;;  %v146_v4 = vld [vmem:[%s1919_s0 + $0x224] sm:$0xf] }
  0x21   :  { %v348_v2 = vmax.bf16 %v346_v50, %v344_v58  ;;  %v167_v5 = vld [vmem:[%s1919_s0 + $0x278] sm:$0xf]  ;;  %v367_v6 = vmax.bf16 %v365_v55, %v363_v61  ;;  %v394_v7 = vmax.bf16 %v392_v63, %v390_v62  ;;  %v189_v8 = vld [vmem:[%s1919_s0 + $0x2d0] sm:$0xf]  ;;  %v373_v9 = vsel %vm207_vm0, %v145_v60, 4286644096 }
  0x22   :  { %v400_v10 = vsel %vm207_vm0, %v102_v59, 4286644096  ;;  %v168_v12 = vld [vmem:[%s1919_s0 + $0x27c] sm:$0xf]  ;;  %v15_v15 = vld [vmem:[%s1919_s0 + $0x18] sm:$0xf] }
  0x23   :  { %v1043_v11 = vcombine.low %v313_v54, %v348_v2  ;;  %v371_v13 = vmax.bf16 %v369_v0, %v367_v6  ;;  %v398_v14 = vmax.bf16 %v396_v1, %v394_v7  ;;  %v37_v16 = vld [vmem:[%s1919_s0 + $0x70] sm:$0xf]  ;;  %v59_v17 = vld [vmem:[%s1919_s0 + $0xc8] sm:$0xf]  ;;  %v190_v18 = vld [vmem:[%s1919_s0 + $0x2d4] sm:$0xf] }
  0x24   :  { %v377_v19 = vsel %vm207_vm0, %v167_v5, 4286644096  ;;  %v404_v20 = vsel %vm207_vm0, %v124_v3, 4286644096  ;;  %v408_v23 = vsel %vm207_vm0, %v146_v4, 4286644096 }
  0x25   :  { %1044 = vst [vmem:[%s1920_s1 + $0x8] sm:$0xff] %v1043_v11   ;;  %v375_v21 = vmax.bf16 %v373_v9, %v371_v13  ;;  %v402_v22 = vmax.bf16 %v400_v10, %v398_v14  ;;  %v16_v24 = vld [vmem:[%s1919_s0 + $0x1c] sm:$0xf]  ;;  %v81_v25 = vld [vmem:[%s1919_s0 + $0x120] sm:$0xf] }
  0x26   :  { %v420_v26 = vsel %vm207_vm0, %v15_v15, 4286644096  ;;  %v423_v27 = vsel %vm207_vm0, %v37_v16, 4286644096  ;;  %v427_v28 = vsel %vm207_vm0, %v59_v17, 4286644096 }
  0x27   :  { %v379_v29 = vmax.bf16 %v377_v19, %v375_v21  ;;  %v381_v30 = vsel %vm207_vm0, %v189_v8, 4286644096  ;;  %v406_v31 = vmax.bf16 %v404_v20, %v402_v22  ;;  %v38_v32 = vld [vmem:[%s1919_s0 + $0x74] sm:$0xf]  ;;  %v103_v33 = vld [vmem:[%s1919_s0 + $0x178] sm:$0xf]  ;;  %v425_v34 = vmax.bf16 %v423_v27, %v420_v26 }
  0x28   :  { %v412_v35 = vsel %vm207_vm0, %v168_v12, 4286644096  ;;  %v60_v36 = vld [vmem:[%s1919_s0 + $0xcc] sm:$0xf]  ;;  %v431_v37 = vsel %vm207_vm0, %v81_v25, 4286644096 }
  0x29   :  { %v410_v38 = vmax.bf16 %v408_v23, %v406_v31  ;;  %v416_v39 = vsel %vm207_vm0, %v190_v18, 4286644096  ;;  %v82_v40 = vld [vmem:[%s1919_s0 + $0x124] sm:$0xf]  ;;  %v125_v41 = vld [vmem:[%s1919_s0 + $0x1d0] sm:$0xf]  ;;  %v429_v42 = vmax.bf16 %v427_v28, %v425_v34  ;;  %v383_v43 = vmax.bf16 %v381_v30, %v379_v29 }
  0x2a   :  { %v435_v44 = vsel %vm207_vm0, %v103_v33, 4286644096  ;;  %v455_v45 = vsel %vm207_vm0, %v16_v24, 4286644096  ;;  %v458_v46 = vsel %vm207_vm0, %v38_v32, 4286644096 }
  0x2b   :  { %v414_v47 = vmax.bf16 %v412_v35, %v410_v38  ;;  %v104_v48 = vld [vmem:[%s1919_s0 + $0x17c] sm:$0xf]  ;;  %v147_v49 = vld [vmem:[%s1919_s0 + $0x228] sm:$0xf]  ;;  %v433_v50 = vmax.bf16 %v431_v37, %v429_v42  ;;  %v460_v51 = vmax.bf16 %v458_v46, %v455_v45  ;;  %v462_v52 = vsel %vm207_vm0, %v60_v36, 4286644096 }
  0x2c   :  { %v439_v53 = vsel %vm207_vm0, %v125_v41, 4286644096  ;;  %v466_v54 = vsel %vm207_vm0, %v82_v40, 4286644096  ;;  %v126_v56 = vld [vmem:[%s1919_s0 + $0x1d4] sm:$0xf] }
  0x2d   :  { %v418_v55 = vmax.bf16 %v416_v39, %v414_v47  ;;  %v148_v57 = vld [vmem:[%s1919_s0 + $0x22c] sm:$0xf]  ;;  %v169_v58 = vld [vmem:[%s1919_s0 + $0x280] sm:$0xf]  ;;  %v437_v59 = vmax.bf16 %v435_v44, %v433_v50  ;;  %v464_v60 = vmax.bf16 %v462_v52, %v460_v51  ;;  %v191_v61 = vld [vmem:[%s1919_s0 + $0x2d8] sm:$0xf] }
  0x2e   :  { %v443_v62 = vsel %vm207_vm0, %v147_v49, 4286644096  ;;  %v470_v63 = vsel %vm207_vm0, %v104_v48, 4286644096  ;;  %v170_v1 = vld [vmem:[%s1919_s0 + $0x284] sm:$0xf] }
  0x2f   :  { %v1045_v0 = vcombine.low %v383_v43, %v418_v55  ;;  %v441_v2 = vmax.bf16 %v439_v53, %v437_v59  ;;  %v468_v3 = vmax.bf16 %v466_v54, %v464_v60  ;;  %v17_v4 = vld [vmem:[%s1919_s0 + $0x20] sm:$0xf]  ;;  %v39_v5 = vld [vmem:[%s1919_s0 + $0x78] sm:$0xf]  ;;  %v61_v6 = vld [vmem:[%s1919_s0 + $0xd0] sm:$0xf] }
  0x30   :  { %v192_v7 = vld [vmem:[%s1919_s0 + $0x2dc] sm:$0xf]  ;;  %v447_v8 = vsel %vm207_vm0, %v169_v58, 4286644096  ;;  %v474_v9 = vsel %vm207_vm0, %v126_v56, 4286644096 }
  0x31   :  { %1046 = vst [vmem:[%s1920_s1 + $0x10] sm:$0xff] %v1045_v0   ;;  %v445_v10 = vmax.bf16 %v443_v62, %v441_v2  ;;  %v472_v11 = vmax.bf16 %v470_v63, %v468_v3  ;;  %v478_v12 = vsel %vm207_vm0, %v148_v57, 4286644096  ;;  %v18_v13 = vld [vmem:[%s1919_s0 + $0x24] sm:$0xf] }
  0x32   :  { %v83_v14 = vld [vmem:[%s1919_s0 + $0x128] sm:$0xf]  ;;  %v490_v15 = vsel %vm207_vm0, %v17_v4, 4286644096  ;;  %v493_v16 = vsel %vm207_vm0, %v39_v5, 4286644096 }
  0x33   :  { %v497_v17 = vsel %vm207_vm0, %v61_v6, 4286644096  ;;  %v449_v18 = vmax.bf16 %v447_v8, %v445_v10  ;;  %v451_v19 = vsel %vm207_vm0, %v191_v61, 4286644096  ;;  %v476_v20 = vmax.bf16 %v474_v9, %v472_v11  ;;  %v40_v21 = vld [vmem:[%s1919_s0 + $0x7c] sm:$0xf] }
  0x34   :  { %v105_v22 = vld [vmem:[%s1919_s0 + $0x180] sm:$0xf]  ;;  %v495_v23 = vmax.bf16 %v493_v16, %v490_v15  ;;  %v482_v24 = vsel %vm207_vm0, %v170_v1, 4286644096  ;;  %v62_v25 = vld [vmem:[%s1919_s0 + $0xd4] sm:$0xf] }
  0x35   :  { %v501_v26 = vsel %vm207_vm0, %v83_v14, 4286644096  ;;  %v480_v27 = vmax.bf16 %v478_v12, %v476_v20  ;;  %v486_v28 = vsel %vm207_vm0, %v192_v7, 4286644096  ;;  %v84_v29 = vld [vmem:[%s1919_s0 + $0x12c] sm:$0xf]  ;;  %v453_v32 = vmax.bf16 %v451_v19, %v449_v18 }
  0x36   :  { %v127_v30 = vld [vmem:[%s1919_s0 + $0x1d8] sm:$0xf]  ;;  %v499_v31 = vmax.bf16 %v497_v17, %v495_v23  ;;  %v505_v33 = vsel %vm207_vm0, %v105_v22, 4286644096  ;;  %v525_v34 = vsel %vm207_vm0, %v18_v13, 4286644096 }
  0x37   :  { %v528_v35 = vsel %vm207_vm0, %v40_v21, 4286644096  ;;  %v484_v36 = vmax.bf16 %v482_v24, %v480_v27  ;;  %v106_v37 = vld [vmem:[%s1919_s0 + $0x184] sm:$0xf]  ;;  %v149_v38 = vld [vmem:[%s1919_s0 + $0x230] sm:$0xf] }
  0x38   :  { %v503_v39 = vmax.bf16 %v501_v26, %v499_v31  ;;  %v530_v40 = vmax.bf16 %v528_v35, %v525_v34  ;;  %v532_v41 = vsel %vm207_vm0, %v62_v25, 4286644096  ;;  %v509_v42 = vsel %vm207_vm0, %v127_v30, 4286644096  ;;  %v128_v45 = vld [vmem:[%s1919_s0 + $0x1dc] sm:$0xf] }
  0x39   :  { %v536_v43 = vsel %vm207_vm0, %v84_v29, 4286644096  ;;  %v488_v44 = vmax.bf16 %v486_v28, %v484_v36  ;;  %v150_v46 = vld [vmem:[%s1919_s0 + $0x234] sm:$0xf]  ;;  %v171_v47 = vld [vmem:[%s1919_s0 + $0x288] sm:$0xf] }
  0x3a   :  { %v507_v48 = vmax.bf16 %v505_v33, %v503_v39  ;;  %v534_v49 = vmax.bf16 %v532_v41, %v530_v40  ;;  %v193_v50 = vld [vmem:[%s1919_s0 + $0x2e0] sm:$0xf]  ;;  %v513_v51 = vsel %vm207_vm0, %v149_v38, 4286644096  ;;  %v540_v52 = vsel %vm207_vm0, %v106_v37, 4286644096 }
  0x3b   :  { %v1047_v53 = vcombine.low %v453_v32, %v488_v44  ;;  %v172_v54 = vld [vmem:[%s1919_s0 + $0x28c] sm:$0xf]  ;;  %v19_v57 = vld [vmem:[%s1919_s0 + $0x28] sm:$0xf]  ;;  %v41_v58 = vld [vmem:[%s1919_s0 + $0x80] sm:$0xf] }
  0x3c   :  { %v511_v55 = vmax.bf16 %v509_v42, %v507_v48  ;;  %v538_v56 = vmax.bf16 %v536_v43, %v534_v49  ;;  %v63_v59 = vld [vmem:[%s1919_s0 + $0xd8] sm:$0xf]  ;;  %v194_v60 = vld [vmem:[%s1919_s0 + $0x2e4] sm:$0xf]  ;;  %v517_v61 = vsel %vm207_vm0, %v171_v47, 4286644096 }
  0x3d   :  { %v544_v62 = vsel %vm207_vm0, %v128_v45, 4286644096  ;;  %1048 = vst [vmem:[%s1920_s1 + $0x18] sm:$0xff] %v1047_v53   ;;  %v548_v1 = vsel %vm207_vm0, %v150_v46, 4286644096 }
  0x3e   :  { %v515_v63 = vmax.bf16 %v513_v51, %v511_v55  ;;  %v542_v0 = vmax.bf16 %v540_v52, %v538_v56  ;;  %v20_v2 = vld [vmem:[%s1919_s0 + $0x2c] sm:$0xf]  ;;  %v85_v3 = vld [vmem:[%s1919_s0 + $0x130] sm:$0xf]  ;;  %v560_v4 = vsel %vm207_vm0, %v19_v57, 4286644096 }
  0x3f   :  { %v563_v5 = vsel %vm207_vm0, %v41_v58, 4286644096  ;;  %v567_v6 = vsel %vm207_vm0, %v63_v59, 4286644096  ;;  %v521_v8 = vsel %vm207_vm0, %v193_v50, 4286644096 }
  0x40   :  { %v519_v7 = vmax.bf16 %v517_v61, %v515_v63  ;;  %v546_v9 = vmax.bf16 %v544_v62, %v542_v0  ;;  %v42_v10 = vld [vmem:[%s1919_s0 + $0x84] sm:$0xf]  ;;  %v107_v11 = vld [vmem:[%s1919_s0 + $0x188] sm:$0xf]  ;;  %v565_v12 = vmax.bf16 %v563_v5, %v560_v4  ;;  %v552_v13 = vsel %vm207_vm0, %v172_v54, 4286644096 }
  0x41   :  { %v64_v14 = vld [vmem:[%s1919_s0 + $0xdc] sm:$0xf]  ;;  %v571_v15 = vsel %vm207_vm0, %v85_v3, 4286644096  ;;  %v556_v17 = vsel %vm207_vm0, %v194_v60, 4286644096 }
  0x42   :  { %v550_v16 = vmax.bf16 %v548_v1, %v546_v9  ;;  %v86_v18 = vld [vmem:[%s1919_s0 + $0x134] sm:$0xf]  ;;  %v129_v19 = vld [vmem:[%s1919_s0 + $0x1e0] sm:$0xf]  ;;  %v569_v20 = vmax.bf16 %v567_v6, %v565_v12  ;;  %v523_v21 = vmax.bf16 %v521_v8, %v519_v7  ;;  %v575_v22 = vsel %vm207_vm0, %v107_v11, 4286644096 }
  0x43   :  { %v595_v23 = vsel %vm207_vm0, %v20_v2, 4286644096  ;;  %v598_v24 = vsel %vm207_vm0, %v42_v10, 4286644096  ;;  %v108_v26 = vld [vmem:[%s1919_s0 + $0x18c] sm:$0xf] }
  0x44   :  { %v554_v25 = vmax.bf16 %v552_v13, %v550_v16  ;;  %v151_v27 = vld [vmem:[%s1919_s0 + $0x238] sm:$0xf]  ;;  %v573_v28 = vmax.bf16 %v571_v15, %v569_v20  ;;  %v600_v29 = vmax.bf16 %v598_v24, %v595_v23  ;;  %v602_v30 = vsel %vm207_vm0, %v64_v14, 4286644096  ;;  %v130_v34 = vld [vmem:[%s1919_s0 + $0x1e4] sm:$0xf] }
  0x45   :  { %v579_v31 = vsel %vm207_vm0, %v129_v19, 4286644096  ;;  %v606_v32 = vsel %vm207_vm0, %v86_v18, 4286644096  ;;  %v152_v35 = vld [vmem:[%s1919_s0 + $0x23c] sm:$0xf] }
  0x46   :  { %v558_v33 = vmax.bf16 %v556_v17, %v554_v25  ;;  %v173_v36 = vld [vmem:[%s1919_s0 + $0x290] sm:$0xf]  ;;  %v577_v37 = vmax.bf16 %v575_v22, %v573_v28  ;;  %v604_v38 = vmax.bf16 %v602_v30, %v600_v29  ;;  %v195_v39 = vld [vmem:[%s1919_s0 + $0x2e8] sm:$0xf]  ;;  %v583_v40 = vsel %vm207_vm0, %v151_v27, 4286644096 }
  0x47   :  { %v610_v41 = vsel %vm207_vm0, %v108_v26, 4286644096  ;;  %v174_v43 = vld [vmem:[%s1919_s0 + $0x294] sm:$0xf]  ;;  %v21_v46 = vld [vmem:[%s1919_s0 + $0x30] sm:$0xf] }
  0x48   :  { %v1049_v42 = vcombine.low %v523_v21, %v558_v33  ;;  %v581_v44 = vmax.bf16 %v579_v31, %v577_v37  ;;  %v608_v45 = vmax.bf16 %v606_v32, %v604_v38  ;;  %v43_v47 = vld [vmem:[%s1919_s0 + $0x88] sm:$0xf]  ;;  %v65_v48 = vld [vmem:[%s1919_s0 + $0xe0] sm:$0xf]  ;;  %v196_v49 = vld [vmem:[%s1919_s0 + $0x2ec] sm:$0xf] }
  0x49   :  { %v587_v50 = vsel %vm207_vm0, %v173_v36, 4286644096  ;;  %v614_v51 = vsel %vm207_vm0, %v130_v34, 4286644096  ;;  %v618_v54 = vsel %vm207_vm0, %v152_v35, 4286644096 }
  0x4a   :  { %1050 = vst [vmem:[%s1920_s1 + $0x20] sm:$0xff] %v1049_v42   ;;  %v585_v52 = vmax.bf16 %v583_v40, %v581_v44  ;;  %v612_v53 = vmax.bf16 %v610_v41, %v608_v45  ;;  %v22_v55 = vld [vmem:[%s1919_s0 + $0x34] sm:$0xf]  ;;  %v87_v56 = vld [vmem:[%s1919_s0 + $0x138] sm:$0xf] }
  0x4b   :  { %v630_v57 = vsel %vm207_vm0, %v21_v46, 4286644096  ;;  %v633_v58 = vsel %vm207_vm0, %v43_v47, 4286644096  ;;  %v637_v59 = vsel %vm207_vm0, %v65_v48, 4286644096 }
  0x4c   :  { %v589_v60 = vmax.bf16 %v587_v50, %v585_v52  ;;  %v591_v61 = vsel %vm207_vm0, %v195_v39, 4286644096  ;;  %v616_v62 = vmax.bf16 %v614_v51, %v612_v53  ;;  %v44_v63 = vld [vmem:[%s1919_s0 + $0x8c] sm:$0xf]  ;;  %v109_v0 = vld [vmem:[%s1919_s0 + $0x190] sm:$0xf]  ;;  %v635_v1 = vmax.bf16 %v633_v58, %v630_v57 }
  0x4d   :  { %v622_v2 = vsel %vm207_vm0, %v174_v43, 4286644096  ;;  %v66_v3 = vld [vmem:[%s1919_s0 + $0xe4] sm:$0xf]  ;;  %v641_v4 = vsel %vm207_vm0, %v87_v56, 4286644096 }
  0x4e   :  { %v620_v5 = vmax.bf16 %v618_v54, %v616_v62  ;;  %v626_v6 = vsel %vm207_vm0, %v196_v49, 4286644096  ;;  %v88_v7 = vld [vmem:[%s1919_s0 + $0x13c] sm:$0xf]  ;;  %v131_v8 = vld [vmem:[%s1919_s0 + $0x1e8] sm:$0xf]  ;;  %v639_v9 = vmax.bf16 %v637_v59, %v635_v1  ;;  %v593_v10 = vmax.bf16 %v591_v61, %v589_v60 }
  0x4f   :  { %v645_v11 = vsel %vm207_vm0, %v109_v0, 4286644096  ;;  %v665_v12 = vsel %vm207_vm0, %v22_v55, 4286644096  ;;  %v668_v13 = vsel %vm207_vm0, %v44_v63, 4286644096 }
  0x50   :  { %v624_v14 = vmax.bf16 %v622_v2, %v620_v5  ;;  %v110_v15 = vld [vmem:[%s1919_s0 + $0x194] sm:$0xf]  ;;  %v153_v16 = vld [vmem:[%s1919_s0 + $0x240] sm:$0xf]  ;;  %v643_v17 = vmax.bf16 %v641_v4, %v639_v9  ;;  %v670_v18 = vmax.bf16 %v668_v13, %v665_v12  ;;  %v672_v19 = vsel %vm207_vm0, %v66_v3, 4286644096 }
  0x51   :  { %v649_v20 = vsel %vm207_vm0, %v131_v8, 4286644096  ;;  %v676_v21 = vsel %vm207_vm0, %v88_v7, 4286644096  ;;  %v132_v23 = vld [vmem:[%s1919_s0 + $0x1ec] sm:$0xf] }
  0x52   :  { %v628_v22 = vmax.bf16 %v626_v6, %v624_v14  ;;  %v154_v24 = vld [vmem:[%s1919_s0 + $0x244] sm:$0xf]  ;;  %v175_v25 = vld [vmem:[%s1919_s0 + $0x298] sm:$0xf]  ;;  %v647_v26 = vmax.bf16 %v645_v11, %v643_v17  ;;  %v674_v27 = vmax.bf16 %v672_v19, %v670_v18  ;;  %v197_v28 = vld [vmem:[%s1919_s0 + $0x2f0] sm:$0xf] }
  0x53   :  { %v653_v29 = vsel %vm207_vm0, %v153_v16, 4286644096  ;;  %v680_v30 = vsel %vm207_vm0, %v110_v15, 4286644096  ;;  %v176_v32 = vld [vmem:[%s1919_s0 + $0x29c] sm:$0xf] }
  0x54   :  { %v1051_v31 = vcombine.low %v593_v10, %v628_v22  ;;  %v651_v33 = vmax.bf16 %v649_v20, %v647_v26  ;;  %v678_v34 = vmax.bf16 %v676_v21, %v674_v27  ;;  %v23_v35 = vld [vmem:[%s1919_s0 + $0x38] sm:$0xf]  ;;  %v45_v36 = vld [vmem:[%s1919_s0 + $0x90] sm:$0xf]  ;;  %v67_v37 = vld [vmem:[%s1919_s0 + $0xe8] sm:$0xf] }
  0x55   :  { %v198_v38 = vld [vmem:[%s1919_s0 + $0x2f4] sm:$0xf]  ;;  %v657_v39 = vsel %vm207_vm0, %v175_v25, 4286644096  ;;  %v684_v40 = vsel %vm207_vm0, %v132_v23, 4286644096 }
  0x56   :  { %1052 = vst [vmem:[%s1920_s1 + $0x28] sm:$0xff] %v1051_v31   ;;  %v655_v41 = vmax.bf16 %v653_v29, %v651_v33  ;;  %v682_v42 = vmax.bf16 %v680_v30, %v678_v34  ;;  %v688_v43 = vsel %vm207_vm0, %v154_v24, 4286644096  ;;  %v24_v44 = vld [vmem:[%s1919_s0 + $0x3c] sm:$0xf] }
  0x57   :  { %v89_v45 = vld [vmem:[%s1919_s0 + $0x140] sm:$0xf]  ;;  %v700_v46 = vsel %vm207_vm0, %v23_v35, 4286644096  ;;  %v703_v47 = vsel %vm207_vm0, %v45_v36, 4286644096 }
  0x58   :  { %v707_v48 = vsel %vm207_vm0, %v67_v37, 4286644096  ;;  %v659_v49 = vmax.bf16 %v657_v39, %v655_v41  ;;  %v661_v50 = vsel %vm207_vm0, %v197_v28, 4286644096  ;;  %v686_v51 = vmax.bf16 %v684_v40, %v682_v42  ;;  %v46_v52 = vld [vmem:[%s1919_s0 + $0x94] sm:$0xf] }
  0x59   :  { %v111_v53 = vld [vmem:[%s1919_s0 + $0x198] sm:$0xf]  ;;  %v705_v54 = vmax.bf16 %v703_v47, %v700_v46  ;;  %v692_v55 = vsel %vm207_vm0, %v176_v32, 4286644096  ;;  %v68_v56 = vld [vmem:[%s1919_s0 + $0xec] sm:$0xf] }
  0x5a   :  { %v711_v57 = vsel %vm207_vm0, %v89_v45, 4286644096  ;;  %v690_v58 = vmax.bf16 %v688_v43, %v686_v51  ;;  %v696_v59 = vsel %vm207_vm0, %v198_v38, 4286644096  ;;  %v90_v60 = vld [vmem:[%s1919_s0 + $0x144] sm:$0xf]  ;;  %v663_v63 = vmax.bf16 %v661_v50, %v659_v49 }
  0x5b   :  { %v133_v61 = vld [vmem:[%s1919_s0 + $0x1f0] sm:$0xf]  ;;  %v709_v62 = vmax.bf16 %v707_v48, %v705_v54  ;;  %v715_v0 = vsel %vm207_vm0, %v111_v53, 4286644096  ;;  %v735_v1 = vsel %vm207_vm0, %v24_v44, 4286644096 }
  0x5c   :  { %v738_v2 = vsel %vm207_vm0, %v46_v52, 4286644096  ;;  %v694_v3 = vmax.bf16 %v692_v55, %v690_v58  ;;  %v112_v4 = vld [vmem:[%s1919_s0 + $0x19c] sm:$0xf]  ;;  %v155_v5 = vld [vmem:[%s1919_s0 + $0x248] sm:$0xf] }
  0x5d   :  { %v713_v6 = vmax.bf16 %v711_v57, %v709_v62  ;;  %v740_v7 = vmax.bf16 %v738_v2, %v735_v1  ;;  %v742_v8 = vsel %vm207_vm0, %v68_v56, 4286644096  ;;  %v719_v9 = vsel %vm207_vm0, %v133_v61, 4286644096  ;;  %v134_v12 = vld [vmem:[%s1919_s0 + $0x1f4] sm:$0xf] }
  0x5e   :  { %v746_v10 = vsel %vm207_vm0, %v90_v60, 4286644096  ;;  %v698_v11 = vmax.bf16 %v696_v59, %v694_v3  ;;  %v156_v13 = vld [vmem:[%s1919_s0 + $0x24c] sm:$0xf]  ;;  %v177_v14 = vld [vmem:[%s1919_s0 + $0x2a0] sm:$0xf] }
  0x5f   :  { %v717_v15 = vmax.bf16 %v715_v0, %v713_v6  ;;  %v744_v16 = vmax.bf16 %v742_v8, %v740_v7  ;;  %v199_v17 = vld [vmem:[%s1919_s0 + $0x2f8] sm:$0xf]  ;;  %v723_v18 = vsel %vm207_vm0, %v155_v5, 4286644096  ;;  %v750_v19 = vsel %vm207_vm0, %v112_v4, 4286644096 }
  0x60   :  { %v1053_v20 = vcombine.low %v663_v63, %v698_v11  ;;  %v178_v21 = vld [vmem:[%s1919_s0 + $0x2a4] sm:$0xf]  ;;  %v25_v24 = vld [vmem:[%s1919_s0 + $0x40] sm:$0xf]  ;;  %v47_v25 = vld [vmem:[%s1919_s0 + $0x98] sm:$0xf] }
  0x61   :  { %v721_v22 = vmax.bf16 %v719_v9, %v717_v15  ;;  %v748_v23 = vmax.bf16 %v746_v10, %v744_v16  ;;  %v69_v26 = vld [vmem:[%s1919_s0 + $0xf0] sm:$0xf]  ;;  %v200_v27 = vld [vmem:[%s1919_s0 + $0x2fc] sm:$0xf]  ;;  %v727_v28 = vsel %vm207_vm0, %v177_v14, 4286644096 }
  0x62   :  { %v754_v29 = vsel %vm207_vm0, %v134_v12, 4286644096  ;;  %1054 = vst [vmem:[%s1920_s1 + $0x30] sm:$0xff] %v1053_v20   ;;  %v758_v32 = vsel %vm207_vm0, %v156_v13, 4286644096 }
  0x63   :  { %v725_v30 = vmax.bf16 %v723_v18, %v721_v22  ;;  %v752_v31 = vmax.bf16 %v750_v19, %v748_v23  ;;  %v26_v33 = vld [vmem:[%s1919_s0 + $0x44] sm:$0xf]  ;;  %v91_v34 = vld [vmem:[%s1919_s0 + $0x148] sm:$0xf]  ;;  %v770_v35 = vsel %vm207_vm0, %v25_v24, 4286644096 }
  0x64   :  { %v773_v36 = vsel %vm207_vm0, %v47_v25, 4286644096  ;;  %v777_v37 = vsel %vm207_vm0, %v69_v26, 4286644096  ;;  %v731_v39 = vsel %vm207_vm0, %v199_v17, 4286644096 }
  0x65   :  { %v729_v38 = vmax.bf16 %v727_v28, %v725_v30  ;;  %v756_v40 = vmax.bf16 %v754_v29, %v752_v31  ;;  %v48_v41 = vld [vmem:[%s1919_s0 + $0x9c] sm:$0xf]  ;;  %v113_v42 = vld [vmem:[%s1919_s0 + $0x1a0] sm:$0xf]  ;;  %v775_v43 = vmax.bf16 %v773_v36, %v770_v35  ;;  %v762_v44 = vsel %vm207_vm0, %v178_v21, 4286644096 }
  0x66   :  { %v70_v45 = vld [vmem:[%s1919_s0 + $0xf4] sm:$0xf]  ;;  %v781_v46 = vsel %vm207_vm0, %v91_v34, 4286644096  ;;  %v766_v48 = vsel %vm207_vm0, %v200_v27, 4286644096 }
  0x67   :  { %v760_v47 = vmax.bf16 %v758_v32, %v756_v40  ;;  %v92_v49 = vld [vmem:[%s1919_s0 + $0x14c] sm:$0xf]  ;;  %v135_v50 = vld [vmem:[%s1919_s0 + $0x1f8] sm:$0xf]  ;;  %v779_v51 = vmax.bf16 %v777_v37, %v775_v43  ;;  %v733_v52 = vmax.bf16 %v731_v39, %v729_v38  ;;  %v785_v53 = vsel %vm207_vm0, %v113_v42, 4286644096 }
  0x68   :  { %v805_v54 = vsel %vm207_vm0, %v26_v33, 4286644096  ;;  %v808_v55 = vsel %vm207_vm0, %v48_v41, 4286644096  ;;  %v114_v57 = vld [vmem:[%s1919_s0 + $0x1a4] sm:$0xf] }
  0x69   :  { %v764_v56 = vmax.bf16 %v762_v44, %v760_v47  ;;  %v157_v58 = vld [vmem:[%s1919_s0 + $0x250] sm:$0xf]  ;;  %v783_v59 = vmax.bf16 %v781_v46, %v779_v51  ;;  %v810_v60 = vmax.bf16 %v808_v55, %v805_v54  ;;  %v812_v61 = vsel %vm207_vm0, %v70_v45, 4286644096  ;;  %v136_v1 = vld [vmem:[%s1919_s0 + $0x1fc] sm:$0xf] }
  0x6a   :  { %v789_v62 = vsel %vm207_vm0, %v135_v50, 4286644096  ;;  %v816_v63 = vsel %vm207_vm0, %v92_v49, 4286644096  ;;  %v158_v2 = vld [vmem:[%s1919_s0 + $0x254] sm:$0xf] }
  0x6b   :  { %v768_v0 = vmax.bf16 %v766_v48, %v764_v56  ;;  %v179_v3 = vld [vmem:[%s1919_s0 + $0x2a8] sm:$0xf]  ;;  %v787_v4 = vmax.bf16 %v785_v53, %v783_v59  ;;  %v814_v5 = vmax.bf16 %v812_v61, %v810_v60  ;;  %v201_v6 = vld [vmem:[%s1919_s0 + $0x300] sm:$0xf]  ;;  %v793_v7 = vsel %vm207_vm0, %v157_v58, 4286644096 }
  0x6c   :  { %v820_v8 = vsel %vm207_vm0, %v114_v57, 4286644096  ;;  %v180_v10 = vld [vmem:[%s1919_s0 + $0x2ac] sm:$0xf]  ;;  %v27_v13 = vld [vmem:[%s1919_s0 + $0x48] sm:$0xf] }
  0x6d   :  { %v1055_v9 = vcombine.low %v733_v52, %v768_v0  ;;  %v791_v11 = vmax.bf16 %v789_v62, %v787_v4  ;;  %v818_v12 = vmax.bf16 %v816_v63, %v814_v5  ;;  %v49_v14 = vld [vmem:[%s1919_s0 + $0xa0] sm:$0xf]  ;;  %v71_v15 = vld [vmem:[%s1919_s0 + $0xf8] sm:$0xf]  ;;  %v202_v16 = vld [vmem:[%s1919_s0 + $0x304] sm:$0xf] }
  0x6e   :  { %v797_v17 = vsel %vm207_vm0, %v179_v3, 4286644096  ;;  %v824_v18 = vsel %vm207_vm0, %v136_v1, 4286644096  ;;  %v828_v21 = vsel %vm207_vm0, %v158_v2, 4286644096 }
  0x6f   :  { %1056 = vst [vmem:[%s1920_s1 + $0x38] sm:$0xff] %v1055_v9   ;;  %v795_v19 = vmax.bf16 %v793_v7, %v791_v11  ;;  %v822_v20 = vmax.bf16 %v820_v8, %v818_v12  ;;  %v28_v22 = vld [vmem:[%s1919_s0 + $0x4c] sm:$0xf]  ;;  %v50_v23 = vld [vmem:[%s1919_s0 + $0xa4] sm:$0xf] }
  0x70   :  { %v93_v24 = vld [vmem:[%s1919_s0 + $0x150] sm:$0xf]  ;;  %v840_v25 = vsel %vm207_vm0, %v27_v13, 4286644096  ;;  %v843_v26 = vsel %vm207_vm0, %v49_v14, 4286644096 }
  0x71   :  { %v847_v27 = vsel %vm207_vm0, %v71_v15, 4286644096  ;;  %v799_v28 = vmax.bf16 %v797_v17, %v795_v19  ;;  %v801_v29 = vsel %vm207_vm0, %v201_v6, 4286644096  ;;  %v826_v30 = vmax.bf16 %v824_v18, %v822_v20  ;;  %v72_v31 = vld [vmem:[%s1919_s0 + $0xfc] sm:$0xf] }
  0x72   :  { %v115_v32 = vld [vmem:[%s1919_s0 + $0x1a8] sm:$0xf]  ;;  %v845_v33 = vmax.bf16 %v843_v26, %v840_v25  ;;  %v832_v34 = vsel %vm207_vm0, %v180_v10, 4286644096  ;;  %v94_v35 = vld [vmem:[%s1919_s0 + $0x154] sm:$0xf] }
  0x73   :  { %v851_v36 = vsel %vm207_vm0, %v93_v24, 4286644096  ;;  %v830_v37 = vmax.bf16 %v828_v21, %v826_v30  ;;  %v836_v38 = vsel %vm207_vm0, %v202_v16, 4286644096  ;;  %v116_v39 = vld [vmem:[%s1919_s0 + $0x1ac] sm:$0xf]  ;;  %v803_v42 = vmax.bf16 %v801_v29, %v799_v28 }
  0x74   :  { %v137_v40 = vld [vmem:[%s1919_s0 + $0x200] sm:$0xf]  ;;  %v849_v41 = vmax.bf16 %v847_v27, %v845_v33  ;;  %v855_v43 = vsel %vm207_vm0, %v115_v32, 4286644096  ;;  %v875_v44 = vsel %vm207_vm0, %v28_v22, 4286644096 }
  0x75   :  { %v878_v45 = vsel %vm207_vm0, %v50_v23, 4286644096  ;;  %v834_v46 = vmax.bf16 %v832_v34, %v830_v37  ;;  %v138_v47 = vld [vmem:[%s1919_s0 + $0x204] sm:$0xf]  ;;  %v159_v48 = vld [vmem:[%s1919_s0 + $0x258] sm:$0xf] }
  0x76   :  { %v181_v49 = vld [vmem:[%s1919_s0 + $0x2b0] sm:$0xf]  ;;  %v853_v50 = vmax.bf16 %v851_v36, %v849_v41  ;;  %v880_v51 = vmax.bf16 %v878_v45, %v875_v44  ;;  %v882_v52 = vsel %vm207_vm0, %v72_v31, 4286644096  ;;  %v859_v53 = vsel %vm207_vm0, %v137_v40, 4286644096 }
  0x77   :  { %v886_v54 = vsel %vm207_vm0, %v94_v35, 4286644096  ;;  %v29_v55 = vld [vmem:[%s1919_s0 + $0x50] sm:$0xf]  ;;  %v838_v56 = vmax.bf16 %v836_v38, %v834_v46  ;;  %v160_v57 = vld [vmem:[%s1919_s0 + $0x25c] sm:$0xf] }
  0x78   :  { %v203_v58 = vld [vmem:[%s1919_s0 + $0x308] sm:$0xf]  ;;  %v857_v59 = vmax.bf16 %v855_v43, %v853_v50  ;;  %v884_v60 = vmax.bf16 %v882_v52, %v880_v51  ;;  %v73_v62 = vld [vmem:[%s1919_s0 + $0x100] sm:$0xf]  ;;  %v863_v63 = vsel %vm207_vm0, %v159_v48, 4286644096 }
  0x79   :  { %v51_v61 = vld [vmem:[%s1919_s0 + $0xa8] sm:$0xf]  ;;  %v867_v0 = vsel %vm207_vm0, %v181_v49, 4286644096  ;;  %v890_v1 = vsel %vm207_vm0, %v116_v39, 4286644096  ;;  %v1057_v2 = vcombine.low %v803_v42, %v838_v56 }
  0x7a   :  { %v182_v3 = vld [vmem:[%s1919_s0 + $0x2b4] sm:$0xf]  ;;  %v861_v4 = vmax.bf16 %v859_v53, %v857_v59  ;;  %v888_v5 = vmax.bf16 %v886_v54, %v884_v60  ;;  %v95_v6 = vld [vmem:[%s1919_s0 + $0x158] sm:$0xf]  ;;  %v910_v7 = vsel %vm207_vm0, %v29_v55, 4286644096 }
  0x7b   :  { %v894_v8 = vsel %vm207_vm0, %v138_v47, 4286644096  ;;  %v913_v9 = vsel %vm207_vm0, %v51_v61, 4286644096  ;;  %v917_v10 = vsel %vm207_vm0, %v73_v62, 4286644096 }
  0x7c   :  { %1058 = vst [vmem:[%s1920_s1 + $0x40] sm:$0xff] %v1057_v2   ;;  %v204_v11 = vld [vmem:[%s1919_s0 + $0x30c] sm:$0xf]  ;;  %v865_v12 = vmax.bf16 %v863_v63, %v861_v4  ;;  %v871_v13 = vsel %vm207_vm0, %v203_v58, 4286644096  ;;  %v892_v14 = vmax.bf16 %v890_v1, %v888_v5  ;;  %v915_v16 = vmax.bf16 %v913_v9, %v910_v7 }
  0x7d   :  { %v117_v15 = vld [vmem:[%s1919_s0 + $0x1b0] sm:$0xf]  ;;  %v898_v17 = vsel %vm207_vm0, %v160_v57, 4286644096  ;;  %v921_v18 = vsel %vm207_vm0, %v95_v6, 4286644096 }
  0x7e   :  { %v30_v19 = vld [vmem:[%s1919_s0 + $0x54] sm:$0x1]  ;;  %v869_v21 = vmax.bf16 %v867_v0, %v865_v12  ;;  %v896_v22 = vmax.bf16 %v894_v8, %v892_v14  ;;  %v139_v23 = vld [vmem:[%s1919_s0 + $0x208] sm:$0xf]  ;;  %v919_v24 = vmax.bf16 %v917_v10, %v915_v16  ;;  %v52_v25 = vld [vmem:[%s1919_s0 + $0xac] sm:$0x1] }
  0x7f   :  { %v74_v26 = vld [vmem:[%s1919_s0 + $0x104] sm:$0x1]  ;;  %v902_v27 = vsel %vm207_vm0, %v182_v3, 4286644096  ;;  %v161_v28 = vld [vmem:[%s1919_s0 + $0x260] sm:$0xf] }
  0x80   :  { %v925_v29 = vsel %vm207_vm0, %v117_v15, 4286644096  ;;  %v900_v30 = vmax.bf16 %v898_v17, %v896_v22  ;;  %v906_v31 = vsel %vm207_vm0, %v204_v11, 4286644096  ;;  %v923_v32 = vmax.bf16 %v921_v18, %v919_v24  ;;  %v96_v33 = vld [vmem:[%s1919_s0 + $0x15c] sm:$0x1] }
  0x81   :  { %v947_v34 = vsel %vm1840_vm3, %v30_v19, 4286644096  ;;  %v929_v35 = vsel %vm207_vm0, %v139_v23, 4286644096  ;;  %v948_v36 = vsel %vm1840_vm3, %v52_v25, 4286644096  ;;  %v873_v38 = vmax.bf16 %v871_v13, %v869_v21 }
  0x82   :  { %v950_v37 = vsel %vm1840_vm3, %v74_v26, 4286644096  ;;  %v904_v39 = vmax.bf16 %v902_v27, %v900_v30  ;;  %v183_v40 = vld [vmem:[%s1919_s0 + $0x2b8] sm:$0xf]  ;;  %v927_v41 = vmax.bf16 %v925_v29, %v923_v32  ;;  %v118_v42 = vld [vmem:[%s1919_s0 + $0x1b4] sm:$0x1]  ;;  %v949_v43 = vmax.bf16 %v948_v36, %v947_v34 }
  0x83   :  { %v933_v44 = vsel %vm207_vm0, %v161_v28, 4286644096  ;;  %v952_v45 = vsel %vm1840_vm3, %v96_v33, 4286644096  ;;  %v205_v47 = vld [vmem:[%s1919_s0 + $0x310] sm:$0xf] }
  0x84   :  { %v908_v46 = vmax.bf16 %v906_v31, %v904_v39  ;;  %v931_v48 = vmax.bf16 %v929_v35, %v927_v41  ;;  %v140_v49 = vld [vmem:[%s1919_s0 + $0x20c] sm:$0x1]  ;;  %v951_v50 = vmax.bf16 %v950_v37, %v949_v43  ;;  %v937_v51 = vsel %vm207_vm0, %v183_v40, 4286644096  ;;  %v162_v55 = vld [vmem:[%s1919_s0 + $0x264] sm:$0x1] }
  0x85   :  { %v954_v52 = vsel %vm1840_vm3, %v118_v42, 4286644096  ;;  %v941_v57 = vsel %vm207_vm0, %v205_v47, 4286644096  ;;  %v956_v58 = vsel %vm1840_vm3, %v140_v49, 4286644096 }
  0x86   :  { %v1059_v53 = vcombine.low %v873_v38, %v908_v46  ;;  %v935_v54 = vmax.bf16 %v933_v44, %v931_v48  ;;  %v953_v56 = vmax.bf16 %v952_v45, %v951_v50  ;;  %v184_v60 = vld [vmem:[%s1919_s0 + $0x2bc] sm:$0x1]  ;;  %v958_v62 = vsel %vm1840_vm3, %v162_v55, 4286644096  ;;  %v206_v0 = vld [vmem:[%s1919_s0 + $0x314] sm:$0x1] }
  0x87   :  { %v960_v2 = vsel %vm1840_vm3, %v184_v60, 4286644096  ;;  %v962_v4 = vsel %vm1840_vm3, %v206_v0, 4286644096  ;;  %v985_v6 = vld [vmem:[%s1920_s1 + $0x54] sm:$0x1] }
  0x88   :  { %1060 = vst [vmem:[%s1920_s1 + $0x48] sm:$0xff] %v1059_v53   ;;  %v939_v59 = vmax.bf16 %v937_v51, %v935_v54  ;;  %v955_v61 = vmax.bf16 %v954_v52, %v953_v56 }
  0x8a   :  { %v943_v63 = vmax.bf16 %v941_v57, %v939_v59  ;;  %v957_v1 = vmax.bf16 %v956_v58, %v955_v61 }
  0x8c   :  { %984 = vst [vmem:[%s1920_s1 + $0x50] sm:$0xf] %v943_v63  ;;  %v959_v3 = vmax.bf16 %v958_v62, %v957_v1 }
  0x8e   :  { %v961_v5 = vmax.bf16 %v960_v2, %v959_v3 }
  0x90   :  { %v963_v7 = vmax.bf16 %v962_v4, %v961_v5 }
  0x92   :  { %v986_v8 = vsel %vm1840_vm3, %v963_v7, %v985_v6 }
  0x93   :  { %987 = vst [vmem:[%s1920_s1 + $0x54] sm:$0x1] %v986_v8 }

// kernel: svhn_forward.8
= control target key start
LH: loop header
LB: loop body
LE: loop exit
PB: predicated region body
PF: predicated region fallthrough
CT: control target
= control target key end

     0   :  { %vm3848_vm0 = vmmov 0   ;;  %vm1664_vm1 = vcmask 523264   ;;  %vm2644_vm2 = vcmask 519168   ;;  %s4916_s1 = inlined_call_operand.vmem [shape: bf16[1600,64], index: 1, kind: input, shape index: {}]   ;;  %s4917_s0 = inlined_call_operand.vmem [shape: bf16[168,1600], index: 0, kind: input, shape index: {}]   ;;  %s4918_s2 = inlined_call_operand.vmem [shape: f32[1,64], index: 2, kind: input, shape index: {}]   ;;  %s4919_s3 = inlined_call_operand.vmem [shape: bf16[168,64], index: 3, kind: output, shape index: {}]  }
   0x1   :  { %v3544_v0 = vld [vmem:[%s4916_s1 + $0x78] sm:$0xff]   ;;  %v3546_v2 = vld [vmem:[%s4916_s1 + $0x70] sm:$0xff]   ;;  %v3548_v4 = vld [vmem:[%s4916_s1 + $0x68] sm:$0xff]  }
   0x2   :  { %v3545_v1 = vld [vmem:[%s4916_s1 + $0x38] sm:$0xff]   ;;  %2967 = vmatprep.subr.bf16.mxu0 %v3544_v0  ;;  %3526 = vmatprep.subr.bf16.mxu1 %v3544_v0  ;;  %v3547_v3 = vld [vmem:[%s4916_s1 + $0x30] sm:$0xff]   ;;  %v3549_v5 = vld [vmem:[%s4916_s1 + $0x28] sm:$0xff]  }
   0x3   :  { %2968 = vmatpush3.bf16.msra.mxu0 %v3545_v1  ;;  %3534 = vmatpush3.bf16.msra.mxu1 %v3545_v1  ;;  %v3550_v6 = vld [vmem:[%s4916_s1 + $0x60] sm:$0xff]   ;;  %v3552_v8 = vld [vmem:[%s4916_s1 + $0x58] sm:$0xff]   ;;  %v3554_v10 = vld [vmem:[%s4916_s1 + $0x50] sm:$0xff]  }
   0x4   :  { %2969 = vmatprep.subr.bf16.mxu0 %v3546_v2  ;;  %3527 = vmatprep.subr.bf16.mxu1 %v3546_v2  ;;  %v3551_v7 = vld [vmem:[%s4916_s1 + $0x20] sm:$0xff]   ;;  %v3553_v9 = vld [vmem:[%s4916_s1 + $0x18] sm:$0xff]   ;;  %v3565_v12 = vld [vmem:[%s4917_s0 + $0x274] ss:$52 sps:$4 sm:$0xff]  }
   0x5   :  { %v3562_v11 = vld [vmem:[%s4917_s0 + $0x4] ss:$52 sps:$4 sm:$0xff]   ;;  %v3555_v13 = vld [vmem:[%s4916_s1 + $0x10] sm:$0xff]   ;;  %v3556_v14 = vld [vmem:[%s4916_s1 + $0x48] sm:$0xff]   ;;  %1778 = vmatprep.mubr.bf16.mxu1 %v3565_v12 }
   0x6   :  { %1730 = vmatprep.mubr.bf16.mxu0 %v3562_v11  ;;  %v3557_v15 = vld [vmem:[%s4916_s1 + $0x8] sm:$0xff]   ;;  %v3558_v16 = vld [vmem:[%s4916_s1 + $0x40] sm:$0xff]   ;;  %v3566_v18 = vld [vmem:[%s4916_s1 + $0x178] sm:$0xff]  }
   0x7   :  { %2970 = vmatpush3.bf16.msra.mxu0 %v3547_v3  ;;  %3535 = vmatpush3.bf16.msra.mxu1 %v3547_v3  ;;  %v3559_v17 = vld [vmem:[%s4916_s1] sm:$0xff]   ;;  %v3568_v21 = vld [vmem:[%s4916_s1 + $0xf8] sm:$0xff]   ;;  %v3570_v24 = vld [vmem:[%s4916_s1 + $0x170] sm:$0xff]  }
   0x8   :  { %2971 = vmatprep.subr.bf16.mxu0 %v3548_v4  ;;  %3528 = vmatprep.subr.bf16.mxu1 %v3548_v4  ;;  %v3560_v19 = vld [vmem:[%s4917_s0] ss:$52 sps:$4 sm:$0xff]   ;;  %v3563_v20 = vld [vmem:[%s4917_s0 + $0x270] ss:$52 sps:$4 sm:$0xff]   ;;  %v3567_v22 = vld [vmem:[%s4916_s1 + $0x138] sm:$0xff]  }
   0x9   :  { %v3569_v23 = vld [vmem:[%s4916_s1 + $0xb8] sm:$0xff]   ;;  %v3571_v25 = vld [vmem:[%s4917_s0 + $0x6c] ss:$52 sps:$4 sm:$0xff]   ;;  %v3575_v27 = vld [vmem:[%s4916_s1 + $0xf0] sm:$0xff]  }
   0xa   :  { %v3573_v26 = vld [vmem:[%s4917_s0 + $0x2dc] ss:$52 sps:$4 sm:$0xff]   ;;  %v3580_v30 = vld [vmem:[%s4916_s1 + $0xe8] sm:$0xff]   ;;  %v3586_v37 = vld [vmem:[%s4917_s0 + $0x344] ss:$52 sps:$4 sm:$0xff]  }
   0xb   :  { %2972 = vmatpush3.bf16.msra.mxu0 %v3549_v5  ;;  %3536 = vmatpush3.bf16.msra.mxu1 %v3549_v5  ;;  %v3576_v28 = vld [vmem:[%s4916_s1 + $0x130] sm:$0xff]   ;;  %v3577_v31 = vld [vmem:[%s4917_s0 + $0x68] ss:$52 sps:$4 sm:$0xff]   ;;  %v3578_v32 = vld [vmem:[%s4917_s0 + $0x2d8] ss:$52 sps:$4 sm:$0xff]  }
   0xc   :  { %2973 = vmatprep.subr.bf16.mxu0 %v3550_v6  ;;  %3529 = vmatprep.subr.bf16.mxu1 %v3550_v6  ;;  %v3579_v29 = vld [vmem:[%s4916_s1 + $0xb0] sm:$0xff]   ;;  %v3581_v33 = vld [vmem:[%s4916_s1 + $0x168] sm:$0xff]   ;;  %v3590_v38 = vld [vmem:[%s4916_s1 + $0xe0] sm:$0xff]  }
   0xd   :  { %v3582_v34 = vld [vmem:[%s4916_s1 + $0xa8] sm:$0xff]   ;;  %v3592_v39 = vld [vmem:[%s4916_s1 + $0x160] sm:$0xff]   ;;  %v3594_v44 = vld [vmem:[%s4916_s1 + $0xd8] sm:$0xff]  }
   0xe   :  { %v3583_v35 = vld [vmem:[%s4916_s1 + $0x128] sm:$0xff]   ;;  %v3591_v40 = vld [vmem:[%s4916_s1 + $0xa0] sm:$0xff]   ;;  %v3595_v45 = vld [vmem:[%s4917_s0 + $0x13c] ss:$52 sps:$4 sm:$0xff]  }
   0xf   :  { %2974 = vmatpush3.bf16.msra.mxu0 %v3551_v7  ;;  %3537 = vmatpush3.bf16.msra.mxu1 %v3551_v7  ;;  %v3584_v36 = vld [vmem:[%s4917_s0 + $0xd4] ss:$52 sps:$4 sm:$0xff]   ;;  %v3593_v41 = vld [vmem:[%s4916_s1 + $0x120] sm:$0xff]   ;;  %v3602_v47 = vld [vmem:[%s4916_s1 + $0x158] sm:$0xff]  }
  0x10   :  { %2975 = vmatprep.subr.bf16.mxu0 %v3552_v8  ;;  %3530 = vmatprep.subr.bf16.mxu1 %v3552_v8  ;;  %v3588_v42 = vld [vmem:[%s4917_s0 + $0xd0] ss:$52 sps:$4 sm:$0xff]   ;;  %v3589_v43 = vld [vmem:[%s4917_s0 + $0x340] ss:$52 sps:$4 sm:$0xff]   ;;  %v3599_v48 = vld [vmem:[%s4916_s1 + $0x98] sm:$0xff]  }
  0x11   :  { %v3597_v46 = vld [vmem:[%s4917_s0 + $0x3ac] ss:$52 sps:$4 sm:$0xff]   ;;  %v3603_v49 = vld [vmem:[%s4916_s1 + $0x118] sm:$0xff]   ;;  %v3604_v50 = vld [vmem:[%s4916_s1 + $0xd0] sm:$0xff]  }
  0x12   :  { %v3606_v51 = vld [vmem:[%s4916_s1 + $0x150] sm:$0xff]   ;;  %v3600_v54 = vld [vmem:[%s4917_s0 + $0x138] ss:$52 sps:$4 sm:$0xff]   ;;  %v3601_v55 = vld [vmem:[%s4917_s0 + $0x3a8] ss:$52 sps:$4 sm:$0xff]  }
  0x13   :  { %2976 = vmatpush3.bf16.msra.mxu0 %v3553_v9  ;;  %3538 = vmatpush3.bf16.msra.mxu1 %v3553_v9  ;;  %v3605_v52 = vld [vmem:[%s4916_s1 + $0x90] sm:$0xff]   ;;  %v3613_v57 = vld [vmem:[%s4916_s1 + $0xc8] sm:$0xff]   ;;  %v3607_v58 = vld [vmem:[%s4917_s0 + $0x1a4] ss:$52 sps:$4 sm:$0xff]  }
  0x14   :  { %2977 = vmatprep.subr.bf16.mxu0 %v3554_v10  ;;  %3531 = vmatprep.subr.bf16.mxu1 %v3554_v10  ;;  %v155_v53 = vld [vmem:[%s4917_s0 + $0x410] sm:$0xff]  ;;  %v3614_v60 = vld [vmem:[%s4916_s1 + $0x88] sm:$0xff]   ;;  %v3615_v62 = vld [vmem:[%s4916_s1 + $0xc0] sm:$0xff]  }
  0x15   :  { %v3610_v56 = vld [vmem:[%s4916_s1 + $0x110] sm:$0xff]   ;;  %v2802_v59 = vcombine.high %v155_v53, %v155_v53  ;;  %v3616_v61 = vld [vmem:[%s4916_s1 + $0x148] sm:$0xff]   ;;  %v3617_v1 = vld [vmem:[%s4916_s1 + $0x80] sm:$0xff]   ;;  %v2801_v5 = vcombine.low %v155_v53, %v155_v53 }
  0x16   :  { %v3618_v63 = vld [vmem:[%s4916_s1 + $0x108] sm:$0xff]   ;;  %v3611_v0 = vld [vmem:[%s4917_s0 + $0x1a0] ss:$52 sps:$4 sm:$0xff]   ;;  %v3626_v6 = vld [vmem:[%s4916_s1 + $0x1f8] sm:$0xff]  }
  0x17   :  { %2978 = vmatpush3.bf16.msra.mxu0 %v3555_v13  ;;  %3539 = vmatpush3.bf16.msra.mxu1 %v3555_v13  ;;  %v3619_v2 = vld [vmem:[%s4917_s0 + $0x20c] ss:$52 sps:$4 sm:$0xff]   ;;  %v3621_v8 = vld [vmem:[%s4917_s0 + $0x8] ss:$52 sps:$4 sm:$0xff]  }
  0x18   :  { %2979 = vmatprep.subr.bf16.mxu0 %v3556_v14  ;;  %3532 = vmatprep.subr.bf16.mxu1 %v3556_v14  ;;  %v3623_v3 = vld [vmem:[%s4917_s0 + $0xc] ss:$52 sps:$4 sm:$0xff]   ;;  %v3624_v9 = vld [vmem:[%s4917_s0 + $0x208] ss:$52 sps:$4 sm:$0xff]   ;;  %v3637_v14 = vld [vmem:[%s4916_s1 + $0x1f0] sm:$0xff]  }
  0x19   :  { %v3625_v4 = vld [vmem:[%s4916_s1 + $0x140] sm:$0xff]   ;;  %v3635_v10 = vld [vmem:[%s4916_s1 + $0x278] sm:$0xff]   ;;  %v3629_v12 = vld [vmem:[%s4917_s0 + $0x74] ss:$52 sps:$4 sm:$0xff]  }
  0x1a   :  { %v3627_v7 = vld [vmem:[%s4916_s1 + $0x100] sm:$0xff]   ;;  %v3628_v11 = vld [vmem:[%s4916_s1 + $0x1b8] sm:$0xff]   ;;  %v3633_v13 = vld [vmem:[%s4917_s0 + $0x14] ss:$52 sps:$4 sm:$0xff]  }
  0x1b   :  { %2980 = vmatpush3.bf16.msra.mxu0 %v3557_v15  ;;  %3540 = vmatpush3.bf16.msra.mxu1 %v3557_v15  ;;  %v3638_v15 = vld [vmem:[%s4916_s1 + $0x1b0] sm:$0xff]  }
  0x1c   :  { %2981 = vmatprep.subr.bf16.mxu0 %v3558_v16  ;;  %3533 = vmatprep.subr.bf16.mxu1 %v3558_v16  ;;  %v3631_v16 = vld [vmem:[%s4917_s0 + $0x10] ss:$52 sps:$4 sm:$0xff]  }
  0x1d   :  { %v3674_v53 = vld [vmem:[%s4917_s0 + $0x27c] ss:$52 sps:$4 sm:$0xff]  }
  0x1f   :  { %2982 = vmatpush3.bf16.msra.mxu0 %v3559_v17  ;;  %3541 = vmatpush3.bf16.msra.mxu1 %v3559_v17  ;;  %v3634_v17 = vld [vmem:[%s4917_s0 + $0x70] ss:$52 sps:$4 sm:$0xff]  }
  0x20   :  { %3131 = vmatprep.subr.bf16.mxu0 %v3566_v18  ;;  %3049 = vmatprep.subr.bf16.mxu1 %v3568_v21  ;;  %v3636_v18 = vld [vmem:[%s4916_s1 + $0x238] sm:$0xff]   ;;  %v3653_v21 = vld [vmem:[%s4916_s1 + $0x1e8] sm:$0xff]  }
  0x22   :  { %1731 = vmatmul.mubr.bf16.vlgmr.msra.gmra.mxu0 %v3560_v19  ;;  %1779 = vmatmul.mubr.bf16.vlgmr.msra.gmra.mxu1 %v3563_v20  ;;  %v3639_v19 = vld [vmem:[%s4917_s0 + $0xdc] ss:$52 sps:$4 sm:$0xff]  }
  0x23   :  { %3132 = vmatpush3.bf16.msra.mxu0 %v3567_v22  ;;  %3050 = vmatpush3.bf16.msra.mxu1 %v3569_v23  ;;  %v3641_v20 = vld [vmem:[%s4917_s0 + $0x7c] ss:$52 sps:$4 sm:$0xff]   ;;  %v3654_v23 = vld [vmem:[%s4916_s1 + $0x1a8] sm:$0xff]  }
  0x24   :  { %3133 = vmatprep.subr.bf16.mxu0 %v3570_v24  ;;  %1738 = vmatprep.mubr.bf16.mxu0 %v3571_v25  ;;  %v3645_v22 = vld [vmem:[%s4916_s1 + $0x270] sm:$0xff]   ;;  %v3643_v25 = vld [vmem:[%s4917_s0 + $0xd8] ss:$52 sps:$4 sm:$0xff]  }
  0x25   :  { %1786 = vmatprep.mubr.bf16.mxu1 %v3573_v26  ;;  %3051 = vmatprep.subr.bf16.mxu1 %v3575_v27  ;;  %v3646_v24 = vld [vmem:[%s4916_s1 + $0x230] sm:$0xff]   ;;  %v3644_v26 = vld [vmem:[%s4917_s0 + $0x78] ss:$52 sps:$4 sm:$0xff]  }
  0x26   :  { %v3655_v27 = vld [vmem:[%s4916_s1 + $0x268] sm:$0xff]  }
  0x27   :  { %3134 = vmatpush3.bf16.msra.mxu0 %v3576_v28  ;;  %3052 = vmatpush3.bf16.msra.mxu1 %v3579_v29  ;;  %v3647_v28 = vld [vmem:[%s4917_s0 + $0x144] ss:$52 sps:$4 sm:$0xff]  }
  0x28   :  { %3053 = vmatprep.subr.bf16.mxu1 %v3580_v30  ;;  %3135 = vmatprep.subr.bf16.mxu0 %v3581_v33  ;;  %v3649_v29 = vld [vmem:[%s4917_s0 + $0xe4] ss:$52 sps:$4 sm:$0xff]  }
  0x29   :  { %v3663_v30 = vld [vmem:[%s4916_s1 + $0x1e0] sm:$0xff]  }
  0x2a   :  { %1739 = vmatmul.mubr.bf16.gmra.mxu0 %v3577_v31  ;;  %1787 = vmatmul.mubr.bf16.gmra.mxu1 %v3578_v32  ;;  %v3664_v31 = vld [vmem:[%s4916_s1 + $0x1a0] sm:$0xff]   ;;  %v3660_v32 = vld [vmem:[%s4916_s1 + $0x228] sm:$0xff]  }
  0x2b   :  { %3054 = vmatpush3.bf16.msra.mxu1 %v3582_v34  ;;  %3136 = vmatpush3.bf16.msra.mxu0 %v3583_v35  ;;  %v3671_v33 = vld [vmem:[%s4916_s1 + $0x260] sm:$0xff]  }
  0x2c   :  { %1746 = vmatprep.mubr.bf16.mxu0 %v3584_v36  ;;  %1794 = vmatprep.mubr.bf16.mxu1 %v3586_v37  ;;  %v3651_v34 = vld [vmem:[%s4917_s0 + $0x140] ss:$52 sps:$4 sm:$0xff]   ;;  %v3673_v37 = vld [vmem:[%s4916_s1 + $0x1d8] sm:$0xff]  }
  0x2d   :  { %3055 = vmatprep.subr.bf16.mxu1 %v3590_v38  ;;  %3137 = vmatprep.subr.bf16.mxu0 %v3592_v39  ;;  %v3652_v35 = vld [vmem:[%s4917_s0 + $0xe0] ss:$52 sps:$4 sm:$0xff]  }
  0x2e   :  { %v3672_v36 = vld [vmem:[%s4916_s1 + $0x220] sm:$0xff]  }
  0x2f   :  { %3056 = vmatpush3.bf16.msra.mxu1 %v3591_v40  ;;  %3138 = vmatpush3.bf16.msra.mxu0 %v3593_v41  ;;  %v3656_v38 = vld [vmem:[%s4917_s0 + $0x1ac] ss:$52 sps:$4 sm:$0xff]   ;;  %v3678_v40 = vld [vmem:[%s4916_s1 + $0x198] sm:$0xff]  }
  0x30   :  { %3057 = vmatprep.subr.bf16.mxu1 %v3594_v44  ;;  %3139 = vmatprep.subr.bf16.mxu0 %v3602_v47  ;;  %v3658_v39 = vld [vmem:[%s4917_s0 + $0x14c] ss:$52 sps:$4 sm:$0xff]   ;;  %v3681_v41 = vld [vmem:[%s4916_s1 + $0x258] sm:$0xff]   ;;  %v3689_v47 = vld [vmem:[%s4916_s1 + $0x1d0] sm:$0xff]  }
  0x31   :  { %v3662_v44 = vld [vmem:[%s4917_s0 + $0x148] ss:$52 sps:$4 sm:$0xff]  }
  0x32   :  { %1747 = vmatmul.mubr.bf16.gmra.mxu0 %v3588_v42  ;;  %1795 = vmatmul.mubr.bf16.gmra.mxu1 %v3589_v43  ;;  %v3682_v42 = vld [vmem:[%s4916_s1 + $0x218] sm:$0xff]  }
  0x33   :  { %1754 = vmatprep.mubr.bf16.mxu0 %v3595_v45  ;;  %1802 = vmatprep.mubr.bf16.mxu1 %v3597_v46  ;;  %v3661_v43 = vld [vmem:[%s4917_s0 + $0x1a8] ss:$52 sps:$4 sm:$0xff]  }
  0x34   :  { %3058 = vmatpush3.bf16.msra.mxu1 %v3599_v48  ;;  %3140 = vmatpush3.bf16.msra.mxu0 %v3603_v49  ;;  %v3665_v45 = vld [vmem:[%s4917_s0 + $0x214] ss:$52 sps:$4 sm:$0xff]  }
  0x35   :  { %3059 = vmatprep.subr.bf16.mxu1 %v3604_v50  ;;  %3141 = vmatprep.subr.bf16.mxu0 %v3606_v51  ;;  %v3667_v46 = vld [vmem:[%s4917_s0 + $0x1b4] ss:$52 sps:$4 sm:$0xff]   ;;  %v3669_v50 = vld [vmem:[%s4917_s0 + $0x210] ss:$52 sps:$4 sm:$0xff]  }
  0x36   :  { %v3690_v48 = vld [vmem:[%s4916_s1 + $0x190] sm:$0xff]  }
  0x37   :  { %v3695_v49 = vld [vmem:[%s4916_s1 + $0x250] sm:$0xff]  }
  0x38   :  { %3060 = vmatpush3.bf16.msra.mxu1 %v3605_v52  ;;  %3142 = vmatpush3.bf16.msra.mxu0 %v3610_v56  ;;  %v3670_v51 = vld [vmem:[%s4917_s0 + $0x1b0] ss:$52 sps:$4 sm:$0xff]  }
  0x39   :  { %3061 = vmatprep.subr.bf16.mxu1 %v3613_v57  ;;  %3143 = vmatprep.subr.bf16.mxu0 %v3616_v61  ;;  %v3698_v52 = vld [vmem:[%s4916_s1 + $0x210] sm:$0xff]   ;;  %v3707_v57 = vld [vmem:[%s4916_s1 + $0x248] sm:$0xff]   ;;  %v3683_v61 = vld [vmem:[%s4917_s0 + $0x2e4] ss:$52 sps:$4 sm:$0xff]  }
  0x3a   :  { %1755 = vmatmul.mubr.bf16.gmra.mxu0 %v3600_v54  ;;  %1803 = vmatmul.mubr.bf16.gmra.mxu1 %v3601_v55  ;;  %v3699_v54 = vld [vmem:[%s4916_s1 + $0x1c8] sm:$0xff]   ;;  %v3676_v56 = vld [vmem:[%s4917_s0 + $0x21c] ss:$52 sps:$4 sm:$0xff]  }
  0x3b   :  { %1762 = vmatprep.mubr.bf16.mxu0 %v3607_v58  ;;  %1810 = vmatprep.mubr.bf16.mxu1 %v2802_v59  ;;  %v3700_v55 = vld [vmem:[%s4916_s1 + $0x188] sm:$0xff]  }
  0x3c   :  { %3062 = vmatpush3.bf16.msra.mxu1 %v3614_v60  ;;  %3144 = vmatpush3.bf16.msra.mxu0 %v3618_v63  ;;  %v3708_v58 = vld [vmem:[%s4916_s1 + $0x208] sm:$0xff]   ;;  %v3712_v63 = vld [vmem:[%s4916_s1 + $0x1c0] sm:$0xff]  }
  0x3d   :  { %3063 = vmatprep.subr.bf16.mxu1 %v3615_v62  ;;  %3145 = vmatprep.subr.bf16.mxu0 %v3625_v4  ;;  %v3679_v59 = vld [vmem:[%s4917_s0 + $0x278] ss:$52 sps:$4 sm:$0xff]   ;;  %v3847_v4 = vmov 0.0  }
  0x3e   :  { %v3680_v60 = vld [vmem:[%s4917_s0 + $0x218] ss:$52 sps:$4 sm:$0xff]  }
  0x3f   :  { %v3685_v62 = vld [vmem:[%s4917_s0 + $0x284] ss:$52 sps:$4 sm:$0xff]  }
  0x40   :  { %3064 = vmatpush3.bf16.msra.mxu1 %v3617_v1  ;;  %3146 = vmatpush3.bf16.msra.mxu0 %v3627_v7  ;;  %v3716_v1 = vld [vmem:[%s4916_s1 + $0x240] sm:$0xff]  }
  0x41   :  { %3213 = vmatprep.subr.bf16.mxu1 %v3626_v6  ;;  %3295 = vmatprep.subr.bf16.mxu0 %v3635_v10  ;;  %v3688_v6 = vld [vmem:[%s4917_s0 + $0x280] ss:$52 sps:$4 sm:$0xff]   ;;  %v3697_v10 = vld [vmem:[%s4917_s0 + $0x2e8] ss:$52 sps:$4 sm:$0xff]  }
  0x42   :  { %1763 = vmatmul.mubr.bf16.gmra.mxu0 %v3611_v0  ;;  %1811 = vmatmul.mubr.bf16.gmra.mxu1 %v2801_v5  ;;  %v3715_v0 = vld [vmem:[%s4916_s1 + $0x180] sm:$0xff]  }
  0x43   :  { %1770 = vmatprep.mubr.bf16.mxu0 %v3619_v2  ;;  %1850 = vmatprep.mubr.bf16.mxu1 %v3623_v3  ;;  %v3717_v2 = vld [vmem:[%s4916_s1 + $0x200] sm:$0xff]   ;;  %v3723_v3 = vld [vmem:[%s4916_s1 + $0x2f8] sm:$0xff]  }
  0x44   :  { %v3687_v5 = vld [vmem:[%s4917_s0 + $0x2e0] ss:$52 sps:$4 sm:$0xff]  }
  0x45   :  { %v3691_v7 = vld [vmem:[%s4917_s0 + $0x34c] ss:$52 sps:$4 sm:$0xff]  }
  0x4a   :  { %1771 = vmatmul.mubr.bf16.gmra.mxu0 %v3624_v9  ;;  %1851 = vmatmul.mubr.bf16.vlgmr.msra.gmra.mxu1 %v3621_v8  ;;  %v3693_v8 = vld [vmem:[%s4917_s0 + $0x2ec] ss:$52 sps:$4 sm:$0xff]   ;;  %v3696_v9 = vld [vmem:[%s4917_s0 + $0x348] ss:$52 sps:$4 sm:$0xff]  }
  0x4b   :  { %3214 = vmatpush3.bf16.msra.mxu1 %v3628_v11  ;;  %1858 = vmatprep.mubr.bf16.mxu1 %v3629_v12  ;;  %v3701_v11 = vld [vmem:[%s4917_s0 + $0x3b4] ss:$52 sps:$4 sm:$0xff]  }
  0x4c   :  { %1970 = vmatprep.mubr.bf16.mxu0 %v3633_v13  ;;  %3215 = vmatprep.subr.bf16.mxu1 %v3637_v14  ;;  %v3703_v12 = vld [vmem:[%s4917_s0 + $0x354] ss:$52 sps:$4 sm:$0xff]   ;;  %v156_v13 = vld [vmem:[%s4917_s0 + $0x418] sm:$0xff]  ;;  %v3705_v14 = vld [vmem:[%s4917_s0 + $0x3b0] ss:$52 sps:$4 sm:$0xff]  }
  0x4f   :  { %3216 = vmatpush3.bf16.msra.mxu1 %v3638_v15  ;;  %v3706_v15 = vld [vmem:[%s4917_s0 + $0x350] ss:$52 sps:$4 sm:$0xff]  }
  0x50   :  { %3217 = vmatprep.subr.bf16.mxu1 %v3653_v21 }
  0x52   :  { %1859 = vmatmul.mubr.bf16.gmra.mxu1 %v3634_v17  ;;  %1971 = vmatmul.mubr.bf16.vlgmr.msra.gmra.mxu0 %v3631_v16  ;;  %v2804_v16 = vcombine.high %v156_v13, %v156_v13  ;;  %v3710_v17 = vld [vmem:[%s4917_s0 + $0x3bc] ss:$52 sps:$4 sm:$0xff]  }
  0x53   :  { %3296 = vmatpush3.bf16.msra.mxu0 %v3636_v18  ;;  %1866 = vmatprep.mubr.bf16.mxu1 %v3639_v19  ;;  %v157_v18 = vld [vmem:[%s4917_s0 + $0x420] sm:$0xff]  ;;  %v2803_v19 = vcombine.low %v156_v13, %v156_v13 }
  0x54   :  { %1978 = vmatprep.mubr.bf16.mxu0 %v3641_v20  ;;  %3297 = vmatprep.subr.bf16.mxu0 %v3645_v22  ;;  %v3714_v20 = vld [vmem:[%s4917_s0 + $0x3b8] ss:$52 sps:$4 sm:$0xff]   ;;  %v2806_v21 = vcombine.high %v157_v18, %v157_v18  ;;  %v3721_v22 = vld [vmem:[%s4917_s0 + $0x1c] ss:$52 sps:$4 sm:$0xff]  }
  0x55   :  { %3218 = vmatpush3.bf16.msra.mxu1 %v3654_v23  ;;  %v3719_v23 = vld [vmem:[%s4917_s0 + $0x18] ss:$52 sps:$4 sm:$0xff]  }
  0x56   :  { %3219 = vmatprep.subr.bf16.mxu1 %v3663_v30  ;;  %v3727_v30 = vld [vmem:[%s4917_s0 + $0x20] ss:$52 sps:$4 sm:$0xff]   ;;  %v3788_v13 = vld [vmem:[%s4917_s0 + $0x3c4] ss:$52 sps:$4 sm:$0xff]  }
  0x57   :  { %3298 = vmatpush3.bf16.msra.mxu0 %v3646_v24  ;;  %v2805_v24 = vcombine.low %v157_v18, %v157_v18 }
  0x58   :  { %3299 = vmatprep.subr.bf16.mxu0 %v3655_v27  ;;  %v3729_v27 = vld [vmem:[%s4917_s0 + $0x24] ss:$52 sps:$4 sm:$0xff]  }
  0x59   :  { %3220 = vmatpush3.bf16.msra.mxu1 %v3664_v31  ;;  %v3746_v31 = vld [vmem:[%s4916_s1 + $0x2e8] sm:$0xff]  }
  0x5a   :  { %1867 = vmatmul.mubr.bf16.gmra.mxu1 %v3643_v25  ;;  %1979 = vmatmul.mubr.bf16.gmra.mxu0 %v3644_v26  ;;  %v3724_v25 = vld [vmem:[%s4916_s1 + $0x2b8] sm:$0xff]  }
  0x5b   :  { %1874 = vmatprep.mubr.bf16.mxu1 %v3647_v28  ;;  %1986 = vmatprep.mubr.bf16.mxu0 %v3649_v29  ;;  %v3725_v26 = vld [vmem:[%s4917_s0 + $0x84] ss:$52 sps:$4 sm:$0xff]   ;;  %v3732_v28 = vld [vmem:[%s4916_s1 + $0x2f0] sm:$0xff]  }
  0x5c   :  { %3300 = vmatpush3.bf16.msra.mxu0 %v3660_v32  ;;  %3221 = vmatprep.subr.bf16.mxu1 %v3673_v37  ;;  %v3733_v29 = vld [vmem:[%s4916_s1 + $0x2b0] sm:$0xff]   ;;  %v3755_v37 = vld [vmem:[%s4916_s1 + $0x2e0] sm:$0xff]  }
  0x5d   :  { %3301 = vmatprep.subr.bf16.mxu0 %v3671_v33  ;;  %3222 = vmatpush3.bf16.msra.mxu1 %v3678_v40  ;;  %v3730_v32 = vld [vmem:[%s4917_s0 + $0x80] ss:$52 sps:$4 sm:$0xff]   ;;  %v3731_v33 = vld [vmem:[%s4916_s1 + $0x318] sm:$0xff]  }
  0x5e   :  { %3223 = vmatprep.subr.bf16.mxu1 %v3689_v47  ;;  %v3756_v40 = vld [vmem:[%s4916_s1 + $0x2a0] sm:$0xff]   ;;  %v3778_v47 = vld [vmem:[%s4916_s1 + $0x2d0] sm:$0xff]  }
  0x60   :  { %3302 = vmatpush3.bf16.msra.mxu0 %v3672_v36  ;;  %v3747_v36 = vld [vmem:[%s4916_s1 + $0x2a8] sm:$0xff]  }
  0x61   :  { %3303 = vmatprep.subr.bf16.mxu0 %v3681_v41  ;;  %3224 = vmatpush3.bf16.msra.mxu1 %v3690_v48  ;;  %v3739_v41 = vld [vmem:[%s4917_s0 + $0x88] ss:$52 sps:$4 sm:$0xff]   ;;  %v3744_v48 = vld [vmem:[%s4917_s0 + $0x150] ss:$52 sps:$4 sm:$0xff]  }
  0x62   :  { %1875 = vmatmul.mubr.bf16.gmra.mxu1 %v3651_v34  ;;  %1987 = vmatmul.mubr.bf16.gmra.mxu0 %v3652_v35  ;;  %v3734_v34 = vld [vmem:[%s4917_s0 + $0xec] ss:$52 sps:$4 sm:$0xff]  }
  0x63   :  { %1882 = vmatprep.mubr.bf16.mxu1 %v3656_v38  ;;  %1994 = vmatprep.mubr.bf16.mxu0 %v3658_v39  ;;  %v3736_v35 = vld [vmem:[%s4917_s0 + $0x8c] ss:$52 sps:$4 sm:$0xff]   ;;  %v3752_v38 = vld [vmem:[%s4916_s1 + $0x310] sm:$0xff]   ;;  %v3738_v39 = vld [vmem:[%s4917_s0 + $0xe8] ss:$52 sps:$4 sm:$0xff]  }
  0x64   :  { %3304 = vmatpush3.bf16.msra.mxu0 %v3682_v42  ;;  %3225 = vmatprep.subr.bf16.mxu1 %v3699_v54  ;;  %v3763_v42 = vld [vmem:[%s4916_s1 + $0x2d8] sm:$0xff]  }
  0x65   :  { %3305 = vmatprep.subr.bf16.mxu0 %v3695_v49  ;;  %3226 = vmatpush3.bf16.msra.mxu1 %v3700_v55  ;;  %v3779_v49 = vld [vmem:[%s4916_s1 + $0x290] sm:$0xff]   ;;  %v3787_v55 = vld [vmem:[%s4916_s1 + $0x288] sm:$0xff]  }
  0x66   :  { %3227 = vmatprep.subr.bf16.mxu1 %v3712_v63  ;;  %v3750_v54 = vld [vmem:[%s4917_s0 + $0x15c] ss:$52 sps:$4 sm:$0xff]   ;;  %v3762_v63 = vld [vmem:[%s4917_s0 + $0x1c0] ss:$52 sps:$4 sm:$0xff]  }
  0x68   :  { %3306 = vmatpush3.bf16.msra.mxu0 %v3698_v52  ;;  %v3745_v52 = vld [vmem:[%s4917_s0 + $0xf0] ss:$52 sps:$4 sm:$0xff]  }
  0x69   :  { %3307 = vmatprep.subr.bf16.mxu0 %v3707_v57  ;;  %3228 = vmatpush3.bf16.msra.mxu1 %v3715_v0  ;;  %v3753_v57 = vld [vmem:[%s4917_s0 + $0x1b8] ss:$52 sps:$4 sm:$0xff]  }
  0x6a   :  { %1883 = vmatmul.mubr.bf16.gmra.mxu1 %v3661_v43  ;;  %1995 = vmatmul.mubr.bf16.gmra.mxu0 %v3662_v44  ;;  %v3740_v43 = vld [vmem:[%s4917_s0 + $0x154] ss:$52 sps:$4 sm:$0xff]   ;;  %v3764_v0 = vld [vmem:[%s4917_s0 + $0x28c] ss:$52 sps:$4 sm:$0xff]  }
  0x6b   :  { %1890 = vmatprep.mubr.bf16.mxu1 %v3665_v45  ;;  %2002 = vmatprep.mubr.bf16.mxu0 %v3667_v46  ;;  %v3742_v44 = vld [vmem:[%s4917_s0 + $0xf4] ss:$52 sps:$4 sm:$0xff]   ;;  %v3768_v45 = vld [vmem:[%s4916_s1 + $0x298] sm:$0xff]  }
  0x6c   :  { %3308 = vmatpush3.bf16.msra.mxu0 %v3708_v58  ;;  %3377 = vmatprep.subr.bf16.mxu1 %v3723_v3  ;;  %v3771_v46 = vld [vmem:[%s4916_s1 + $0x308] sm:$0xff]  }
  0x6d   :  { %3309 = vmatprep.subr.bf16.mxu0 %v3716_v1  ;;  %v3754_v58 = vld [vmem:[%s4917_s0 + $0x158] ss:$52 sps:$4 sm:$0xff]   ;;  %v3770_v3 = vld [vmem:[%s4917_s0 + $0x228] ss:$52 sps:$4 sm:$0xff]  }
  0x6e   :  { %v3766_v1 = vld [vmem:[%s4917_s0 + $0x22c] ss:$52 sps:$4 sm:$0xff]  }
  0x70   :  { %3310 = vmatpush3.bf16.msra.mxu0 %v3717_v2  ;;  %v3769_v2 = vld [vmem:[%s4917_s0 + $0x288] ss:$52 sps:$4 sm:$0xff]  }
  0x71   :  { %3474 = vmatprep.subr.bf16.mxu0 %v3847_v4 }
  0x72   :  { %1891 = vmatmul.mubr.bf16.gmra.mxu1 %v3669_v50  ;;  %2003 = vmatmul.mubr.bf16.gmra.mxu0 %v3670_v51  ;;  %v3794_v50 = vld [vmem:[%s4916_s1 + $0x300] sm:$0xff]   ;;  %v3786_v51 = vld [vmem:[%s4916_s1 + $0x2c8] sm:$0xff]  }
  0x73   :  { %1898 = vmatprep.mubr.bf16.mxu1 %v3674_v53  ;;  %2010 = vmatprep.mubr.bf16.mxu0 %v3676_v56  ;;  %v3748_v53 = vld [vmem:[%s4917_s0 + $0x1bc] ss:$52 sps:$4 sm:$0xff]   ;;  %v3798_v56 = vld [vmem:[%s4916_s1 + $0x2c0] sm:$0xff]  }
  0x7a   :  { %1899 = vmatmul.mubr.bf16.gmra.mxu1 %v3679_v59  ;;  %2011 = vmatmul.mubr.bf16.gmra.mxu0 %v3680_v60  ;;  %v3801_v59 = vld [vmem:[%s4916_s1 + $0x280] sm:$0xff]  }
  0x7b   :  { %1906 = vmatprep.mubr.bf16.mxu1 %v3683_v61  ;;  %2018 = vmatprep.mubr.bf16.mxu0 %v3685_v62  ;;  %v3757_v60 = vld [vmem:[%s4917_s0 + $0x224] ss:$52 sps:$4 sm:$0xff]   ;;  %v3761_v62 = vld [vmem:[%s4917_s0 + $0x220] ss:$52 sps:$4 sm:$0xff]  }
  0x7c   :  { %v3759_v61 = vld [vmem:[%s4917_s0 + $0x1c4] ss:$52 sps:$4 sm:$0xff]  }
  0x82   :  { %1907 = vmatmul.mubr.bf16.gmra.mxu1 %v3687_v5  ;;  %2019 = vmatmul.mubr.bf16.gmra.mxu0 %v3688_v6  ;;  %v3772_v5 = vld [vmem:[%s4917_s0 + $0x2f4] ss:$52 sps:$4 sm:$0xff]  }
  0x83   :  { %1914 = vmatprep.mubr.bf16.mxu1 %v3691_v7  ;;  %2026 = vmatprep.mubr.bf16.mxu0 %v3693_v8  ;;  %v3774_v6 = vld [vmem:[%s4917_s0 + $0x294] ss:$52 sps:$4 sm:$0xff]   ;;  %v3776_v7 = vld [vmem:[%s4917_s0 + $0x2f0] ss:$52 sps:$4 sm:$0xff]  }
  0x84   :  { %v3777_v8 = vld [vmem:[%s4917_s0 + $0x290] ss:$52 sps:$4 sm:$0xff]  }
  0x8a   :  { %1915 = vmatmul.mubr.bf16.gmra.mxu1 %v3696_v9  ;;  %2027 = vmatmul.mubr.bf16.gmra.mxu0 %v3697_v10  ;;  %v3780_v9 = vld [vmem:[%s4917_s0 + $0x35c] ss:$52 sps:$4 sm:$0xff]  }
  0x8b   :  { %1922 = vmatprep.mubr.bf16.mxu1 %v3701_v11  ;;  %2034 = vmatprep.mubr.bf16.mxu0 %v3703_v12  ;;  %v3782_v10 = vld [vmem:[%s4917_s0 + $0x2fc] ss:$52 sps:$4 sm:$0xff]   ;;  %v3784_v11 = vld [vmem:[%s4917_s0 + $0x358] ss:$52 sps:$4 sm:$0xff]  }
  0x8c   :  { %v3785_v12 = vld [vmem:[%s4917_s0 + $0x2f8] ss:$52 sps:$4 sm:$0xff]  }
  0x92   :  { %1923 = vmatmul.mubr.bf16.gmra.mxu1 %v3705_v14  ;;  %2035 = vmatmul.mubr.bf16.gmra.mxu0 %v3706_v15  ;;  %v3790_v14 = vld [vmem:[%s4917_s0 + $0x364] ss:$52 sps:$4 sm:$0xff]  }
  0x93   :  { %1930 = vmatprep.mubr.bf16.mxu1 %v2804_v16  ;;  %2042 = vmatprep.mubr.bf16.mxu0 %v3710_v17 }
  0x9a   :  { %1931 = vmatmul.mubr.bf16.gmra.mxu1 %v2803_v19  ;;  %2043 = vmatmul.mubr.bf16.gmra.mxu0 %v3714_v20  ;;  %v158_v19 = vld [vmem:[%s4917_s0 + $0x428] sm:$0xff] }
  0x9b   :  { %2050 = vmatprep.mubr.bf16.mxu0 %v2806_v21  ;;  %2090 = vmatprep.mubr.bf16.mxu1 %v3721_v22 }
  0xa2   :  { %2051 = vmatmul.mubr.bf16.gmra.mxu0 %v2805_v24  ;;  %2091 = vmatmul.mubr.bf16.vlgmr.msra.gmra.mxu1 %v3719_v23  ;;  %v3792_v24 = vld [vmem:[%s4917_s0 + $0x3c0] ss:$52 sps:$4 sm:$0xff]  }
  0xa3   :  { %3378 = vmatpush3.bf16.msra.mxu1 %v3724_v25  ;;  %2098 = vmatprep.mubr.bf16.mxu1 %v3725_v26  ;;  %v3793_v25 = vld [vmem:[%s4917_s0 + $0x360] ss:$52 sps:$4 sm:$0xff]   ;;  %v2808_v26 = vcombine.high %v158_v19, %v158_v19 }
  0xa4   :  { %2210 = vmatprep.mubr.bf16.mxu0 %v3729_v27  ;;  %3379 = vmatprep.subr.bf16.mxu1 %v3732_v28  ;;  %v3796_v27 = vld [vmem:[%s4917_s0 + $0x3cc] ss:$52 sps:$4 sm:$0xff]  }
  0xa7   :  { %3380 = vmatpush3.bf16.msra.mxu1 %v3733_v29 }
  0xa8   :  { %3381 = vmatprep.subr.bf16.mxu1 %v3746_v31 }
  0xaa   :  { %2099 = vmatmul.mubr.bf16.gmra.mxu1 %v3730_v32  ;;  %2211 = vmatmul.mubr.bf16.vlgmr.msra.gmra.mxu0 %v3727_v30 }
  0xab   :  { %3475 = vmatpush3.bf16.msra.mxu0 %v3731_v33  ;;  %2106 = vmatprep.mubr.bf16.mxu1 %v3734_v34 }
  0xac   :  { %2218 = vmatprep.mubr.bf16.mxu0 %v3736_v35  ;;  %3382 = vmatpush3.bf16.msra.mxu1 %v3747_v36  ;;  %v159_v36 = vld [vmem:[%s4917_s0 + $0x430] sm:$0xff] }
  0xad   :  { %3476 = vmatprep.subr.bf16.mxu0 %v3847_v4  ;;  %3383 = vmatprep.subr.bf16.mxu1 %v3755_v37 }
  0xaf   :  { %3477 = vmatpush3.bf16.msra.mxu0 %v3752_v38 }
  0xb0   :  { %3384 = vmatpush3.bf16.msra.mxu1 %v3756_v40  ;;  %3478 = vmatprep.subr.bf16.mxu0 %v3847_v4 }
  0xb1   :  { %3385 = vmatprep.subr.bf16.mxu1 %v3763_v42  ;;  %v3800_v42 = vld [vmem:[%s4917_s0 + $0x3c8] ss:$52 sps:$4 sm:$0xff]  }
  0xb2   :  { %2107 = vmatmul.mubr.bf16.gmra.mxu1 %v3738_v39  ;;  %2219 = vmatmul.mubr.bf16.gmra.mxu0 %v3739_v41  ;;  %v2807_v41 = vcombine.low %v158_v19, %v158_v19 }
  0xb3   :  { %2114 = vmatprep.mubr.bf16.mxu1 %v3740_v43  ;;  %2226 = vmatprep.mubr.bf16.mxu0 %v3742_v44  ;;  %v2810_v43 = vcombine.high %v159_v36, %v159_v36  ;;  %v3805_v44 = vld [vmem:[%s4917_s0 + $0x2c] ss:$52 sps:$4 sm:$0xff]  }
  0xb4   :  { %3386 = vmatpush3.bf16.msra.mxu1 %v3768_v45  ;;  %3479 = vmatpush3.bf16.msra.mxu0 %v3771_v46 }
  0xb5   :  { %3387 = vmatprep.subr.bf16.mxu1 %v3778_v47  ;;  %3480 = vmatprep.subr.bf16.mxu0 %v3847_v4 }
  0xb8   :  { %3388 = vmatpush3.bf16.msra.mxu1 %v3779_v49  ;;  %3481 = vmatpush3.bf16.msra.mxu0 %v3794_v50 }
  0xb9   :  { %3389 = vmatprep.subr.bf16.mxu1 %v3786_v51 }
  0xba   :  { %2115 = vmatmul.mubr.bf16.gmra.mxu1 %v3744_v48  ;;  %2227 = vmatmul.mubr.bf16.gmra.mxu0 %v3745_v52 }
  0xbb   :  { %2122 = vmatprep.mubr.bf16.mxu1 %v3748_v53  ;;  %2234 = vmatprep.mubr.bf16.mxu0 %v3750_v54 }
  0xbc   :  { %3390 = vmatpush3.bf16.msra.mxu1 %v3787_v55  ;;  %v4512_v55 = vld [vmem:[%s4918_s2] ss:$0 sm:$0xff] }
  0xbd   :  { %3391 = vmatprep.subr.bf16.mxu1 %v3798_v56 }
  0xc0   :  { %3392 = vmatpush3.bf16.msra.mxu1 %v3801_v59  ;;  %v2809_v59 = vcombine.low %v159_v36, %v159_v36  ;;  %v3817_v36 = vld [vmem:[%s4917_s0 + $0x164] ss:$52 sps:$4 sm:$0xff]  }
  0xc2   :  { %2123 = vmatmul.mubr.bf16.gmra.mxu1 %v3753_v57  ;;  %2235 = vmatmul.mubr.bf16.gmra.mxu0 %v3754_v58  ;;  %v3803_v58 = vld [vmem:[%s4917_s0 + $0x28] ss:$52 sps:$4 sm:$0xff]  }
  0xc3   :  { %2130 = vmatprep.mubr.bf16.mxu1 %v3757_v60  ;;  %2242 = vmatprep.mubr.bf16.mxu0 %v3759_v61  ;;  %v3809_v61 = vld [vmem:[%s4917_s0 + $0x94] ss:$52 sps:$4 sm:$0xff]  }
  0xca   :  { %2131 = vmatmul.mubr.bf16.gmra.mxu1 %v3761_v62  ;;  %2243 = vmatmul.mubr.bf16.gmra.mxu0 %v3762_v63 }
  0xcb   :  { %2138 = vmatprep.mubr.bf16.mxu1 %v3764_v0  ;;  %2250 = vmatprep.mubr.bf16.mxu0 %v3766_v1 }
  0xd2   :  { %2139 = vmatmul.mubr.bf16.gmra.mxu1 %v3769_v2  ;;  %2251 = vmatmul.mubr.bf16.gmra.mxu0 %v3770_v3 }
  0xd3   :  { %2146 = vmatprep.mubr.bf16.mxu1 %v3772_v5  ;;  %2258 = vmatprep.mubr.bf16.mxu0 %v3774_v6 }
  0xda   :  { %2147 = vmatmul.mubr.bf16.gmra.mxu1 %v3776_v7  ;;  %2259 = vmatmul.mubr.bf16.gmra.mxu0 %v3777_v8 }
  0xdb   :  { %2154 = vmatprep.mubr.bf16.mxu1 %v3780_v9  ;;  %2266 = vmatprep.mubr.bf16.mxu0 %v3782_v10 }
  0xe2   :  { %v2983_v15 = vpop.f32.mrf.mxu0  ;;  %v3019_v16 = vpop.f32.mrf.mxu1  ;;  %2155 = vmatmul.mubr.bf16.gmra.mxu1 %v3784_v11  ;;  %2267 = vmatmul.mubr.bf16.gmra.mxu0 %v3785_v12  ;;  %v3807_v12 = vld [vmem:[%s4917_s0 + $0x90] ss:$52 sps:$4 sm:$0xff]  }
  0xe3   :  { %2162 = vmatprep.mubr.bf16.mxu1 %v3788_v13  ;;  %2274 = vmatprep.mubr.bf16.mxu0 %v3790_v14  ;;  %v3810_v13 = vld [vmem:[%s4917_s0 + $0x30] ss:$52 sps:$4 sm:$0xff]  }
  0xe4   :  { %v2984_v17 = vpop.f32.mrf.mxu0  ;;  %v3020_v18 = vpop.f32.mrf.mxu1 }
  0xe5   :  { %v4473_v20 = vadd.f32 %v2984_v17, %v2983_v15  ;;  %v4475_v21 = vadd.f32 %v3020_v18, %v3019_v16  ;;  %v3813_v15 = vld [vmem:[%s4917_s0 + $0xfc] ss:$52 sps:$4 sm:$0xff]  }
  0xe6   :  { %v2986_v22 = vpop.f32.mrf.mxu0  ;;  %v3022_v23 = vpop.f32.mrf.mxu1 }
  0xe8   :  { %v2987_v28 = vpop.f32.mrf.mxu0  ;;  %v3023_v29 = vpop.f32.mrf.mxu1 }
  0xe9   :  { %v4486_v30 = vadd.f32 %v2987_v28, %v2986_v22  ;;  %v4488_v31 = vadd.f32 %v3023_v29, %v3022_v23 }
  0xea   :  { %v2989_v32 = vpop.f32.mrf.mxu0  ;;  %v3025_v33 = vpop.f32.mrf.mxu1  ;;  %2163 = vmatmul.mubr.bf16.gmra.mxu1 %v3792_v24  ;;  %2275 = vmatmul.mubr.bf16.gmra.mxu0 %v3793_v25 }
  0xeb   :  { %2170 = vmatprep.mubr.bf16.mxu1 %v2808_v26  ;;  %2282 = vmatprep.mubr.bf16.mxu0 %v3796_v27 }
  0xec   :  { %v2990_v34 = vpop.f32.mrf.mxu0  ;;  %v3026_v35 = vpop.f32.mrf.mxu1 }
  0xed   :  { %v4493_v37 = vadd.f32 %v2990_v34, %v2989_v32  ;;  %v4495_v38 = vadd.f32 %v3026_v35, %v3025_v33  ;;  %v3811_v33 = vld [vmem:[%s4917_s0 + $0xf8] ss:$52 sps:$4 sm:$0xff]  }
  0xee   :  { %v2992_v39 = vpop.f32.mrf.mxu0  ;;  %v3028_v40 = vpop.f32.mrf.mxu1  ;;  %v3814_v34 = vld [vmem:[%s4917_s0 + $0x98] ss:$52 sps:$4 sm:$0xff]  }
  0xf0   :  { %v2993_v45 = vpop.f32.mrf.mxu0  ;;  %v3029_v46 = vpop.f32.mrf.mxu1 }
  0xf1   :  { %v4503_v47 = vadd.f32 %v2993_v45, %v2992_v39  ;;  %v4505_v48 = vadd.f32 %v3029_v46, %v3028_v40  ;;  %v1733_v46 = vadd.f32 %v4473_v20, %v4512_v55 }
  0xf2   :  { %v2995_v49 = vpop.f32.mrf.mxu0  ;;  %v3031_v50 = vpop.f32.mrf.mxu1  ;;  %2171 = vmatmul.mubr.bf16.gmra.mxu1 %v2807_v41  ;;  %2283 = vmatmul.mubr.bf16.gmra.mxu0 %v3800_v42 }
  0xf3   :  { %2290 = vmatprep.mubr.bf16.mxu0 %v2810_v43  ;;  %2330 = vmatprep.mubr.bf16.mxu1 %v3805_v44 }
  0xf4   :  { %v2996_v51 = vpop.f32.mrf.mxu0  ;;  %v3032_v52 = vpop.f32.mrf.mxu1 }
  0xf5   :  { %v4507_v53 = vadd.f32 %v2996_v51, %v2995_v49  ;;  %v3033_v54 = vadd.f32 %v3032_v52, %v3031_v50 }
  0xf6   :  { %v2998_v56 = vpop.f32.mrf.mxu0  ;;  %v3034_v57 = vpop.f32.mrf.mxu1 }
  0xf7   :  { %v4518_v60 = vadd.f32 %v3033_v54, %v4512_v55  ;;  %v3815_v54 = vld [vmem:[%s4917_s0 + $0x160] ss:$52 sps:$4 sm:$0xff]  }
  0xf8   :  { %v2999_v62 = vpop.f32.mrf.mxu0  ;;  %v3035_v63 = vpop.f32.mrf.mxu1 }
  0xf9   :  { %v4523_v0 = vadd.f32 %v2999_v62, %v2998_v56  ;;  %v3036_v1 = vadd.f32 %v3035_v63, %v3034_v57  ;;  %v3818_v56 = vld [vmem:[%s4917_s0 + $0x100] ss:$52 sps:$4 sm:$0xff]  }
  0xfa   :  { %v3001_v2 = vpop.f32.mrf.mxu0  ;;  %v3037_v3 = vpop.f32.mrf.mxu1  ;;  %2291 = vmatmul.mubr.bf16.gmra.mxu0 %v2809_v59  ;;  %2331 = vmatmul.mubr.bf16.vlgmr.msra.gmra.mxu1 %v3803_v58  ;;  %v3821_v58 = vld [vmem:[%s4917_s0 + $0x1cc] ss:$52 sps:$4 sm:$0xff]  }
  0xfb   :  { %v4526_v5 = vadd.f32 %v3036_v1, %v4512_v55  ;;  %2338 = vmatprep.mubr.bf16.mxu1 %v3809_v61  ;;  %3482 = vmatprep.mubr.msk.bf16.mxu0 %vm3848_vm0, %v3847_v4  ;;  %v1736_v61 = vadd.f32 %v4486_v30, %v4512_v55 }
  0xfc   :  { %v3002_v6 = vpop.f32.mrf.mxu0  ;;  %v3038_v7 = vpop.f32.mrf.mxu1 }
  0xfd   :  { %v4530_v8 = vadd.f32 %v3002_v6, %v3001_v2  ;;  %v3039_v9 = vadd.f32 %v3038_v7, %v3037_v3 }
  0xfe   :  { %v3004_v10 = vpop.f32.mrf.mxu0  ;;  %v3040_v11 = vpop.f32.mrf.mxu1 }
  0xff   :  { %v4539_v14 = vadd.f32 %v3039_v9, %v4512_v55  ;;  %v1741_v9 = vadd.f32 %v4493_v37, %v4512_v55 }
 0x100   :  { %v3005_v16 = vpop.f32.mrf.mxu0  ;;  %v3041_v17 = vpop.f32.mrf.mxu1 }
 0x101   :  { %v4544_v18 = vadd.f32 %v3005_v16, %v3004_v10  ;;  %v3042_v19 = vadd.f32 %v3041_v17, %v3040_v11 }
 0x102   :  { %v3007_v22 = vpop.f32.mrf.mxu0  ;;  %v3043_v23 = vpop.f32.mrf.mxu1  ;;  %2339 = vmatmul.mubr.bf16.gmra.mxu1 %v3807_v12  ;;  %3483 = vmatmul.mubr.msk.bf16.vlgmr.msra.gmra.mxu0 %vm1664_vm1, %v3810_v13  ;;  %v3819_v13 = vld [vmem:[%s4917_s0 + $0x1c8] ss:$52 sps:$4 sm:$0xff]  }
 0x103   :  { %v4548_v24 = vadd.f32 %v3042_v19, %v4512_v55  ;;  %2346 = vmatprep.mubr.bf16.mxu1 %v3813_v15  ;;  %3486 = vmatprep.mubr.msk.bf16.mxu0 %vm3848_vm0, %v3847_v4  ;;  %v3822_v15 = vld [vmem:[%s4917_s0 + $0x168] ss:$52 sps:$4 sm:$0xff]  }
 0x104   :  { %v3008_v25 = vpop.f32.mrf.mxu0  ;;  %v3044_v26 = vpop.f32.mrf.mxu1  ;;  %v3825_v19 = vld [vmem:[%s4917_s0 + $0x234] ss:$52 sps:$4 sm:$0xff]  }
 0x105   :  { %v4552_v27 = vadd.f32 %v3008_v25, %v3007_v22  ;;  %v3045_v28 = vadd.f32 %v3044_v26, %v3043_v23  ;;  %v1744_v23 = vadd.f32 %v4503_v47, %v4512_v55 }
 0x106   :  { %v3010_v29 = vpop.f32.mrf.mxu0  ;;  %v3046_v32 = vpop.f32.mrf.mxu1 }
 0x107   :  { %v4561_v35 = vadd.f32 %v3045_v28, %v4512_v55 }
 0x108   :  { %v3011_v39 = vpop.f32.mrf.mxu0  ;;  %v3047_v40 = vpop.f32.mrf.mxu1 }
 0x109   :  { %v4566_v41 = vadd.f32 %v3011_v39, %v3010_v29  ;;  %v1749_v39 = vadd.f32 %v4507_v53, %v4512_v55 }
 0x10a   :  { %v3013_v42 = vpop.f32.mrf.mxu0  ;;  %v3065_v43 = vpop.f32.mrf.mxu1  ;;  %2347 = vmatmul.mubr.bf16.gmra.mxu1 %v3811_v33  ;;  %3487 = vmatmul.mubr.msk.bf16.gmra.mxu0 %vm1664_vm1, %v3814_v34 }
 0x10b   :  { %2354 = vmatprep.mubr.bf16.mxu1 %v3817_v36  ;;  %3490 = vmatprep.mubr.msk.bf16.mxu0 %vm3848_vm0, %v3847_v4 }
 0x10c   :  { %v3014_v44 = vpop.f32.mrf.mxu0  ;;  %v3066_v45 = vpop.f32.mrf.mxu1 }
 0x10d   :  { %v4573_v49 = vadd.f32 %v3014_v44, %v3013_v42  ;;  %v3067_v50 = vadd.f32 %v3066_v45, %v3065_v43  ;;  %v3823_v44 = vld [vmem:[%s4917_s0 + $0x230] ss:$52 sps:$4 sm:$0xff]  }
 0x10e   :  { %v3016_v51 = vpop.f32.mrf.mxu0  ;;  %v3068_v52 = vpop.f32.mrf.mxu1  ;;  %v3826_v45 = vld [vmem:[%s4917_s0 + $0x1d0] ss:$52 sps:$4 sm:$0xff]  }
 0x10f   :  { %v1853_v57 = vadd.f32 %v3067_v50, %v1733_v46 }
 0x110   :  { %v3017_v59 = vpop.f32.mrf.mxu0  ;;  %v3069_v20 = vpop.f32.mrf.mxu1 }
 0x111   :  { %v4586_v62 = vadd.f32 %v3017_v59, %v3016_v51  ;;  %v3070_v63 = vadd.f32 %v3069_v20, %v3068_v52  ;;  %v3829_v51 = vld [vmem:[%s4917_s0 + $0x29c] ss:$52 sps:$4 sm:$0xff]  }
 0x112   :  { %v3071_v1 = vpop.f32.mrf.mxu1  ;;  %v3147_v2 = vpop.f32.mrf.mxu0  ;;  %2355 = vmatmul.mubr.bf16.gmra.mxu1 %v3815_v54  ;;  %3491 = vmatmul.mubr.msk.bf16.gmra.mxu0 %vm1664_vm1, %v3818_v56  ;;  %v1752_v54 = vadd.f32 %v4523_v0, %v4512_v55 }
 0x113   :  { %v1856_v3 = vadd.f32 %v3070_v63, %v1736_v61  ;;  %2362 = vmatprep.mubr.bf16.mxu1 %v3821_v58  ;;  %3494 = vmatprep.mubr.msk.bf16.mxu0 %vm3848_vm0, %v3847_v4 }
 0x114   :  { %v3072_v6 = vpop.f32.mrf.mxu1  ;;  %v3148_v7 = vpop.f32.mrf.mxu0 }
 0x115   :  { %v3073_v10 = vadd.f32 %v3072_v6, %v3071_v1  ;;  %v3149_v30 = vadd.f32 %v3148_v7, %v3147_v2  ;;  %v1757_v2 = vadd.f32 %v4530_v8, %v4512_v55 }
 0x116   :  { %v3074_v11 = vpop.f32.mrf.mxu1  ;;  %v3150_v12 = vpop.f32.mrf.mxu0 }
 0x117   :  { %v1861_v16 = vadd.f32 %v3073_v10, %v1741_v9  ;;  %v4599_v17 = vadd.f32 %v3149_v30, %v1853_v57  ;;  %v3827_v9 = vld [vmem:[%s4917_s0 + $0x298] ss:$52 sps:$4 sm:$0xff]  }
 0x118   :  { %v3075_v37 = vpop.f32.mrf.mxu1  ;;  %v3151_v22 = vpop.f32.mrf.mxu0  ;;  %v3830_v10 = vld [vmem:[%s4917_s0 + $0x238] ss:$52 sps:$4 sm:$0xff]  }
 0x119   :  { %v3076_v25 = vadd.f32 %v3075_v37, %v3074_v11  ;;  %v3152_v26 = vadd.f32 %v3151_v22, %v3150_v12  ;;  %v3833_v12 = vld [vmem:[%s4917_s0 + $0x304] ss:$52 sps:$4 sm:$0xff]  }
 0x11a   :  { %v3077_v28 = vpop.f32.mrf.mxu1  ;;  %v3153_v29 = vpop.f32.mrf.mxu0  ;;  %2363 = vmatmul.mubr.bf16.gmra.mxu1 %v3819_v13  ;;  %3495 = vmatmul.mubr.msk.bf16.gmra.mxu0 %vm1664_vm1, %v3822_v15  ;;  %v1760_v15 = vadd.f32 %v4544_v18, %v4512_v55 }
 0x11b   :  { %v1864_v32 = vadd.f32 %v3076_v25, %v1744_v23  ;;  %v4607_v33 = vadd.f32 %v3152_v26, %v1856_v3  ;;  %2370 = vmatprep.mubr.bf16.mxu1 %v3825_v19  ;;  %3498 = vmatprep.mubr.msk.bf16.mxu0 %vm3848_vm0, %v3847_v4 }
 0x11c   :  { %v3078_v34 = vpop.f32.mrf.mxu1  ;;  %v3154_v36 = vpop.f32.mrf.mxu0 }
 0x11d   :  { %v3079_v47 = vadd.f32 %v3078_v34, %v3077_v28  ;;  %v3155_v40 = vadd.f32 %v3154_v36, %v3153_v29  ;;  %v1765_v29 = vadd.f32 %v4552_v27, %v4512_v55 }
 0x11e   :  { %v3080_v42 = vpop.f32.mrf.mxu1  ;;  %v3156_v43 = vpop.f32.mrf.mxu0 }
 0x11f   :  { %v1869_v46 = vadd.f32 %v3079_v47, %v1749_v39  ;;  %v4619_v50 = vadd.f32 %v3155_v40, %v1861_v16  ;;  %v3831_v39 = vld [vmem:[%s4917_s0 + $0x300] ss:$52 sps:$4 sm:$0xff]  }
 0x120   :  { %v3081_v53 = vpop.f32.mrf.mxu1  ;;  %v3157_v52 = vpop.f32.mrf.mxu0  ;;  %v3834_v47 = vld [vmem:[%s4917_s0 + $0x2a0] ss:$52 sps:$4 sm:$0xff]  }
 0x121   :  { %v3082_v56 = vadd.f32 %v3081_v53, %v3080_v42  ;;  %v3158_v57 = vadd.f32 %v3157_v52, %v3156_v43  ;;  %v3837_v43 = vld [vmem:[%s4917_s0 + $0x36c] ss:$52 sps:$4 sm:$0xff]  }
 0x122   :  { %v3083_v58 = vpop.f32.mrf.mxu1  ;;  %v3159_v59 = vpop.f32.mrf.mxu0  ;;  %2371 = vmatmul.mubr.bf16.gmra.mxu1 %v3823_v44  ;;  %3499 = vmatmul.mubr.msk.bf16.gmra.mxu0 %vm1664_vm1, %v3826_v45  ;;  %v1768_v45 = vadd.f32 %v4566_v41, %v4512_v55 }
 0x123   :  { %v1872_v20 = vadd.f32 %v3082_v56, %v1752_v54  ;;  %v4627_v61 = vadd.f32 %v3158_v57, %v1864_v32  ;;  %2378 = vmatprep.mubr.bf16.mxu1 %v3829_v51  ;;  %3502 = vmatprep.mubr.msk.bf16.mxu0 %vm3848_vm0, %v3847_v4 }
 0x124   :  { %v3084_v63 = vpop.f32.mrf.mxu1  ;;  %v3160_v1 = vpop.f32.mrf.mxu0 }
 0x125   :  { %v3085_v0 = vadd.f32 %v3084_v63, %v3083_v58  ;;  %v3161_v3 = vadd.f32 %v3160_v1, %v3159_v59  ;;  %v1773_v59 = vadd.f32 %v4573_v49, %v4512_v55 }
 0x126   :  { %v3086_v6 = vpop.f32.mrf.mxu1  ;;  %v3162_v7 = vpop.f32.mrf.mxu0 }
 0x127   :  { %v1877_v30 = vadd.f32 %v3085_v0, %v1757_v2  ;;  %v4639_v11 = vadd.f32 %v3161_v3, %v1869_v46  ;;  %v3835_v2 = vld [vmem:[%s4917_s0 + $0x368] ss:$52 sps:$4 sm:$0xff]  }
 0x128   :  { %v3087_v8 = vpop.f32.mrf.mxu1  ;;  %v3163_v13 = vpop.f32.mrf.mxu0  ;;  %v3838_v0 = vld [vmem:[%s4917_s0 + $0x308] ss:$52 sps:$4 sm:$0xff]  }
 0x129   :  { %v3088_v16 = vadd.f32 %v3087_v8, %v3086_v6  ;;  %v3164_v19 = vadd.f32 %v3163_v13, %v3162_v7  ;;  %v3841_v7 = vld [vmem:[%s4917_s0 + $0x3d4] ss:$52 sps:$4 sm:$0xff]  }
 0x12a   :  { %v3089_v37 = vpop.f32.mrf.mxu1  ;;  %v3165_v22 = vpop.f32.mrf.mxu0  ;;  %2379 = vmatmul.mubr.bf16.gmra.mxu1 %v3827_v9  ;;  %3503 = vmatmul.mubr.msk.bf16.gmra.mxu0 %vm1664_vm1, %v3830_v10  ;;  %v1776_v10 = vadd.f32 %v4586_v62, %v4512_v55  ;;  %v160_v62 = vld [vmem:[%s4917_s0 + $0x438] sm:$0xff] }
 0x12b   :  { %v1880_v23 = vadd.f32 %v3088_v16, %v1760_v15  ;;  %v4647_v25 = vadd.f32 %v3164_v19, %v1872_v20  ;;  %2386 = vmatprep.mubr.bf16.mxu1 %v3833_v12  ;;  %3506 = vmatprep.mubr.msk.bf16.mxu0 %vm3848_vm0, %v3847_v4 }
 0x12c   :  { %v3090_v26 = vpop.f32.mrf.mxu1  ;;  %v3166_v28 = vpop.f32.mrf.mxu0 }
 0x12d   :  { %v3091_v18 = vadd.f32 %v3090_v26, %v3089_v37  ;;  %v3167_v32 = vadd.f32 %v3166_v28, %v3165_v22  ;;  %v1781_v22 = vadd.f32 %v4475_v21, %v4512_v55  ;;  %v1784_v21 = vadd.f32 %v4488_v31, %v4512_v55 }
 0x12e   :  { %v3092_v34 = vpop.f32.mrf.mxu1  ;;  %v3168_v36 = vpop.f32.mrf.mxu0 }
 0x12f   :  { %v1885_v40 = vadd.f32 %v3091_v18, %v1765_v29  ;;  %v4659_v42 = vadd.f32 %v3167_v32, %v1877_v30  ;;  %v3839_v18 = vld [vmem:[%s4917_s0 + $0x3d0] ss:$52 sps:$4 sm:$0xff]  }
 0x130   :  { %v3093_v27 = vpop.f32.mrf.mxu1  ;;  %v3169_v44 = vpop.f32.mrf.mxu0  ;;  %v3842_v32 = vld [vmem:[%s4917_s0 + $0x370] ss:$52 sps:$4 sm:$0xff]  }
 0x131   :  { %v3094_v46 = vadd.f32 %v3093_v27, %v3092_v34  ;;  %v3170_v51 = vadd.f32 %v3169_v44, %v3168_v36 }
 0x132   :  { %v3095_v53 = vpop.f32.mrf.mxu1  ;;  %v3171_v52 = vpop.f32.mrf.mxu0  ;;  %2387 = vmatmul.mubr.bf16.gmra.mxu1 %v3831_v39  ;;  %3507 = vmatmul.mubr.msk.bf16.gmra.mxu0 %vm1664_vm1, %v3834_v47  ;;  %v2812_v39 = vcombine.high %v160_v62, %v160_v62 }
 0x133   :  { %v1888_v54 = vadd.f32 %v3094_v46, %v1768_v45  ;;  %v4667_v56 = vadd.f32 %v3170_v51, %v1880_v23  ;;  %2394 = vmatprep.mubr.bf16.mxu1 %v3837_v43  ;;  %3510 = vmatprep.mubr.msk.bf16.mxu0 %vm3848_vm0, %v3847_v4 }
 0x134   :  { %v3096_v57 = vpop.f32.mrf.mxu1  ;;  %v3172_v58 = vpop.f32.mrf.mxu0 }
 0x135   :  { %v3097_v41 = vadd.f32 %v3096_v57, %v3095_v53  ;;  %v3173_v20 = vadd.f32 %v3172_v58, %v3171_v52 }
 0x136   :  { %v3098_v63 = vpop.f32.mrf.mxu1  ;;  %v3174_v1 = vpop.f32.mrf.mxu0 }
 0x137   :  { %v1893_v3 = vadd.f32 %v3097_v41, %v1773_v59  ;;  %v4679_v6 = vadd.f32 %v3173_v20, %v1885_v40  ;;  %v2811_v41 = vcombine.low %v160_v62, %v160_v62  ;;  %v3845_v20 = vld [vmem:[%s4917_s0 + $0x3d8] ss:$52 sps:$4 sm:$0xff]  }
 0x138   :  { %v3099_v49 = vpop.f32.mrf.mxu1  ;;  %v3175_v9 = vpop.f32.mrf.mxu0 }
 0x139   :  { %v3100_v30 = vadd.f32 %v3099_v49, %v3098_v63  ;;  %v3176_v12 = vadd.f32 %v3175_v9, %v3174_v1 }
 0x13a   :  { %v3101_v8 = vpop.f32.mrf.mxu1  ;;  %v3177_v13 = vpop.f32.mrf.mxu0  ;;  %2395 = vmatmul.mubr.bf16.gmra.mxu1 %v3835_v2  ;;  %3511 = vmatmul.mubr.msk.bf16.gmra.mxu0 %vm1664_vm1, %v3838_v0 }
 0x13b   :  { %v1896_v15 = vadd.f32 %v3100_v30, %v1776_v10  ;;  %v4687_v16 = vadd.f32 %v3176_v12, %v1888_v54  ;;  %2402 = vmatprep.mubr.bf16.mxu1 %v3841_v7  ;;  %3514 = vmatprep.mubr.msk.bf16.mxu0 %vm3848_vm0, %v3847_v4  ;;  %v1789_v54 = vadd.f32 %v4495_v38, %v4512_v55 }
 0x13c   :  { %v3102_v19 = vpop.f32.mrf.mxu1  ;;  %v3178_v37 = vpop.f32.mrf.mxu0 }
 0x13d   :  { %v3103_v23 = vadd.f32 %v3102_v19, %v3101_v8  ;;  %v3179_v26 = vadd.f32 %v3178_v37, %v3177_v13 }
 0x13e   :  { %v3104_v28 = vpop.f32.mrf.mxu1  ;;  %v3180_v29 = vpop.f32.mrf.mxu0 }
 0x13f   :  { %v1901_v34 = vadd.f32 %v3103_v23, %v1781_v22  ;;  %v4702_v36 = vadd.f32 %v3179_v26, %v1893_v3  ;;  %v1792_v3 = vadd.f32 %v4505_v48, %v4512_v55  ;;  %v3846_v48 = vld [vmem:[%s4917_s0 + $0x440] ss:$0 sps:$4 sm:$0xff]  }
 0x140   :  { %v3105_v47 = vpop.f32.mrf.mxu1  ;;  %v3181_v40 = vpop.f32.mrf.mxu0 }
 0x141   :  { %v3106_v43 = vadd.f32 %v3105_v47, %v3104_v28  ;;  %v3182_v27 = vadd.f32 %v3181_v40, %v3180_v29 }
 0x142   :  { %v3107_v44 = vpop.f32.mrf.mxu1  ;;  %v3183_v45 = vpop.f32.mrf.mxu0  ;;  %2403 = vmatmul.mubr.bf16.gmra.mxu1 %v3839_v18  ;;  %3515 = vmatmul.mubr.msk.bf16.gmra.mxu0 %vm1664_vm1, %v3842_v32 }
 0x143   :  { %v1904_v46 = vadd.f32 %v3106_v43, %v1784_v21  ;;  %v4707_v51 = vadd.f32 %v3182_v27, %v1896_v15  ;;  %2410 = vmatprep.mubr.bf16.mxu1 %v2812_v39  ;;  %3518 = vmatprep.mubr.msk.bf16.mxu0 %vm3848_vm0, %v3847_v4 }
 0x144   :  { %v3108_v53 = vpop.f32.mrf.mxu1  ;;  %v3184_v52 = vpop.f32.mrf.mxu0 }
 0x145   :  { %v3109_v31 = vadd.f32 %v3108_v53, %v3107_v44  ;;  %v3185_v57 = vadd.f32 %v3184_v52, %v3183_v45 }
 0x146   :  { %v3110_v58 = vpop.f32.mrf.mxu1  ;;  %v3186_v59 = vpop.f32.mrf.mxu0 }
 0x147   :  { %v1909_v63 = vadd.f32 %v3109_v31, %v1789_v54  ;;  %v4716_v1 = vadd.f32 %v3185_v57, %v1901_v34 }
 0x148   :  { %v3111_v2 = vpop.f32.mrf.mxu1  ;;  %v3187_v0 = vpop.f32.mrf.mxu0 }
 0x149   :  { %v3112_v7 = vadd.f32 %v3111_v2, %v3110_v58  ;;  %v3188_v49 = vadd.f32 %v3187_v0, %v3186_v59 }
 0x14a   :  { %v3113_v38 = vpop.f32.mrf.mxu1  ;;  %v3189_v9 = vpop.f32.mrf.mxu0  ;;  %2411 = vmatmul.mubr.bf16.gmra.mxu1 %v2811_v41  ;;  %3519 = vmatmul.mubr.msk.bf16.gmra.mxu0 %vm1664_vm1, %v3845_v20 }
 0x14b   :  { %v1912_v10 = vadd.f32 %v3112_v7, %v1792_v3  ;;  %v4721_v30 = vadd.f32 %v3188_v49, %v1904_v46  ;;  %3522 = vmatprep.mubr.msk.bf16.mxu0 %vm3848_vm0, %v3847_v4 }
 0x14c   :  { %v3114_v12 = vpop.f32.mrf.mxu1  ;;  %v3190_v8 = vpop.f32.mrf.mxu0 }
 0x14d   :  { %v3115_v13 = vadd.f32 %v3114_v12, %v3113_v38  ;;  %v3191_v15 = vadd.f32 %v3190_v8, %v3189_v9 }
 0x14e   :  { %v3116_v19 = vpop.f32.mrf.mxu1  ;;  %v3192_v37 = vpop.f32.mrf.mxu0 }
 0x14f   :  { %v1917_v55 = vadd.f32 %v3115_v13, %v4518_v60  ;;  %v4729_v62 = vadd.f32 %v3191_v15, %v1909_v63 }
 0x150   :  { %v3117_v22 = vpop.f32.mrf.mxu1  ;;  %v3193_v23 = vpop.f32.mrf.mxu0 }
 0x151   :  { %v3118_v26 = vadd.f32 %v3117_v22, %v3116_v19  ;;  %v3194_v28 = vadd.f32 %v3193_v23, %v3192_v37 }
 0x152   :  { %v3119_v29 = vpop.f32.mrf.mxu1  ;;  %v3195_v4 = vpop.f32.mrf.mxu0  ;;  %3523 = vmatmul.mubr.msk.bf16.gmra.mxu0 %vm1664_vm1, %v3846_v48 }
 0x153   :  { %v1920_v18 = vadd.f32 %v3118_v26, %v4526_v5  ;;  %v4733_v32 = vadd.f32 %v3194_v28, %v1912_v10 }
 0x154   :  { %v3120_v34 = vpop.f32.mrf.mxu1  ;;  %v3196_v39 = vpop.f32.mrf.mxu0 }
 0x155   :  { %v3121_v47 = vadd.f32 %v3120_v34, %v3119_v29  ;;  %v3197_v40 = vadd.f32 %v3196_v39, %v3195_v4 }
 0x156   :  { %v3122_v21 = vpop.f32.mrf.mxu1  ;;  %v3198_v60 = vpop.f32.mrf.mxu0 }
 0x157   :  { %v1925_v43 = vadd.f32 %v3121_v47, %v4539_v14  ;;  %v4736_v27 = vadd.f32 %v3197_v40, %v1917_v55 }
 0x158   :  { %v3123_v44 = vpop.f32.mrf.mxu1  ;;  %v3199_v45 = vpop.f32.mrf.mxu0 }
 0x159   :  { %v3124_v46 = vadd.f32 %v3123_v44, %v3122_v21  ;;  %v3200_v53 = vadd.f32 %v3199_v45, %v3198_v60 }
 0x15a   :  { %v3125_v52 = vpop.f32.mrf.mxu1  ;;  %v3201_v54 = vpop.f32.mrf.mxu0 }
 0x15b   :  { %v1928_v5 = vadd.f32 %v3124_v46, %v4548_v24  ;;  %v4739_v31 = vadd.f32 %v3200_v53, %v1920_v18 }
 0x15c   :  { %v3126_v57 = vpop.f32.mrf.mxu1  ;;  %v3202_v58 = vpop.f32.mrf.mxu0 }
 0x15d   :  { %v3127_v59 = vadd.f32 %v3126_v57, %v3125_v52  ;;  %v3203_v41 = vadd.f32 %v3202_v58, %v3201_v54 }
 0x15e   :  { %v3128_v20 = vpop.f32.mrf.mxu1  ;;  %v3204_v63 = vpop.f32.mrf.mxu0 }
 0x15f   :  { %v1933_v14 = vadd.f32 %v3127_v59, %v4561_v35  ;;  %v4742_v2 = vadd.f32 %v3203_v41, %v1925_v43 }
 0x160   :  { %v3129_v0 = vpop.f32.mrf.mxu1  ;;  %v3205_v3 = vpop.f32.mrf.mxu0 }
 0x161   :  { %v3206_v7 = vadd.f32 %v3205_v3, %v3204_v63 }
 0x162   :  { %v3207_v49 = vpop.f32.mrf.mxu0  ;;  %v3229_v38 = vpop.f32.mrf.mxu1 }
 0x163   :  { %v4744_v9 = vadd.f32 %v3206_v7, %v1928_v5 }
 0x164   :  { %v3208_v24 = vpop.f32.mrf.mxu0  ;;  %v3230_v10 = vpop.f32.mrf.mxu1 }
 0x165   :  { %v3209_v12 = vadd.f32 %v3208_v24, %v3207_v49  ;;  %v3231_v8 = vadd.f32 %v3230_v10, %v3229_v38 }
 0x166   :  { %v3210_v13 = vpop.f32.mrf.mxu0  ;;  %v3232_v15 = vpop.f32.mrf.mxu1 }
 0x167   :  { %v4746_v19 = vadd.f32 %v3209_v12, %v1933_v14  ;;  %v2093_v37 = vadd.f32 %v3231_v8, %v4599_v17 }
 0x168   :  { %v3211_v35 = vpop.f32.mrf.mxu0  ;;  %v3233_v48 = vpop.f32.mrf.mxu1 }
 0x169   :  { %v3234_v55 = vadd.f32 %v3233_v48, %v3232_v15 }
 0x16a   :  { %v3235_v22 = vpop.f32.mrf.mxu1  ;;  %v3311_v23 = vpop.f32.mrf.mxu0 }
 0x16b   :  { %v2096_v26 = vadd.f32 %v3234_v55, %v4607_v33 }
 0x16c   :  { %v3236_v28 = vpop.f32.mrf.mxu1  ;;  %v3312_v29 = vpop.f32.mrf.mxu0 }
 0x16d   :  { %v3237_v4 = vadd.f32 %v3236_v28, %v3235_v22  ;;  %v3313_v18 = vadd.f32 %v3312_v29, %v3311_v23 }
 0x16e   :  { %v3238_v34 = vpop.f32.mrf.mxu1  ;;  %v3314_v39 = vpop.f32.mrf.mxu0 }
 0x16f   :  { %v2101_v47 = vadd.f32 %v3237_v4, %v4619_v50  ;;  %v4751_v40 = vadd.f32 %v3313_v18, %v2093_v37 }
 0x170   :  { %v3239_v21 = vpop.f32.mrf.mxu1  ;;  %v3315_v60 = vpop.f32.mrf.mxu0 }
 0x171   :  { %v3240_v17 = vadd.f32 %v3239_v21, %v3238_v34  ;;  %v3316_v43 = vadd.f32 %v3315_v60, %v3314_v39 }
 0x172   :  { %v3241_v44 = vpop.f32.mrf.mxu1  ;;  %v3317_v45 = vpop.f32.mrf.mxu0 }
 0x173   :  { %v2104_v46 = vadd.f32 %v3240_v17, %v4627_v61  ;;  %v4754_v53 = vadd.f32 %v3316_v43, %v2096_v26 }
 0x174   :  { %v3242_v33 = vpop.f32.mrf.mxu1  ;;  %v3318_v52 = vpop.f32.mrf.mxu0 }
 0x175   :  { %v3243_v54 = vadd.f32 %v3242_v33, %v3241_v44  ;;  %v3319_v5 = vadd.f32 %v3318_v52, %v3317_v45 }
 0x176   :  { %v3244_v57 = vpop.f32.mrf.mxu1  ;;  %v3320_v58 = vpop.f32.mrf.mxu0 }
 0x177   :  { %v2109_v50 = vadd.f32 %v3243_v54, %v4639_v11  ;;  %v4757_v59 = vadd.f32 %v3319_v5, %v2101_v47 }
 0x178   :  { %v3245_v41 = vpop.f32.mrf.mxu1  ;;  %v3321_v20 = vpop.f32.mrf.mxu0 }
 0x179   :  { %v3246_v63 = vadd.f32 %v3245_v41, %v3244_v57  ;;  %v3322_v14 = vadd.f32 %v3321_v20, %v3320_v58 }
 0x17a   :  { %v3247_v0 = vpop.f32.mrf.mxu1  ;;  %v3323_v3 = vpop.f32.mrf.mxu0 }
 0x17b   :  { %v2112_v61 = vadd.f32 %v3246_v63, %v4647_v25  ;;  %v4760_v7 = vadd.f32 %v3322_v14, %v2104_v46 }
 0x17c   :  { %v3248_v49 = vpop.f32.mrf.mxu1  ;;  %v3324_v38 = vpop.f32.mrf.mxu0 }
 0x17d   :  { %v3249_v24 = vadd.f32 %v3248_v49, %v3247_v0  ;;  %v3325_v10 = vadd.f32 %v3324_v38, %v3323_v3 }
 0x17e   :  { %v3250_v12 = vpop.f32.mrf.mxu1  ;;  %v3326_v8 = vpop.f32.mrf.mxu0 }
 0x17f   :  { %v2117_v11 = vadd.f32 %v3249_v24, %v4659_v42  ;;  %v4763_v13 = vadd.f32 %v3325_v10, %v2109_v50 }
 0x180   :  { %v3251_v15 = vpop.f32.mrf.mxu1  ;;  %v3327_v37 = vpop.f32.mrf.mxu0 }
 0x181   :  { %v3252_v35 = vadd.f32 %v3251_v15, %v3250_v12  ;;  %v3328_v48 = vadd.f32 %v3327_v37, %v3326_v8 }
 0x182   :  { %v3253_v55 = vpop.f32.mrf.mxu1  ;;  %v3329_v22 = vpop.f32.mrf.mxu0 }
 0x183   :  { %v2120_v25 = vadd.f32 %v3252_v35, %v4667_v56  ;;  %v4766_v23 = vadd.f32 %v3328_v48, %v2112_v61 }
 0x184   :  { %v3254_v26 = vpop.f32.mrf.mxu1  ;;  %v3330_v28 = vpop.f32.mrf.mxu0 }
 0x185   :  { %v3255_v29 = vadd.f32 %v3254_v26, %v3253_v55  ;;  %v3331_v4 = vadd.f32 %v3330_v28, %v3329_v22 }
 0x186   :  { %v3256_v18 = vpop.f32.mrf.mxu1  ;;  %v3332_v34 = vpop.f32.mrf.mxu0 }
 0x187   :  { %v2125_v42 = vadd.f32 %v3255_v29, %v4679_v6  ;;  %v4769_v39 = vadd.f32 %v3331_v4, %v2117_v11 }
 0x188   :  { %v3257_v47 = vpop.f32.mrf.mxu1  ;;  %v3333_v21 = vpop.f32.mrf.mxu0 }
 0x189   :  { %v3258_v60 = vadd.f32 %v3257_v47, %v3256_v18  ;;  %v3334_v17 = vadd.f32 %v3333_v21, %v3332_v34 }
 0x18a   :  { %v3259_v43 = vpop.f32.mrf.mxu1  ;;  %v3335_v44 = vpop.f32.mrf.mxu0 }
 0x18b   :  { %v2128_v56 = vadd.f32 %v3258_v60, %v4687_v16  ;;  %v4772_v45 = vadd.f32 %v3334_v17, %v2120_v25 }
 0x18c   :  { %v3260_v46 = vpop.f32.mrf.mxu1  ;;  %v3336_v33 = vpop.f32.mrf.mxu0 }
 0x18d   :  { %v3261_v52 = vadd.f32 %v3260_v46, %v3259_v43  ;;  %v3337_v54 = vadd.f32 %v3336_v33, %v3335_v44 }
 0x18e   :  { %v3262_v5 = vpop.f32.mrf.mxu1  ;;  %v3338_v57 = vpop.f32.mrf.mxu0 }
 0x18f   :  { %v2133_v6 = vadd.f32 %v3261_v52, %v4702_v36  ;;  %v4775_v58 = vadd.f32 %v3337_v54, %v2125_v42 }
 0x190   :  { %v3263_v50 = vpop.f32.mrf.mxu1  ;;  %v3339_v41 = vpop.f32.mrf.mxu0 }
 0x191   :  { %v3264_v20 = vadd.f32 %v3263_v50, %v3262_v5  ;;  %v3340_v63 = vadd.f32 %v3339_v41, %v3338_v57 }
 0x192   :  { %v3265_v14 = vpop.f32.mrf.mxu1  ;;  %v3341_v0 = vpop.f32.mrf.mxu0 }
 0x193   :  { %v2136_v16 = vadd.f32 %v3264_v20, %v4707_v51  ;;  %v4778_v3 = vadd.f32 %v3340_v63, %v2128_v56 }
 0x194   :  { %v3266_v61 = vpop.f32.mrf.mxu1  ;;  %v3342_v49 = vpop.f32.mrf.mxu0 }
 0x195   :  { %v3267_v38 = vadd.f32 %v3266_v61, %v3265_v14  ;;  %v3343_v24 = vadd.f32 %v3342_v49, %v3341_v0 }
 0x196   :  { %v3268_v10 = vpop.f32.mrf.mxu1  ;;  %v3344_v12 = vpop.f32.mrf.mxu0 }
 0x197   :  { %v2141_v36 = vadd.f32 %v3267_v38, %v4716_v1  ;;  %v4781_v8 = vadd.f32 %v3343_v24, %v2133_v6 }
 0x198   :  { %v3269_v11 = vpop.f32.mrf.mxu1  ;;  %v3345_v15 = vpop.f32.mrf.mxu0 }
 0x199   :  { %v3270_v37 = vadd.f32 %v3269_v11, %v3268_v10  ;;  %v3346_v35 = vadd.f32 %v3345_v15, %v3344_v12 }
 0x19a   :  { %v3271_v48 = vpop.f32.mrf.mxu1  ;;  %v3347_v55 = vpop.f32.mrf.mxu0 }
 0x19b   :  { %v2144_v51 = vadd.f32 %v3270_v37, %v4721_v30  ;;  %v4784_v22 = vadd.f32 %v3346_v35, %v2136_v16 }
 0x19c   :  { %v3272_v25 = vpop.f32.mrf.mxu1  ;;  %v3348_v26 = vpop.f32.mrf.mxu0 }
 0x19d   :  { %v3273_v28 = vadd.f32 %v3272_v25, %v3271_v48  ;;  %v3349_v29 = vadd.f32 %v3348_v26, %v3347_v55 }
 0x19e   :  { %v3274_v4 = vpop.f32.mrf.mxu1  ;;  %v3350_v18 = vpop.f32.mrf.mxu0 }
 0x19f   :  { %v2149_v1 = vadd.f32 %v3273_v28, %v4729_v62  ;;  %v4787_v34 = vadd.f32 %v3349_v29, %v2141_v36 }
 0x1a0   :  { %v3275_v42 = vpop.f32.mrf.mxu1  ;;  %v3351_v47 = vpop.f32.mrf.mxu0 }
 0x1a1   :  { %v3276_v21 = vadd.f32 %v3275_v42, %v3274_v4  ;;  %v3352_v60 = vadd.f32 %v3351_v47, %v3350_v18 }
 0x1a2   :  { %v3277_v17 = vpop.f32.mrf.mxu1  ;;  %v3353_v43 = vpop.f32.mrf.mxu0 }
 0x1a3   :  { %v2152_v30 = vadd.f32 %v3276_v21, %v4733_v32  ;;  %v4790_v44 = vadd.f32 %v3352_v60, %v2144_v51 }
 0x1a4   :  { %v3278_v56 = vpop.f32.mrf.mxu1  ;;  %v3354_v46 = vpop.f32.mrf.mxu0 }
 0x1a5   :  { %v3279_v33 = vadd.f32 %v3278_v56, %v3277_v17  ;;  %v3355_v52 = vadd.f32 %v3354_v46, %v3353_v43 }
 0x1a6   :  { %v3280_v54 = vpop.f32.mrf.mxu1  ;;  %v3356_v5 = vpop.f32.mrf.mxu0 }
 0x1a7   :  { %v2157_v62 = vadd.f32 %v3279_v33, %v4736_v27  ;;  %v4793_v57 = vadd.f32 %v3355_v52, %v2149_v1 }
 0x1a8   :  { %v3281_v6 = vpop.f32.mrf.mxu1  ;;  %v3357_v50 = vpop.f32.mrf.mxu0 }
 0x1a9   :  { %v3282_v41 = vadd.f32 %v3281_v6, %v3280_v54  ;;  %v3358_v20 = vadd.f32 %v3357_v50, %v3356_v5 }
 0x1aa   :  { %v3283_v63 = vpop.f32.mrf.mxu1  ;;  %v3359_v14 = vpop.f32.mrf.mxu0 }
 0x1ab   :  { %v2160_v32 = vadd.f32 %v3282_v41, %v4739_v31  ;;  %v4796_v0 = vadd.f32 %v3358_v20, %v2152_v30 }
 0x1ac   :  { %v3284_v16 = vpop.f32.mrf.mxu1  ;;  %v3360_v61 = vpop.f32.mrf.mxu0 }
 0x1ad   :  { %v3285_v49 = vadd.f32 %v3284_v16, %v3283_v63  ;;  %v3361_v38 = vadd.f32 %v3360_v61, %v3359_v14 }
 0x1ae   :  { %v3286_v24 = vpop.f32.mrf.mxu1  ;;  %v3362_v10 = vpop.f32.mrf.mxu0 }
 0x1af   :  { %v2165_v27 = vadd.f32 %v3285_v49, %v4742_v2  ;;  %v4799_v12 = vadd.f32 %v3361_v38, %v2157_v62 }
 0x1b0   :  { %v3287_v36 = vpop.f32.mrf.mxu1  ;;  %v3363_v11 = vpop.f32.mrf.mxu0 }
 0x1b1   :  { %v3288_v15 = vadd.f32 %v3287_v36, %v3286_v24  ;;  %v3364_v37 = vadd.f32 %v3363_v11, %v3362_v10 }
 0x1b2   :  { %v3289_v35 = vpop.f32.mrf.mxu1  ;;  %v3365_v48 = vpop.f32.mrf.mxu0 }
 0x1b3   :  { %v2168_v31 = vadd.f32 %v3288_v15, %v4744_v9  ;;  %v4802_v55 = vadd.f32 %v3364_v37, %v2160_v32 }
 0x1b4   :  { %v3290_v51 = vpop.f32.mrf.mxu1  ;;  %v3366_v25 = vpop.f32.mrf.mxu0 }
 0x1b5   :  { %v3291_v26 = vadd.f32 %v3290_v51, %v3289_v35  ;;  %v3367_v28 = vadd.f32 %v3366_v25, %v3365_v48 }
 0x1b6   :  { %v3292_v29 = vpop.f32.mrf.mxu1  ;;  %v3368_v4 = vpop.f32.mrf.mxu0 }
 0x1b7   :  { %v2173_v2 = vadd.f32 %v3291_v26, %v4746_v19  ;;  %v4805_v18 = vadd.f32 %v3367_v28, %v2165_v27 }
 0x1b8   :  { %v3293_v1 = vpop.f32.mrf.mxu1  ;;  %v3369_v42 = vpop.f32.mrf.mxu0 }
 0x1b9   :  { %v3370_v47 = vadd.f32 %v3369_v42, %v3368_v4 }
 0x1ba   :  { %v3371_v21 = vpop.f32.mrf.mxu0  ;;  %v3393_v60 = vpop.f32.mrf.mxu1 }
 0x1bb   :  { %v4807_v17 = vadd.f32 %v3370_v47, %v2168_v31 }
 0x1bc   :  { %v3372_v9 = vpop.f32.mrf.mxu0  ;;  %v3394_v43 = vpop.f32.mrf.mxu1 }
 0x1bd   :  { %v3373_v30 = vadd.f32 %v3372_v9, %v3371_v21  ;;  %v3395_v56 = vadd.f32 %v3394_v43, %v3393_v60 }
 0x1be   :  { %v3374_v46 = vpop.f32.mrf.mxu0  ;;  %v3396_v33 = vpop.f32.mrf.mxu1 }
 0x1bf   :  { %v4809_v52 = vadd.f32 %v3373_v30, %v2173_v2  ;;  %v2333_v62 = vadd.f32 %v3395_v56, %v4751_v40 }
 0x1c0   :  { %v3375_v54 = vpop.f32.mrf.mxu0  ;;  %v3397_v5 = vpop.f32.mrf.mxu1 }
 0x1c1   :  { %v3398_v19 = vadd.f32 %v3397_v5, %v3396_v33 }
 0x1c2   :  { %v3399_v6 = vpop.f32.mrf.mxu1  ;;  %v2452_v50 = vpop.f32.mrf.mxu0 }
 0x1c3   :  { %v2453_v41 = vadd.f32 %v2452_v50, %v2333_v62  ;;  %v2336_v16 = vadd.f32 %v3398_v19, %v4754_v53 }
 0x1c4   :  { %v3400_v20 = vpop.f32.mrf.mxu1  ;;  %v3484_v63 = vpop.f32.mrf.mxu0 }
 0x1c5   :  { %v2538_v14 = vmax.f32 %v2453_v41, 0.0  ;;  %v3401_v32 = vadd.f32 %v3400_v20, %v3399_v6 }
 0x1c6   :  { %v3402_v61 = vpop.f32.mrf.mxu1  ;;  %v2455_v49 = vpop.f32.mrf.mxu0 }
 0x1c7   :  { %v2946_v38 = vpack.c.bf16 %v2538_v14, %v2538_v14  ;;  %v2456_v24 = vadd.f32 %v2455_v49, %v2336_v16  ;;  %v2341_v11 = vadd.f32 %v3401_v32, %v4757_v59 }
 0x1c8   :  { %v3403_v10 = vpop.f32.mrf.mxu1  ;;  %v3485_v27 = vpop.f32.mrf.mxu0 }
 0x1c9   :  { %2645 = vst.msk [vmem:[%s4919_s3] sm:$0xf] %vm2644_vm2, %v2946_v38  ;;  %v2539_v40 = vmax.f32 %v2456_v24, 0.0  ;;  %v3404_v36 = vadd.f32 %v3403_v10, %v3402_v61 }
 0x1ca   :  { %v3405_v15 = vpop.f32.mrf.mxu1  ;;  %v2460_v37 = vpop.f32.mrf.mxu0 }
 0x1cb   :  { %v2947_v35 = vpack.c.bf16 %v2539_v40, %v2539_v40  ;;  %v2461_v53 = vadd.f32 %v2460_v37, %v2341_v11  ;;  %v2344_v26 = vadd.f32 %v3404_v36, %v4760_v7 }
 0x1cc   :  { %v3406_v48 = vpop.f32.mrf.mxu1  ;;  %v3488_v31 = vpop.f32.mrf.mxu0 }
 0x1cd   :  { %2646 = vst.msk [vmem:[%s4919_s3 + $0x4] sm:$0xf] %vm2644_vm2, %v2947_v35  ;;  %v2540_v51 = vmax.f32 %v2461_v53, 0.0  ;;  %v3407_v25 = vadd.f32 %v3406_v48, %v3405_v15 }
 0x1ce   :  { %v3408_v28 = vpop.f32.mrf.mxu1  ;;  %v2463_v29 = vpop.f32.mrf.mxu0 }
 0x1cf   :  { %v2948_v4 = vpack.c.bf16 %v2540_v51, %v2540_v51  ;;  %v2464_v2 = vadd.f32 %v2463_v29, %v2344_v26  ;;  %v2349_v21 = vadd.f32 %v3407_v25, %v4763_v13 }
 0x1d0   :  { %v3409_v59 = vpop.f32.mrf.mxu1  ;;  %v3489_v1 = vpop.f32.mrf.mxu0 }
 0x1d1   :  { %2647 = vst.msk [vmem:[%s4919_s3 + $0x8] sm:$0xf] %vm2644_vm2, %v2948_v4  ;;  %v2541_v42 = vmax.f32 %v2464_v2, 0.0  ;;  %v3410_v47 = vadd.f32 %v3409_v59, %v3408_v28 }
 0x1d2   :  { %v3411_v60 = vpop.f32.mrf.mxu1  ;;  %v2468_v9 = vpop.f32.mrf.mxu0 }
 0x1d3   :  { %v2949_v43 = vpack.c.bf16 %v2541_v42, %v2541_v42  ;;  %v2469_v30 = vadd.f32 %v2468_v9, %v2349_v21  ;;  %v2352_v54 = vadd.f32 %v3410_v47, %v4766_v23 }
 0x1d4   :  { %v3412_v7 = vpop.f32.mrf.mxu1  ;;  %v3492_v56 = vpop.f32.mrf.mxu0 }
 0x1d5   :  { %2648 = vst.msk [vmem:[%s4919_s3 + $0xc] sm:$0xf] %vm2644_vm2, %v2949_v43  ;;  %v2542_v46 = vmax.f32 %v2469_v30, 0.0  ;;  %v3413_v33 = vadd.f32 %v3412_v7, %v3411_v60 }
 0x1d6   :  { %v3414_v5 = vpop.f32.mrf.mxu1  ;;  %v2471_v19 = vpop.f32.mrf.mxu0 }
 0x1d7   :  { %v2950_v62 = vpack.c.bf16 %v2542_v46, %v2542_v46  ;;  %v2472_v6 = vadd.f32 %v2471_v19, %v2352_v54  ;;  %v2357_v63 = vadd.f32 %v3413_v33, %v4769_v39 }
 0x1d8   :  { %v3415_v13 = vpop.f32.mrf.mxu1  ;;  %v3493_v50 = vpop.f32.mrf.mxu0 }
 0x1d9   :  { %2649 = vst.msk [vmem:[%s4919_s3 + $0x10] sm:$0xf] %vm2644_vm2, %v2950_v62  ;;  %v2543_v41 = vmax.f32 %v2472_v6, 0.0  ;;  %v3416_v20 = vadd.f32 %v3415_v13, %v3414_v5 }
 0x1da   :  { %v3417_v14 = vpop.f32.mrf.mxu1  ;;  %v2476_v32 = vpop.f32.mrf.mxu0 }
 0x1db   :  { %v2951_v16 = vpack.c.bf16 %v2543_v41, %v2543_v41  ;;  %v2477_v61 = vadd.f32 %v2476_v32, %v2357_v63  ;;  %v2360_v10 = vadd.f32 %v3416_v20, %v4772_v45 }
 0x1dc   :  { %v3418_v23 = vpop.f32.mrf.mxu1  ;;  %v3496_v49 = vpop.f32.mrf.mxu0 }
 0x1dd   :  { %2650 = vst.msk [vmem:[%s4919_s3 + $0x14] sm:$0xf] %vm2644_vm2, %v2951_v16  ;;  %v2544_v38 = vmax.f32 %v2477_v61, 0.0  ;;  %v3419_v24 = vadd.f32 %v3418_v23, %v3417_v14 }
 0x1de   :  { %v3420_v27 = vpop.f32.mrf.mxu1  ;;  %v2479_v40 = vpop.f32.mrf.mxu0 }
 0x1df   :  { %v2952_v36 = vpack.c.bf16 %v2544_v38, %v2544_v38  ;;  %v2480_v11 = vadd.f32 %v2479_v40, %v2360_v10  ;;  %v2365_v53 = vadd.f32 %v3419_v24, %v4775_v58 }
 0x1e0   :  { %v3421_v39 = vpop.f32.mrf.mxu1  ;;  %v3497_v15 = vpop.f32.mrf.mxu0 }
 0x1e1   :  { %2651 = vst.msk [vmem:[%s4919_s3 + $0x18] sm:$0xf] %vm2644_vm2, %v2952_v36  ;;  %v2545_v37 = vmax.f32 %v2480_v11, 0.0  ;;  %v3422_v35 = vadd.f32 %v3421_v39, %v3420_v27 }
 0x1e2   :  { %v3423_v48 = vpop.f32.mrf.mxu1  ;;  %v2484_v31 = vpop.f32.mrf.mxu0 }
 0x1e3   :  { %v2953_v51 = vpack.c.bf16 %v2545_v37, %v2545_v37  ;;  %v2485_v25 = vadd.f32 %v2484_v31, %v2365_v53  ;;  %v2368_v4 = vadd.f32 %v3422_v35, %v4778_v3 }
 0x1e4   :  { %v3424_v45 = vpop.f32.mrf.mxu1  ;;  %v3500_v26 = vpop.f32.mrf.mxu0 }
 0x1e5   :  { %2652 = vst.msk [vmem:[%s4919_s3 + $0x1c] sm:$0xf] %vm2644_vm2, %v2953_v51  ;;  %v2546_v28 = vmax.f32 %v2485_v25, 0.0  ;;  %v3425_v29 = vadd.f32 %v3424_v45, %v3423_v48 }
 0x1e6   :  { %v3426_v2 = vpop.f32.mrf.mxu1  ;;  %v2487_v59 = vpop.f32.mrf.mxu0 }
 0x1e7   :  { %v2954_v1 = vpack.c.bf16 %v2546_v28, %v2546_v28  ;;  %v2488_v42 = vadd.f32 %v2487_v59, %v2368_v4  ;;  %v2373_v9 = vadd.f32 %v3425_v29, %v4781_v8 }
 0x1e8   :  { %v3427_v58 = vpop.f32.mrf.mxu1  ;;  %v3501_v47 = vpop.f32.mrf.mxu0 }
 0x1e9   :  { %2653 = vst.msk [vmem:[%s4919_s3 + $0x20] sm:$0xf] %vm2644_vm2, %v2954_v1  ;;  %v2547_v21 = vmax.f32 %v2488_v42, 0.0  ;;  %v3428_v60 = vadd.f32 %v3427_v58, %v3426_v2 }
 0x1ea   :  { %v3429_v43 = vpop.f32.mrf.mxu1  ;;  %v2492_v30 = vpop.f32.mrf.mxu0 }
 0x1eb   :  { %v2955_v7 = vpack.c.bf16 %v2547_v21, %v2547_v21  ;;  %v2493_v56 = vadd.f32 %v2492_v30, %v2373_v9  ;;  %v2376_v5 = vadd.f32 %v3428_v60, %v4784_v22 }
 0x1ec   :  { %v3430_v3 = vpop.f32.mrf.mxu1  ;;  %v3504_v46 = vpop.f32.mrf.mxu0 }
 0x1ed   :  { %2654 = vst.msk [vmem:[%s4919_s3 + $0x24] sm:$0xf] %vm2644_vm2, %v2955_v7  ;;  %v2548_v33 = vmax.f32 %v2493_v56, 0.0  ;;  %v3431_v54 = vadd.f32 %v3430_v3, %v3429_v43 }
 0x1ee   :  { %v3432_v19 = vpop.f32.mrf.mxu1  ;;  %v2495_v62 = vpop.f32.mrf.mxu0 }
 0x1ef   :  { %v2956_v6 = vpack.c.bf16 %v2548_v33, %v2548_v33  ;;  %v2496_v13 = vadd.f32 %v2495_v62, %v2376_v5  ;;  %v2381_v63 = vadd.f32 %v3431_v54, %v4787_v34 }
 0x1f0   :  { %v3433_v8 = vpop.f32.mrf.mxu1  ;;  %v3505_v50 = vpop.f32.mrf.mxu0 }
 0x1f1   :  { %2655 = vst.msk [vmem:[%s4919_s3 + $0x28] sm:$0xf] %vm2644_vm2, %v2956_v6  ;;  %v2549_v41 = vmax.f32 %v2496_v13, 0.0  ;;  %v3434_v20 = vadd.f32 %v3433_v8, %v3432_v19 }
 0x1f2   :  { %v3435_v14 = vpop.f32.mrf.mxu1  ;;  %v2500_v32 = vpop.f32.mrf.mxu0 }
 0x1f3   :  { %v2957_v16 = vpack.c.bf16 %v2549_v41, %v2549_v41  ;;  %v2501_v61 = vadd.f32 %v2500_v32, %v2381_v63  ;;  %v2384_v24 = vadd.f32 %v3434_v20, %v4790_v44 }
 0x1f4   :  { %v3436_v22 = vpop.f32.mrf.mxu1  ;;  %v3508_v23 = vpop.f32.mrf.mxu0 }
 0x1f5   :  { %2656 = vst.msk [vmem:[%s4919_s3 + $0x2c] sm:$0xf] %vm2644_vm2, %v2957_v16  ;;  %v2550_v49 = vmax.f32 %v2501_v61, 0.0  ;;  %v3437_v38 = vadd.f32 %v3436_v22, %v3435_v14 }
 0x1f6   :  { %v3438_v10 = vpop.f32.mrf.mxu1  ;;  %v2503_v27 = vpop.f32.mrf.mxu0 }
 0x1f7   :  { %v2958_v40 = vpack.c.bf16 %v2550_v49, %v2550_v49  ;;  %v2504_v36 = vadd.f32 %v2503_v27, %v2384_v24  ;;  %v2389_v37 = vadd.f32 %v3437_v38, %v4793_v57 }
 0x1f8   :  { %v3439_v34 = vpop.f32.mrf.mxu1  ;;  %v3509_v11 = vpop.f32.mrf.mxu0 }
 0x1f9   :  { %2657 = vst.msk [vmem:[%s4919_s3 + $0x30] sm:$0xf] %vm2644_vm2, %v2958_v40  ;;  %v2551_v39 = vmax.f32 %v2504_v36, 0.0  ;;  %v3440_v15 = vadd.f32 %v3439_v34, %v3438_v10 }
 0x1fa   :  { %v3441_v35 = vpop.f32.mrf.mxu1  ;;  %v2508_v53 = vpop.f32.mrf.mxu0 }
 0x1fb   :  { %v2959_v48 = vpack.c.bf16 %v2551_v39, %v2551_v39  ;;  %v2509_v31 = vadd.f32 %v2508_v53, %v2389_v37  ;;  %v2392_v26 = vadd.f32 %v3440_v15, %v4796_v0 }
 0x1fc   :  { %v3442_v44 = vpop.f32.mrf.mxu1  ;;  %v3512_v51 = vpop.f32.mrf.mxu0 }
 0x1fd   :  { %2658 = vst.msk [vmem:[%s4919_s3 + $0x34] sm:$0xf] %vm2644_vm2, %v2959_v48  ;;  %v2552_v25 = vmax.f32 %v2509_v31, 0.0  ;;  %v3443_v45 = vadd.f32 %v3442_v44, %v3441_v35 }
 0x1fe   :  { %v3444_v28 = vpop.f32.mrf.mxu1  ;;  %v2511_v29 = vpop.f32.mrf.mxu0 }
 0x1ff   :  { %v2960_v4 = vpack.c.bf16 %v2552_v25, %v2552_v25  ;;  %v2512_v2 = vadd.f32 %v2511_v29, %v2392_v26  ;;  %v2397_v58 = vadd.f32 %v3443_v45, %v4799_v12 }
 0x200   :  { %v3445_v57 = vpop.f32.mrf.mxu1  ;;  %v3513_v59 = vpop.f32.mrf.mxu0 }
 0x201   :  { %2659 = vst.msk [vmem:[%s4919_s3 + $0x38] sm:$0xf] %vm2644_vm2, %v2960_v4  ;;  %v2553_v1 = vmax.f32 %v2512_v2, 0.0  ;;  %v3446_v42 = vadd.f32 %v3445_v57, %v3444_v28 }
 0x202   :  { %v3447_v47 = vpop.f32.mrf.mxu1  ;;  %v2516_v21 = vpop.f32.mrf.mxu0 }
 0x203   :  { %v2961_v60 = vpack.c.bf16 %v2553_v1, %v2553_v1  ;;  %v2517_v9 = vadd.f32 %v2516_v21, %v2397_v58  ;;  %v2400_v56 = vadd.f32 %v3446_v42, %v4802_v55 }
 0x204   :  { %v3448_v0 = vpop.f32.mrf.mxu1  ;;  %v3516_v43 = vpop.f32.mrf.mxu0 }
 0x205   :  { %2660 = vst.msk [vmem:[%s4919_s3 + $0x3c] sm:$0xf] %vm2644_vm2, %v2961_v60  ;;  %v2554_v30 = vmax.f32 %v2517_v9, 0.0  ;;  %v3449_v7 = vadd.f32 %v3448_v0, %v3447_v47 }
 0x206   :  { %v3450_v3 = vpop.f32.mrf.mxu1  ;;  %v2519_v46 = vpop.f32.mrf.mxu0 }
 0x207   :  { %v2962_v33 = vpack.c.bf16 %v2554_v30, %v2554_v30  ;;  %v2520_v54 = vadd.f32 %v2519_v46, %v2400_v56  ;;  %v2405_v6 = vadd.f32 %v3449_v7, %v4805_v18 }
 0x208   :  { %v3451_v12 = vpop.f32.mrf.mxu1  ;;  %v3517_v5 = vpop.f32.mrf.mxu0 }
 0x209   :  { %2661 = vst.msk [vmem:[%s4919_s3 + $0x40] sm:$0xf] %vm2644_vm2, %v2962_v33  ;;  %v2555_v19 = vmax.f32 %v2520_v54, 0.0  ;;  %v3452_v62 = vadd.f32 %v3451_v12, %v3450_v3 }
 0x20a   :  { %v3453_v13 = vpop.f32.mrf.mxu1  ;;  %v2524_v8 = vpop.f32.mrf.mxu0 }
 0x20b   :  { %v2963_v50 = vpack.c.bf16 %v2555_v19, %v2555_v19  ;;  %v2525_v41 = vadd.f32 %v2524_v8, %v2405_v6  ;;  %v2408_v32 = vadd.f32 %v3452_v62, %v4807_v17 }
 0x20c   :  { %v3454_v55 = vpop.f32.mrf.mxu1  ;;  %v3520_v20 = vpop.f32.mrf.mxu0 }
 0x20d   :  { %2662 = vst.msk [vmem:[%s4919_s3 + $0x44] sm:$0xf] %vm2644_vm2, %v2963_v50  ;;  %v2556_v63 = vmax.f32 %v2525_v41, 0.0  ;;  %v3455_v14 = vadd.f32 %v3454_v55, %v3453_v13 }
 0x20e   :  { %v3456_v16 = vpop.f32.mrf.mxu1  ;;  %v2527_v61 = vpop.f32.mrf.mxu0 }
 0x20f   :  { %v2964_v22 = vpack.c.bf16 %v2556_v63, %v2556_v63  ;;  %v2528_v23 = vadd.f32 %v2527_v61, %v2408_v32  ;;  %v2413_v24 = vadd.f32 %v3455_v14, %v4809_v52 }
 0x210   :  { %v3457_v18 = vpop.f32.mrf.mxu1  ;;  %v3521_v49 = vpop.f32.mrf.mxu0 }
 0x211   :  { %2663 = vst.msk [vmem:[%s4919_s3 + $0x48] sm:$0xf] %vm2644_vm2, %v2964_v22  ;;  %v2557_v38 = vmax.f32 %v2528_v23, 0.0 }
 0x212   :  { %v2532_v10 = vpop.f32.mrf.mxu0 }
 0x213   :  { %v2965_v27 = vpack.c.bf16 %v2557_v38, %v2557_v38  ;;  %v2533_v40 = vadd.f32 %v2532_v10, %v2413_v24 }
 0x214   :  { %v3524_v36 = vpop.f32.mrf.mxu0 }
 0x215   :  { %2664 = vst.msk [vmem:[%s4919_s3 + $0x4c] sm:$0xf] %vm2644_vm2, %v2965_v27  ;;  %v2558_v17 = vmax.f32 %v2533_v40, 0.0 }
 0x216   :  { %v2535_v34 = vpop.f32.mrf.mxu0 }
 0x217   :  { %v2966_v11 = vpack.c.bf16 %v2558_v17, %v2558_v17 }
 0x218   :  { %v3525_v39 = vpop.f32.mrf.mxu0 }
 0x219   :  { %2665 = vst.msk [vmem:[%s4919_s3 + $0x50] sm:$0xf] %vm2644_vm2, %v2966_v11 }

// kernel: svhn_forward.9
= control target key start
LH: loop header
LB: loop body
LE: loop exit
PB: predicated region body
PF: predicated region fallthrough
CT: control target
= control target key end

     0   :  { %vm27_vm0 = vcmask 1043456   ;;  %s196_s0 = inlined_call_operand.vmem [shape: bf16[9,16,128], index: 0, kind: input, shape index: {}]   ;;  %s197_s1 = inlined_call_operand.vmem [shape: bf16[16,128], index: 1, kind: output, shape index: {}]  }
   0x1   :  { %v9_v0 = vld [vmem:[%s196_s0] sm:$0xf]  ;;  %v11_v1 = vld [vmem:[%s196_s0 + $0x8] sm:$0xf]  ;;  %v13_v2 = vld [vmem:[%s196_s0 + $0x10] sm:$0xf] }
   0x2   :  { %v10_v3 = vld [vmem:[%s196_s0 + $0x4] sm:$0xf]  ;;  %v12_v4 = vld [vmem:[%s196_s0 + $0xc] sm:$0xf]  ;;  %v14_v5 = vld [vmem:[%s196_s0 + $0x14] sm:$0xf] }
   0x3   :  { %v15_v6 = vld [vmem:[%s196_s0 + $0x18] sm:$0xf]  ;;  %v17_v7 = vld [vmem:[%s196_s0 + $0x20] sm:$0xf]  ;;  %v19_v8 = vld [vmem:[%s196_s0 + $0x28] sm:$0xf] }
   0x4   :  { %v16_v9 = vld [vmem:[%s196_s0 + $0x1c] sm:$0xf]  ;;  %v18_v10 = vld [vmem:[%s196_s0 + $0x24] sm:$0xf]  ;;  %v21_v11 = vld [vmem:[%s196_s0 + $0x30] sm:$0xf] }
   0x5   :  { %v23_v12 = vld [vmem:[%s196_s0 + $0x38] sm:$0xf]  ;;  %v25_v13 = vld [vmem:[%s196_s0 + $0x40] sm:$0xf]  ;;  %v20_v14 = vld [vmem:[%s196_s0 + $0x2c] sm:$0xf] }
   0x6   :  { %v22_v15 = vld [vmem:[%s196_s0 + $0x34] sm:$0xf]  ;;  %v30_v16 = vsel %vm27_vm0, %v9_v0, 4286644096  ;;  %v33_v17 = vsel %vm27_vm0, %v11_v1, 4286644096 }
   0x7   :  { %v36_v18 = vsel %vm27_vm0, %v13_v2, 4286644096  ;;  %v24_v19 = vld [vmem:[%s196_s0 + $0x3c] sm:$0xf]  ;;  %v40_v21 = vsel %vm27_vm0, %v15_v6, 4286644096 }
   0x8   :  { %v38_v20 = vmax.bf16 %v36_v18, %v30_v16  ;;  %v44_v22 = vsel %vm27_vm0, %v17_v7, 4286644096  ;;  %v48_v23 = vsel %vm27_vm0, %v19_v8, 4286644096  ;;  %v42_v24 = vmax.bf16 %v40_v21, %v33_v17  ;;  %v26_v32 = vld [vmem:[%s196_s0 + $0x44] sm:$0xf] }
   0x9   :  { %v52_v25 = vsel %vm27_vm0, %v21_v11, 4286644096  ;;  %v56_v26 = vsel %vm27_vm0, %v23_v12, 4286644096  ;;  %v60_v27 = vsel %vm27_vm0, %v25_v13, 4286644096 }
   0xa   :  { %v46_v28 = vmax.bf16 %v44_v22, %v38_v20  ;;  %v65_v29 = vsel %vm27_vm0, %v10_v3, 4286644096  ;;  %v68_v30 = vsel %vm27_vm0, %v12_v4, 4286644096  ;;  %v71_v31 = vsel %vm27_vm0, %v14_v5, 4286644096 }
   0xb   :  { %v50_v33 = vmax.bf16 %v48_v23, %v42_v24  ;;  %v73_v34 = vmax.bf16 %v71_v31, %v65_v29  ;;  %v75_v35 = vsel %vm27_vm0, %v16_v9, 4286644096  ;;  %v79_v36 = vsel %vm27_vm0, %v18_v10, 4286644096 }
   0xc   :  { %v54_v37 = vmax.bf16 %v52_v25, %v46_v28  ;;  %v77_v38 = vmax.bf16 %v75_v35, %v68_v30  ;;  %v83_v39 = vsel %vm27_vm0, %v20_v14, 4286644096  ;;  %v87_v40 = vsel %vm27_vm0, %v22_v15, 4286644096 }
   0xd   :  { %v58_v41 = vmax.bf16 %v56_v26, %v50_v33  ;;  %v81_v42 = vmax.bf16 %v79_v36, %v73_v34  ;;  %v91_v43 = vsel %vm27_vm0, %v24_v19, 4286644096  ;;  %v95_v46 = vsel %vm27_vm0, %v26_v32, 4286644096 }
   0xe   :  { %v62_v44 = vmax.bf16 %v60_v27, %v54_v37  ;;  %v85_v45 = vmax.bf16 %v83_v39, %v77_v38 }
   0xf   :  { %v89_v47 = vmax.bf16 %v87_v40, %v81_v42 }
  0x10   :  { %v93_v48 = vmax.bf16 %v91_v43, %v85_v45  ;;  %v63_v49 = vmax.bf16 %v62_v44, %v58_v41 }
  0x11   :  { %v97_v50 = vmax.bf16 %v95_v46, %v89_v47 }
  0x13   :  { %v98_v51 = vmax.bf16 %v97_v50, %v93_v48 }
  0x15   :  { %v110_v52 = vcombine.low %v63_v49, %v98_v51 }
  0x17   :  { %109 = vst [vmem:[%s197_s1] sm:$0xff] %v110_v52  }

// kernel: svhn_forward.10
= control target key start
LH: loop header
LB: loop body
LE: loop exit
PB: predicated region body
PF: predicated region fallthrough
CT: control target
= control target key end

     0   :  { %s1195_s1 = inlined_call_operand.vmem [shape: bf16[1024,128], index: 1, kind: input, shape index: {}]   ;;  %s1196_s0 = inlined_call_operand.vmem [shape: bf16[8,1024], index: 0, kind: input, shape index: {}]   ;;  %s1197_s2 = inlined_call_operand.vmem [shape: f32[1,128], index: 2, kind: input, shape index: {}]   ;;  %s1198_s3 = inlined_call_operand.vmem [shape: bf16[8,128], index: 3, kind: output, shape index: {}]  }
   0x1   :  { %v893_v0 = vld [vmem:[%s1195_s1 + $0x78] sm:$0xff]   ;;  %v897_v4 = vld [vmem:[%s1195_s1 + $0x70] sm:$0xff]   ;;  %v901_v8 = vld [vmem:[%s1195_s1 + $0x68] sm:$0xff]  }
   0x2   :  { %v894_v1 = vld [vmem:[%s1195_s1 + $0xf8] sm:$0xff]   ;;  %805 = vmatprep.subr.bf16.mxu0 %v893_v0  ;;  %v898_v5 = vld [vmem:[%s1195_s1 + $0xf0] sm:$0xff]   ;;  %v902_v9 = vld [vmem:[%s1195_s1 + $0xe8] sm:$0xff]  }
   0x3   :  { %v895_v2 = vld [vmem:[%s1195_s1 + $0x38] sm:$0xff]   ;;  %827 = vmatprep.subr.bf16.mxu1 %v894_v1  ;;  %v899_v6 = vld [vmem:[%s1195_s1 + $0x30] sm:$0xff]   ;;  %v903_v10 = vld [vmem:[%s1195_s1 + $0x28] sm:$0xff]  }
   0x4   :  { %v896_v3 = vld [vmem:[%s1195_s1 + $0xb8] sm:$0xff]   ;;  %806 = vmatpush3.bf16.msra.mxu0 %v895_v2  ;;  %v900_v7 = vld [vmem:[%s1195_s1 + $0xb0] sm:$0xff]   ;;  %v904_v11 = vld [vmem:[%s1195_s1 + $0xa8] sm:$0xff]  }
   0x5   :  { %828 = vmatpush3.bf16.msra.mxu1 %v896_v3  ;;  %807 = vmatprep.subr.bf16.mxu0 %v897_v4  ;;  %v905_v12 = vld [vmem:[%s1195_s1 + $0x60] sm:$0xff]   ;;  %v909_v16 = vld [vmem:[%s1195_s1 + $0x58] sm:$0xff]   ;;  %v913_v20 = vld [vmem:[%s1195_s1 + $0x50] sm:$0xff]  }
   0x6   :  { %829 = vmatprep.subr.bf16.mxu1 %v898_v5  ;;  %v906_v13 = vld [vmem:[%s1195_s1 + $0xe0] sm:$0xff]   ;;  %v910_v17 = vld [vmem:[%s1195_s1 + $0xd8] sm:$0xff]   ;;  %v914_v21 = vld [vmem:[%s1195_s1 + $0xd0] sm:$0xff]  }
   0x7   :  { %v907_v14 = vld [vmem:[%s1195_s1 + $0x20] sm:$0xff]   ;;  %v911_v18 = vld [vmem:[%s1195_s1 + $0x18] sm:$0xff]   ;;  %v915_v22 = vld [vmem:[%s1195_s1 + $0x10] sm:$0xff]  }
   0x8   :  { %808 = vmatpush3.bf16.msra.mxu0 %v899_v6  ;;  %v908_v15 = vld [vmem:[%s1195_s1 + $0xa0] sm:$0xff]   ;;  %v912_v19 = vld [vmem:[%s1195_s1 + $0x98] sm:$0xff]   ;;  %v916_v23 = vld [vmem:[%s1195_s1 + $0x90] sm:$0xff]  }
   0x9   :  { %830 = vmatpush3.bf16.msra.mxu1 %v900_v7  ;;  %809 = vmatprep.subr.bf16.mxu0 %v901_v8  ;;  %v917_v24 = vld [vmem:[%s1195_s1 + $0x48] sm:$0xff]   ;;  %v921_v28 = vld [vmem:[%s1195_s1 + $0x40] sm:$0xff]   ;;  %v929_v38 = vld [vmem:[%s1195_s1 + $0x178] sm:$0xff]  }
   0xa   :  { %831 = vmatprep.subr.bf16.mxu1 %v902_v9  ;;  %v918_v25 = vld [vmem:[%s1195_s1 + $0xc8] sm:$0xff]   ;;  %v922_v29 = vld [vmem:[%s1195_s1 + $0xc0] sm:$0xff]   ;;  %v930_v39 = vld [vmem:[%s1195_s1 + $0x1f8] sm:$0xff]  }
   0xb   :  { %v919_v26 = vld [vmem:[%s1195_s1 + $0x8] sm:$0xff]   ;;  %v923_v30 = vld [vmem:[%s1195_s1] sm:$0xff]   ;;  %v931_v40 = vld [vmem:[%s1195_s1 + $0x138] sm:$0xff]  }
   0xc   :  { %810 = vmatpush3.bf16.msra.mxu0 %v903_v10  ;;  %v920_v27 = vld [vmem:[%s1195_s1 + $0x88] sm:$0xff]   ;;  %v924_v31 = vld [vmem:[%s1195_s1 + $0x80] sm:$0xff]   ;;  %v932_v41 = vld [vmem:[%s1195_s1 + $0x1b8] sm:$0xff]  }
   0xd   :  { %832 = vmatpush3.bf16.msra.mxu1 %v904_v11  ;;  %811 = vmatprep.subr.bf16.mxu0 %v905_v12  ;;  %v15_v32 = vld [vmem:[%s1196_s0] sm:$0xff]  ;;  %v16_v33 = vld [vmem:[%s1196_s0 + $0x8] sm:$0xff]  ;;  %v933_v42 = vld [vmem:[%s1195_s1 + $0x170] sm:$0xff]  }
   0xe   :  { %833 = vmatprep.subr.bf16.mxu1 %v906_v13  ;;  %v733_v34 = vcombine.low %v15_v32, %v15_v32  ;;  %v734_v35 = vcombine.high %v15_v32, %v15_v32  ;;  %v735_v36 = vcombine.low %v16_v33, %v16_v33  ;;  %v736_v37 = vcombine.high %v16_v33, %v16_v33  ;;  %v934_v43 = vld [vmem:[%s1195_s1 + $0x1f0] sm:$0xff]   ;;  %v937_v46 = vld [vmem:[%s1195_s1 + $0x168] sm:$0xff]   ;;  %v941_v50 = vld [vmem:[%s1195_s1 + $0x160] sm:$0xff]  }
   0xf   :  { %v935_v44 = vld [vmem:[%s1195_s1 + $0x130] sm:$0xff]   ;;  %v938_v47 = vld [vmem:[%s1195_s1 + $0x1e8] sm:$0xff]   ;;  %v942_v51 = vld [vmem:[%s1195_s1 + $0x1e0] sm:$0xff]  }
  0x10   :  { %812 = vmatpush3.bf16.msra.mxu0 %v907_v14  ;;  %598 = vmatprep.mubr.bf16.mxu0 %v734_v35  ;;  %v936_v45 = vld [vmem:[%s1195_s1 + $0x1b0] sm:$0xff]   ;;  %v939_v48 = vld [vmem:[%s1195_s1 + $0x128] sm:$0xff]   ;;  %v943_v52 = vld [vmem:[%s1195_s1 + $0x120] sm:$0xff]  }
  0x11   :  { %834 = vmatpush3.bf16.msra.mxu1 %v908_v15  ;;  %813 = vmatprep.subr.bf16.mxu0 %v909_v16  ;;  %v940_v49 = vld [vmem:[%s1195_s1 + $0x1a8] sm:$0xff]   ;;  %v944_v53 = vld [vmem:[%s1195_s1 + $0x1a0] sm:$0xff]   ;;  %v945_v54 = vld [vmem:[%s1195_s1 + $0x158] sm:$0xff]  }
  0x12   :  { %835 = vmatprep.subr.bf16.mxu1 %v910_v17  ;;  %638 = vmatprep.mubr.bf16.mxu1 %v736_v37  ;;  %v946_v55 = vld [vmem:[%s1195_s1 + $0x1d8] sm:$0xff]   ;;  %v949_v58 = vld [vmem:[%s1195_s1 + $0x150] sm:$0xff]   ;;  %v953_v62 = vld [vmem:[%s1195_s1 + $0x148] sm:$0xff]  }
  0x13   :  { %v947_v56 = vld [vmem:[%s1195_s1 + $0x118] sm:$0xff]   ;;  %v950_v59 = vld [vmem:[%s1195_s1 + $0x1d0] sm:$0xff]   ;;  %v954_v63 = vld [vmem:[%s1195_s1 + $0x1c8] sm:$0xff]  }
  0x14   :  { %814 = vmatpush3.bf16.msra.mxu0 %v911_v18  ;;  %v948_v57 = vld [vmem:[%s1195_s1 + $0x198] sm:$0xff]   ;;  %v951_v60 = vld [vmem:[%s1195_s1 + $0x110] sm:$0xff]   ;;  %v955_v0 = vld [vmem:[%s1195_s1 + $0x108] sm:$0xff]  }
  0x15   :  { %836 = vmatpush3.bf16.msra.mxu1 %v912_v19  ;;  %815 = vmatprep.subr.bf16.mxu0 %v913_v20  ;;  %v952_v61 = vld [vmem:[%s1195_s1 + $0x190] sm:$0xff]   ;;  %v956_v1 = vld [vmem:[%s1195_s1 + $0x188] sm:$0xff]   ;;  %v957_v2 = vld [vmem:[%s1195_s1 + $0x140] sm:$0xff]  }
  0x16   :  { %837 = vmatprep.subr.bf16.mxu1 %v914_v21  ;;  %v958_v3 = vld [vmem:[%s1195_s1 + $0x1c0] sm:$0xff]   ;;  %v17_v6 = vld [vmem:[%s1196_s0 + $0x10] sm:$0xff]  ;;  %v18_v9 = vld [vmem:[%s1196_s0 + $0x18] sm:$0xff] }
  0x17   :  { %v959_v4 = vld [vmem:[%s1195_s1 + $0x100] sm:$0xff]   ;;  %v737_v7 = vcombine.low %v17_v6, %v17_v6  ;;  %v738_v8 = vcombine.high %v17_v6, %v17_v6  ;;  %v739_v10 = vcombine.low %v18_v9, %v18_v9  ;;  %v740_v11 = vcombine.high %v18_v9, %v18_v9 }
  0x18   :  { %816 = vmatpush3.bf16.msra.mxu0 %v915_v22  ;;  %v960_v5 = vld [vmem:[%s1195_s1 + $0x180] sm:$0xff]  }
  0x19   :  { %838 = vmatpush3.bf16.msra.mxu1 %v916_v23  ;;  %817 = vmatprep.subr.bf16.mxu0 %v917_v24  ;;  %v732_v21 = vld [vmem:[%s1197_s2] ss:$0 sm:$0xff] }
  0x1a   :  { %839 = vmatprep.subr.bf16.mxu1 %v918_v25 }
  0x1c   :  { %818 = vmatpush3.bf16.msra.mxu0 %v919_v26 }
  0x1d   :  { %840 = vmatpush3.bf16.msra.mxu1 %v920_v27  ;;  %819 = vmatprep.subr.bf16.mxu0 %v921_v28 }
  0x1e   :  { %841 = vmatprep.subr.bf16.mxu1 %v922_v29 }
  0x20   :  { %820 = vmatpush3.bf16.msra.mxu0 %v923_v30 }
  0x21   :  { %842 = vmatpush3.bf16.msra.mxu1 %v924_v31  ;;  %849 = vmatprep.subr.bf16.mxu0 %v929_v38 }
  0x22   :  { %871 = vmatprep.subr.bf16.mxu1 %v930_v39 }
  0x23   :  { %599 = vmatmul.mubr.bf16.vlgmr.msra.gmra.mxu0 %v733_v34 }
  0x24   :  { %639 = vmatmul.mubr.bf16.vlgmr.msra.gmra.mxu1 %v735_v36  ;;  %850 = vmatpush3.bf16.msra.mxu0 %v931_v40 }
  0x25   :  { %872 = vmatpush3.bf16.msra.mxu1 %v932_v41  ;;  %851 = vmatprep.subr.bf16.mxu0 %v933_v42 }
  0x26   :  { %873 = vmatprep.subr.bf16.mxu1 %v934_v43  ;;  %678 = vmatprep.mubr.bf16.mxu0 %v738_v8 }
  0x27   :  { %718 = vmatprep.mubr.bf16.mxu1 %v740_v11 }
  0x28   :  { %852 = vmatpush3.bf16.msra.mxu0 %v935_v44 }
  0x29   :  { %874 = vmatpush3.bf16.msra.mxu1 %v936_v45  ;;  %853 = vmatprep.subr.bf16.mxu0 %v937_v46 }
  0x2a   :  { %875 = vmatprep.subr.bf16.mxu1 %v938_v47 }
  0x2c   :  { %854 = vmatpush3.bf16.msra.mxu0 %v939_v48 }
  0x2d   :  { %876 = vmatpush3.bf16.msra.mxu1 %v940_v49  ;;  %855 = vmatprep.subr.bf16.mxu0 %v941_v50 }
  0x2e   :  { %877 = vmatprep.subr.bf16.mxu1 %v942_v51 }
  0x30   :  { %856 = vmatpush3.bf16.msra.mxu0 %v943_v52 }
  0x31   :  { %878 = vmatpush3.bf16.msra.mxu1 %v944_v53  ;;  %857 = vmatprep.subr.bf16.mxu0 %v945_v54 }
  0x32   :  { %879 = vmatprep.subr.bf16.mxu1 %v946_v55 }
  0x34   :  { %858 = vmatpush3.bf16.msra.mxu0 %v947_v56 }
  0x35   :  { %880 = vmatpush3.bf16.msra.mxu1 %v948_v57  ;;  %859 = vmatprep.subr.bf16.mxu0 %v949_v58 }
  0x36   :  { %881 = vmatprep.subr.bf16.mxu1 %v950_v59 }
  0x38   :  { %860 = vmatpush3.bf16.msra.mxu0 %v951_v60 }
  0x39   :  { %882 = vmatpush3.bf16.msra.mxu1 %v952_v61  ;;  %861 = vmatprep.subr.bf16.mxu0 %v953_v62 }
  0x3a   :  { %883 = vmatprep.subr.bf16.mxu1 %v954_v63 }
  0x3c   :  { %862 = vmatpush3.bf16.msra.mxu0 %v955_v0 }
  0x3d   :  { %884 = vmatpush3.bf16.msra.mxu1 %v956_v1  ;;  %863 = vmatprep.subr.bf16.mxu0 %v957_v2 }
  0x3e   :  { %885 = vmatprep.subr.bf16.mxu1 %v958_v3 }
  0x40   :  { %864 = vmatpush3.bf16.msra.mxu0 %v959_v4 }
  0x41   :  { %886 = vmatpush3.bf16.msra.mxu1 %v960_v5 }
  0x43   :  { %679 = vmatmul.mubr.bf16.vlgmr.msra.gmra.mxu0 %v737_v7 }
  0x44   :  { %719 = vmatmul.mubr.bf16.vlgmr.msra.gmra.mxu1 %v739_v10 }
  0xe3   :  { %v821_v12 = vpop.f32.mrf.mxu0 }
  0xe4   :  { %v843_v13 = vpop.f32.mrf.mxu1 }
  0xe5   :  { %v822_v14 = vpop.f32.mrf.mxu0 }
  0xe6   :  { %v844_v15 = vpop.f32.mrf.mxu1  ;;  %v823_v20 = vadd.f32 %v822_v14, %v821_v12 }
  0xe7   :  { %v824_v16 = vpop.f32.mrf.mxu0  ;;  %v845_v23 = vadd.f32 %v844_v15, %v843_v13 }
  0xe8   :  { %v846_v17 = vpop.f32.mrf.mxu1  ;;  %v601_v22 = vadd.f32 %v823_v20, %v732_v21 }
  0xe9   :  { %v825_v18 = vpop.f32.mrf.mxu0 }
  0xea   :  { %v847_v19 = vpop.f32.mrf.mxu1  ;;  %v641_v28 = vadd.f32 %v845_v23, %v601_v22 }
 0x103   :  { %v865_v24 = vpop.f32.mrf.mxu0 }
 0x104   :  { %v887_v25 = vpop.f32.mrf.mxu1 }
 0x105   :  { %v866_v26 = vpop.f32.mrf.mxu0 }
 0x106   :  { %v888_v27 = vpop.f32.mrf.mxu1  ;;  %v867_v29 = vadd.f32 %v866_v26, %v865_v24 }
 0x107   :  { %v868_v30 = vpop.f32.mrf.mxu0  ;;  %v889_v33 = vadd.f32 %v888_v27, %v887_v25 }
 0x108   :  { %v890_v31 = vpop.f32.mrf.mxu1  ;;  %v681_v32 = vadd.f32 %v867_v29, %v641_v28 }
 0x109   :  { %v869_v34 = vpop.f32.mrf.mxu0 }
 0x10a   :  { %v891_v35 = vpop.f32.mrf.mxu1  ;;  %v721_v36 = vadd.f32 %v889_v33, %v681_v32 }
 0x10c   :  { %v726_v37 = vpack.c.bf16 %v721_v36, %v721_v36 }
 0x10e   :  { %727 = vst [vmem:[%s1198_s3] sm:$0xf] %v726_v37 }

// kernel: svhn_forward.11
= control target key start
LH: loop header
LB: loop body
LE: loop exit
PB: predicated region body
PF: predicated region fallthrough
CT: control target
= control target key end

     0   :  { %v6865_v3 = vmov 0   ;;  %s9142_s1 = inlined_call_operand.vmem [shape: bf16[128,2048], index: 1, kind: input, shape index: {}]   ;;  %s9143_s0 = inlined_call_operand.vmem [shape: bf16[8,128], index: 0, kind: input, shape index: {}]   ;;  %s9144_s3 = inlined_call_operand.vmem [shape: bf16[2048,512], index: 3, kind: input, shape index: {}]   ;;  %s9145_s2 = inlined_call_operand.vmem [shape: f32[1,2048], index: 2, kind: input, shape index: {}]   ;;  %s9146_s4 = inlined_call_operand.vmem [shape: f32[1,512], index: 4, kind: input, shape index: {}]   ;;  %s9147_s5 = inlined_call_operand.vmem [shape: bf16[512,128], index: 5, kind: input, shape index: {}]   ;;  %s9148_s6 = inlined_call_operand.vmem [shape: f32[1,128], index: 6, kind: input, shape index: {}]   ;;  %s9149_s7 = inlined_call_operand.vmem [shape: f32[8,128], index: 7, kind: output, shape index: {}]  }
   0x1   :  { %v140_v0 = vld [vmem:[%s9142_s1 + $0x380] sm:$0xff]  ;;  %v141_v2 = vld [vmem:[%s9142_s1 + $0x388] sm:$0xff]  ;;  %912 = vmatprep.mubr.bf16.mxu0 %v6865_v3  ;;  %953 = vmatprep.mubr.bf16.mxu1 %v6865_v3  ;;  %v142_v63 = vld [vmem:[%s9142_s1 + $0x390] sm:$0xff] }
   0x2   :  { %v148_v1 = vld [vmem:[%s9142_s1 + $0x3c0] sm:$0xff]  ;;  %v149_v5 = vld [vmem:[%s9142_s1 + $0x3c8] sm:$0xff] }
   0x3   :  { %v5459_v4 = vcombine.high %v140_v0, %v148_v1  ;;  %v5458_v6 = vcombine.low %v140_v0, %v148_v1  ;;  %v124_v7 = vld [vmem:[%s9142_s1 + $0x300] sm:$0xff]  ;;  %v5461_v9 = vcombine.high %v141_v2, %v149_v5  ;;  %v5460_v10 = vcombine.low %v141_v2, %v149_v5  ;;  %v125_v12 = vld [vmem:[%s9142_s1 + $0x308] sm:$0xff]  ;;  %v150_v0 = vld [vmem:[%s9142_s1 + $0x3d0] sm:$0xff] }
   0x4   :  { %v132_v8 = vld [vmem:[%s9142_s1 + $0x340] sm:$0xff]  ;;  %v133_v13 = vld [vmem:[%s9142_s1 + $0x348] sm:$0xff]  ;;  %v143_v1 = vld [vmem:[%s9142_s1 + $0x398] sm:$0xff] }
   0x5   :  { %v5443_v11 = vcombine.high %v124_v7, %v132_v8  ;;  %v108_v14 = vld [vmem:[%s9142_s1 + $0x280] sm:$0xff]  ;;  %880 = vmatprep.subr.bf16.mxu0 %v5459_v4  ;;  %v5445_v15 = vcombine.high %v125_v12, %v133_v13  ;;  %v109_v17 = vld [vmem:[%s9142_s1 + $0x288] sm:$0xff]  ;;  %921 = vmatprep.subr.bf16.mxu1 %v5461_v9  ;;  %v5442_v19 = vcombine.low %v124_v7, %v132_v8  ;;  %v151_v2 = vld [vmem:[%s9142_s1 + $0x3d8] sm:$0xff] }
   0x6   :  { %v116_v16 = vld [vmem:[%s9142_s1 + $0x2c0] sm:$0xff]  ;;  %v117_v18 = vld [vmem:[%s9142_s1 + $0x2c8] sm:$0xff]  ;;  %881 = vmatpush1.bf16.msra.mxu0 %v5458_v6  ;;  %922 = vmatpush1.bf16.msra.mxu1 %v5460_v10  ;;  %v5444_v20 = vcombine.low %v125_v12, %v133_v13  ;;  %v5463_v6 = vcombine.high %v142_v63, %v150_v0  ;;  %v5465_v7 = vcombine.high %v143_v1, %v151_v2  ;;  %v126_v8 = vld [vmem:[%s9142_s1 + $0x310] sm:$0xff] }
   0x7   :  { %882 = vmatprep.subr.bf16.mxu0 %v5443_v11  ;;  %v5427_v21 = vcombine.high %v108_v14, %v116_v16  ;;  %923 = vmatprep.subr.bf16.mxu1 %v5445_v15  ;;  %v5429_v22 = vcombine.high %v109_v17, %v117_v18  ;;  %v92_v23 = vld [vmem:[%s9142_s1 + $0x200] sm:$0xff]  ;;  %v93_v25 = vld [vmem:[%s9142_s1 + $0x208] sm:$0xff]  ;;  %v5426_v27 = vcombine.low %v108_v14, %v116_v16  ;;  %v134_v9 = vld [vmem:[%s9142_s1 + $0x350] sm:$0xff] }
   0x8   :  { %v100_v24 = vld [vmem:[%s9142_s1 + $0x240] sm:$0xff]  ;;  %v101_v26 = vld [vmem:[%s9142_s1 + $0x248] sm:$0xff]  ;;  %v5428_v28 = vcombine.low %v109_v17, %v117_v18  ;;  %v127_v10 = vld [vmem:[%s9142_s1 + $0x318] sm:$0xff]  ;;  %v5462_v13 = vcombine.low %v142_v63, %v150_v0  ;;  %v5464_v14 = vcombine.low %v143_v1, %v151_v2  ;;  %v5447_v15 = vcombine.high %v126_v8, %v134_v9 }
   0x9   :  { %v5411_v29 = vcombine.high %v92_v23, %v100_v24  ;;  %v5413_v30 = vcombine.high %v93_v25, %v101_v26  ;;  %v76_v31 = vld [vmem:[%s9142_s1 + $0x180] sm:$0xff]  ;;  %v77_v33 = vld [vmem:[%s9142_s1 + $0x188] sm:$0xff]  ;;  %v5410_v35 = vcombine.low %v92_v23, %v100_v24  ;;  %v5412_v36 = vcombine.low %v93_v25, %v101_v26  ;;  %v135_v11 = vld [vmem:[%s9142_s1 + $0x358] sm:$0xff] }
   0xa   :  { %883 = vmatpush1.bf16.msra.mxu0 %v5442_v19  ;;  %924 = vmatpush1.bf16.msra.mxu1 %v5444_v20  ;;  %v84_v32 = vld [vmem:[%s9142_s1 + $0x1c0] sm:$0xff]  ;;  %v85_v34 = vld [vmem:[%s9142_s1 + $0x1c8] sm:$0xff]  ;;  %v5449_v16 = vcombine.high %v127_v10, %v135_v11  ;;  %v110_v17 = vld [vmem:[%s9142_s1 + $0x290] sm:$0xff] }
   0xb   :  { %884 = vmatprep.subr.bf16.mxu0 %v5427_v21  ;;  %925 = vmatprep.subr.bf16.mxu1 %v5429_v22  ;;  %v5395_v37 = vcombine.high %v76_v31, %v84_v32  ;;  %v5397_v38 = vcombine.high %v77_v33, %v85_v34  ;;  %v60_v39 = vld [vmem:[%s9142_s1 + $0x100] sm:$0xff]  ;;  %v61_v41 = vld [vmem:[%s9142_s1 + $0x108] sm:$0xff]  ;;  %v5394_v43 = vcombine.low %v76_v31, %v84_v32  ;;  %v118_v18 = vld [vmem:[%s9142_s1 + $0x2d0] sm:$0xff] }
   0xc   :  { %v68_v40 = vld [vmem:[%s9142_s1 + $0x140] sm:$0xff]  ;;  %v69_v42 = vld [vmem:[%s9142_s1 + $0x148] sm:$0xff]  ;;  %v5396_v44 = vcombine.low %v77_v33, %v85_v34  ;;  %v111_v19 = vld [vmem:[%s9142_s1 + $0x298] sm:$0xff]  ;;  %v5446_v21 = vcombine.low %v126_v8, %v134_v9  ;;  %v5448_v22 = vcombine.low %v127_v10, %v135_v11  ;;  %v5431_v23 = vcombine.high %v110_v17, %v118_v18 }
   0xd   :  { %v5379_v45 = vcombine.high %v60_v39, %v68_v40  ;;  %v5381_v46 = vcombine.high %v61_v41, %v69_v42  ;;  %v44_v47 = vld [vmem:[%s9142_s1 + $0x80] sm:$0xff]  ;;  %v45_v49 = vld [vmem:[%s9142_s1 + $0x88] sm:$0xff]  ;;  %v5378_v51 = vcombine.low %v60_v39, %v68_v40  ;;  %v5380_v52 = vcombine.low %v61_v41, %v69_v42  ;;  %v119_v20 = vld [vmem:[%s9142_s1 + $0x2d8] sm:$0xff] }
   0xe   :  { %885 = vmatpush1.bf16.msra.mxu0 %v5426_v27  ;;  %926 = vmatpush1.bf16.msra.mxu1 %v5428_v28  ;;  %v52_v48 = vld [vmem:[%s9142_s1 + $0xc0] sm:$0xff]  ;;  %v53_v50 = vld [vmem:[%s9142_s1 + $0xc8] sm:$0xff]  ;;  %v5433_v24 = vcombine.high %v111_v19, %v119_v20  ;;  %v94_v25 = vld [vmem:[%s9142_s1 + $0x210] sm:$0xff] }
   0xf   :  { %886 = vmatprep.subr.bf16.mxu0 %v5411_v29  ;;  %927 = vmatprep.subr.bf16.mxu1 %v5413_v30  ;;  %v5363_v53 = vcombine.high %v44_v47, %v52_v48  ;;  %v5365_v54 = vcombine.high %v45_v49, %v53_v50  ;;  %v28_v55 = vld [vmem:[%s9142_s1] sm:$0xff]  ;;  %v29_v57 = vld [vmem:[%s9142_s1 + $0x8] sm:$0xff]  ;;  %v5362_v59 = vcombine.low %v44_v47, %v52_v48  ;;  %v102_v26 = vld [vmem:[%s9142_s1 + $0x250] sm:$0xff] }
  0x10   :  { %v36_v56 = vld [vmem:[%s9142_s1 + $0x40] sm:$0xff]  ;;  %v37_v58 = vld [vmem:[%s9142_s1 + $0x48] sm:$0xff]  ;;  %v5364_v60 = vcombine.low %v45_v49, %v53_v50  ;;  %v95_v27 = vld [vmem:[%s9142_s1 + $0x218] sm:$0xff]  ;;  %v5430_v29 = vcombine.low %v110_v17, %v118_v18  ;;  %v5432_v30 = vcombine.low %v111_v19, %v119_v20  ;;  %v5415_v31 = vcombine.high %v94_v25, %v102_v26 }
  0x11   :  { %v5347_v61 = vcombine.high %v28_v55, %v36_v56  ;;  %v5349_v62 = vcombine.high %v29_v57, %v37_v58  ;;  %v5346_v4 = vcombine.low %v28_v55, %v36_v56  ;;  %v5348_v5 = vcombine.low %v29_v57, %v37_v58  ;;  %v7031_v12 = vld [vmem:[%s9143_s0] sm:$0xf]  ;;  %v103_v28 = vld [vmem:[%s9142_s1 + $0x258] sm:$0xff]  ;;  %v78_v33 = vld [vmem:[%s9142_s1 + $0x190] sm:$0xff] }
  0x12   :  { %887 = vmatpush1.bf16.msra.mxu0 %v5410_v35  ;;  %928 = vmatpush1.bf16.msra.mxu1 %v5412_v36  ;;  %v5417_v32 = vcombine.high %v95_v27, %v103_v28  ;;  %v86_v34 = vld [vmem:[%s9142_s1 + $0x1d0] sm:$0xff]  ;;  %v79_v35 = vld [vmem:[%s9142_s1 + $0x198] sm:$0xff]  ;;  %v144_v0 = vld [vmem:[%s9142_s1 + $0x3a0] sm:$0xff] }
  0x13   :  { %888 = vmatprep.subr.bf16.mxu0 %v5395_v37  ;;  %929 = vmatprep.subr.bf16.mxu1 %v5397_v38  ;;  %v87_v36 = vld [vmem:[%s9142_s1 + $0x1d8] sm:$0xff]  ;;  %v5414_v37 = vcombine.low %v94_v25, %v102_v26  ;;  %v5416_v38 = vcombine.low %v95_v27, %v103_v28  ;;  %v5399_v39 = vcombine.high %v78_v33, %v86_v34  ;;  %v62_v40 = vld [vmem:[%s9142_s1 + $0x110] sm:$0xff]  ;;  %v152_v2 = vld [vmem:[%s9142_s1 + $0x3e0] sm:$0xff] }
  0x14   :  { %v5401_v41 = vcombine.high %v79_v35, %v87_v36  ;;  %v70_v42 = vld [vmem:[%s9142_s1 + $0x150] sm:$0xff]  ;;  %v5467_v8 = vcombine.high %v144_v0, %v152_v2  ;;  %v128_v9 = vld [vmem:[%s9142_s1 + $0x320] sm:$0xff] }
  0x15   :  { %v5383_v47 = vcombine.high %v62_v40, %v70_v42  ;;  %v46_v48 = vld [vmem:[%s9142_s1 + $0x90] sm:$0xff]  ;;  %v136_v11 = vld [vmem:[%s9142_s1 + $0x360] sm:$0xff] }
  0x16   :  { %889 = vmatpush1.bf16.msra.mxu0 %v5394_v43  ;;  %930 = vmatpush1.bf16.msra.mxu1 %v5396_v44  ;;  %v63_v43 = vld [vmem:[%s9142_s1 + $0x118] sm:$0xff]  ;;  %v54_v50 = vld [vmem:[%s9142_s1 + $0xd0] sm:$0xff]  ;;  %v5451_v17 = vcombine.high %v128_v9, %v136_v11  ;;  %v112_v18 = vld [vmem:[%s9142_s1 + $0x2a0] sm:$0xff] }
  0x17   :  { %890 = vmatprep.subr.bf16.mxu0 %v5379_v45  ;;  %931 = vmatprep.subr.bf16.mxu1 %v5381_v46  ;;  %v71_v44 = vld [vmem:[%s9142_s1 + $0x158] sm:$0xff]  ;;  %v5398_v45 = vcombine.low %v78_v33, %v86_v34  ;;  %v5400_v46 = vcombine.low %v79_v35, %v87_v36  ;;  %v5367_v55 = vcombine.high %v46_v48, %v54_v50  ;;  %v30_v56 = vld [vmem:[%s9142_s1 + $0x10] sm:$0xff]  ;;  %v120_v20 = vld [vmem:[%s9142_s1 + $0x2e0] sm:$0xff] }
  0x18   :  { %v5385_v49 = vcombine.high %v63_v43, %v71_v44  ;;  %v38_v58 = vld [vmem:[%s9142_s1 + $0x50] sm:$0xff]  ;;  %v5435_v25 = vcombine.high %v112_v18, %v120_v20  ;;  %v96_v26 = vld [vmem:[%s9142_s1 + $0x220] sm:$0xff] }
  0x19   :  { %v5351_v63 = vcombine.high %v30_v56, %v38_v58  ;;  %v104_v28 = vld [vmem:[%s9142_s1 + $0x260] sm:$0xff] }
  0x1a   :  { %891 = vmatpush1.bf16.msra.mxu0 %v5378_v51  ;;  %932 = vmatpush1.bf16.msra.mxu1 %v5380_v52  ;;  %v47_v51 = vld [vmem:[%s9142_s1 + $0x98] sm:$0xff]  ;;  %v5419_v33 = vcombine.high %v96_v26, %v104_v28  ;;  %v80_v34 = vld [vmem:[%s9142_s1 + $0x1a0] sm:$0xff] }
  0x1b   :  { %892 = vmatprep.subr.bf16.mxu0 %v5363_v53  ;;  %933 = vmatprep.subr.bf16.mxu1 %v5365_v54  ;;  %v55_v52 = vld [vmem:[%s9142_s1 + $0xd8] sm:$0xff]  ;;  %v5382_v53 = vcombine.low %v62_v40, %v70_v42  ;;  %v5384_v54 = vcombine.low %v63_v43, %v71_v44  ;;  %v88_v36 = vld [vmem:[%s9142_s1 + $0x1e0] sm:$0xff] }
  0x1c   :  { %v5369_v57 = vcombine.high %v47_v51, %v55_v52  ;;  %v64_v42 = vld [vmem:[%s9142_s1 + $0x120] sm:$0xff] }
  0x1d   :  { %v72_v44 = vld [vmem:[%s9142_s1 + $0x160] sm:$0xff] }
  0x1e   :  { %893 = vmatpush1.bf16.msra.mxu0 %v5362_v59  ;;  %934 = vmatpush1.bf16.msra.mxu1 %v5364_v60  ;;  %v31_v59 = vld [vmem:[%s9142_s1 + $0x18] sm:$0xff] }
  0x1f   :  { %894 = vmatprep.subr.bf16.mxu0 %v5347_v61  ;;  %935 = vmatprep.subr.bf16.mxu1 %v5349_v62  ;;  %v39_v60 = vld [vmem:[%s9142_s1 + $0x58] sm:$0xff]  ;;  %v5366_v61 = vcombine.low %v46_v48, %v54_v50  ;;  %v5368_v62 = vcombine.low %v47_v51, %v55_v52  ;;  %v48_v48 = vld [vmem:[%s9142_s1 + $0xa0] sm:$0xff]  ;;  %v5387_v51 = vcombine.high %v64_v42, %v72_v44  ;;  %v49_v52 = vld [vmem:[%s9142_s1 + $0xa8] sm:$0xff] }
  0x20   :  { %v5353_v1 = vcombine.high %v31_v59, %v39_v60 }
  0x22   :  { %895 = vmatpush1.bf16.msra.mxu0 %v5346_v4  ;;  %936 = vmatpush1.bf16.msra.mxu1 %v5348_v5  ;;  %v145_v4 = vld [vmem:[%s9142_s1 + $0x3a8] sm:$0xff] }
  0x23   :  { %962 = vmatprep.subr.bf16.mxu0 %v5463_v6  ;;  %1003 = vmatprep.subr.bf16.mxu1 %v5465_v7  ;;  %v153_v5 = vld [vmem:[%s9142_s1 + $0x3e8] sm:$0xff]  ;;  %v5350_v6 = vcombine.low %v30_v56, %v38_v58  ;;  %v5352_v7 = vcombine.low %v31_v59, %v39_v60  ;;  %v32_v56 = vld [vmem:[%s9142_s1 + $0x20] sm:$0xff] }
  0x24   :  { %v5469_v10 = vcombine.high %v145_v4, %v153_v5  ;;  %v33_v60 = vld [vmem:[%s9142_s1 + $0x28] sm:$0xff] }
  0x25   :  { %913 = vmatmul.mubr.bf16.vlgmr.msra.gmra.mxu0 %v7031_v12  ;;  %954 = vmatmul.mubr.bf16.vlgmr.msra.gmra.mxu1 %v7031_v12 }
  0x26   :  { %963 = vmatpush1.bf16.msra.mxu0 %v5462_v13  ;;  %1004 = vmatpush1.bf16.msra.mxu1 %v5464_v14  ;;  %v129_v13 = vld [vmem:[%s9142_s1 + $0x328] sm:$0xff] }
  0x27   :  { %964 = vmatprep.subr.bf16.mxu0 %v5447_v15  ;;  %1005 = vmatprep.subr.bf16.mxu1 %v5449_v16  ;;  %v137_v14 = vld [vmem:[%s9142_s1 + $0x368] sm:$0xff]  ;;  %v5466_v15 = vcombine.low %v144_v0, %v152_v2  ;;  %v5468_v16 = vcombine.low %v145_v4, %v153_v5  ;;  %v146_v0 = vld [vmem:[%s9142_s1 + $0x3b0] sm:$0xff]  ;;  %v147_v5 = vld [vmem:[%s9142_s1 + $0x3b8] sm:$0xff] }
  0x28   :  { %994 = vmatprep.mubr.bf16.mxu0 %v6865_v3  ;;  %1035 = vmatprep.mubr.bf16.mxu1 %v6865_v3  ;;  %v5453_v19 = vcombine.high %v129_v13, %v137_v14 }
  0x2a   :  { %965 = vmatpush1.bf16.msra.mxu0 %v5446_v21  ;;  %1006 = vmatpush1.bf16.msra.mxu1 %v5448_v22  ;;  %v113_v21 = vld [vmem:[%s9142_s1 + $0x2a8] sm:$0xff] }
  0x2b   :  { %966 = vmatprep.subr.bf16.mxu0 %v5431_v23  ;;  %1007 = vmatprep.subr.bf16.mxu1 %v5433_v24  ;;  %v121_v22 = vld [vmem:[%s9142_s1 + $0x2e8] sm:$0xff]  ;;  %v5450_v23 = vcombine.low %v128_v9, %v136_v11  ;;  %v5452_v24 = vcombine.low %v129_v13, %v137_v14  ;;  %v130_v9 = vld [vmem:[%s9142_s1 + $0x330] sm:$0xff]  ;;  %v131_v14 = vld [vmem:[%s9142_s1 + $0x338] sm:$0xff] }
  0x2c   :  { %v5437_v27 = vcombine.high %v113_v21, %v121_v22 }
  0x2e   :  { %967 = vmatpush1.bf16.msra.mxu0 %v5430_v29  ;;  %1008 = vmatpush1.bf16.msra.mxu1 %v5432_v30  ;;  %v97_v29 = vld [vmem:[%s9142_s1 + $0x228] sm:$0xff] }
  0x2f   :  { %968 = vmatprep.subr.bf16.mxu0 %v5415_v31  ;;  %1009 = vmatprep.subr.bf16.mxu1 %v5417_v32  ;;  %v105_v30 = vld [vmem:[%s9142_s1 + $0x268] sm:$0xff]  ;;  %v5434_v31 = vcombine.low %v112_v18, %v120_v20  ;;  %v5436_v32 = vcombine.low %v113_v21, %v121_v22  ;;  %v114_v18 = vld [vmem:[%s9142_s1 + $0x2b0] sm:$0xff] }
  0x30   :  { %v5421_v35 = vcombine.high %v97_v29, %v105_v30  ;;  %v5420_v40 = vcombine.low %v97_v29, %v105_v30 }
  0x32   :  { %969 = vmatpush1.bf16.msra.mxu0 %v5414_v37  ;;  %1010 = vmatpush1.bf16.msra.mxu1 %v5416_v38  ;;  %v81_v37 = vld [vmem:[%s9142_s1 + $0x1a8] sm:$0xff] }
  0x33   :  { %970 = vmatprep.subr.bf16.mxu0 %v5399_v39  ;;  %1011 = vmatprep.subr.bf16.mxu1 %v5401_v41  ;;  %v89_v38 = vld [vmem:[%s9142_s1 + $0x1e8] sm:$0xff]  ;;  %v5418_v39 = vcombine.low %v96_v26, %v104_v28  ;;  %v5403_v41 = vcombine.high %v80_v34, %v88_v36  ;;  %v98_v26 = vld [vmem:[%s9142_s1 + $0x230] sm:$0xff] }
  0x34   :  { %v5405_v43 = vcombine.high %v81_v37, %v89_v38  ;;  %v5404_v50 = vcombine.low %v81_v37, %v89_v38 }
  0x36   :  { %971 = vmatpush1.bf16.msra.mxu0 %v5398_v45  ;;  %1012 = vmatpush1.bf16.msra.mxu1 %v5400_v46  ;;  %v65_v45 = vld [vmem:[%s9142_s1 + $0x128] sm:$0xff] }
  0x37   :  { %972 = vmatprep.subr.bf16.mxu0 %v5383_v47  ;;  %1013 = vmatprep.subr.bf16.mxu1 %v5385_v49  ;;  %v73_v46 = vld [vmem:[%s9142_s1 + $0x168] sm:$0xff]  ;;  %v5402_v47 = vcombine.low %v80_v34, %v88_v36  ;;  %v56_v49 = vld [vmem:[%s9142_s1 + $0xe0] sm:$0xff]  ;;  %v82_v34 = vld [vmem:[%s9142_s1 + $0x1b0] sm:$0xff] }
  0x38   :  { %v5388_v58 = vcombine.low %v65_v45, %v73_v46  ;;  %v5371_v59 = vcombine.high %v48_v48, %v56_v49 }
  0x3a   :  { %973 = vmatpush1.bf16.msra.mxu0 %v5382_v53  ;;  %1014 = vmatpush1.bf16.msra.mxu1 %v5384_v54  ;;  %v57_v53 = vld [vmem:[%s9142_s1 + $0xe8] sm:$0xff]  ;;  %v5389_v54 = vcombine.high %v65_v45, %v73_v46  ;;  %v67_v46 = vld [vmem:[%s9142_s1 + $0x138] sm:$0xff] }
  0x3b   :  { %974 = vmatprep.subr.bf16.mxu0 %v5367_v55  ;;  %1015 = vmatprep.subr.bf16.mxu1 %v5369_v57  ;;  %v5386_v55 = vcombine.low %v64_v42, %v72_v44  ;;  %v40_v57 = vld [vmem:[%s9142_s1 + $0x60] sm:$0xff]  ;;  %v5372_v2 = vcombine.low %v49_v52, %v57_v53  ;;  %v74_v42 = vld [vmem:[%s9142_s1 + $0x170] sm:$0xff] }
  0x3c   :  { %v5355_v4 = vcombine.high %v32_v56, %v40_v57 }
  0x3e   :  { %975 = vmatpush1.bf16.msra.mxu0 %v5366_v61  ;;  %1016 = vmatpush1.bf16.msra.mxu1 %v5368_v62  ;;  %v41_v61 = vld [vmem:[%s9142_s1 + $0x68] sm:$0xff]  ;;  %v5373_v62 = vcombine.high %v49_v52, %v57_v53 }
  0x3f   :  { %976 = vmatprep.subr.bf16.mxu0 %v5351_v63  ;;  %1017 = vmatprep.subr.bf16.mxu1 %v5353_v1  ;;  %v5370_v63 = vcombine.low %v48_v48, %v56_v49  ;;  %v154_v1 = vld [vmem:[%s9142_s1 + $0x3f0] sm:$0xff]  ;;  %v5356_v11 = vcombine.low %v33_v60, %v41_v61 }
  0x40   :  { %v5471_v13 = vcombine.high %v146_v0, %v154_v1  ;;  %v50_v49 = vld [vmem:[%s9142_s1 + $0xb0] sm:$0xff] }
  0x42   :  { %977 = vmatpush1.bf16.msra.mxu0 %v5350_v6  ;;  %1018 = vmatpush1.bf16.msra.mxu1 %v5352_v7  ;;  %v155_v6 = vld [vmem:[%s9142_s1 + $0x3f8] sm:$0xff]  ;;  %v5357_v7 = vcombine.high %v33_v60, %v41_v61 }
  0x43   :  { %1044 = vmatprep.subr.bf16.mxu0 %v5467_v8  ;;  %1085 = vmatprep.subr.bf16.mxu1 %v5469_v10  ;;  %v5354_v8 = vcombine.low %v32_v56, %v40_v57  ;;  %v138_v10 = vld [vmem:[%s9142_s1 + $0x370] sm:$0xff]  ;;  %v5472_v20 = vcombine.low %v147_v5, %v155_v6 }
  0x44   :  { %v5455_v21 = vcombine.high %v130_v9, %v138_v10  ;;  %v34_v57 = vld [vmem:[%s9142_s1 + $0x30] sm:$0xff] }
  0x45   :  { %995 = vmatmul.mubr.bf16.vlgmr.msra.gmra.mxu0 %v7031_v12  ;;  %1036 = vmatmul.mubr.bf16.vlgmr.msra.gmra.mxu1 %v7031_v12 }
  0x46   :  { %1045 = vmatpush1.bf16.msra.mxu0 %v5466_v15  ;;  %1086 = vmatpush1.bf16.msra.mxu1 %v5468_v16  ;;  %v139_v15 = vld [vmem:[%s9142_s1 + $0x378] sm:$0xff]  ;;  %v5473_v16 = vcombine.high %v147_v5, %v155_v6  ;;  %v6066_v5 = vld [vmem:[%s9144_s3 + $0xe4] ss:$16 sps:$4 sm:$0xff]  }
  0x47   :  { %1046 = vmatprep.subr.bf16.mxu0 %v5451_v17  ;;  %1087 = vmatprep.subr.bf16.mxu1 %v5453_v19  ;;  %v5470_v17 = vcombine.low %v146_v0, %v154_v1  ;;  %v122_v19 = vld [vmem:[%s9142_s1 + $0x2f0] sm:$0xff]  ;;  %v5457_v22 = vcombine.high %v131_v14, %v139_v15  ;;  %v5456_v28 = vcombine.low %v131_v14, %v139_v15 }
  0x48   :  { %1076 = vmatprep.mubr.bf16.mxu0 %v6865_v3  ;;  %1117 = vmatprep.mubr.bf16.mxu1 %v6865_v3  ;;  %v5439_v29 = vcombine.high %v114_v18, %v122_v19  ;;  %v6070_v14 = vld [vmem:[%s9144_s3 + $0xc0] ss:$16 sps:$4 sm:$0xff]  }
  0x49   :  { %v6073_v15 = vld [vmem:[%s9144_s3 + $0x2c0] ss:$16 sps:$4 sm:$0xff]  }
  0x4a   :  { %1047 = vmatpush1.bf16.msra.mxu0 %v5450_v23  ;;  %1088 = vmatpush1.bf16.msra.mxu1 %v5452_v24  ;;  %v115_v23 = vld [vmem:[%s9142_s1 + $0x2b8] sm:$0xff] }
  0x4b   :  { %1048 = vmatprep.subr.bf16.mxu0 %v5435_v25  ;;  %1089 = vmatprep.subr.bf16.mxu1 %v5437_v27  ;;  %v123_v24 = vld [vmem:[%s9142_s1 + $0x2f8] sm:$0xff]  ;;  %v5454_v25 = vcombine.low %v130_v9, %v138_v10  ;;  %v106_v27 = vld [vmem:[%s9142_s1 + $0x270] sm:$0xff] }
  0x4c   :  { %v5441_v30 = vcombine.high %v115_v23, %v123_v24  ;;  %v5440_v36 = vcombine.low %v115_v23, %v123_v24  ;;  %v5423_v37 = vcombine.high %v98_v26, %v106_v27  ;;  %v6064_v9 = vld [vmem:[%s9144_s3 + $0xe0] ss:$16 sps:$4 sm:$0xff]   ;;  %v6090_v23 = vld [vmem:[%s9144_s3 + $0x64] ss:$16 sps:$4 sm:$0xff]  }
  0x4d   :  { %v6067_v10 = vld [vmem:[%s9144_s3 + $0x2e0] ss:$16 sps:$4 sm:$0xff]   ;;  %v6093_v24 = vld [vmem:[%s9144_s3 + $0x264] ss:$16 sps:$4 sm:$0xff]  }
  0x4e   :  { %1049 = vmatpush1.bf16.msra.mxu0 %v5434_v31  ;;  %1090 = vmatpush1.bf16.msra.mxu1 %v5436_v32  ;;  %v99_v31 = vld [vmem:[%s9142_s1 + $0x238] sm:$0xff] }
  0x4f   :  { %1050 = vmatprep.subr.bf16.mxu0 %v5419_v33  ;;  %1091 = vmatprep.subr.bf16.mxu1 %v5421_v35  ;;  %v107_v32 = vld [vmem:[%s9142_s1 + $0x278] sm:$0xff]  ;;  %v5438_v33 = vcombine.low %v114_v18, %v122_v19  ;;  %v90_v35 = vld [vmem:[%s9142_s1 + $0x1f0] sm:$0xff] }
  0x50   :  { %v5425_v38 = vcombine.high %v99_v31, %v107_v32  ;;  %v5407_v44 = vcombine.high %v82_v34, %v90_v35  ;;  %v5406_v48 = vcombine.low %v82_v34, %v90_v35  ;;  %v6076_v18 = vld [vmem:[%s9144_s3 + $0xa0] ss:$16 sps:$4 sm:$0xff]   ;;  %v6108_v35 = vld [vmem:[%s9144_s3 + $0x4] ss:$16 sps:$4 sm:$0xff]  }
  0x51   :  { %v6079_v19 = vld [vmem:[%s9144_s3 + $0x2a0] ss:$16 sps:$4 sm:$0xff]  }
  0x52   :  { %1051 = vmatpush1.bf16.msra.mxu0 %v5418_v39  ;;  %1092 = vmatpush1.bf16.msra.mxu1 %v5420_v40  ;;  %v91_v39 = vld [vmem:[%s9142_s1 + $0x1f8] sm:$0xff]  ;;  %v5422_v40 = vcombine.low %v98_v26, %v106_v27  ;;  %v6091_v26 = vld [vmem:[%s9144_s3 + $0x260] ss:$16 sps:$4 sm:$0xff]   ;;  %v6096_v27 = vld [vmem:[%s9144_s3 + $0x44] ss:$16 sps:$4 sm:$0xff]  }
  0x53   :  { %1052 = vmatprep.subr.bf16.mxu0 %v5403_v41  ;;  %1093 = vmatprep.subr.bf16.mxu1 %v5405_v43  ;;  %v66_v41 = vld [vmem:[%s9142_s1 + $0x130] sm:$0xff]  ;;  %v5424_v43 = vcombine.low %v99_v31, %v107_v32 }
  0x54   :  { %v5391_v52 = vcombine.high %v66_v41, %v74_v42  ;;  %v5390_v56 = vcombine.low %v66_v41, %v74_v42  ;;  %v6102_v31 = vld [vmem:[%s9144_s3 + $0x24] ss:$16 sps:$4 sm:$0xff]   ;;  %v6103_v34 = vld [vmem:[%s9144_s3 + $0x220] ss:$16 sps:$4 sm:$0xff]  }
  0x55   :  { %v6105_v32 = vld [vmem:[%s9144_s3 + $0x224] ss:$16 sps:$4 sm:$0xff]   ;;  %v6115_v41 = vld [vmem:[%s9144_s3 + $0x3e0] ss:$16 sps:$4 sm:$0xff]  }
  0x56   :  { %1053 = vmatpush1.bf16.msra.mxu0 %v5402_v47  ;;  %1094 = vmatpush1.bf16.msra.mxu1 %v5404_v50  ;;  %v75_v47 = vld [vmem:[%s9142_s1 + $0x178] sm:$0xff]  ;;  %v58_v50 = vld [vmem:[%s9142_s1 + $0xf0] sm:$0xff] }
  0x57   :  { %1054 = vmatprep.subr.bf16.mxu0 %v5387_v51  ;;  %1095 = vmatprep.subr.bf16.mxu1 %v5389_v54  ;;  %v5393_v53 = vcombine.high %v67_v46, %v75_v47  ;;  %v51_v54 = vld [vmem:[%s9142_s1 + $0xb8] sm:$0xff]  ;;  %v5375_v60 = vcombine.high %v50_v49, %v58_v50  ;;  %v5374_v0 = vcombine.low %v50_v49, %v58_v50  ;;  %v6120_v42 = vld [vmem:[%s9144_s3 + $0x1c4] ss:$16 sps:$4 sm:$0xff]   ;;  %v6127_v49 = vld [vmem:[%s9144_s3 + $0x3a0] ss:$16 sps:$4 sm:$0xff]  }
  0x58   :  { %v6132_v50 = vld [vmem:[%s9144_s3 + $0x184] ss:$16 sps:$4 sm:$0xff]  }
  0x5a   :  { %1055 = vmatpush1.bf16.msra.mxu0 %v5386_v55  ;;  %1096 = vmatpush1.bf16.msra.mxu1 %v5388_v58  ;;  %v59_v55 = vld [vmem:[%s9142_s1 + $0xf8] sm:$0xff]  ;;  %v42_v58 = vld [vmem:[%s9142_s1 + $0x70] sm:$0xff] }
  0x5b   :  { %1056 = vmatprep.subr.bf16.mxu0 %v5371_v59  ;;  %1097 = vmatprep.subr.bf16.mxu1 %v5373_v62  ;;  %v5392_v59 = vcombine.low %v67_v46, %v75_v47  ;;  %v5377_v61 = vcombine.high %v51_v54, %v59_v55  ;;  %v35_v62 = vld [vmem:[%s9142_s1 + $0x38] sm:$0xff]  ;;  %v5376_v1 = vcombine.low %v51_v54, %v59_v55  ;;  %v6126_v46 = vld [vmem:[%s9144_s3 + $0x1a4] ss:$16 sps:$4 sm:$0xff]  }
  0x5c   :  { %v5358_v6 = vcombine.low %v34_v57, %v42_v58  ;;  %v6129_v47 = vld [vmem:[%s9144_s3 + $0x3a4] ss:$16 sps:$4 sm:$0xff]  }
  0x5d   :  { %v6138_v54 = vld [vmem:[%s9144_s3 + $0x164] ss:$16 sps:$4 sm:$0xff]  }
  0x5e   :  { %1057 = vmatpush1.bf16.msra.mxu0 %v5370_v63  ;;  %1098 = vmatpush1.bf16.msra.mxu1 %v5372_v2  ;;  %v43_v63 = vld [vmem:[%s9142_s1 + $0x78] sm:$0xff]  ;;  %v5359_v2 = vcombine.high %v34_v57, %v42_v58  ;;  %v6141_v55 = vld [vmem:[%s9144_s3 + $0x364] ss:$16 sps:$4 sm:$0xff]   ;;  %v6139_v57 = vld [vmem:[%s9144_s3 + $0x360] ss:$16 sps:$4 sm:$0xff]  }
  0x5f   :  { %1058 = vmatprep.subr.bf16.mxu0 %v5355_v4  ;;  %1099 = vmatprep.subr.bf16.mxu1 %v5357_v7  ;;  %v5361_v4 = vcombine.high %v35_v62, %v43_v63  ;;  %v6069_v7 = vld [vmem:[%s9144_s3 + $0x2e4] ss:$16 sps:$4 sm:$0xff]  }
  0x60   :  { %v6144_v58 = vld [vmem:[%s9144_s3 + $0x144] ss:$16 sps:$4 sm:$0xff]  }
  0x62   :  { %1059 = vmatpush1.bf16.msra.mxu0 %v5354_v8  ;;  %1100 = vmatpush1.bf16.msra.mxu1 %v5356_v11  ;;  %v5360_v8 = vcombine.low %v35_v62, %v43_v63  ;;  %v6072_v11 = vld [vmem:[%s9144_s3 + $0xc4] ss:$16 sps:$4 sm:$0xff]  }
  0x63   :  { %1126 = vmatprep.subr.bf16.mxu0 %v5471_v13  ;;  %1167 = vmatprep.subr.bf16.mxu1 %v5473_v16  ;;  %v6075_v13 = vld [vmem:[%s9144_s3 + $0x2c4] ss:$16 sps:$4 sm:$0xff]  }
  0x64   :  { %v6078_v16 = vld [vmem:[%s9144_s3 + $0xa4] ss:$16 sps:$4 sm:$0xff]  }
  0x65   :  { %1077 = vmatmul.mubr.bf16.vlgmr.msra.gmra.mxu0 %v7031_v12  ;;  %1118 = vmatmul.mubr.bf16.vlgmr.msra.gmra.mxu1 %v7031_v12  ;;  %v6150_v62 = vld [vmem:[%s9144_s3 + $0x124] ss:$16 sps:$4 sm:$0xff]  }
  0x66   :  { %1127 = vmatpush1.bf16.msra.mxu0 %v5470_v17  ;;  %1168 = vmatpush1.bf16.msra.mxu1 %v5472_v20  ;;  %v6081_v17 = vld [vmem:[%s9144_s3 + $0x2a4] ss:$16 sps:$4 sm:$0xff]  }
  0x67   :  { %1128 = vmatprep.subr.bf16.mxu0 %v5455_v21  ;;  %1169 = vmatprep.subr.bf16.mxu1 %v5457_v22  ;;  %v6087_v20 = vld [vmem:[%s9144_s3 + $0x284] ss:$16 sps:$4 sm:$0xff]   ;;  %v6082_v21 = vld [vmem:[%s9144_s3 + $0x80] ss:$16 sps:$4 sm:$0xff]  }
  0x68   :  { %1158 = vmatprep.mubr.bf16.mxu0 %v6865_v3  ;;  %1199 = vmatprep.mubr.bf16.mxu1 %v6865_v3  ;;  %v83_v3 = vld [vmem:[%s9142_s1 + $0x1b8] sm:$0xff]  ;;  %v6085_v22 = vld [vmem:[%s9144_s3 + $0x280] ss:$16 sps:$4 sm:$0xff]   ;;  %v6153_v63 = vld [vmem:[%s9144_s3 + $0x324] ss:$16 sps:$4 sm:$0xff]  }
  0x69   :  { %v5409_v45 = vcombine.high %v83_v3, %v91_v39  ;;  %v5408_v51 = vcombine.low %v83_v3, %v91_v39  ;;  %v6114_v3 = vld [vmem:[%s9144_s3 + $0x1e4] ss:$16 sps:$4 sm:$0xff]  }
  0x6a   :  { %1129 = vmatpush1.bf16.msra.mxu0 %v5454_v25  ;;  %1170 = vmatpush1.bf16.msra.mxu1 %v5456_v28  ;;  %v6088_v25 = vld [vmem:[%s9144_s3 + $0x60] ss:$16 sps:$4 sm:$0xff]   ;;  %v6099_v28 = vld [vmem:[%s9144_s3 + $0x244] ss:$16 sps:$4 sm:$0xff]  }
  0x6b   :  { %1130 = vmatprep.subr.bf16.mxu0 %v5439_v29  ;;  %1171 = vmatprep.subr.bf16.mxu1 %v5441_v30  ;;  %v6094_v29 = vld [vmem:[%s9144_s3 + $0x40] ss:$16 sps:$4 sm:$0xff]   ;;  %v6117_v39 = vld [vmem:[%s9144_s3 + $0x3e4] ss:$16 sps:$4 sm:$0xff]  }
  0x6c   :  { %v6097_v30 = vld [vmem:[%s9144_s3 + $0x240] ss:$16 sps:$4 sm:$0xff]  }
  0x6e   :  { %1131 = vmatpush1.bf16.msra.mxu0 %v5438_v33  ;;  %1172 = vmatpush1.bf16.msra.mxu1 %v5440_v36  ;;  %v6100_v33 = vld [vmem:[%s9144_s3 + $0x20] ss:$16 sps:$4 sm:$0xff]   ;;  %v6111_v36 = vld [vmem:[%s9144_s3 + $0x204] ss:$16 sps:$4 sm:$0xff]  }
  0x6f   :  { %1132 = vmatprep.subr.bf16.mxu0 %v5423_v37  ;;  %1173 = vmatprep.subr.bf16.mxu1 %v5425_v38  ;;  %v6106_v37 = vld [vmem:[%s9144_s3] ss:$16 sps:$4 sm:$0xff]  }
  0x70   :  { %v6109_v38 = vld [vmem:[%s9144_s3 + $0x200] ss:$16 sps:$4 sm:$0xff]  }
  0x72   :  { %1133 = vmatpush1.bf16.msra.mxu0 %v5422_v40  ;;  %1174 = vmatpush1.bf16.msra.mxu1 %v5424_v43  ;;  %v6112_v40 = vld [vmem:[%s9144_s3 + $0x1e0] ss:$16 sps:$4 sm:$0xff]   ;;  %v6123_v43 = vld [vmem:[%s9144_s3 + $0x3c4] ss:$16 sps:$4 sm:$0xff]  }
  0x73   :  { %1134 = vmatprep.subr.bf16.mxu0 %v5407_v44  ;;  %1175 = vmatprep.subr.bf16.mxu1 %v5409_v45  ;;  %v6118_v44 = vld [vmem:[%s9144_s3 + $0x1c0] ss:$16 sps:$4 sm:$0xff]  }
  0x74   :  { %v6121_v45 = vld [vmem:[%s9144_s3 + $0x3c0] ss:$16 sps:$4 sm:$0xff]  }
  0x76   :  { %1135 = vmatpush1.bf16.msra.mxu0 %v5406_v48  ;;  %1176 = vmatpush1.bf16.msra.mxu1 %v5408_v51  ;;  %v6124_v48 = vld [vmem:[%s9144_s3 + $0x1a0] ss:$16 sps:$4 sm:$0xff]   ;;  %v6135_v51 = vld [vmem:[%s9144_s3 + $0x384] ss:$16 sps:$4 sm:$0xff]  }
  0x77   :  { %1136 = vmatprep.subr.bf16.mxu0 %v5391_v52  ;;  %1177 = vmatprep.subr.bf16.mxu1 %v5393_v53  ;;  %v6130_v52 = vld [vmem:[%s9144_s3 + $0x180] ss:$16 sps:$4 sm:$0xff]  }
  0x78   :  { %v6133_v53 = vld [vmem:[%s9144_s3 + $0x380] ss:$16 sps:$4 sm:$0xff]  }
  0x7a   :  { %1137 = vmatpush1.bf16.msra.mxu0 %v5390_v56  ;;  %1178 = vmatpush1.bf16.msra.mxu1 %v5392_v59  ;;  %v6136_v56 = vld [vmem:[%s9144_s3 + $0x160] ss:$16 sps:$4 sm:$0xff]   ;;  %v6147_v59 = vld [vmem:[%s9144_s3 + $0x344] ss:$16 sps:$4 sm:$0xff]  }
  0x7b   :  { %1138 = vmatprep.subr.bf16.mxu0 %v5375_v60  ;;  %1179 = vmatprep.subr.bf16.mxu1 %v5377_v61  ;;  %v6142_v60 = vld [vmem:[%s9144_s3 + $0x140] ss:$16 sps:$4 sm:$0xff]  }
  0x7c   :  { %v6145_v61 = vld [vmem:[%s9144_s3 + $0x340] ss:$16 sps:$4 sm:$0xff]  }
  0x7e   :  { %1139 = vmatpush1.bf16.msra.mxu0 %v5374_v0  ;;  %1180 = vmatpush1.bf16.msra.mxu1 %v5376_v1  ;;  %v6148_v0 = vld [vmem:[%s9144_s3 + $0x120] ss:$16 sps:$4 sm:$0xff]  }
  0x7f   :  { %1140 = vmatprep.subr.bf16.mxu0 %v5359_v2  ;;  %1181 = vmatprep.subr.bf16.mxu1 %v5361_v4  ;;  %v6151_v1 = vld [vmem:[%s9144_s3 + $0x320] ss:$16 sps:$4 sm:$0xff]   ;;  %v6156_v2 = vld [vmem:[%s9144_s3 + $0x104] ss:$16 sps:$4 sm:$0xff]  }
  0x80   :  { %v6159_v4 = vld [vmem:[%s9144_s3 + $0x304] ss:$16 sps:$4 sm:$0xff]  }
  0x82   :  { %1141 = vmatpush1.bf16.msra.mxu0 %v5358_v6  ;;  %1182 = vmatpush1.bf16.msra.mxu1 %v5360_v8  ;;  %v6157_v6 = vld [vmem:[%s9144_s3 + $0x300] ss:$16 sps:$4 sm:$0xff]   ;;  %v6165_v8 = vld [vmem:[%s9144_s3 + $0x6e4] ss:$16 sps:$4 sm:$0xff]  }
  0x83   :  { %4334 = vmatprep.subr.bf16.mxu0 %v6066_v5  ;;  %4375 = vmatprep.subr.bf16.mxu1 %v6069_v7  ;;  %v6154_v5 = vld [vmem:[%s9144_s3 + $0x100] ss:$16 sps:$4 sm:$0xff]   ;;  %v6162_v7 = vld [vmem:[%s9144_s3 + $0x4e4] ss:$16 sps:$4 sm:$0xff]  }
  0x85   :  { %1159 = vmatmul.mubr.bf16.vlgmr.msra.gmra.mxu0 %v7031_v12  ;;  %1200 = vmatmul.mubr.bf16.vlgmr.msra.gmra.mxu1 %v7031_v12  ;;  %v6084_v12 = vld [vmem:[%s9144_s3 + $0x84] ss:$16 sps:$4 sm:$0xff]  }
  0x86   :  { %4335 = vmatpush1.bf16.msra.mxu0 %v6064_v9  ;;  %4376 = vmatpush1.bf16.msra.mxu1 %v6067_v10  ;;  %v160_v9 = vlaneseq }
  0x87   :  { %4336 = vmatprep.subr.bf16.mxu0 %v6072_v11  ;;  %4377 = vmatprep.subr.bf16.mxu1 %v6075_v13  ;;  %v7514_v11 = vld [vmem:[%s9145_s2] sm:$0xff] }
  0x88   :  { %v7509_v10 = vshrl.u32 %v160_v9, 7  ;;  %v6207_v9 = vld [vmem:[%s9144_s3 + $0x604] ss:$16 sps:$4 sm:$0xff]  }
  0x8a   :  { %4337 = vmatpush1.bf16.msra.mxu0 %v6070_v14  ;;  %4378 = vmatpush1.bf16.msra.mxu1 %v6073_v15  ;;  %v7517_v13 = vsub.s32 0, %v7509_v10  ;;  %v7520_v14 = vsub.s32 2, %v7509_v10  ;;  %v7523_v15 = vsub.s32 1, %v7509_v10 }
  0x8b   :  { %4338 = vmatprep.subr.bf16.mxu0 %v6078_v16  ;;  %4379 = vmatprep.subr.bf16.mxu1 %v6081_v17  ;;  %v7526_v16 = vsub.s32 3, %v7509_v10 }
  0x8c   :  { %v163_v17 = vrot.slane %v7514_v11, %v7517_v13 }
  0x8e   :  { %4339 = vmatpush1.bf16.msra.mxu0 %v6076_v18  ;;  %4380 = vmatpush1.bf16.msra.mxu1 %v6079_v19  ;;  %v171_v18 = vrot.slane %v7514_v11, %v7520_v14  ;;  %v167_v19 = vrot.slane %v7514_v11, %v7523_v15 }
  0x8f   :  { %4340 = vmatprep.subr.bf16.mxu0 %v6084_v12  ;;  %4381 = vmatprep.subr.bf16.mxu1 %v6087_v20  ;;  %v175_v20 = vrot.slane %v7514_v11, %v7526_v16 }
  0x92   :  { %4341 = vmatpush1.bf16.msra.mxu0 %v6082_v21  ;;  %4382 = vmatpush1.bf16.msra.mxu1 %v6085_v22 }
  0x93   :  { %4342 = vmatprep.subr.bf16.mxu0 %v6090_v23  ;;  %4383 = vmatprep.subr.bf16.mxu1 %v6093_v24 }
  0x96   :  { %4343 = vmatpush1.bf16.msra.mxu0 %v6088_v25  ;;  %4384 = vmatpush1.bf16.msra.mxu1 %v6091_v26 }
  0x97   :  { %4344 = vmatprep.subr.bf16.mxu0 %v6096_v27  ;;  %4385 = vmatprep.subr.bf16.mxu1 %v6099_v28 }
  0x9a   :  { %4345 = vmatpush1.bf16.msra.mxu0 %v6094_v29  ;;  %4386 = vmatpush1.bf16.msra.mxu1 %v6097_v30 }
  0x9b   :  { %4346 = vmatprep.subr.bf16.mxu0 %v6102_v31  ;;  %4387 = vmatprep.subr.bf16.mxu1 %v6105_v32 }
  0x9e   :  { %4347 = vmatpush1.bf16.msra.mxu0 %v6100_v33  ;;  %4388 = vmatpush1.bf16.msra.mxu1 %v6103_v34  ;;  %v6160_v33 = vld [vmem:[%s9144_s3 + $0x4e0] ss:$16 sps:$4 sm:$0xff]  }
  0x9f   :  { %4348 = vmatprep.subr.bf16.mxu0 %v6108_v35  ;;  %4389 = vmatprep.subr.bf16.mxu1 %v6111_v36  ;;  %v6163_v36 = vld [vmem:[%s9144_s3 + $0x6e0] ss:$16 sps:$4 sm:$0xff]  }
  0xa2   :  { %4349 = vmatpush1.bf16.msra.mxu0 %v6106_v37  ;;  %4390 = vmatpush1.bf16.msra.mxu1 %v6109_v38  ;;  %v6168_v37 = vld [vmem:[%s9144_s3 + $0x4c4] ss:$16 sps:$4 sm:$0xff]  }
  0xa3   :  { %4350 = vmatprep.subr.bf16.mxu0 %v6114_v3  ;;  %4391 = vmatprep.subr.bf16.mxu1 %v6117_v39 }
  0xa6   :  { %4351 = vmatpush2.bf16.msra.mxu0 %v6112_v40  ;;  %4392 = vmatpush2.bf16.msra.mxu1 %v6115_v41 }
  0xa7   :  { %4352 = vmatprep.subr.bf16.mxu0 %v6120_v42  ;;  %4393 = vmatprep.subr.bf16.mxu1 %v6123_v43  ;;  %v6171_v42 = vld [vmem:[%s9144_s3 + $0x6c4] ss:$16 sps:$4 sm:$0xff]   ;;  %v6166_v43 = vld [vmem:[%s9144_s3 + $0x4c0] ss:$16 sps:$4 sm:$0xff]  }
  0xaa   :  { %4353 = vmatpush2.bf16.msra.mxu0 %v6118_v44  ;;  %4394 = vmatpush2.bf16.msra.mxu1 %v6121_v45  ;;  %v6169_v44 = vld [vmem:[%s9144_s3 + $0x6c0] ss:$16 sps:$4 sm:$0xff]   ;;  %v6174_v45 = vld [vmem:[%s9144_s3 + $0x4a4] ss:$16 sps:$4 sm:$0xff]  }
  0xab   :  { %4354 = vmatprep.subr.bf16.mxu0 %v6126_v46  ;;  %4395 = vmatprep.subr.bf16.mxu1 %v6129_v47  ;;  %v6172_v46 = vld [vmem:[%s9144_s3 + $0x4a0] ss:$16 sps:$4 sm:$0xff]   ;;  %v6177_v47 = vld [vmem:[%s9144_s3 + $0x6a4] ss:$16 sps:$4 sm:$0xff]  }
  0xae   :  { %4355 = vmatpush2.bf16.msra.mxu0 %v6124_v48  ;;  %4396 = vmatpush2.bf16.msra.mxu1 %v6127_v49  ;;  %v6175_v48 = vld [vmem:[%s9144_s3 + $0x6a0] ss:$16 sps:$4 sm:$0xff]   ;;  %v6180_v49 = vld [vmem:[%s9144_s3 + $0x484] ss:$16 sps:$4 sm:$0xff]  }
  0xaf   :  { %4356 = vmatprep.subr.bf16.mxu0 %v6132_v50  ;;  %4397 = vmatprep.subr.bf16.mxu1 %v6135_v51  ;;  %v6178_v50 = vld [vmem:[%s9144_s3 + $0x480] ss:$16 sps:$4 sm:$0xff]   ;;  %v6183_v51 = vld [vmem:[%s9144_s3 + $0x684] ss:$16 sps:$4 sm:$0xff]  }
  0xb2   :  { %4357 = vmatpush2.bf16.msra.mxu0 %v6130_v52  ;;  %4398 = vmatpush2.bf16.msra.mxu1 %v6133_v53  ;;  %v6181_v52 = vld [vmem:[%s9144_s3 + $0x680] ss:$16 sps:$4 sm:$0xff]   ;;  %v6186_v53 = vld [vmem:[%s9144_s3 + $0x464] ss:$16 sps:$4 sm:$0xff]  }
  0xb3   :  { %4358 = vmatprep.subr.bf16.mxu0 %v6138_v54  ;;  %4399 = vmatprep.subr.bf16.mxu1 %v6141_v55  ;;  %v6184_v54 = vld [vmem:[%s9144_s3 + $0x460] ss:$16 sps:$4 sm:$0xff]   ;;  %v6189_v55 = vld [vmem:[%s9144_s3 + $0x664] ss:$16 sps:$4 sm:$0xff]  }
  0xb6   :  { %4359 = vmatpush2.bf16.msra.mxu0 %v6136_v56  ;;  %4400 = vmatpush2.bf16.msra.mxu1 %v6139_v57  ;;  %v6187_v56 = vld [vmem:[%s9144_s3 + $0x660] ss:$16 sps:$4 sm:$0xff]   ;;  %v6192_v57 = vld [vmem:[%s9144_s3 + $0x444] ss:$16 sps:$4 sm:$0xff]  }
  0xb7   :  { %4360 = vmatprep.subr.bf16.mxu0 %v6144_v58  ;;  %4401 = vmatprep.subr.bf16.mxu1 %v6147_v59  ;;  %v6190_v58 = vld [vmem:[%s9144_s3 + $0x440] ss:$16 sps:$4 sm:$0xff]   ;;  %v6195_v59 = vld [vmem:[%s9144_s3 + $0x644] ss:$16 sps:$4 sm:$0xff]  }
  0xba   :  { %4361 = vmatpush2.bf16.msra.mxu0 %v6142_v60  ;;  %4402 = vmatpush2.bf16.msra.mxu1 %v6145_v61  ;;  %v182_v60 = vsub.s32 5, %v7509_v10  ;;  %v6193_v61 = vld [vmem:[%s9144_s3 + $0x640] ss:$16 sps:$4 sm:$0xff]  }
  0xbb   :  { %4362 = vmatprep.subr.bf16.mxu0 %v6150_v62  ;;  %4403 = vmatprep.subr.bf16.mxu1 %v6153_v63  ;;  %v6198_v62 = vld [vmem:[%s9144_s3 + $0x424] ss:$16 sps:$4 sm:$0xff]   ;;  %v190_v63 = vsub.s32 7, %v7509_v10 }
  0xbe   :  { %4363 = vmatpush2.bf16.msra.mxu0 %v6148_v0  ;;  %4404 = vmatpush2.bf16.msra.mxu1 %v6151_v1  ;;  %v6196_v0 = vld [vmem:[%s9144_s3 + $0x420] ss:$16 sps:$4 sm:$0xff]   ;;  %v6201_v1 = vld [vmem:[%s9144_s3 + $0x624] ss:$16 sps:$4 sm:$0xff]  }
  0xbf   :  { %4364 = vmatprep.subr.bf16.mxu0 %v6156_v2  ;;  %4405 = vmatprep.subr.bf16.mxu1 %v6159_v4  ;;  %v183_v2 = vrot.slane %v7514_v11, %v182_v60  ;;  %v6199_v4 = vld [vmem:[%s9144_s3 + $0x620] ss:$16 sps:$4 sm:$0xff]  }
  0xc2   :  { %4365 = vmatpush2.bf16.msra.mxu0 %v6154_v5  ;;  %4406 = vmatpush2.bf16.msra.mxu1 %v6157_v6  ;;  %v6204_v5 = vld [vmem:[%s9144_s3 + $0x404] ss:$16 sps:$4 sm:$0xff]  }
  0xc3   :  { %4416 = vmatprep.subr.bf16.mxu0 %v6162_v7  ;;  %4457 = vmatprep.subr.bf16.mxu1 %v6165_v8  ;;  %v191_v7 = vrot.slane %v7514_v11, %v190_v63  ;;  %v6202_v8 = vld [vmem:[%s9144_s3 + $0x400] ss:$16 sps:$4 sm:$0xff]  }
  0xe5   :  { %v914_v12 = vpop.f32.mrf.mxu0  ;;  %v955_v22 = vpop.f32.mrf.mxu1 }
  0xe6   :  { %v915_v21 = vadd.f32 %v914_v12, %v163_v17  ;;  %v956_v23 = vadd.f32 %v955_v22, %v171_v18 }
  0xe7   :  { %v916_v24 = vpop.f32.mrf.mxu0  ;;  %v957_v26 = vpop.f32.mrf.mxu1 }
  0xe8   :  { %v917_v25 = vadd.f32 %v916_v24, %v167_v19  ;;  %v1208_v27 = vmax.f32 %v915_v21, 0.0  ;;  %v1210_v28 = vmax.f32 %v956_v23, 0.0  ;;  %v958_v29 = vadd.f32 %v957_v26, %v175_v20  ;;  %v6205_v20 = vld [vmem:[%s9144_s3 + $0x600] ss:$16 sps:$4 sm:$0xff]   ;;  %v6210_v21 = vld [vmem:[%s9144_s3 + $0x5e4] ss:$16 sps:$4 sm:$0xff]  }
  0xe9   :  { %v918_v30 = vpop.f32.mrf.mxu0  ;;  %v959_v32 = vpop.f32.mrf.mxu1  ;;  %v6208_v24 = vld [vmem:[%s9144_s3 + $0x5e0] ss:$16 sps:$4 sm:$0xff]  }
  0xea   :  { %v1209_v31 = vmax.f32 %v917_v25, 0.0  ;;  %v1211_v34 = vmax.f32 %v958_v29, 0.0  ;;  %v7545_v38 = vpack.c.bf16 %v1210_v28, %v1210_v28  ;;  %v7549_v40 = vpack.c.bf16 %v1208_v27, %v1208_v27  ;;  %v6213_v25 = vld [vmem:[%s9144_s3 + $0x7e4] ss:$16 sps:$4 sm:$0xff]   ;;  %v6211_v32 = vld [vmem:[%s9144_s3 + $0x7e0] ss:$16 sps:$4 sm:$0xff]  }
  0xeb   :  { %v919_v35 = vpop.f32.mrf.mxu0  ;;  %v960_v39 = vpop.f32.mrf.mxu1 }
  0xec   :  { %v7547_v3 = vpack.c.bf16 %v1209_v31, %v1209_v31  ;;  %v7551_v41 = vpack.c.bf16 %v1211_v34, %v1211_v34  ;;  %v6214_v35 = vld [vmem:[%s9144_s3 + $0x5c0] ss:$16 sps:$4 sm:$0xff]   ;;  %v6222_v39 = vld [vmem:[%s9144_s3 + $0x5a4] ss:$16 sps:$4 sm:$0xff]  }
  0xee   :  { %4366 = vmatprep.mubr.bf16.mxu0 %v7547_v3  ;;  %4407 = vmatprep.mubr.bf16.mxu1 %v7551_v41 }
  0xef   :  { %4367 = vmatmul.mubr.bf16.vlgmr.msra.gmra.mxu0 %v7549_v40  ;;  %4408 = vmatmul.mubr.bf16.vlgmr.msra.gmra.mxu1 %v7545_v38 }
  0xf0   :  { %4417 = vmatpush1.bf16.msra.mxu0 %v6160_v33  ;;  %4458 = vmatpush1.bf16.msra.mxu1 %v6163_v36  ;;  %v6216_v33 = vld [vmem:[%s9144_s3 + $0x5c4] ss:$16 sps:$4 sm:$0xff]  }
  0xf1   :  { %4418 = vmatprep.subr.bf16.mxu0 %v6168_v37  ;;  %4459 = vmatprep.subr.bf16.mxu1 %v6171_v42  ;;  %v6219_v36 = vld [vmem:[%s9144_s3 + $0x7c4] ss:$16 sps:$4 sm:$0xff]   ;;  %v6217_v37 = vld [vmem:[%s9144_s3 + $0x7c0] ss:$16 sps:$4 sm:$0xff]  }
  0xf2   :  { %v6220_v42 = vld [vmem:[%s9144_s3 + $0x5a0] ss:$16 sps:$4 sm:$0xff]  }
  0xf4   :  { %4419 = vmatpush1.bf16.msra.mxu0 %v6166_v43  ;;  %4460 = vmatpush1.bf16.msra.mxu1 %v6169_v44  ;;  %v6225_v43 = vld [vmem:[%s9144_s3 + $0x7a4] ss:$16 sps:$4 sm:$0xff]   ;;  %v6223_v44 = vld [vmem:[%s9144_s3 + $0x7a0] ss:$16 sps:$4 sm:$0xff]  }
  0xf5   :  { %4420 = vmatprep.subr.bf16.mxu0 %v6174_v45  ;;  %4461 = vmatprep.subr.bf16.mxu1 %v6177_v47  ;;  %v6228_v45 = vld [vmem:[%s9144_s3 + $0x584] ss:$16 sps:$4 sm:$0xff]  }
  0xf6   :  { %v6231_v47 = vld [vmem:[%s9144_s3 + $0x784] ss:$16 sps:$4 sm:$0xff]  }
  0xf8   :  { %4421 = vmatpush1.bf16.msra.mxu0 %v6172_v46  ;;  %4462 = vmatpush1.bf16.msra.mxu1 %v6175_v48  ;;  %v6226_v46 = vld [vmem:[%s9144_s3 + $0x580] ss:$16 sps:$4 sm:$0xff]  }
  0xf9   :  { %4422 = vmatprep.subr.bf16.mxu0 %v6180_v49  ;;  %4463 = vmatprep.subr.bf16.mxu1 %v6183_v51  ;;  %v6229_v48 = vld [vmem:[%s9144_s3 + $0x780] ss:$16 sps:$4 sm:$0xff]   ;;  %v6234_v49 = vld [vmem:[%s9144_s3 + $0x564] ss:$16 sps:$4 sm:$0xff]  }
  0xfa   :  { %v6237_v51 = vld [vmem:[%s9144_s3 + $0x764] ss:$16 sps:$4 sm:$0xff]  }
  0xfc   :  { %4423 = vmatpush1.bf16.msra.mxu0 %v6178_v50  ;;  %4464 = vmatpush1.bf16.msra.mxu1 %v6181_v52  ;;  %v6232_v50 = vld [vmem:[%s9144_s3 + $0x560] ss:$16 sps:$4 sm:$0xff]   ;;  %v186_v52 = vsub.s32 6, %v7509_v10 }
  0xfd   :  { %4424 = vmatprep.subr.bf16.mxu0 %v6186_v53  ;;  %4465 = vmatprep.subr.bf16.mxu1 %v6189_v55  ;;  %v6235_v53 = vld [vmem:[%s9144_s3 + $0x760] ss:$16 sps:$4 sm:$0xff]   ;;  %v6240_v55 = vld [vmem:[%s9144_s3 + $0x544] ss:$16 sps:$4 sm:$0xff]  }
 0x100   :  { %4425 = vmatpush1.bf16.msra.mxu0 %v6184_v54  ;;  %4466 = vmatpush1.bf16.msra.mxu1 %v6187_v56  ;;  %v178_v54 = vsub.s32 4, %v7509_v10  ;;  %v6238_v56 = vld [vmem:[%s9144_s3 + $0x540] ss:$16 sps:$4 sm:$0xff]  }
 0x101   :  { %4426 = vmatprep.subr.bf16.mxu0 %v6192_v57  ;;  %4467 = vmatprep.subr.bf16.mxu1 %v6195_v59  ;;  %v6243_v57 = vld [vmem:[%s9144_s3 + $0x744] ss:$16 sps:$4 sm:$0xff]  }
 0x102   :  { %v179_v59 = vrot.slane %v7514_v11, %v178_v54 }
 0x104   :  { %4427 = vmatpush1.bf16.msra.mxu0 %v6190_v58  ;;  %4468 = vmatpush1.bf16.msra.mxu1 %v6193_v61  ;;  %v187_v58 = vrot.slane %v7514_v11, %v186_v52  ;;  %v6241_v61 = vld [vmem:[%s9144_s3 + $0x740] ss:$16 sps:$4 sm:$0xff]  }
 0x105   :  { %4428 = vmatprep.subr.bf16.mxu0 %v6198_v62  ;;  %v7634_v6 = vpop.f32.mrf.mxu0  ;;  %4469 = vmatprep.subr.bf16.mxu1 %v6201_v1  ;;  %v7645_v17 = vpop.f32.mrf.mxu1  ;;  %v6246_v62 = vld [vmem:[%s9144_s3 + $0x524] ss:$16 sps:$4 sm:$0xff]   ;;  %v6244_v11 = vld [vmem:[%s9144_s3 + $0x520] ss:$16 sps:$4 sm:$0xff]  }
 0x106   :  { %v6249_v1 = vld [vmem:[%s9144_s3 + $0x724] ss:$16 sps:$4 sm:$0xff]  }
 0x107   :  { %v998_v18 = vpop.f32.mrf.mxu0  ;;  %v1039_v12 = vpop.f32.mrf.mxu1 }
 0x108   :  { %4429 = vmatpush1.bf16.msra.mxu0 %v6196_v0  ;;  %v999_v19 = vadd.f32 %v998_v18, %v183_v2  ;;  %4470 = vmatpush1.bf16.msra.mxu1 %v6199_v4  ;;  %v1040_v23 = vadd.f32 %v1039_v12, %v191_v7  ;;  %v7742_v0 = vld [vmem:[%s9145_s2 + $0x8] sm:$0xff]  ;;  %v1038_v2 = vadd.f32 %v7645_v17, %v187_v58  ;;  %v6247_v7 = vld [vmem:[%s9144_s3 + $0x720] ss:$16 sps:$4 sm:$0xff]   ;;  %v6255_v18 = vld [vmem:[%s9144_s3 + $0x704] ss:$16 sps:$4 sm:$0xff]  }
 0x109   :  { %4430 = vmatprep.subr.bf16.mxu0 %v6204_v5  ;;  %v1000_v22 = vpop.f32.mrf.mxu0  ;;  %4471 = vmatprep.subr.bf16.mxu1 %v6207_v9  ;;  %v1041_v27 = vpop.f32.mrf.mxu1  ;;  %v199_v4 = vrot.slane %v7742_v0, %v7523_v15  ;;  %v997_v5 = vadd.f32 %v7634_v6, %v179_v59  ;;  %v207_v17 = vrot.slane %v7742_v0, %v7526_v16  ;;  %v6250_v6 = vld [vmem:[%s9144_s3 + $0x500] ss:$16 sps:$4 sm:$0xff]   ;;  %v6282_v59 = vld [vmem:[%s9144_s3 + $0x864] ss:$16 sps:$4 sm:$0xff]  }
 0x10a   :  { %v1213_v26 = vmax.f32 %v999_v19, 0.0  ;;  %v1215_v28 = vmax.f32 %v1040_v23, 0.0  ;;  %v6277_v58 = vld [vmem:[%s9144_s3 + $0xa80] ss:$16 sps:$4 sm:$0xff]  }
 0x10b   :  { %v1001_v29 = vpop.f32.mrf.mxu0  ;;  %v1042_v31 = vpop.f32.mrf.mxu1  ;;  %v1212_v23 = vmax.f32 %v997_v5, 0.0  ;;  %v6289_v5 = vld [vmem:[%s9144_s3 + $0xa40] ss:$16 sps:$4 sm:$0xff]  }
 0x10c   :  { %4431 = vmatpush1.bf16.msra.mxu0 %v6202_v8  ;;  %v7659_v30 = vpack.c.bf16 %v1213_v26, %v1213_v26  ;;  %4472 = vmatpush1.bf16.msra.mxu1 %v6205_v20  ;;  %v7667_v34 = vpack.c.bf16 %v1215_v28, %v1215_v28  ;;  %v6252_v8 = vld [vmem:[%s9144_s3 + $0x504] ss:$16 sps:$4 sm:$0xff]   ;;  %v1214_v20 = vmax.f32 %v1038_v2, 0.0  ;;  %v6256_v28 = vld [vmem:[%s9144_s3 + $0x8e0] ss:$16 sps:$4 sm:$0xff]  }
 0x10d   :  { %4432 = vmatprep.subr.bf16.mxu0 %v6210_v21  ;;  %4473 = vmatprep.subr.bf16.mxu1 %v6213_v25  ;;  %v6258_v25 = vld [vmem:[%s9144_s3 + $0x8e4] ss:$16 sps:$4 sm:$0xff]  }
 0x10e   :  { %4448 = vmatprep.mubr.bf16.mxu0 %v7659_v30  ;;  %4489 = vmatprep.mubr.bf16.mxu1 %v7667_v34  ;;  %v6261_v29 = vld [vmem:[%s9144_s3 + $0xae4] ss:$16 sps:$4 sm:$0xff]  }
 0x10f   :  { %v6291_v2 = vld [vmem:[%s9144_s3 + $0xa44] ss:$16 sps:$4 sm:$0xff]  }
 0x110   :  { %4433 = vmatpush2.bf16.msra.mxu0 %v6208_v24  ;;  %4474 = vmatpush2.bf16.msra.mxu1 %v6211_v32  ;;  %v6253_v24 = vld [vmem:[%s9144_s3 + $0x700] ss:$16 sps:$4 sm:$0xff]  }
 0x111   :  { %4434 = vmatprep.subr.bf16.mxu0 %v6216_v33  ;;  %4475 = vmatprep.subr.bf16.mxu1 %v6219_v36  ;;  %v6259_v33 = vld [vmem:[%s9144_s3 + $0xae0] ss:$16 sps:$4 sm:$0xff]  }
 0x114   :  { %4435 = vmatpush2.bf16.msra.mxu0 %v6214_v35  ;;  %4476 = vmatpush2.bf16.msra.mxu1 %v6217_v37  ;;  %v6264_v35 = vld [vmem:[%s9144_s3 + $0x8c4] ss:$16 sps:$4 sm:$0xff]  }
 0x115   :  { %4436 = vmatprep.subr.bf16.mxu0 %v6222_v39  ;;  %4477 = vmatprep.subr.bf16.mxu1 %v6225_v43  ;;  %v7790_v39 = vpack.c.bf16 %v1214_v20, %v1214_v20  ;;  %v7792_v43 = vpack.c.bf16 %v1212_v23, %v1212_v23  ;;  %v6300_v20 = vld [vmem:[%s9144_s3 + $0x804] ss:$16 sps:$4 sm:$0xff]  }
 0x118   :  { %4437 = vmatpush2.bf16.msra.mxu0 %v6220_v42  ;;  %4478 = vmatpush2.bf16.msra.mxu1 %v6223_v44  ;;  %v6267_v44 = vld [vmem:[%s9144_s3 + $0xac4] ss:$16 sps:$4 sm:$0xff]  }
 0x119   :  { %4438 = vmatprep.subr.bf16.mxu0 %v6228_v45  ;;  %4479 = vmatprep.subr.bf16.mxu1 %v6231_v47  ;;  %v6262_v47 = vld [vmem:[%s9144_s3 + $0x8c0] ss:$16 sps:$4 sm:$0xff]  }
 0x11c   :  { %4439 = vmatpush2.bf16.msra.mxu0 %v6226_v46  ;;  %4480 = vmatpush2.bf16.msra.mxu1 %v6229_v48  ;;  %v6265_v48 = vld [vmem:[%s9144_s3 + $0xac0] ss:$16 sps:$4 sm:$0xff]  }
 0x11d   :  { %4440 = vmatprep.subr.bf16.mxu0 %v6234_v49  ;;  %4481 = vmatprep.subr.bf16.mxu1 %v6237_v51  ;;  %v6270_v49 = vld [vmem:[%s9144_s3 + $0x8a4] ss:$16 sps:$4 sm:$0xff]   ;;  %v6268_v51 = vld [vmem:[%s9144_s3 + $0x8a0] ss:$16 sps:$4 sm:$0xff]  }
 0x120   :  { %4441 = vmatpush2.bf16.msra.mxu0 %v6232_v50  ;;  %4482 = vmatpush2.bf16.msra.mxu1 %v6235_v53  ;;  %v6273_v50 = vld [vmem:[%s9144_s3 + $0xaa4] ss:$16 sps:$4 sm:$0xff]   ;;  %v6271_v53 = vld [vmem:[%s9144_s3 + $0xaa0] ss:$16 sps:$4 sm:$0xff]  }
 0x121   :  { %4442 = vmatprep.subr.bf16.mxu0 %v6240_v55  ;;  %4483 = vmatprep.subr.bf16.mxu1 %v6243_v57  ;;  %v6276_v55 = vld [vmem:[%s9144_s3 + $0x884] ss:$16 sps:$4 sm:$0xff]   ;;  %v6274_v57 = vld [vmem:[%s9144_s3 + $0x880] ss:$16 sps:$4 sm:$0xff]  }
 0x124   :  { %4443 = vmatpush2.bf16.msra.mxu0 %v6238_v56  ;;  %4484 = vmatpush2.bf16.msra.mxu1 %v6241_v61  ;;  %v6279_v56 = vld [vmem:[%s9144_s3 + $0xa84] ss:$16 sps:$4 sm:$0xff]  }
 0x125   :  { %4444 = vmatprep.subr.bf16.mxu0 %v6246_v62  ;;  %v7760_v9 = vpop.f32.mrf.mxu0  ;;  %4485 = vmatprep.subr.bf16.mxu1 %v6249_v1  ;;  %v7770_v19 = vpop.f32.mrf.mxu1  ;;  %v6285_v61 = vld [vmem:[%s9144_s3 + $0xa64] ss:$16 sps:$4 sm:$0xff]   ;;  %v6280_v62 = vld [vmem:[%s9144_s3 + $0x860] ss:$16 sps:$4 sm:$0xff]  }
 0x126   :  { %v6288_v1 = vld [vmem:[%s9144_s3 + $0x844] ss:$16 sps:$4 sm:$0xff]  }
 0x127   :  { %v1080_v12 = vpop.f32.mrf.mxu0  ;;  %v1121_v22 = vpop.f32.mrf.mxu1 }
 0x128   :  { %4445 = vmatpush2.bf16.msra.mxu0 %v6244_v11  ;;  %v1081_v21 = vadd.f32 %v1080_v12, %v199_v4  ;;  %4486 = vmatpush2.bf16.msra.mxu1 %v6247_v7  ;;  %v1122_v27 = vadd.f32 %v1121_v22, %v207_v17  ;;  %v6283_v11 = vld [vmem:[%s9144_s3 + $0xa60] ss:$16 sps:$4 sm:$0xff]   ;;  %v6294_v7 = vld [vmem:[%s9144_s3 + $0x824] ss:$16 sps:$4 sm:$0xff]   ;;  %v211_v17 = vrot.slane %v7742_v0, %v178_v54 }
 0x129   :  { %4446 = vmatprep.subr.bf16.mxu0 %v6252_v8  ;;  %v1082_v26 = vpop.f32.mrf.mxu0  ;;  %4487 = vmatprep.subr.bf16.mxu1 %v6255_v18  ;;  %v1123_v32 = vpop.f32.mrf.mxu1  ;;  %v6286_v4 = vld [vmem:[%s9144_s3 + $0x840] ss:$16 sps:$4 sm:$0xff]   ;;  %v6297_v8 = vld [vmem:[%s9144_s3 + $0xa24] ss:$16 sps:$4 sm:$0xff]  }
 0x12a   :  { %v1217_v31 = vmax.f32 %v1081_v21, 0.0  ;;  %v1219_v36 = vmax.f32 %v1122_v27, 0.0  ;;  %v6292_v18 = vld [vmem:[%s9144_s3 + $0x820] ss:$16 sps:$4 sm:$0xff]  }
 0x12b   :  { %v1083_v37 = vpop.f32.mrf.mxu0  ;;  %v1124_v42 = vpop.f32.mrf.mxu1  ;;  %v6295_v12 = vld [vmem:[%s9144_s3 + $0xa20] ss:$16 sps:$4 sm:$0xff]  }
 0x12c   :  { %4447 = vmatpush2.bf16.msra.mxu0 %v6250_v6  ;;  %4488 = vmatpush2.bf16.msra.mxu1 %v6253_v24  ;;  %v7797_v45 = vpack.c.bf16 %v1217_v31, %v1217_v31  ;;  %v7800_v46 = vpack.c.bf16 %v1219_v36, %v1219_v36  ;;  %v219_v6 = vrot.slane %v7742_v0, %v186_v52  ;;  %v6303_v52 = vld [vmem:[%s9144_s3 + $0xa04] ss:$16 sps:$4 sm:$0xff]   ;;  %v6301_v27 = vld [vmem:[%s9144_s3 + $0xa00] ss:$16 sps:$4 sm:$0xff]  }
 0x12d   :  { %4498 = vmatprep.subr.bf16.mxu0 %v6258_v25  ;;  %4539 = vmatprep.subr.bf16.mxu1 %v6261_v29  ;;  %v6298_v25 = vld [vmem:[%s9144_s3 + $0x800] ss:$16 sps:$4 sm:$0xff]   ;;  %v6309_v31 = vld [vmem:[%s9144_s3 + $0xbe4] ss:$16 sps:$4 sm:$0xff]  }
 0x12e   :  { %v6307_v37 = vld [vmem:[%s9144_s3 + $0xbe0] ss:$16 sps:$4 sm:$0xff]   ;;  %v6312_v42 = vld [vmem:[%s9144_s3 + $0x9c4] ss:$16 sps:$4 sm:$0xff]  }
 0x12f   :  { %4449 = vmatmul.mubr.bf16.vlgmr.msra.gmra.mxu0 %v7792_v43  ;;  %4490 = vmatmul.mubr.bf16.vlgmr.msra.gmra.mxu1 %v7790_v39 }
 0x130   :  { %4499 = vmatpush1.bf16.msra.mxu0 %v6256_v28  ;;  %4540 = vmatpush1.bf16.msra.mxu1 %v6259_v33  ;;  %v6306_v28 = vld [vmem:[%s9144_s3 + $0x9e4] ss:$16 sps:$4 sm:$0xff]  }
 0x131   :  { %4500 = vmatprep.subr.bf16.mxu0 %v6264_v35  ;;  %4541 = vmatprep.subr.bf16.mxu1 %v6267_v44  ;;  %v6304_v35 = vld [vmem:[%s9144_s3 + $0x9e0] ss:$16 sps:$4 sm:$0xff]   ;;  %v6315_v44 = vld [vmem:[%s9144_s3 + $0xbc4] ss:$16 sps:$4 sm:$0xff]  }
 0x132   :  { %4530 = vmatprep.mubr.bf16.mxu0 %v7797_v45  ;;  %4571 = vmatprep.mubr.bf16.mxu1 %v7800_v46 }
 0x134   :  { %4501 = vmatpush1.bf16.msra.mxu0 %v6262_v47  ;;  %4542 = vmatpush1.bf16.msra.mxu1 %v6265_v48  ;;  %v6310_v47 = vld [vmem:[%s9144_s3 + $0x9c0] ss:$16 sps:$4 sm:$0xff]  }
 0x135   :  { %4502 = vmatprep.subr.bf16.mxu0 %v6270_v49  ;;  %4543 = vmatprep.subr.bf16.mxu1 %v6273_v50  ;;  %v6313_v48 = vld [vmem:[%s9144_s3 + $0xbc0] ss:$16 sps:$4 sm:$0xff]   ;;  %v6318_v49 = vld [vmem:[%s9144_s3 + $0x9a4] ss:$16 sps:$4 sm:$0xff]  }
 0x136   :  { %v6321_v50 = vld [vmem:[%s9144_s3 + $0xba4] ss:$16 sps:$4 sm:$0xff]  }
 0x138   :  { %4503 = vmatpush1.bf16.msra.mxu0 %v6268_v51  ;;  %4544 = vmatpush1.bf16.msra.mxu1 %v6271_v53  ;;  %v6316_v51 = vld [vmem:[%s9144_s3 + $0x9a0] ss:$16 sps:$4 sm:$0xff]  }
 0x139   :  { %4504 = vmatprep.subr.bf16.mxu0 %v6276_v55  ;;  %4545 = vmatprep.subr.bf16.mxu1 %v6279_v56  ;;  %v6319_v53 = vld [vmem:[%s9144_s3 + $0xba0] ss:$16 sps:$4 sm:$0xff]   ;;  %v6324_v55 = vld [vmem:[%s9144_s3 + $0x984] ss:$16 sps:$4 sm:$0xff]  }
 0x13a   :  { %v6327_v56 = vld [vmem:[%s9144_s3 + $0xb84] ss:$16 sps:$4 sm:$0xff]  }
 0x13c   :  { %4505 = vmatpush1.bf16.msra.mxu0 %v6274_v57  ;;  %4546 = vmatpush1.bf16.msra.mxu1 %v6277_v58  ;;  %v6322_v57 = vld [vmem:[%s9144_s3 + $0x980] ss:$16 sps:$4 sm:$0xff]  }
 0x13d   :  { %4506 = vmatprep.subr.bf16.mxu0 %v6282_v59  ;;  %4547 = vmatprep.subr.bf16.mxu1 %v6285_v61  ;;  %v6325_v58 = vld [vmem:[%s9144_s3 + $0xb80] ss:$16 sps:$4 sm:$0xff]   ;;  %v6330_v59 = vld [vmem:[%s9144_s3 + $0x964] ss:$16 sps:$4 sm:$0xff]  }
 0x13e   :  { %v6333_v61 = vld [vmem:[%s9144_s3 + $0xb64] ss:$16 sps:$4 sm:$0xff]  }
 0x140   :  { %4507 = vmatpush1.bf16.msra.mxu0 %v6280_v62  ;;  %4548 = vmatpush1.bf16.msra.mxu1 %v6283_v11  ;;  %v6328_v62 = vld [vmem:[%s9144_s3 + $0x960] ss:$16 sps:$4 sm:$0xff]  }
 0x141   :  { %4508 = vmatprep.subr.bf16.mxu0 %v6288_v1  ;;  %4549 = vmatprep.subr.bf16.mxu1 %v6291_v2  ;;  %v6331_v11 = vld [vmem:[%s9144_s3 + $0xb60] ss:$16 sps:$4 sm:$0xff]   ;;  %v6336_v1 = vld [vmem:[%s9144_s3 + $0x944] ss:$16 sps:$4 sm:$0xff]  }
 0x142   :  { %v6339_v2 = vld [vmem:[%s9144_s3 + $0xb44] ss:$16 sps:$4 sm:$0xff]  }
 0x144   :  { %4509 = vmatpush1.bf16.msra.mxu0 %v6286_v4  ;;  %4550 = vmatpush1.bf16.msra.mxu1 %v6289_v5  ;;  %v6334_v4 = vld [vmem:[%s9144_s3 + $0x940] ss:$16 sps:$4 sm:$0xff]   ;;  %v195_v5 = vrot.slane %v7742_v0, %v7517_v13 }
 0x145   :  { %4510 = vmatprep.subr.bf16.mxu0 %v6294_v7  ;;  %v1160_v54 = vpop.f32.mrf.mxu0  ;;  %4551 = vmatprep.subr.bf16.mxu1 %v6297_v8  ;;  %v1201_v22 = vpop.f32.mrf.mxu1  ;;  %v6337_v7 = vld [vmem:[%s9144_s3 + $0xb40] ss:$16 sps:$4 sm:$0xff]   ;;  %v6342_v8 = vld [vmem:[%s9144_s3 + $0x924] ss:$16 sps:$4 sm:$0xff]  }
 0x146   :  { %v7883_v21 = vadd.f32 %v1160_v54, %v211_v17  ;;  %v7887_v24 = vadd.f32 %v1201_v22, %v219_v6  ;;  %v203_v17 = vrot.slane %v7742_v0, %v7520_v14  ;;  %v6345_v6 = vld [vmem:[%s9144_s3 + $0xb24] ss:$16 sps:$4 sm:$0xff]   ;;  %v1079_v54 = vadd.f32 %v7760_v9, %v195_v5  ;;  %v6346_v22 = vld [vmem:[%s9144_s3 + $0x900] ss:$16 sps:$4 sm:$0xff]  }
 0x147   :  { %v7885_v23 = vpop.f32.mrf.mxu0  ;;  %v7892_v26 = vpop.f32.mrf.mxu1  ;;  %v6385_v5 = vld [vmem:[%s9144_s3 + $0xe40] ss:$16 sps:$4 sm:$0xff]  }
 0x148   :  { %4511 = vmatpush1.bf16.msra.mxu0 %v6292_v18  ;;  %4552 = vmatpush1.bf16.msra.mxu1 %v6295_v12  ;;  %v215_v18 = vrot.slane %v7742_v0, %v182_v60  ;;  %v223_v12 = vrot.slane %v7742_v0, %v190_v63  ;;  %v6348_v60 = vld [vmem:[%s9144_s3 + $0x904] ss:$16 sps:$4 sm:$0xff]   ;;  %v1120_v10 = vadd.f32 %v7770_v19, %v203_v17  ;;  %v6349_v19 = vld [vmem:[%s9144_s3 + $0xb00] ss:$16 sps:$4 sm:$0xff]  }
 0x149   :  { %4512 = vmatprep.subr.bf16.mxu0 %v6300_v20  ;;  %v1164_v29 = vpop.f32.mrf.mxu0  ;;  %4553 = vmatprep.subr.bf16.mxu1 %v6303_v52  ;;  %v1205_v32 = vpop.f32.mrf.mxu1  ;;  %v6340_v20 = vld [vmem:[%s9144_s3 + $0x920] ss:$16 sps:$4 sm:$0xff]   ;;  %v6351_v63 = vld [vmem:[%s9144_s3 + $0xb04] ss:$16 sps:$4 sm:$0xff]  }
 0x14a   :  { %v6343_v52 = vld [vmem:[%s9144_s3 + $0xb20] ss:$16 sps:$4 sm:$0xff]   ;;  %v1163_v0 = vadd.f32 %v7885_v23, %v215_v18  ;;  %v1204_v9 = vadd.f32 %v7892_v26, %v223_v12  ;;  %v6357_v26 = vld [vmem:[%s9144_s3 + $0xee4] ss:$16 sps:$4 sm:$0xff]  }
 0x14b   :  { %v1165_v33 = vpop.f32.mrf.mxu0  ;;  %v1206_v36 = vpop.f32.mrf.mxu1  ;;  %v6388_v17 = vld [vmem:[%s9144_s3 + $0xc20] ss:$16 sps:$4 sm:$0xff]   ;;  %v6396_v18 = vld [vmem:[%s9144_s3 + $0xc04] ss:$16 sps:$4 sm:$0xff]  }
 0x14c   :  { %4513 = vmatpush1.bf16.msra.mxu0 %v6298_v25  ;;  %4554 = vmatpush1.bf16.msra.mxu1 %v6301_v27  ;;  %v1216_v25 = vmax.f32 %v1079_v54, 0.0  ;;  %v6354_v27 = vld [vmem:[%s9144_s3 + $0xce4] ss:$16 sps:$4 sm:$0xff]   ;;  %v1221_v23 = vmax.f32 %v1163_v0, 0.0  ;;  %v1223_v29 = vmax.f32 %v1204_v9, 0.0 }
 0x14d   :  { %4514 = vmatprep.subr.bf16.mxu0 %v6306_v28  ;;  %4555 = vmatprep.subr.bf16.mxu1 %v6309_v31  ;;  %v1218_v28 = vmax.f32 %v1120_v10, 0.0  ;;  %v6352_v31 = vld [vmem:[%s9144_s3 + $0xce0] ss:$16 sps:$4 sm:$0xff]   ;;  %v6399_v12 = vld [vmem:[%s9144_s3 + $0xe04] ss:$16 sps:$4 sm:$0xff]  }
 0x14e   :  { %v8016_v32 = vpack.c.bf16 %v1216_v25, %v1216_v25  ;;  %v6355_v33 = vld [vmem:[%s9144_s3 + $0xee0] ss:$16 sps:$4 sm:$0xff]   ;;  %v6408_v0 = vld [vmem:[%s9144_s3 + $0xdc4] ss:$16 sps:$4 sm:$0xff]  }
 0x14f   :  { %v8024_v36 = vpack.c.bf16 %v1218_v28, %v1218_v28  ;;  %v6397_v54 = vld [vmem:[%s9144_s3 + $0xe00] ss:$16 sps:$4 sm:$0xff]   ;;  %v6411_v9 = vld [vmem:[%s9144_s3 + $0xfc4] ss:$16 sps:$4 sm:$0xff]  }
 0x150   :  { %4515 = vmatpush2.bf16.msra.mxu0 %v6304_v35  ;;  %4556 = vmatpush2.bf16.msra.mxu1 %v6307_v37  ;;  %v6360_v35 = vld [vmem:[%s9144_s3 + $0xcc4] ss:$16 sps:$4 sm:$0xff]   ;;  %v8026_v37 = vpack.c.bf16 %v1221_v23, %v1221_v23  ;;  %v6400_v10 = vld [vmem:[%s9144_s3 + $0xde0] ss:$16 sps:$4 sm:$0xff]  }
 0x151   :  { %4516 = vmatprep.subr.bf16.mxu0 %v6312_v42  ;;  %4557 = vmatprep.subr.bf16.mxu1 %v6315_v44  ;;  %v6363_v42 = vld [vmem:[%s9144_s3 + $0xec4] ss:$16 sps:$4 sm:$0xff]   ;;  %v8031_v44 = vpack.c.bf16 %v1223_v29, %v1223_v29  ;;  %v6409_v25 = vld [vmem:[%s9144_s3 + $0xfc0] ss:$16 sps:$4 sm:$0xff]  }
 0x152   :  { %v6412_v28 = vld [vmem:[%s9144_s3 + $0xda0] ss:$16 sps:$4 sm:$0xff]   ;;  %v6423_v29 = vld [vmem:[%s9144_s3 + $0xf84] ss:$16 sps:$4 sm:$0xff]  }
 0x153   :  { %v6415_v23 = vld [vmem:[%s9144_s3 + $0xfa0] ss:$16 sps:$4 sm:$0xff]  }
 0x154   :  { %4517 = vmatpush2.bf16.msra.mxu0 %v6310_v47  ;;  %4558 = vmatpush2.bf16.msra.mxu1 %v6313_v48  ;;  %v6358_v47 = vld [vmem:[%s9144_s3 + $0xcc0] ss:$16 sps:$4 sm:$0xff]  }
 0x155   :  { %4518 = vmatprep.subr.bf16.mxu0 %v6318_v49  ;;  %4559 = vmatprep.subr.bf16.mxu1 %v6321_v50  ;;  %v6361_v48 = vld [vmem:[%s9144_s3 + $0xec0] ss:$16 sps:$4 sm:$0xff]   ;;  %v6366_v49 = vld [vmem:[%s9144_s3 + $0xca4] ss:$16 sps:$4 sm:$0xff]  }
 0x156   :  { %v6369_v50 = vld [vmem:[%s9144_s3 + $0xea4] ss:$16 sps:$4 sm:$0xff]  }
 0x158   :  { %4519 = vmatpush2.bf16.msra.mxu0 %v6316_v51  ;;  %4560 = vmatpush2.bf16.msra.mxu1 %v6319_v53  ;;  %v6364_v51 = vld [vmem:[%s9144_s3 + $0xca0] ss:$16 sps:$4 sm:$0xff]  }
 0x159   :  { %4520 = vmatprep.subr.bf16.mxu0 %v6324_v55  ;;  %4561 = vmatprep.subr.bf16.mxu1 %v6327_v56  ;;  %v6367_v53 = vld [vmem:[%s9144_s3 + $0xea0] ss:$16 sps:$4 sm:$0xff]   ;;  %v6372_v55 = vld [vmem:[%s9144_s3 + $0xc84] ss:$16 sps:$4 sm:$0xff]  }
 0x15a   :  { %v6375_v56 = vld [vmem:[%s9144_s3 + $0xe84] ss:$16 sps:$4 sm:$0xff]  }
 0x15c   :  { %4521 = vmatpush2.bf16.msra.mxu0 %v6322_v57  ;;  %4562 = vmatpush2.bf16.msra.mxu1 %v6325_v58  ;;  %v6370_v57 = vld [vmem:[%s9144_s3 + $0xc80] ss:$16 sps:$4 sm:$0xff]  }
 0x15d   :  { %4522 = vmatprep.subr.bf16.mxu0 %v6330_v59  ;;  %4563 = vmatprep.subr.bf16.mxu1 %v6333_v61  ;;  %v6373_v58 = vld [vmem:[%s9144_s3 + $0xe80] ss:$16 sps:$4 sm:$0xff]   ;;  %v6378_v59 = vld [vmem:[%s9144_s3 + $0xc64] ss:$16 sps:$4 sm:$0xff]  }
 0x15e   :  { %v6381_v61 = vld [vmem:[%s9144_s3 + $0xe64] ss:$16 sps:$4 sm:$0xff]  }
 0x160   :  { %4523 = vmatpush2.bf16.msra.mxu0 %v6328_v62  ;;  %4564 = vmatpush2.bf16.msra.mxu1 %v6331_v11  ;;  %v6376_v62 = vld [vmem:[%s9144_s3 + $0xc60] ss:$16 sps:$4 sm:$0xff]  }
 0x161   :  { %4524 = vmatprep.subr.bf16.mxu0 %v6336_v1  ;;  %4565 = vmatprep.subr.bf16.mxu1 %v6339_v2  ;;  %v6379_v11 = vld [vmem:[%s9144_s3 + $0xe60] ss:$16 sps:$4 sm:$0xff]   ;;  %v6384_v1 = vld [vmem:[%s9144_s3 + $0xc44] ss:$16 sps:$4 sm:$0xff]  }
 0x162   :  { %v6387_v2 = vld [vmem:[%s9144_s3 + $0xe44] ss:$16 sps:$4 sm:$0xff]  }
 0x164   :  { %4525 = vmatpush2.bf16.msra.mxu0 %v6334_v4  ;;  %4566 = vmatpush2.bf16.msra.mxu1 %v6337_v7  ;;  %v6382_v4 = vld [vmem:[%s9144_s3 + $0xc40] ss:$16 sps:$4 sm:$0xff]   ;;  %v6390_v7 = vld [vmem:[%s9144_s3 + $0xc24] ss:$16 sps:$4 sm:$0xff]  }
 0x165   :  { %4526 = vmatprep.subr.bf16.mxu0 %v6342_v8  ;;  %4567 = vmatprep.subr.bf16.mxu1 %v6345_v6  ;;  %v6393_v8 = vld [vmem:[%s9144_s3 + $0xe24] ss:$16 sps:$4 sm:$0xff]   ;;  %v6391_v6 = vld [vmem:[%s9144_s3 + $0xe20] ss:$16 sps:$4 sm:$0xff]  }
 0x168   :  { %4527 = vmatpush2.bf16.msra.mxu0 %v6340_v20  ;;  %4568 = vmatpush2.bf16.msra.mxu1 %v6343_v52  ;;  %v6394_v20 = vld [vmem:[%s9144_s3 + $0xc00] ss:$16 sps:$4 sm:$0xff]   ;;  %v6402_v52 = vld [vmem:[%s9144_s3 + $0xde4] ss:$16 sps:$4 sm:$0xff]  }
 0x169   :  { %4528 = vmatprep.subr.bf16.mxu0 %v6348_v60  ;;  %4569 = vmatprep.subr.bf16.mxu1 %v6351_v63  ;;  %v6405_v60 = vld [vmem:[%s9144_s3 + $0xfe4] ss:$16 sps:$4 sm:$0xff]   ;;  %v6403_v63 = vld [vmem:[%s9144_s3 + $0xfe0] ss:$16 sps:$4 sm:$0xff]  }
 0x16c   :  { %4529 = vmatpush2.bf16.msra.mxu0 %v6346_v22  ;;  %4570 = vmatpush2.bf16.msra.mxu1 %v6349_v19  ;;  %v6406_v22 = vld [vmem:[%s9144_s3 + $0xdc0] ss:$16 sps:$4 sm:$0xff]   ;;  %v6414_v19 = vld [vmem:[%s9144_s3 + $0xda4] ss:$16 sps:$4 sm:$0xff]  }
 0x16d   :  { %4580 = vmatprep.subr.bf16.mxu0 %v6354_v27  ;;  %4621 = vmatprep.subr.bf16.mxu1 %v6357_v26  ;;  %v6417_v27 = vld [vmem:[%s9144_s3 + $0xfa4] ss:$16 sps:$4 sm:$0xff]  }
 0x16e   :  { %v6420_v26 = vld [vmem:[%s9144_s3 + $0xd84] ss:$16 sps:$4 sm:$0xff]  }
 0x16f   :  { %4531 = vmatmul.mubr.bf16.vlgmr.msra.gmra.mxu0 %v8016_v32  ;;  %4572 = vmatmul.mubr.bf16.vlgmr.msra.gmra.mxu1 %v8024_v36 }
 0x170   :  { %4581 = vmatpush1.bf16.msra.mxu0 %v6352_v31  ;;  %4622 = vmatpush1.bf16.msra.mxu1 %v6355_v33  ;;  %v6418_v31 = vld [vmem:[%s9144_s3 + $0xd80] ss:$16 sps:$4 sm:$0xff]  }
 0x171   :  { %4582 = vmatprep.subr.bf16.mxu0 %v6360_v35  ;;  %4623 = vmatprep.subr.bf16.mxu1 %v6363_v42  ;;  %v6421_v33 = vld [vmem:[%s9144_s3 + $0xf80] ss:$16 sps:$4 sm:$0xff]   ;;  %v6426_v35 = vld [vmem:[%s9144_s3 + $0xd64] ss:$16 sps:$4 sm:$0xff]  }
 0x172   :  { %4612 = vmatprep.mubr.bf16.mxu0 %v8026_v37  ;;  %4653 = vmatprep.mubr.bf16.mxu1 %v8031_v44  ;;  %v6429_v42 = vld [vmem:[%s9144_s3 + $0xf64] ss:$16 sps:$4 sm:$0xff]  }
 0x174   :  { %4583 = vmatpush1.bf16.msra.mxu0 %v6358_v47  ;;  %4624 = vmatpush1.bf16.msra.mxu1 %v6361_v48  ;;  %v6424_v47 = vld [vmem:[%s9144_s3 + $0xd60] ss:$16 sps:$4 sm:$0xff]  }
 0x175   :  { %4584 = vmatprep.subr.bf16.mxu0 %v6366_v49  ;;  %4625 = vmatprep.subr.bf16.mxu1 %v6369_v50  ;;  %v6427_v48 = vld [vmem:[%s9144_s3 + $0xf60] ss:$16 sps:$4 sm:$0xff]   ;;  %v6432_v49 = vld [vmem:[%s9144_s3 + $0xd44] ss:$16 sps:$4 sm:$0xff]  }
 0x176   :  { %v6435_v50 = vld [vmem:[%s9144_s3 + $0xf44] ss:$16 sps:$4 sm:$0xff]  }
 0x178   :  { %4585 = vmatpush1.bf16.msra.mxu0 %v6364_v51  ;;  %4626 = vmatpush1.bf16.msra.mxu1 %v6367_v53  ;;  %v6430_v51 = vld [vmem:[%s9144_s3 + $0xd40] ss:$16 sps:$4 sm:$0xff]  }
 0x179   :  { %4586 = vmatprep.subr.bf16.mxu0 %v6372_v55  ;;  %4627 = vmatprep.subr.bf16.mxu1 %v6375_v56  ;;  %v6433_v53 = vld [vmem:[%s9144_s3 + $0xf40] ss:$16 sps:$4 sm:$0xff]   ;;  %v6438_v55 = vld [vmem:[%s9144_s3 + $0xd24] ss:$16 sps:$4 sm:$0xff]  }
 0x17a   :  { %v6441_v56 = vld [vmem:[%s9144_s3 + $0xf24] ss:$16 sps:$4 sm:$0xff]  }
 0x17c   :  { %4587 = vmatpush1.bf16.msra.mxu0 %v6370_v57  ;;  %4628 = vmatpush1.bf16.msra.mxu1 %v6373_v58  ;;  %v6436_v57 = vld [vmem:[%s9144_s3 + $0xd20] ss:$16 sps:$4 sm:$0xff]  }
 0x17d   :  { %4588 = vmatprep.subr.bf16.mxu0 %v6378_v59  ;;  %4629 = vmatprep.subr.bf16.mxu1 %v6381_v61  ;;  %v6439_v58 = vld [vmem:[%s9144_s3 + $0xf20] ss:$16 sps:$4 sm:$0xff]   ;;  %v6444_v59 = vld [vmem:[%s9144_s3 + $0xd04] ss:$16 sps:$4 sm:$0xff]  }
 0x17e   :  { %v6447_v61 = vld [vmem:[%s9144_s3 + $0xf04] ss:$16 sps:$4 sm:$0xff]  }
 0x180   :  { %4589 = vmatpush1.bf16.msra.mxu0 %v6376_v62  ;;  %4630 = vmatpush1.bf16.msra.mxu1 %v6379_v11  ;;  %v6442_v62 = vld [vmem:[%s9144_s3 + $0xd00] ss:$16 sps:$4 sm:$0xff]  }
 0x181   :  { %4590 = vmatprep.subr.bf16.mxu0 %v6384_v1  ;;  %4631 = vmatprep.subr.bf16.mxu1 %v6387_v2  ;;  %v6445_v11 = vld [vmem:[%s9144_s3 + $0xf00] ss:$16 sps:$4 sm:$0xff]   ;;  %v1220_v1 = vmax.f32 %v7883_v21, 0.0  ;;  %v6450_v2 = vld [vmem:[%s9144_s3 + $0xec] ss:$16 sps:$4 sm:$0xff]  }
 0x182   :  { %v6448_v21 = vld [vmem:[%s9144_s3 + $0xe8] ss:$16 sps:$4 sm:$0xff]  }
 0x184   :  { %4591 = vmatpush1.bf16.msra.mxu0 %v6382_v4  ;;  %4632 = vmatpush1.bf16.msra.mxu1 %v6385_v5  ;;  %v1752_v4 = vld [vmem:[%s9146_s4] sm:$0xf]  ;;  %v1222_v5 = vmax.f32 %v7887_v24, 0.0  ;;  %v6451_v24 = vld [vmem:[%s9144_s3 + $0x2e8] ss:$16 sps:$4 sm:$0xff]  }
 0x185   :  { %4592 = vmatprep.subr.bf16.mxu0 %v6390_v7  ;;  %4633 = vmatprep.subr.bf16.mxu1 %v6393_v8  ;;  %v6453_v7 = vld [vmem:[%s9144_s3 + $0x2ec] ss:$16 sps:$4 sm:$0xff]   ;;  %v1757_v8 = vrot.slane %v1752_v4, %v7517_v13 }
 0x188   :  { %4593 = vmatpush1.bf16.msra.mxu0 %v6388_v17  ;;  %4634 = vmatpush1.bf16.msra.mxu1 %v6391_v6  ;;  %v8226_v17 = vpack.c.bf16 %v1220_v1, %v1220_v1  ;;  %v8231_v6 = vpack.c.bf16 %v1222_v5, %v1222_v5  ;;  %v6493_v1 = vld [vmem:[%s9144_s3 + $0x208] ss:$16 sps:$4 sm:$0xff]  }
 0x189   :  { %4594 = vmatprep.subr.bf16.mxu0 %v6396_v18  ;;  %4635 = vmatprep.subr.bf16.mxu1 %v6399_v12  ;;  %v1761_v18 = vrot.slane %v1752_v4, %v7523_v15  ;;  %v6456_v12 = vld [vmem:[%s9144_s3 + $0xcc] ss:$16 sps:$4 sm:$0xff]   ;;  %v6454_v15 = vld [vmem:[%s9144_s3 + $0xc8] ss:$16 sps:$4 sm:$0xff]  }
 0x18a   :  { %v6501_v4 = vld [vmem:[%s9144_s3 + $0x3ec] ss:$16 sps:$4 sm:$0xff]   ;;  %v6496_v5 = vld [vmem:[%s9144_s3 + $0x1e8] ss:$16 sps:$4 sm:$0xff]  }
 0x18c   :  { %4595 = vmatpush1.bf16.msra.mxu0 %v6394_v20  ;;  %4636 = vmatpush1.bf16.msra.mxu1 %v6397_v54  ;;  %v6459_v20 = vld [vmem:[%s9144_s3 + $0x2cc] ss:$16 sps:$4 sm:$0xff]  }
 0x18d   :  { %4596 = vmatprep.subr.bf16.mxu0 %v6402_v52  ;;  %4637 = vmatprep.subr.bf16.mxu1 %v6405_v60 }
 0x190   :  { %4597 = vmatpush2.bf16.msra.mxu0 %v6400_v10  ;;  %4638 = vmatpush2.bf16.msra.mxu1 %v6403_v63  ;;  %v6457_v10 = vld [vmem:[%s9144_s3 + $0x2c8] ss:$16 sps:$4 sm:$0xff]   ;;  %v6462_v63 = vld [vmem:[%s9144_s3 + $0xac] ss:$16 sps:$4 sm:$0xff]  }
 0x191   :  { %4598 = vmatprep.subr.bf16.mxu0 %v6408_v0  ;;  %4639 = vmatprep.subr.bf16.mxu1 %v6411_v9 }
 0x194   :  { %4599 = vmatpush2.bf16.msra.mxu0 %v6406_v22  ;;  %4640 = vmatpush2.bf16.msra.mxu1 %v6409_v25 }
 0x195   :  { %4600 = vmatprep.subr.bf16.mxu0 %v6414_v19  ;;  %4641 = vmatprep.subr.bf16.mxu1 %v6417_v27 }
 0x198   :  { %4601 = vmatpush2.bf16.msra.mxu0 %v6412_v28  ;;  %4642 = vmatpush2.bf16.msra.mxu1 %v6415_v23  ;;  %v6460_v28 = vld [vmem:[%s9144_s3 + $0xa8] ss:$16 sps:$4 sm:$0xff]  }
 0x199   :  { %4602 = vmatprep.subr.bf16.mxu0 %v6420_v26  ;;  %4643 = vmatprep.subr.bf16.mxu1 %v6423_v29  ;;  %v6468_v26 = vld [vmem:[%s9144_s3 + $0x8c] ss:$16 sps:$4 sm:$0xff]  }
 0x19c   :  { %4603 = vmatpush2.bf16.msra.mxu0 %v6418_v31  ;;  %4644 = vmatpush2.bf16.msra.mxu1 %v6421_v33  ;;  %v6471_v31 = vld [vmem:[%s9144_s3 + $0x28c] ss:$16 sps:$4 sm:$0xff]   ;;  %v6466_v33 = vld [vmem:[%s9144_s3 + $0x88] ss:$16 sps:$4 sm:$0xff]  }
 0x19d   :  { %4604 = vmatprep.subr.bf16.mxu0 %v6426_v35  ;;  %4645 = vmatprep.subr.bf16.mxu1 %v6429_v42  ;;  %v6469_v35 = vld [vmem:[%s9144_s3 + $0x288] ss:$16 sps:$4 sm:$0xff]   ;;  %v6474_v42 = vld [vmem:[%s9144_s3 + $0x6c] ss:$16 sps:$4 sm:$0xff]  }
 0x1a0   :  { %4605 = vmatpush2.bf16.msra.mxu0 %v6424_v47  ;;  %4646 = vmatpush2.bf16.msra.mxu1 %v6427_v48  ;;  %v6477_v47 = vld [vmem:[%s9144_s3 + $0x26c] ss:$16 sps:$4 sm:$0xff]   ;;  %v6472_v48 = vld [vmem:[%s9144_s3 + $0x68] ss:$16 sps:$4 sm:$0xff]  }
 0x1a1   :  { %4606 = vmatprep.subr.bf16.mxu0 %v6432_v49  ;;  %4647 = vmatprep.subr.bf16.mxu1 %v6435_v50  ;;  %v6475_v49 = vld [vmem:[%s9144_s3 + $0x268] ss:$16 sps:$4 sm:$0xff]   ;;  %v6480_v50 = vld [vmem:[%s9144_s3 + $0x4c] ss:$16 sps:$4 sm:$0xff]  }
 0x1a4   :  { %4607 = vmatpush2.bf16.msra.mxu0 %v6430_v51  ;;  %4648 = vmatpush2.bf16.msra.mxu1 %v6433_v53  ;;  %v6483_v51 = vld [vmem:[%s9144_s3 + $0x24c] ss:$16 sps:$4 sm:$0xff]   ;;  %v6478_v53 = vld [vmem:[%s9144_s3 + $0x48] ss:$16 sps:$4 sm:$0xff]  }
 0x1a5   :  { %4608 = vmatprep.subr.bf16.mxu0 %v6438_v55  ;;  %4649 = vmatprep.subr.bf16.mxu1 %v6441_v56  ;;  %v6481_v55 = vld [vmem:[%s9144_s3 + $0x248] ss:$16 sps:$4 sm:$0xff]   ;;  %v6486_v56 = vld [vmem:[%s9144_s3 + $0x2c] ss:$16 sps:$4 sm:$0xff]  }
 0x1a8   :  { %4609 = vmatpush2.bf16.msra.mxu0 %v6436_v57  ;;  %4650 = vmatpush2.bf16.msra.mxu1 %v6439_v58  ;;  %v6489_v57 = vld [vmem:[%s9144_s3 + $0x22c] ss:$16 sps:$4 sm:$0xff]   ;;  %v6484_v58 = vld [vmem:[%s9144_s3 + $0x28] ss:$16 sps:$4 sm:$0xff]  }
 0x1a9   :  { %4610 = vmatprep.subr.bf16.mxu0 %v6444_v59  ;;  %4651 = vmatprep.subr.bf16.mxu1 %v6447_v61  ;;  %v6487_v59 = vld [vmem:[%s9144_s3 + $0x228] ss:$16 sps:$4 sm:$0xff]   ;;  %v6492_v61 = vld [vmem:[%s9144_s3 + $0xc] ss:$16 sps:$4 sm:$0xff]  }
 0x1ac   :  { %4611 = vmatpush2.bf16.msra.mxu0 %v6442_v62  ;;  %4652 = vmatpush2.bf16.msra.mxu1 %v6445_v11  ;;  %v6495_v62 = vld [vmem:[%s9144_s3 + $0x20c] ss:$16 sps:$4 sm:$0xff]   ;;  %v6490_v11 = vld [vmem:[%s9144_s3 + $0x8] ss:$16 sps:$4 sm:$0xff]  }
 0x1ad   :  { %4662 = vmatprep.subr.bf16.mxu0 %v6450_v2  ;;  %4703 = vmatprep.subr.bf16.mxu1 %v6453_v7  ;;  %v6498_v2 = vld [vmem:[%s9144_s3 + $0x1ec] ss:$16 sps:$4 sm:$0xff]   ;;  %v6499_v7 = vld [vmem:[%s9144_s3 + $0x3e8] ss:$16 sps:$4 sm:$0xff]  }
 0x1af   :  { %4613 = vmatmul.mubr.bf16.vlgmr.msra.gmra.mxu0 %v8226_v17  ;;  %v4368_v13 = vpop.f32.mrf.mxu0  ;;  %4654 = vmatmul.mubr.bf16.vlgmr.msra.gmra.mxu1 %v8231_v6  ;;  %v4409_v52 = vpop.f32.mrf.mxu1 }
 0x1b0   :  { %v4369_v54 = vadd.f32 %v4368_v13, %v1757_v8  ;;  %4663 = vmatpush1.bf16.msra.mxu0 %v6448_v21  ;;  %4694 = vmatprep.mubr.bf16.mxu0 %v7547_v3  ;;  %v6465_v3 = vld [vmem:[%s9144_s3 + $0x2ac] ss:$16 sps:$4 sm:$0xff]  }
 0x1b1   :  { %4704 = vmatpush1.bf16.msra.mxu1 %v6451_v24  ;;  %v4370_v60 = vpop.f32.mrf.mxu0  ;;  %4735 = vmatprep.mubr.bf16.mxu1 %v7551_v41  ;;  %v4411_v22 = vpop.f32.mrf.mxu1  ;;  %v6463_v41 = vld [vmem:[%s9144_s3 + $0x2a8] ss:$16 sps:$4 sm:$0xff]   ;;  %v6504_v21 = vld [vmem:[%s9144_s3 + $0x1cc] ss:$16 sps:$4 sm:$0xff]  }
 0x1b2   :  { %v8252_v0 = vadd.f32 %v4409_v52, %v4369_v54  ;;  %v4371_v9 = vadd.f32 %v4370_v60, %v1761_v18  ;;  %4664 = vmatprep.subr.bf16.mxu0 %v6456_v12  ;;  %4705 = vmatprep.subr.bf16.mxu1 %v6459_v20  ;;  %v6507_v8 = vld [vmem:[%s9144_s3 + $0x3cc] ss:$16 sps:$4 sm:$0xff]   ;;  %v6502_v24 = vld [vmem:[%s9144_s3 + $0x1c8] ss:$16 sps:$4 sm:$0xff]  }
 0x1b3   :  { %v4372_v25 = vpop.f32.mrf.mxu0  ;;  %v4413_v27 = vpop.f32.mrf.mxu1  ;;  %v6505_v18 = vld [vmem:[%s9144_s3 + $0x3c8] ss:$16 sps:$4 sm:$0xff]   ;;  %v6510_v12 = vld [vmem:[%s9144_s3 + $0x1ac] ss:$16 sps:$4 sm:$0xff]  }
 0x1b4   :  { %v8258_v19 = vadd.f32 %v4411_v22, %v4371_v9  ;;  %4665 = vmatpush1.bf16.msra.mxu0 %v6454_v15  ;;  %v6513_v13 = vld [vmem:[%s9144_s3 + $0x3ac] ss:$16 sps:$4 sm:$0xff]   ;;  %v6508_v20 = vld [vmem:[%s9144_s3 + $0x1a8] ss:$16 sps:$4 sm:$0xff]  }
 0x1b5   :  { %4706 = vmatpush1.bf16.msra.mxu1 %v6457_v10  ;;  %v4373_v23 = vpop.f32.mrf.mxu0  ;;  %4666 = vmatprep.subr.bf16.mxu0 %v6462_v63  ;;  %v4414_v29 = vpop.f32.mrf.mxu1  ;;  %v6511_v54 = vld [vmem:[%s9144_s3 + $0x3a8] ss:$16 sps:$4 sm:$0xff]   ;;  %v6516_v52 = vld [vmem:[%s9144_s3 + $0x18c] ss:$16 sps:$4 sm:$0xff]  }
 0x1b6   :  { %4707 = vmatprep.subr.bf16.mxu1 %v6465_v3  ;;  %v6519_v15 = vld [vmem:[%s9144_s3 + $0x38c] ss:$16 sps:$4 sm:$0xff]   ;;  %v6514_v60 = vld [vmem:[%s9144_s3 + $0x188] ss:$16 sps:$4 sm:$0xff]  }
 0x1b7   :  { %v6517_v10 = vld [vmem:[%s9144_s3 + $0x388] ss:$16 sps:$4 sm:$0xff]   ;;  %v6522_v63 = vld [vmem:[%s9144_s3 + $0x16c] ss:$16 sps:$4 sm:$0xff]  }
 0x1b8   :  { %4667 = vmatpush1.bf16.msra.mxu0 %v6460_v28  ;;  %v6525_v9 = vld [vmem:[%s9144_s3 + $0x36c] ss:$16 sps:$4 sm:$0xff]   ;;  %v6520_v22 = vld [vmem:[%s9144_s3 + $0x168] ss:$16 sps:$4 sm:$0xff]  }
 0x1b9   :  { %4708 = vmatpush1.bf16.msra.mxu1 %v6463_v41  ;;  %4668 = vmatprep.subr.bf16.mxu0 %v6468_v26  ;;  %v6523_v3 = vld [vmem:[%s9144_s3 + $0x368] ss:$16 sps:$4 sm:$0xff]   ;;  %v6528_v25 = vld [vmem:[%s9144_s3 + $0x14c] ss:$16 sps:$4 sm:$0xff]  }
 0x1ba   :  { %4709 = vmatprep.subr.bf16.mxu1 %v6471_v31  ;;  %v6531_v27 = vld [vmem:[%s9144_s3 + $0x34c] ss:$16 sps:$4 sm:$0xff]   ;;  %v6526_v28 = vld [vmem:[%s9144_s3 + $0x148] ss:$16 sps:$4 sm:$0xff]  }
 0x1bb   :  { %v6529_v23 = vld [vmem:[%s9144_s3 + $0x348] ss:$16 sps:$4 sm:$0xff]   ;;  %v6534_v41 = vld [vmem:[%s9144_s3 + $0x12c] ss:$16 sps:$4 sm:$0xff]  }
 0x1bc   :  { %4669 = vmatpush1.bf16.msra.mxu0 %v6466_v33  ;;  %v6537_v26 = vld [vmem:[%s9144_s3 + $0x32c] ss:$16 sps:$4 sm:$0xff]   ;;  %v6532_v29 = vld [vmem:[%s9144_s3 + $0x128] ss:$16 sps:$4 sm:$0xff]  }
 0x1bd   :  { %4710 = vmatpush1.bf16.msra.mxu1 %v6469_v35  ;;  %4670 = vmatprep.subr.bf16.mxu0 %v6474_v42  ;;  %v6535_v31 = vld [vmem:[%s9144_s3 + $0x328] ss:$16 sps:$4 sm:$0xff]   ;;  %v6540_v33 = vld [vmem:[%s9144_s3 + $0x10c] ss:$16 sps:$4 sm:$0xff]  }
 0x1be   :  { %4711 = vmatprep.subr.bf16.mxu1 %v6477_v47  ;;  %v6543_v35 = vld [vmem:[%s9144_s3 + $0x30c] ss:$16 sps:$4 sm:$0xff]   ;;  %v6538_v42 = vld [vmem:[%s9144_s3 + $0x108] ss:$16 sps:$4 sm:$0xff]  }
 0x1bf   :  { %v6541_v47 = vld [vmem:[%s9144_s3 + $0x308] ss:$16 sps:$4 sm:$0xff]  }
 0x1c0   :  { %4671 = vmatpush1.bf16.msra.mxu0 %v6472_v48  ;;  %v6546_v48 = vld [vmem:[%s9144_s3 + $0x4ec] ss:$16 sps:$4 sm:$0xff]  }
 0x1c1   :  { %4712 = vmatpush1.bf16.msra.mxu1 %v6475_v49  ;;  %4672 = vmatprep.subr.bf16.mxu0 %v6480_v50  ;;  %v6549_v49 = vld [vmem:[%s9144_s3 + $0x6ec] ss:$16 sps:$4 sm:$0xff]   ;;  %v6544_v50 = vld [vmem:[%s9144_s3 + $0x4e8] ss:$16 sps:$4 sm:$0xff]  }
 0x1c2   :  { %4713 = vmatprep.subr.bf16.mxu1 %v6483_v51  ;;  %v6547_v51 = vld [vmem:[%s9144_s3 + $0x6e8] ss:$16 sps:$4 sm:$0xff]  }
 0x1c4   :  { %4673 = vmatpush1.bf16.msra.mxu0 %v6478_v53  ;;  %v6552_v53 = vld [vmem:[%s9144_s3 + $0x4cc] ss:$16 sps:$4 sm:$0xff]  }
 0x1c5   :  { %4714 = vmatpush1.bf16.msra.mxu1 %v6481_v55  ;;  %4674 = vmatprep.subr.bf16.mxu0 %v6486_v56  ;;  %v6555_v56 = vld [vmem:[%s9144_s3 + $0x6cc] ss:$16 sps:$4 sm:$0xff]  }
 0x1c6   :  { %4715 = vmatprep.subr.bf16.mxu1 %v6489_v57 }
 0x1c8   :  { %4675 = vmatpush1.bf16.msra.mxu0 %v6484_v58 }
 0x1c9   :  { %4716 = vmatpush1.bf16.msra.mxu1 %v6487_v59  ;;  %4676 = vmatprep.subr.bf16.mxu0 %v6492_v61  ;;  %v6550_v59 = vld [vmem:[%s9144_s3 + $0x4c8] ss:$16 sps:$4 sm:$0xff]  }
 0x1ca   :  { %4717 = vmatprep.subr.bf16.mxu1 %v6495_v62 }
 0x1cc   :  { %4677 = vmatpush1.bf16.msra.mxu0 %v6490_v11 }
 0x1cd   :  { %4718 = vmatpush1.bf16.msra.mxu1 %v6493_v1  ;;  %4678 = vmatprep.subr.bf16.mxu0 %v6498_v2 }
 0x1ce   :  { %4719 = vmatprep.subr.bf16.mxu1 %v6501_v4 }
 0x1d0   :  { %4679 = vmatpush2.bf16.msra.mxu0 %v6496_v5  ;;  %v6556_v5 = vld [vmem:[%s9144_s3 + $0x4a8] ss:$16 sps:$4 sm:$0xff]  }
 0x1d1   :  { %4720 = vmatpush2.bf16.msra.mxu1 %v6499_v7  ;;  %4680 = vmatprep.subr.bf16.mxu0 %v6504_v21  ;;  %v6564_v7 = vld [vmem:[%s9144_s3 + $0x48c] ss:$16 sps:$4 sm:$0xff]  }
 0x1d2   :  { %4721 = vmatprep.subr.bf16.mxu1 %v6507_v8  ;;  %v6567_v8 = vld [vmem:[%s9144_s3 + $0x68c] ss:$16 sps:$4 sm:$0xff]  }
 0x1d4   :  { %4681 = vmatpush2.bf16.msra.mxu0 %v6502_v24  ;;  %v6562_v24 = vld [vmem:[%s9144_s3 + $0x488] ss:$16 sps:$4 sm:$0xff]  }
 0x1d5   :  { %4722 = vmatpush2.bf16.msra.mxu1 %v6505_v18  ;;  %4682 = vmatprep.subr.bf16.mxu0 %v6510_v12  ;;  %v6565_v18 = vld [vmem:[%s9144_s3 + $0x688] ss:$16 sps:$4 sm:$0xff]   ;;  %v6570_v12 = vld [vmem:[%s9144_s3 + $0x46c] ss:$16 sps:$4 sm:$0xff]  }
 0x1d6   :  { %4723 = vmatprep.subr.bf16.mxu1 %v6513_v13  ;;  %v6573_v13 = vld [vmem:[%s9144_s3 + $0x66c] ss:$16 sps:$4 sm:$0xff]  }
 0x1d8   :  { %4683 = vmatpush2.bf16.msra.mxu0 %v6508_v20  ;;  %v6568_v20 = vld [vmem:[%s9144_s3 + $0x468] ss:$16 sps:$4 sm:$0xff]  }
 0x1d9   :  { %4724 = vmatpush2.bf16.msra.mxu1 %v6511_v54  ;;  %4684 = vmatprep.subr.bf16.mxu0 %v6516_v52  ;;  %v6571_v54 = vld [vmem:[%s9144_s3 + $0x668] ss:$16 sps:$4 sm:$0xff]   ;;  %v6576_v52 = vld [vmem:[%s9144_s3 + $0x44c] ss:$16 sps:$4 sm:$0xff]  }
 0x1da   :  { %4725 = vmatprep.subr.bf16.mxu1 %v6519_v15  ;;  %v6579_v15 = vld [vmem:[%s9144_s3 + $0x64c] ss:$16 sps:$4 sm:$0xff]  }
 0x1dc   :  { %4685 = vmatpush2.bf16.msra.mxu0 %v6514_v60  ;;  %v6574_v60 = vld [vmem:[%s9144_s3 + $0x448] ss:$16 sps:$4 sm:$0xff]  }
 0x1dd   :  { %4726 = vmatpush2.bf16.msra.mxu1 %v6517_v10  ;;  %4686 = vmatprep.subr.bf16.mxu0 %v6522_v63  ;;  %v6577_v10 = vld [vmem:[%s9144_s3 + $0x648] ss:$16 sps:$4 sm:$0xff]   ;;  %v6582_v63 = vld [vmem:[%s9144_s3 + $0x42c] ss:$16 sps:$4 sm:$0xff]  }
 0x1de   :  { %4727 = vmatprep.subr.bf16.mxu1 %v6525_v9  ;;  %v6585_v9 = vld [vmem:[%s9144_s3 + $0x62c] ss:$16 sps:$4 sm:$0xff]  }
 0x1e0   :  { %4687 = vmatpush2.bf16.msra.mxu0 %v6520_v22  ;;  %v6580_v22 = vld [vmem:[%s9144_s3 + $0x428] ss:$16 sps:$4 sm:$0xff]  }
 0x1e1   :  { %4728 = vmatpush2.bf16.msra.mxu1 %v6523_v3  ;;  %4688 = vmatprep.subr.bf16.mxu0 %v6528_v25  ;;  %v6583_v3 = vld [vmem:[%s9144_s3 + $0x628] ss:$16 sps:$4 sm:$0xff]   ;;  %v6588_v25 = vld [vmem:[%s9144_s3 + $0x40c] ss:$16 sps:$4 sm:$0xff]  }
 0x1e2   :  { %4729 = vmatprep.subr.bf16.mxu1 %v6531_v27  ;;  %v6591_v27 = vld [vmem:[%s9144_s3 + $0x60c] ss:$16 sps:$4 sm:$0xff]  }
 0x1e4   :  { %4689 = vmatpush2.bf16.msra.mxu0 %v6526_v28  ;;  %v6586_v28 = vld [vmem:[%s9144_s3 + $0x408] ss:$16 sps:$4 sm:$0xff]  }
 0x1e5   :  { %4730 = vmatpush2.bf16.msra.mxu1 %v6529_v23  ;;  %4690 = vmatprep.subr.bf16.mxu0 %v6534_v41  ;;  %v6589_v23 = vld [vmem:[%s9144_s3 + $0x608] ss:$16 sps:$4 sm:$0xff]   ;;  %v6594_v41 = vld [vmem:[%s9144_s3 + $0x5ec] ss:$16 sps:$4 sm:$0xff]  }
 0x1e6   :  { %4731 = vmatprep.subr.bf16.mxu1 %v6537_v26  ;;  %v6597_v26 = vld [vmem:[%s9144_s3 + $0x7ec] ss:$16 sps:$4 sm:$0xff]  }
 0x1e8   :  { %4691 = vmatpush2.bf16.msra.mxu0 %v6532_v29  ;;  %v6592_v29 = vld [vmem:[%s9144_s3 + $0x5e8] ss:$16 sps:$4 sm:$0xff]  }
 0x1e9   :  { %4732 = vmatpush2.bf16.msra.mxu1 %v6535_v31  ;;  %4692 = vmatprep.subr.bf16.mxu0 %v6540_v33  ;;  %v6595_v31 = vld [vmem:[%s9144_s3 + $0x7e8] ss:$16 sps:$4 sm:$0xff]   ;;  %v6600_v33 = vld [vmem:[%s9144_s3 + $0x5cc] ss:$16 sps:$4 sm:$0xff]  }
 0x1ea   :  { %4733 = vmatprep.subr.bf16.mxu1 %v6543_v35  ;;  %v6603_v35 = vld [vmem:[%s9144_s3 + $0x7cc] ss:$16 sps:$4 sm:$0xff]  }
 0x1ec   :  { %4693 = vmatpush2.bf16.msra.mxu0 %v6538_v42  ;;  %v6598_v42 = vld [vmem:[%s9144_s3 + $0x5c8] ss:$16 sps:$4 sm:$0xff]  }
 0x1ed   :  { %4734 = vmatpush2.bf16.msra.mxu1 %v6541_v47  ;;  %4744 = vmatprep.subr.bf16.mxu0 %v6546_v48  ;;  %v6601_v47 = vld [vmem:[%s9144_s3 + $0x7c8] ss:$16 sps:$4 sm:$0xff]   ;;  %v6606_v48 = vld [vmem:[%s9144_s3 + $0x5ac] ss:$16 sps:$4 sm:$0xff]  }
 0x1ee   :  { %4785 = vmatprep.subr.bf16.mxu1 %v6549_v49  ;;  %v6609_v49 = vld [vmem:[%s9144_s3 + $0x7ac] ss:$16 sps:$4 sm:$0xff]  }
 0x1ef   :  { %v4450_v55 = vpop.f32.mrf.mxu0  ;;  %4695 = vmatmul.mubr.bf16.vlgmr.msra.gmra.mxu0 %v7549_v40  ;;  %v4491_v58 = vpop.f32.mrf.mxu1  ;;  %v6553_v40 = vld [vmem:[%s9144_s3 + $0x6c8] ss:$16 sps:$4 sm:$0xff]  }
 0x1f0   :  { %v4451_v57 = vadd.f32 %v4450_v55, %v8252_v0  ;;  %4736 = vmatmul.mubr.bf16.vlgmr.msra.gmra.mxu1 %v7545_v38  ;;  %4745 = vmatpush1.bf16.msra.mxu0 %v6544_v50  ;;  %v6558_v0 = vld [vmem:[%s9144_s3 + $0x4ac] ss:$16 sps:$4 sm:$0xff]   ;;  %v6604_v50 = vld [vmem:[%s9144_s3 + $0x5a8] ss:$16 sps:$4 sm:$0xff]  }
 0x1f1   :  { %4776 = vmatprep.mubr.bf16.mxu0 %v7659_v30  ;;  %4786 = vmatpush1.bf16.msra.mxu1 %v6547_v51  ;;  %v4452_v61 = vpop.f32.mrf.mxu0  ;;  %v4493_v11 = vpop.f32.mrf.mxu1  ;;  %v6561_v30 = vld [vmem:[%s9144_s3 + $0x6ac] ss:$16 sps:$4 sm:$0xff]   ;;  %v6607_v51 = vld [vmem:[%s9144_s3 + $0x7a8] ss:$16 sps:$4 sm:$0xff]  }
 0x1f2   :  { %v8453_v62 = vadd.f32 %v4491_v58, %v4451_v57  ;;  %4817 = vmatprep.mubr.bf16.mxu1 %v7667_v34  ;;  %v4453_v38 = vadd.f32 %v4452_v61, %v8258_v19  ;;  %4746 = vmatprep.subr.bf16.mxu0 %v6552_v53  ;;  %v6559_v19 = vld [vmem:[%s9144_s3 + $0x6a8] ss:$16 sps:$4 sm:$0xff]   ;;  %v6612_v53 = vld [vmem:[%s9144_s3 + $0x58c] ss:$16 sps:$4 sm:$0xff]  }
 0x1f3   :  { %v4454_v1 = vpop.f32.mrf.mxu0  ;;  %4787 = vmatprep.subr.bf16.mxu1 %v6555_v56  ;;  %v4495_v4 = vpop.f32.mrf.mxu1  ;;  %v6615_v55 = vld [vmem:[%s9144_s3 + $0x78c] ss:$16 sps:$4 sm:$0xff]   ;;  %v6610_v56 = vld [vmem:[%s9144_s3 + $0x588] ss:$16 sps:$4 sm:$0xff]  }
 0x1f4   :  { %v8460_v2 = vadd.f32 %v4493_v11, %v4453_v38  ;;  %4747 = vmatpush1.bf16.msra.mxu0 %v6550_v59  ;;  %v6613_v57 = vld [vmem:[%s9144_s3 + $0x788] ss:$16 sps:$4 sm:$0xff]   ;;  %v6618_v58 = vld [vmem:[%s9144_s3 + $0x56c] ss:$16 sps:$4 sm:$0xff]  }
 0x1f5   :  { %4788 = vmatpush1.bf16.msra.mxu1 %v6553_v40  ;;  %v4455_v34 = vpop.f32.mrf.mxu0  ;;  %4748 = vmatprep.subr.bf16.mxu0 %v6558_v0  ;;  %v4496_v21 = vpop.f32.mrf.mxu1  ;;  %v6621_v59 = vld [vmem:[%s9144_s3 + $0x76c] ss:$16 sps:$4 sm:$0xff]   ;;  %v6616_v61 = vld [vmem:[%s9144_s3 + $0x568] ss:$16 sps:$4 sm:$0xff]  }
 0x1f6   :  { %4789 = vmatprep.subr.bf16.mxu1 %v6561_v30  ;;  %v6619_v40 = vld [vmem:[%s9144_s3 + $0x768] ss:$16 sps:$4 sm:$0xff]   ;;  %v6624_v0 = vld [vmem:[%s9144_s3 + $0x54c] ss:$16 sps:$4 sm:$0xff]  }
 0x1f7   :  { %v6627_v38 = vld [vmem:[%s9144_s3 + $0x74c] ss:$16 sps:$4 sm:$0xff]   ;;  %v6622_v11 = vld [vmem:[%s9144_s3 + $0x548] ss:$16 sps:$4 sm:$0xff]  }
 0x1f8   :  { %4749 = vmatpush1.bf16.msra.mxu0 %v6556_v5  ;;  %v6625_v30 = vld [vmem:[%s9144_s3 + $0x748] ss:$16 sps:$4 sm:$0xff]   ;;  %v6630_v1 = vld [vmem:[%s9144_s3 + $0x52c] ss:$16 sps:$4 sm:$0xff]  }
 0x1f9   :  { %4790 = vmatpush1.bf16.msra.mxu1 %v6559_v19  ;;  %4750 = vmatprep.subr.bf16.mxu0 %v6564_v7  ;;  %v6633_v4 = vld [vmem:[%s9144_s3 + $0x72c] ss:$16 sps:$4 sm:$0xff]   ;;  %v6628_v5 = vld [vmem:[%s9144_s3 + $0x528] ss:$16 sps:$4 sm:$0xff]  }
 0x1fa   :  { %4791 = vmatprep.subr.bf16.mxu1 %v6567_v8  ;;  %v6631_v34 = vld [vmem:[%s9144_s3 + $0x728] ss:$16 sps:$4 sm:$0xff]   ;;  %v6636_v19 = vld [vmem:[%s9144_s3 + $0x50c] ss:$16 sps:$4 sm:$0xff]  }
 0x1fb   :  { %v6639_v7 = vld [vmem:[%s9144_s3 + $0x70c] ss:$16 sps:$4 sm:$0xff]   ;;  %v6634_v21 = vld [vmem:[%s9144_s3 + $0x508] ss:$16 sps:$4 sm:$0xff]  }
 0x1fc   :  { %4751 = vmatpush1.bf16.msra.mxu0 %v6562_v24  ;;  %v6637_v8 = vld [vmem:[%s9144_s3 + $0x708] ss:$16 sps:$4 sm:$0xff]   ;;  %v6642_v24 = vld [vmem:[%s9144_s3 + $0x8ec] ss:$16 sps:$4 sm:$0xff]  }
 0x1fd   :  { %4792 = vmatpush1.bf16.msra.mxu1 %v6565_v18  ;;  %4752 = vmatprep.subr.bf16.mxu0 %v6570_v12  ;;  %v6645_v18 = vld [vmem:[%s9144_s3 + $0xaec] ss:$16 sps:$4 sm:$0xff]   ;;  %v6640_v12 = vld [vmem:[%s9144_s3 + $0x8e8] ss:$16 sps:$4 sm:$0xff]  }
 0x1fe   :  { %4793 = vmatprep.subr.bf16.mxu1 %v6573_v13  ;;  %v6643_v13 = vld [vmem:[%s9144_s3 + $0xae8] ss:$16 sps:$4 sm:$0xff]  }
 0x200   :  { %4753 = vmatpush1.bf16.msra.mxu0 %v6568_v20  ;;  %v6646_v20 = vld [vmem:[%s9144_s3 + $0x8c8] ss:$16 sps:$4 sm:$0xff]  }
 0x201   :  { %4794 = vmatpush1.bf16.msra.mxu1 %v6571_v54  ;;  %4754 = vmatprep.subr.bf16.mxu0 %v6576_v52  ;;  %v6648_v54 = vld [vmem:[%s9144_s3 + $0x8cc] ss:$16 sps:$4 sm:$0xff]  }
 0x202   :  { %4795 = vmatprep.subr.bf16.mxu1 %v6579_v15  ;;  %v6651_v52 = vld [vmem:[%s9144_s3 + $0xacc] ss:$16 sps:$4 sm:$0xff]  }
 0x204   :  { %4755 = vmatpush1.bf16.msra.mxu0 %v6574_v60  ;;  %v6649_v60 = vld [vmem:[%s9144_s3 + $0xac8] ss:$16 sps:$4 sm:$0xff]  }
 0x205   :  { %4796 = vmatpush1.bf16.msra.mxu1 %v6577_v10  ;;  %4756 = vmatprep.subr.bf16.mxu0 %v6582_v63  ;;  %v6654_v10 = vld [vmem:[%s9144_s3 + $0x8ac] ss:$16 sps:$4 sm:$0xff]  }
 0x206   :  { %4797 = vmatprep.subr.bf16.mxu1 %v6585_v9 }
 0x208   :  { %4757 = vmatpush1.bf16.msra.mxu0 %v6580_v22  ;;  %v6657_v22 = vld [vmem:[%s9144_s3 + $0xaac] ss:$16 sps:$4 sm:$0xff]  }
 0x209   :  { %4798 = vmatpush1.bf16.msra.mxu1 %v6583_v3  ;;  %4758 = vmatprep.subr.bf16.mxu0 %v6588_v25 }
 0x20a   :  { %4799 = vmatprep.subr.bf16.mxu1 %v6591_v27 }
 0x20c   :  { %4759 = vmatpush1.bf16.msra.mxu0 %v6586_v28 }
 0x20d   :  { %4800 = vmatpush1.bf16.msra.mxu1 %v6589_v23  ;;  %4760 = vmatprep.subr.bf16.mxu0 %v6594_v41 }
 0x20e   :  { %4801 = vmatprep.subr.bf16.mxu1 %v6597_v26  ;;  %v6658_v26 = vld [vmem:[%s9144_s3 + $0x888] ss:$16 sps:$4 sm:$0xff]  }
 0x210   :  { %4761 = vmatpush2.bf16.msra.mxu0 %v6592_v29  ;;  %v6663_v29 = vld [vmem:[%s9144_s3 + $0xa8c] ss:$16 sps:$4 sm:$0xff]  }
 0x211   :  { %4802 = vmatpush2.bf16.msra.mxu1 %v6595_v31  ;;  %4762 = vmatprep.subr.bf16.mxu0 %v6600_v33  ;;  %v6661_v31 = vld [vmem:[%s9144_s3 + $0xa88] ss:$16 sps:$4 sm:$0xff]   ;;  %v6666_v33 = vld [vmem:[%s9144_s3 + $0x86c] ss:$16 sps:$4 sm:$0xff]  }
 0x212   :  { %4803 = vmatprep.subr.bf16.mxu1 %v6603_v35  ;;  %v6669_v35 = vld [vmem:[%s9144_s3 + $0xa6c] ss:$16 sps:$4 sm:$0xff]  }
 0x214   :  { %4763 = vmatpush2.bf16.msra.mxu0 %v6598_v42  ;;  %v6664_v42 = vld [vmem:[%s9144_s3 + $0x868] ss:$16 sps:$4 sm:$0xff]  }
 0x215   :  { %4804 = vmatpush2.bf16.msra.mxu1 %v6601_v47  ;;  %4764 = vmatprep.subr.bf16.mxu0 %v6606_v48  ;;  %v6667_v47 = vld [vmem:[%s9144_s3 + $0xa68] ss:$16 sps:$4 sm:$0xff]   ;;  %v6672_v48 = vld [vmem:[%s9144_s3 + $0x84c] ss:$16 sps:$4 sm:$0xff]  }
 0x216   :  { %4805 = vmatprep.subr.bf16.mxu1 %v6609_v49  ;;  %v6675_v49 = vld [vmem:[%s9144_s3 + $0xa4c] ss:$16 sps:$4 sm:$0xff]  }
 0x218   :  { %4765 = vmatpush2.bf16.msra.mxu0 %v6604_v50  ;;  %v6670_v50 = vld [vmem:[%s9144_s3 + $0x848] ss:$16 sps:$4 sm:$0xff]  }
 0x219   :  { %4806 = vmatpush2.bf16.msra.mxu1 %v6607_v51  ;;  %4766 = vmatprep.subr.bf16.mxu0 %v6612_v53  ;;  %v6673_v51 = vld [vmem:[%s9144_s3 + $0xa48] ss:$16 sps:$4 sm:$0xff]   ;;  %v6678_v53 = vld [vmem:[%s9144_s3 + $0x82c] ss:$16 sps:$4 sm:$0xff]  }
 0x21a   :  { %4807 = vmatprep.subr.bf16.mxu1 %v6615_v55  ;;  %v6681_v55 = vld [vmem:[%s9144_s3 + $0xa2c] ss:$16 sps:$4 sm:$0xff]  }
 0x21c   :  { %4767 = vmatpush2.bf16.msra.mxu0 %v6610_v56  ;;  %v6676_v56 = vld [vmem:[%s9144_s3 + $0x828] ss:$16 sps:$4 sm:$0xff]  }
 0x21d   :  { %4808 = vmatpush2.bf16.msra.mxu1 %v6613_v57  ;;  %4768 = vmatprep.subr.bf16.mxu0 %v6618_v58  ;;  %v6679_v57 = vld [vmem:[%s9144_s3 + $0xa28] ss:$16 sps:$4 sm:$0xff]   ;;  %v6684_v58 = vld [vmem:[%s9144_s3 + $0x80c] ss:$16 sps:$4 sm:$0xff]  }
 0x21e   :  { %4809 = vmatprep.subr.bf16.mxu1 %v6621_v59  ;;  %v6687_v59 = vld [vmem:[%s9144_s3 + $0xa0c] ss:$16 sps:$4 sm:$0xff]  }
 0x220   :  { %4769 = vmatpush2.bf16.msra.mxu0 %v6616_v61  ;;  %v6682_v61 = vld [vmem:[%s9144_s3 + $0x808] ss:$16 sps:$4 sm:$0xff]  }
 0x221   :  { %4810 = vmatpush2.bf16.msra.mxu1 %v6619_v40  ;;  %4770 = vmatprep.subr.bf16.mxu0 %v6624_v0  ;;  %v6685_v40 = vld [vmem:[%s9144_s3 + $0xa08] ss:$16 sps:$4 sm:$0xff]   ;;  %v6690_v0 = vld [vmem:[%s9144_s3 + $0x9ec] ss:$16 sps:$4 sm:$0xff]  }
 0x222   :  { %4811 = vmatprep.subr.bf16.mxu1 %v6627_v38  ;;  %v6693_v38 = vld [vmem:[%s9144_s3 + $0xbec] ss:$16 sps:$4 sm:$0xff]  }
 0x224   :  { %4771 = vmatpush2.bf16.msra.mxu0 %v6622_v11  ;;  %v6688_v11 = vld [vmem:[%s9144_s3 + $0x9e8] ss:$16 sps:$4 sm:$0xff]  }
 0x225   :  { %4812 = vmatpush2.bf16.msra.mxu1 %v6625_v30  ;;  %4772 = vmatprep.subr.bf16.mxu0 %v6630_v1  ;;  %v6691_v30 = vld [vmem:[%s9144_s3 + $0xbe8] ss:$16 sps:$4 sm:$0xff]   ;;  %v6696_v1 = vld [vmem:[%s9144_s3 + $0x9cc] ss:$16 sps:$4 sm:$0xff]  }
 0x226   :  { %4813 = vmatprep.subr.bf16.mxu1 %v6633_v4  ;;  %v6699_v4 = vld [vmem:[%s9144_s3 + $0xbcc] ss:$16 sps:$4 sm:$0xff]  }
 0x228   :  { %4773 = vmatpush2.bf16.msra.mxu0 %v6628_v5  ;;  %v6694_v5 = vld [vmem:[%s9144_s3 + $0x9c8] ss:$16 sps:$4 sm:$0xff]  }
 0x229   :  { %4814 = vmatpush2.bf16.msra.mxu1 %v6631_v34  ;;  %4774 = vmatprep.subr.bf16.mxu0 %v6636_v19  ;;  %v6697_v34 = vld [vmem:[%s9144_s3 + $0xbc8] ss:$16 sps:$4 sm:$0xff]   ;;  %v6702_v19 = vld [vmem:[%s9144_s3 + $0x9ac] ss:$16 sps:$4 sm:$0xff]  }
 0x22a   :  { %4815 = vmatprep.subr.bf16.mxu1 %v6639_v7  ;;  %v6705_v7 = vld [vmem:[%s9144_s3 + $0xbac] ss:$16 sps:$4 sm:$0xff]  }
 0x22c   :  { %4775 = vmatpush2.bf16.msra.mxu0 %v6634_v21  ;;  %v6700_v21 = vld [vmem:[%s9144_s3 + $0x9a8] ss:$16 sps:$4 sm:$0xff]  }
 0x22d   :  { %4816 = vmatpush2.bf16.msra.mxu1 %v6637_v8  ;;  %4826 = vmatprep.subr.bf16.mxu0 %v6642_v24  ;;  %v6703_v8 = vld [vmem:[%s9144_s3 + $0xba8] ss:$16 sps:$4 sm:$0xff]   ;;  %v6708_v24 = vld [vmem:[%s9144_s3 + $0x98c] ss:$16 sps:$4 sm:$0xff]  }
 0x22e   :  { %4867 = vmatprep.subr.bf16.mxu1 %v6645_v18  ;;  %v6711_v18 = vld [vmem:[%s9144_s3 + $0xb8c] ss:$16 sps:$4 sm:$0xff]  }
 0x22f   :  { %v4532_v15 = vpop.f32.mrf.mxu0  ;;  %4777 = vmatmul.mubr.bf16.vlgmr.msra.gmra.mxu0 %v7792_v43  ;;  %v4573_v9 = vpop.f32.mrf.mxu1 }
 0x230   :  { %v4533_v63 = vadd.f32 %v4532_v15, %v8453_v62  ;;  %4818 = vmatmul.mubr.bf16.vlgmr.msra.gmra.mxu1 %v7790_v39  ;;  %4827 = vmatpush1.bf16.msra.mxu0 %v6640_v12  ;;  %v6652_v39 = vld [vmem:[%s9144_s3 + $0x8a8] ss:$16 sps:$4 sm:$0xff]  }
 0x231   :  { %4858 = vmatprep.mubr.bf16.mxu0 %v7797_v45  ;;  %4868 = vmatpush1.bf16.msra.mxu1 %v6643_v13  ;;  %v4534_v43 = vpop.f32.mrf.mxu0  ;;  %v4575_v27 = vpop.f32.mrf.mxu1  ;;  %v6655_v45 = vld [vmem:[%s9144_s3 + $0xaa8] ss:$16 sps:$4 sm:$0xff]  }
 0x232   :  { %v8658_v3 = vadd.f32 %v4573_v9, %v4533_v63  ;;  %4899 = vmatprep.mubr.bf16.mxu1 %v7800_v46  ;;  %v4535_v25 = vadd.f32 %v4534_v43, %v8460_v2  ;;  %4828 = vmatprep.subr.bf16.mxu0 %v6648_v54  ;;  %v6660_v46 = vld [vmem:[%s9144_s3 + $0x88c] ss:$16 sps:$4 sm:$0xff]   ;;  %v6706_v12 = vld [vmem:[%s9144_s3 + $0x988] ss:$16 sps:$4 sm:$0xff]  }
 0x233   :  { %v4536_v62 = vpop.f32.mrf.mxu0  ;;  %4869 = vmatprep.subr.bf16.mxu1 %v6651_v52  ;;  %v4577_v23 = vpop.f32.mrf.mxu1  ;;  %v6709_v13 = vld [vmem:[%s9144_s3 + $0xb88] ss:$16 sps:$4 sm:$0xff]   ;;  %v6717_v54 = vld [vmem:[%s9144_s3 + $0xb6c] ss:$16 sps:$4 sm:$0xff]  }
 0x234   :  { %v8668_v28 = vadd.f32 %v4575_v27, %v4535_v25  ;;  %4829 = vmatpush1.bf16.msra.mxu0 %v6646_v20  ;;  %v6714_v20 = vld [vmem:[%s9144_s3 + $0x96c] ss:$16 sps:$4 sm:$0xff]   ;;  %v6712_v52 = vld [vmem:[%s9144_s3 + $0x968] ss:$16 sps:$4 sm:$0xff]  }
 0x235   :  { %4870 = vmatpush1.bf16.msra.mxu1 %v6649_v60  ;;  %v4537_v2 = vpop.f32.mrf.mxu0  ;;  %4830 = vmatprep.subr.bf16.mxu0 %v6654_v10  ;;  %v4578_v41 = vpop.f32.mrf.mxu1  ;;  %v6715_v15 = vld [vmem:[%s9144_s3 + $0xb68] ss:$16 sps:$4 sm:$0xff]   ;;  %v6720_v60 = vld [vmem:[%s9144_s3 + $0x94c] ss:$16 sps:$4 sm:$0xff]  }
 0x236   :  { %4871 = vmatprep.subr.bf16.mxu1 %v6657_v22  ;;  %v6723_v10 = vld [vmem:[%s9144_s3 + $0xb4c] ss:$16 sps:$4 sm:$0xff]   ;;  %v6718_v63 = vld [vmem:[%s9144_s3 + $0x948] ss:$16 sps:$4 sm:$0xff]  }
 0x237   :  { %v6721_v9 = vld [vmem:[%s9144_s3 + $0xb48] ss:$16 sps:$4 sm:$0xff]   ;;  %v6726_v22 = vld [vmem:[%s9144_s3 + $0x92c] ss:$16 sps:$4 sm:$0xff]  }
 0x238   :  { %4831 = vmatpush1.bf16.msra.mxu0 %v6652_v39  ;;  %v6729_v43 = vld [vmem:[%s9144_s3 + $0xb2c] ss:$16 sps:$4 sm:$0xff]   ;;  %v6724_v25 = vld [vmem:[%s9144_s3 + $0x928] ss:$16 sps:$4 sm:$0xff]  }
 0x239   :  { %4872 = vmatpush1.bf16.msra.mxu1 %v6655_v45  ;;  %4832 = vmatprep.subr.bf16.mxu0 %v6660_v46  ;;  %v6727_v27 = vld [vmem:[%s9144_s3 + $0xb28] ss:$16 sps:$4 sm:$0xff]   ;;  %v6732_v39 = vld [vmem:[%s9144_s3 + $0x90c] ss:$16 sps:$4 sm:$0xff]  }
 0x23a   :  { %4873 = vmatprep.subr.bf16.mxu1 %v6663_v29  ;;  %v6735_v62 = vld [vmem:[%s9144_s3 + $0xb0c] ss:$16 sps:$4 sm:$0xff]   ;;  %v6730_v45 = vld [vmem:[%s9144_s3 + $0x908] ss:$16 sps:$4 sm:$0xff]  }
 0x23b   :  { %v6733_v23 = vld [vmem:[%s9144_s3 + $0xb08] ss:$16 sps:$4 sm:$0xff]   ;;  %v6738_v46 = vld [vmem:[%s9144_s3 + $0xcec] ss:$16 sps:$4 sm:$0xff]  }
 0x23c   :  { %4833 = vmatpush1.bf16.msra.mxu0 %v6658_v26  ;;  %v6741_v2 = vld [vmem:[%s9144_s3 + $0xeec] ss:$16 sps:$4 sm:$0xff]   ;;  %v6736_v41 = vld [vmem:[%s9144_s3 + $0xce8] ss:$16 sps:$4 sm:$0xff]  }
 0x23d   :  { %4874 = vmatpush1.bf16.msra.mxu1 %v6661_v31  ;;  %4834 = vmatprep.subr.bf16.mxu0 %v6666_v33  ;;  %v6739_v26 = vld [vmem:[%s9144_s3 + $0xee8] ss:$16 sps:$4 sm:$0xff]   ;;  %v6744_v29 = vld [vmem:[%s9144_s3 + $0xccc] ss:$16 sps:$4 sm:$0xff]  }
 0x23e   :  { %4875 = vmatprep.subr.bf16.mxu1 %v6669_v35  ;;  %v6747_v33 = vld [vmem:[%s9144_s3 + $0xecc] ss:$16 sps:$4 sm:$0xff]  }
 0x240   :  { %4835 = vmatpush1.bf16.msra.mxu0 %v6664_v42 }
 0x241   :  { %4876 = vmatpush1.bf16.msra.mxu1 %v6667_v47  ;;  %4836 = vmatprep.subr.bf16.mxu0 %v6672_v48  ;;  %v6742_v47 = vld [vmem:[%s9144_s3 + $0xcc8] ss:$16 sps:$4 sm:$0xff]  }
 0x242   :  { %4877 = vmatprep.subr.bf16.mxu1 %v6675_v49 }
 0x244   :  { %4837 = vmatpush1.bf16.msra.mxu0 %v6670_v50 }
 0x245   :  { %4878 = vmatpush1.bf16.msra.mxu1 %v6673_v51  ;;  %4838 = vmatprep.subr.bf16.mxu0 %v6678_v53  ;;  %v6748_v53 = vld [vmem:[%s9144_s3 + $0xca8] ss:$16 sps:$4 sm:$0xff]  }
 0x246   :  { %4879 = vmatprep.subr.bf16.mxu1 %v6681_v55 }
 0x248   :  { %4839 = vmatpush1.bf16.msra.mxu0 %v6676_v56  ;;  %v6756_v56 = vld [vmem:[%s9144_s3 + $0xc8c] ss:$16 sps:$4 sm:$0xff]  }
 0x249   :  { %4880 = vmatpush1.bf16.msra.mxu1 %v6679_v57  ;;  %4840 = vmatprep.subr.bf16.mxu0 %v6684_v58  ;;  %v6759_v58 = vld [vmem:[%s9144_s3 + $0xe8c] ss:$16 sps:$4 sm:$0xff]  }
 0x24a   :  { %4881 = vmatprep.subr.bf16.mxu1 %v6687_v59  ;;  %v6754_v59 = vld [vmem:[%s9144_s3 + $0xc88] ss:$16 sps:$4 sm:$0xff]  }
 0x24c   :  { %4841 = vmatpush1.bf16.msra.mxu0 %v6682_v61  ;;  %v6757_v61 = vld [vmem:[%s9144_s3 + $0xe88] ss:$16 sps:$4 sm:$0xff]  }
 0x24d   :  { %4882 = vmatpush1.bf16.msra.mxu1 %v6685_v40  ;;  %4842 = vmatprep.subr.bf16.mxu0 %v6690_v0  ;;  %v6762_v40 = vld [vmem:[%s9144_s3 + $0xc6c] ss:$16 sps:$4 sm:$0xff]  }
 0x24e   :  { %4883 = vmatprep.subr.bf16.mxu1 %v6693_v38  ;;  %v6765_v0 = vld [vmem:[%s9144_s3 + $0xe6c] ss:$16 sps:$4 sm:$0xff]   ;;  %v6760_v38 = vld [vmem:[%s9144_s3 + $0xc68] ss:$16 sps:$4 sm:$0xff]  }
 0x250   :  { %4843 = vmatpush2.bf16.msra.mxu0 %v6688_v11  ;;  %v6763_v11 = vld [vmem:[%s9144_s3 + $0xe68] ss:$16 sps:$4 sm:$0xff]  }
 0x251   :  { %4884 = vmatpush2.bf16.msra.mxu1 %v6691_v30  ;;  %4844 = vmatprep.subr.bf16.mxu0 %v6696_v1  ;;  %v6768_v30 = vld [vmem:[%s9144_s3 + $0xc4c] ss:$16 sps:$4 sm:$0xff]  }
 0x252   :  { %4885 = vmatprep.subr.bf16.mxu1 %v6699_v4  ;;  %v6771_v1 = vld [vmem:[%s9144_s3 + $0xe4c] ss:$16 sps:$4 sm:$0xff]   ;;  %v6766_v4 = vld [vmem:[%s9144_s3 + $0xc48] ss:$16 sps:$4 sm:$0xff]  }
 0x254   :  { %4845 = vmatpush2.bf16.msra.mxu0 %v6694_v5  ;;  %v6769_v5 = vld [vmem:[%s9144_s3 + $0xe48] ss:$16 sps:$4 sm:$0xff]  }
 0x255   :  { %4886 = vmatpush2.bf16.msra.mxu1 %v6697_v34  ;;  %4846 = vmatprep.subr.bf16.mxu0 %v6702_v19  ;;  %v6774_v34 = vld [vmem:[%s9144_s3 + $0xc2c] ss:$16 sps:$4 sm:$0xff]  }
 0x256   :  { %4887 = vmatprep.subr.bf16.mxu1 %v6705_v7  ;;  %v6777_v19 = vld [vmem:[%s9144_s3 + $0xe2c] ss:$16 sps:$4 sm:$0xff]   ;;  %v6772_v7 = vld [vmem:[%s9144_s3 + $0xc28] ss:$16 sps:$4 sm:$0xff]  }
 0x258   :  { %4847 = vmatpush2.bf16.msra.mxu0 %v6700_v21  ;;  %v6775_v21 = vld [vmem:[%s9144_s3 + $0xe28] ss:$16 sps:$4 sm:$0xff]  }
 0x259   :  { %4888 = vmatpush2.bf16.msra.mxu1 %v6703_v8  ;;  %4848 = vmatprep.subr.bf16.mxu0 %v6708_v24  ;;  %v6780_v8 = vld [vmem:[%s9144_s3 + $0xc0c] ss:$16 sps:$4 sm:$0xff]  }
 0x25a   :  { %4889 = vmatprep.subr.bf16.mxu1 %v6711_v18  ;;  %v6783_v24 = vld [vmem:[%s9144_s3 + $0xe0c] ss:$16 sps:$4 sm:$0xff]   ;;  %v6778_v18 = vld [vmem:[%s9144_s3 + $0xc08] ss:$16 sps:$4 sm:$0xff]  }
 0x25c   :  { %4849 = vmatpush2.bf16.msra.mxu0 %v6706_v12  ;;  %v6781_v12 = vld [vmem:[%s9144_s3 + $0xe08] ss:$16 sps:$4 sm:$0xff]  }
 0x25d   :  { %4890 = vmatpush2.bf16.msra.mxu1 %v6709_v13  ;;  %4850 = vmatprep.subr.bf16.mxu0 %v6714_v20  ;;  %v6786_v13 = vld [vmem:[%s9144_s3 + $0xdec] ss:$16 sps:$4 sm:$0xff]  }
 0x25e   :  { %4891 = vmatprep.subr.bf16.mxu1 %v6717_v54  ;;  %v6789_v20 = vld [vmem:[%s9144_s3 + $0xfec] ss:$16 sps:$4 sm:$0xff]   ;;  %v6784_v54 = vld [vmem:[%s9144_s3 + $0xde8] ss:$16 sps:$4 sm:$0xff]  }
 0x260   :  { %4851 = vmatpush2.bf16.msra.mxu0 %v6712_v52  ;;  %v6787_v52 = vld [vmem:[%s9144_s3 + $0xfe8] ss:$16 sps:$4 sm:$0xff]  }
 0x261   :  { %4892 = vmatpush2.bf16.msra.mxu1 %v6715_v15  ;;  %4852 = vmatprep.subr.bf16.mxu0 %v6720_v60  ;;  %v6792_v15 = vld [vmem:[%s9144_s3 + $0xdcc] ss:$16 sps:$4 sm:$0xff]  }
 0x262   :  { %4893 = vmatprep.subr.bf16.mxu1 %v6723_v10  ;;  %v6795_v60 = vld [vmem:[%s9144_s3 + $0xfcc] ss:$16 sps:$4 sm:$0xff]   ;;  %v6790_v10 = vld [vmem:[%s9144_s3 + $0xdc8] ss:$16 sps:$4 sm:$0xff]  }
 0x264   :  { %4853 = vmatpush2.bf16.msra.mxu0 %v6718_v63  ;;  %v6793_v63 = vld [vmem:[%s9144_s3 + $0xfc8] ss:$16 sps:$4 sm:$0xff]  }
 0x265   :  { %4894 = vmatpush2.bf16.msra.mxu1 %v6721_v9  ;;  %4854 = vmatprep.subr.bf16.mxu0 %v6726_v22  ;;  %v6798_v9 = vld [vmem:[%s9144_s3 + $0xdac] ss:$16 sps:$4 sm:$0xff]  }
 0x266   :  { %4895 = vmatprep.subr.bf16.mxu1 %v6729_v43  ;;  %v6801_v22 = vld [vmem:[%s9144_s3 + $0xfac] ss:$16 sps:$4 sm:$0xff]   ;;  %v6796_v43 = vld [vmem:[%s9144_s3 + $0xda8] ss:$16 sps:$4 sm:$0xff]  }
 0x268   :  { %4855 = vmatpush2.bf16.msra.mxu0 %v6724_v25  ;;  %v6799_v25 = vld [vmem:[%s9144_s3 + $0xfa8] ss:$16 sps:$4 sm:$0xff]  }
 0x269   :  { %4896 = vmatpush2.bf16.msra.mxu1 %v6727_v27  ;;  %4856 = vmatprep.subr.bf16.mxu0 %v6732_v39  ;;  %v6804_v27 = vld [vmem:[%s9144_s3 + $0xd8c] ss:$16 sps:$4 sm:$0xff]  }
 0x26a   :  { %4897 = vmatprep.subr.bf16.mxu1 %v6735_v62  ;;  %v6807_v39 = vld [vmem:[%s9144_s3 + $0xf8c] ss:$16 sps:$4 sm:$0xff]   ;;  %v6802_v62 = vld [vmem:[%s9144_s3 + $0xd88] ss:$16 sps:$4 sm:$0xff]  }
 0x26c   :  { %4857 = vmatpush2.bf16.msra.mxu0 %v6730_v45  ;;  %v6805_v45 = vld [vmem:[%s9144_s3 + $0xf88] ss:$16 sps:$4 sm:$0xff]  }
 0x26d   :  { %4898 = vmatpush2.bf16.msra.mxu1 %v6733_v23  ;;  %4908 = vmatprep.subr.bf16.mxu0 %v6738_v46  ;;  %v6810_v23 = vld [vmem:[%s9144_s3 + $0xd6c] ss:$16 sps:$4 sm:$0xff]  }
 0x26e   :  { %4949 = vmatprep.subr.bf16.mxu1 %v6741_v2  ;;  %v6813_v46 = vld [vmem:[%s9144_s3 + $0xf6c] ss:$16 sps:$4 sm:$0xff]   ;;  %v6808_v2 = vld [vmem:[%s9144_s3 + $0xd68] ss:$16 sps:$4 sm:$0xff]  }
 0x26f   :  { %v4614_v31 = vpop.f32.mrf.mxu0  ;;  %4859 = vmatmul.mubr.bf16.vlgmr.msra.gmra.mxu0 %v8016_v32  ;;  %v4655_v42 = vpop.f32.mrf.mxu1  ;;  %v6745_v32 = vld [vmem:[%s9144_s3 + $0xec8] ss:$16 sps:$4 sm:$0xff]  }
 0x270   :  { %v4615_v35 = vadd.f32 %v4614_v31, %v8658_v3  ;;  %4900 = vmatmul.mubr.bf16.vlgmr.msra.gmra.mxu1 %v8024_v36  ;;  %4909 = vmatpush1.bf16.msra.mxu0 %v6736_v41  ;;  %v6750_v3 = vld [vmem:[%s9144_s3 + $0xcac] ss:$16 sps:$4 sm:$0xff]   ;;  %v6811_v41 = vld [vmem:[%s9144_s3 + $0xf68] ss:$16 sps:$4 sm:$0xff]  }
 0x271   :  { %4940 = vmatprep.mubr.bf16.mxu0 %v8026_v37  ;;  %4950 = vmatpush1.bf16.msra.mxu1 %v6739_v26  ;;  %v8851_v48 = vpop.f32.mrf.mxu0  ;;  %v8862_v36 = vpop.f32.mrf.mxu1  ;;  %v6753_v37 = vld [vmem:[%s9144_s3 + $0xeac] ss:$16 sps:$4 sm:$0xff]   ;;  %v6814_v31 = vld [vmem:[%s9144_s3 + $0xd48] ss:$16 sps:$4 sm:$0xff]  }
 0x272   :  { %v8859_v49 = vadd.f32 %v4655_v42, %v4615_v35  ;;  %4981 = vmatprep.mubr.bf16.mxu1 %v8031_v44  ;;  %4910 = vmatprep.subr.bf16.mxu0 %v6744_v29  ;;  %v6751_v44 = vld [vmem:[%s9144_s3 + $0xea8] ss:$16 sps:$4 sm:$0xff]   ;;  %v6816_v26 = vld [vmem:[%s9144_s3 + $0xd4c] ss:$16 sps:$4 sm:$0xff]  }
 0x273   :  { %v4618_v50 = vpop.f32.mrf.mxu0  ;;  %4951 = vmatprep.subr.bf16.mxu1 %v6747_v33  ;;  %v4659_v51 = vpop.f32.mrf.mxu1  ;;  %v6819_v29 = vld [vmem:[%s9144_s3 + $0xf4c] ss:$16 sps:$4 sm:$0xff]   ;;  %v6817_v33 = vld [vmem:[%s9144_s3 + $0xf48] ss:$16 sps:$4 sm:$0xff]  }
 0x274   :  { %4911 = vmatpush1.bf16.msra.mxu0 %v6742_v47  ;;  %v6822_v35 = vld [vmem:[%s9144_s3 + $0xd2c] ss:$16 sps:$4 sm:$0xff]   ;;  %v4617_v47 = vadd.f32 %v8851_v48, %v8668_v28  ;;  %v6826_v50 = vld [vmem:[%s9144_s3 + $0xd08] ss:$16 sps:$4 sm:$0xff]  }
 0x275   :  { %4952 = vmatpush1.bf16.msra.mxu1 %v6745_v32  ;;  %v4619_v55 = vpop.f32.mrf.mxu0  ;;  %4912 = vmatprep.subr.bf16.mxu0 %v6750_v3  ;;  %v4660_v57 = vpop.f32.mrf.mxu1  ;;  %v6825_v42 = vld [vmem:[%s9144_s3 + $0xf2c] ss:$16 sps:$4 sm:$0xff]   ;;  %v6820_v32 = vld [vmem:[%s9144_s3 + $0xd28] ss:$16 sps:$4 sm:$0xff]  }
 0x276   :  { %4953 = vmatprep.subr.bf16.mxu1 %v6753_v37  ;;  %v6823_v3 = vld [vmem:[%s9144_s3 + $0xf28] ss:$16 sps:$4 sm:$0xff]   ;;  %v6828_v37 = vld [vmem:[%s9144_s3 + $0xd0c] ss:$16 sps:$4 sm:$0xff]   ;;  %v4658_v48 = vadd.f32 %v8862_v36, %v4617_v47  ;;  %v6864_v36 = vld [vmem:[%s9146_s4] sm:$0xf] }
 0x277   :  { %v6831_v28 = vld [vmem:[%s9144_s3 + $0xf0c] ss:$16 sps:$4 sm:$0xff]   ;;  %v6829_v51 = vld [vmem:[%s9144_s3 + $0xf08] ss:$16 sps:$4 sm:$0xff]   ;;  %v6834_v57 = vld [vmem:[%s9147_s5 + $0x70] sm:$0xff]  }
 0x278   :  { %4913 = vmatpush1.bf16.msra.mxu0 %v6748_v53  ;;  %v6832_v53 = vld [vmem:[%s9147_s5 + $0x78] sm:$0xff]   ;;  %v4991_v55 = vmax.f32 %v4658_v48, 0.0  ;;  %v6862_v48 = vld [vmem:[%s9147_s5 + $0xc0] sm:$0xff]  }
 0x279   :  { %4954 = vmatpush1.bf16.msra.mxu1 %v6751_v44  ;;  %4914 = vmatprep.subr.bf16.mxu0 %v6756_v56  ;;  %v1765_v44 = vrot.slane %v6864_v36, %v7520_v14  ;;  %v6833_v56 = vld [vmem:[%s9147_s5 + $0x38] sm:$0xff]   ;;  %v6835_v14 = vld [vmem:[%s9147_s5 + $0x30] sm:$0xff]  }
 0x27a   :  { %4955 = vmatprep.subr.bf16.mxu1 %v6759_v58  ;;  %v1769_v58 = vrot.slane %v6864_v36, %v7526_v16  ;;  %v6836_v16 = vld [vmem:[%s9147_s5 + $0x68] sm:$0xff]  }
 0x27c   :  { %4915 = vmatpush1.bf16.msra.mxu0 %v6754_v59  ;;  %v4995_v59 = vpack.c.bf16 %v4991_v55, %v4991_v55 }
 0x27d   :  { %4956 = vmatpush1.bf16.msra.mxu1 %v6757_v61  ;;  %4916 = vmatprep.subr.bf16.mxu0 %v6762_v40 }
 0x27e   :  { %4957 = vmatprep.subr.bf16.mxu1 %v6765_v0 }
 0x280   :  { %4917 = vmatpush1.bf16.msra.mxu0 %v6760_v38 }
 0x281   :  { %4958 = vmatpush1.bf16.msra.mxu1 %v6763_v11  ;;  %4918 = vmatprep.subr.bf16.mxu0 %v6768_v30 }
 0x282   :  { %4959 = vmatprep.subr.bf16.mxu1 %v6771_v1 }
 0x284   :  { %4919 = vmatpush1.bf16.msra.mxu0 %v6766_v4 }
 0x285   :  { %4960 = vmatpush1.bf16.msra.mxu1 %v6769_v5  ;;  %4920 = vmatprep.subr.bf16.mxu0 %v6774_v34 }
 0x286   :  { %4961 = vmatprep.subr.bf16.mxu1 %v6777_v19  ;;  %v6838_v19 = vld [vmem:[%s9147_s5 + $0x60] sm:$0xff]  }
 0x288   :  { %4921 = vmatpush1.bf16.msra.mxu0 %v6772_v7 }
 0x289   :  { %4962 = vmatpush1.bf16.msra.mxu1 %v6775_v21  ;;  %4922 = vmatprep.subr.bf16.mxu0 %v6780_v8  ;;  %v6848_v21 = vld [vmem:[%s9147_s5 + $0xf8] sm:$0xff]  }
 0x28a   :  { %4963 = vmatprep.subr.bf16.mxu1 %v6783_v24  ;;  %v6849_v8 = vld [vmem:[%s9147_s5 + $0xb8] sm:$0xff]   ;;  %v6850_v24 = vld [vmem:[%s9147_s5 + $0xf0] sm:$0xff]  }
 0x28c   :  { %4923 = vmatpush1.bf16.msra.mxu0 %v6778_v18  ;;  %v6839_v18 = vld [vmem:[%s9147_s5 + $0x20] sm:$0xff]  }
 0x28d   :  { %4964 = vmatpush1.bf16.msra.mxu1 %v6781_v12  ;;  %4924 = vmatprep.subr.bf16.mxu0 %v6786_v13  ;;  %v6840_v12 = vld [vmem:[%s9147_s5 + $0x58] sm:$0xff]   ;;  %v6851_v13 = vld [vmem:[%s9147_s5 + $0xb0] sm:$0xff]  }
 0x28e   :  { %4965 = vmatprep.subr.bf16.mxu1 %v6789_v20  ;;  %v6852_v20 = vld [vmem:[%s9147_s5 + $0xe8] sm:$0xff]  }
 0x290   :  { %4925 = vmatpush2.bf16.msra.mxu0 %v6784_v54  ;;  %v6841_v54 = vld [vmem:[%s9147_s5 + $0x18] sm:$0xff]  }
 0x291   :  { %4966 = vmatpush2.bf16.msra.mxu1 %v6787_v52  ;;  %4926 = vmatprep.subr.bf16.mxu0 %v6792_v15  ;;  %v6842_v52 = vld [vmem:[%s9147_s5 + $0x50] sm:$0xff]   ;;  %v6853_v15 = vld [vmem:[%s9147_s5 + $0xa8] sm:$0xff]  }
 0x292   :  { %4967 = vmatprep.subr.bf16.mxu1 %v6795_v60  ;;  %v6854_v60 = vld [vmem:[%s9147_s5 + $0xe0] sm:$0xff]  }
 0x294   :  { %4927 = vmatpush2.bf16.msra.mxu0 %v6790_v10  ;;  %v6843_v10 = vld [vmem:[%s9147_s5 + $0x10] sm:$0xff]  }
 0x295   :  { %4968 = vmatpush2.bf16.msra.mxu1 %v6793_v63  ;;  %4928 = vmatprep.subr.bf16.mxu0 %v6798_v9  ;;  %v6844_v63 = vld [vmem:[%s9147_s5 + $0x48] sm:$0xff]   ;;  %v6855_v9 = vld [vmem:[%s9147_s5 + $0xa0] sm:$0xff]  }
 0x296   :  { %4969 = vmatprep.subr.bf16.mxu1 %v6801_v22  ;;  %v6856_v22 = vld [vmem:[%s9147_s5 + $0xd8] sm:$0xff]  }
 0x298   :  { %4929 = vmatpush2.bf16.msra.mxu0 %v6796_v43  ;;  %v6845_v43 = vld [vmem:[%s9147_s5 + $0x8] sm:$0xff]  }
 0x299   :  { %4970 = vmatpush2.bf16.msra.mxu1 %v6799_v25  ;;  %4930 = vmatprep.subr.bf16.mxu0 %v6804_v27  ;;  %v6846_v25 = vld [vmem:[%s9147_s5 + $0x40] sm:$0xff]   ;;  %v6857_v27 = vld [vmem:[%s9147_s5 + $0x98] sm:$0xff]  }
 0x29a   :  { %4971 = vmatprep.subr.bf16.mxu1 %v6807_v39  ;;  %v6847_v39 = vld [vmem:[%s9147_s5] sm:$0xff]  }
 0x29c   :  { %4931 = vmatpush2.bf16.msra.mxu0 %v6802_v62  ;;  %v4990_v62 = vmax.f32 %v8859_v49, 0.0 }
 0x29d   :  { %4972 = vmatpush2.bf16.msra.mxu1 %v6805_v45  ;;  %4932 = vmatprep.subr.bf16.mxu0 %v6810_v23 }
 0x29e   :  { %4973 = vmatprep.subr.bf16.mxu1 %v6813_v46  ;;  %v4994_v45 = vpack.c.bf16 %v4990_v62, %v4990_v62  ;;  %v6858_v46 = vld [vmem:[%s9147_s5 + $0xd0] sm:$0xff]  }
 0x2a0   :  { %4933 = vmatpush2.bf16.msra.mxu0 %v6808_v2 }
 0x2a1   :  { %4974 = vmatpush2.bf16.msra.mxu1 %v6811_v41  ;;  %4934 = vmatprep.subr.bf16.mxu0 %v6816_v26  ;;  %v6859_v26 = vld [vmem:[%s9147_s5 + $0x90] sm:$0xff]  }
 0x2a2   :  { %4975 = vmatprep.subr.bf16.mxu1 %v6819_v29 }
 0x2a4   :  { %4935 = vmatpush2.bf16.msra.mxu0 %v6814_v31 }
 0x2a5   :  { %4976 = vmatpush2.bf16.msra.mxu1 %v6817_v33  ;;  %4936 = vmatprep.subr.bf16.mxu0 %v6822_v35 }
 0x2a6   :  { %4977 = vmatprep.subr.bf16.mxu1 %v6825_v42  ;;  %v6860_v42 = vld [vmem:[%s9147_s5 + $0xc8] sm:$0xff]  }
 0x2a8   :  { %4937 = vmatpush2.bf16.msra.mxu0 %v6820_v32 }
 0x2a9   :  { %4978 = vmatpush2.bf16.msra.mxu1 %v6823_v3  ;;  %4938 = vmatprep.subr.bf16.mxu0 %v6828_v37  ;;  %v6861_v3 = vld [vmem:[%s9147_s5 + $0x88] sm:$0xff]  }
 0x2aa   :  { %4979 = vmatprep.subr.bf16.mxu1 %v6831_v28 }
 0x2ac   :  { %4939 = vmatpush2.bf16.msra.mxu0 %v6826_v50  ;;  %v6863_v50 = vld [vmem:[%s9147_s5 + $0x80] sm:$0xff]  }
 0x2ad   :  { %4980 = vmatpush2.bf16.msra.mxu1 %v6829_v51  ;;  %6019 = vmatprep.subr.bf16.mxu0 %v6832_v53 }
 0x2ae   :  { %6041 = vmatprep.subr.bf16.mxu1 %v6848_v21 }
 0x2af   :  { %v4696_v61 = vpop.f32.mrf.mxu0  ;;  %4941 = vmatmul.mubr.bf16.vlgmr.msra.gmra.mxu0 %v8226_v17 }
 0x2b0   :  { %v4697_v40 = vadd.f32 %v4696_v61, %v1765_v44  ;;  %v4737_v0 = vpop.f32.mrf.mxu1  ;;  %4982 = vmatmul.mubr.bf16.vlgmr.msra.gmra.mxu1 %v8231_v6  ;;  %6020 = vmatpush3.bf16.msra.mxu0 %v6833_v56  ;;  %v6837_v6 = vld [vmem:[%s9147_s5 + $0x28] sm:$0xff]  }
 0x2b1   :  { %5293 = vmatprep.mubr.bf16.mxu0 %v4995_v59  ;;  %v4698_v38 = vpop.f32.mrf.mxu0  ;;  %6021 = vmatprep.subr.bf16.mxu0 %v6834_v57 }
 0x2b2   :  { %v4738_v11 = vadd.f32 %v4737_v0, %v4697_v40  ;;  %v4699_v30 = vadd.f32 %v4698_v38, %v1769_v58  ;;  %v4739_v1 = vpop.f32.mrf.mxu1  ;;  %6042 = vmatpush3.bf16.msra.mxu1 %v6849_v8 }
 0x2b3   :  { %v4700_v17 = vpop.f32.mrf.mxu0  ;;  %6043 = vmatprep.subr.bf16.mxu1 %v6850_v24 }
 0x2b4   :  { %v4740_v4 = vadd.f32 %v4739_v1, %v4699_v30  ;;  %v4741_v5 = vpop.f32.mrf.mxu1  ;;  %6022 = vmatpush3.bf16.msra.mxu0 %v6835_v14 }
 0x2b5   :  { %v4701_v34 = vpop.f32.mrf.mxu0  ;;  %6023 = vmatprep.subr.bf16.mxu0 %v6836_v16 }
 0x2b6   :  { %v4742_v7 = vpop.f32.mrf.mxu1  ;;  %6044 = vmatpush3.bf16.msra.mxu1 %v6851_v13 }
 0x2b7   :  { %6045 = vmatprep.subr.bf16.mxu1 %v6852_v20 }
 0x2b8   :  { %6024 = vmatpush3.bf16.msra.mxu0 %v6837_v6 }
 0x2b9   :  { %6025 = vmatprep.subr.bf16.mxu0 %v6838_v19 }
 0x2ba   :  { %6046 = vmatpush3.bf16.msra.mxu1 %v6853_v15 }
 0x2bb   :  { %6047 = vmatprep.subr.bf16.mxu1 %v6854_v60 }
 0x2bc   :  { %6026 = vmatpush3.bf16.msra.mxu0 %v6839_v18 }
 0x2bd   :  { %6027 = vmatprep.subr.bf16.mxu0 %v6840_v12 }
 0x2be   :  { %6048 = vmatpush3.bf16.msra.mxu1 %v6855_v9 }
 0x2bf   :  { %6049 = vmatprep.subr.bf16.mxu1 %v6856_v22 }
 0x2c0   :  { %6028 = vmatpush3.bf16.msra.mxu0 %v6841_v54 }
 0x2c1   :  { %6029 = vmatprep.subr.bf16.mxu0 %v6842_v52  ;;  %v5986_v52 = vld [vmem:[%s9148_s6] ss:$0 sm:$0xff] }
 0x2c2   :  { %6050 = vmatpush3.bf16.msra.mxu1 %v6857_v27 }
 0x2c3   :  { %6051 = vmatprep.subr.bf16.mxu1 %v6858_v46 }
 0x2c4   :  { %6030 = vmatpush3.bf16.msra.mxu0 %v6843_v10 }
 0x2c5   :  { %6031 = vmatprep.subr.bf16.mxu0 %v6844_v63 }
 0x2c6   :  { %6052 = vmatpush3.bf16.msra.mxu1 %v6859_v26 }
 0x2c7   :  { %6053 = vmatprep.subr.bf16.mxu1 %v6860_v42 }
 0x2c8   :  { %6032 = vmatpush3.bf16.msra.mxu0 %v6845_v43 }
 0x2c9   :  { %6033 = vmatprep.subr.bf16.mxu0 %v6846_v25 }
 0x2ca   :  { %6054 = vmatpush3.bf16.msra.mxu1 %v6861_v3 }
 0x2cb   :  { %6055 = vmatprep.subr.bf16.mxu1 %v6862_v48 }
 0x2cc   :  { %6034 = vmatpush3.bf16.msra.mxu0 %v6847_v39 }
 0x2ce   :  { %6056 = vmatpush3.bf16.msra.mxu1 %v6863_v50 }
 0x2cf   :  { %5294 = vmatmul.mubr.bf16.vlgmr.msra.gmra.mxu0 %v4994_v45 }
 0x2ef   :  { %v4778_v23 = vpop.f32.mrf.mxu0 }
 0x2f0   :  { %v4779_v2 = vadd.f32 %v4778_v23, %v4738_v11  ;;  %v4819_v41 = vpop.f32.mrf.mxu1 }
 0x2f1   :  { %v4780_v29 = vpop.f32.mrf.mxu0 }
 0x2f2   :  { %v4820_v31 = vadd.f32 %v4819_v41, %v4779_v2  ;;  %v4781_v49 = vadd.f32 %v4780_v29, %v4740_v4  ;;  %v4821_v33 = vpop.f32.mrf.mxu1 }
 0x2f3   :  { %v4782_v35 = vpop.f32.mrf.mxu0 }
 0x2f4   :  { %v4822_v47 = vadd.f32 %v4821_v33, %v4781_v49  ;;  %v4823_v32 = vpop.f32.mrf.mxu1 }
 0x2f5   :  { %v4783_v37 = vpop.f32.mrf.mxu0 }
 0x2f6   :  { %v4824_v28 = vpop.f32.mrf.mxu1 }
 0x32f   :  { %v4860_v51 = vpop.f32.mrf.mxu0 }
 0x330   :  { %v4861_v53 = vadd.f32 %v4860_v51, %v4820_v31  ;;  %v4901_v55 = vpop.f32.mrf.mxu1 }
 0x331   :  { %v4862_v36 = vpop.f32.mrf.mxu0 }
 0x332   :  { %v4902_v44 = vadd.f32 %v4901_v55, %v4861_v53  ;;  %v4903_v56 = vpop.f32.mrf.mxu1  ;;  %v4863_v40 = vadd.f32 %v4862_v36, %v4822_v47 }
 0x333   :  { %v4864_v57 = vpop.f32.mrf.mxu0 }
 0x334   :  { %v4905_v58 = vpop.f32.mrf.mxu1  ;;  %v4904_v14 = vadd.f32 %v4903_v56, %v4863_v40 }
 0x335   :  { %v4865_v59 = vpop.f32.mrf.mxu0 }
 0x336   :  { %v4906_v61 = vpop.f32.mrf.mxu1 }
 0x36f   :  { %v4942_v0 = vpop.f32.mrf.mxu0 }
 0x370   :  { %v4943_v38 = vadd.f32 %v4942_v0, %v4902_v44  ;;  %v4983_v16 = vpop.f32.mrf.mxu1 }
 0x371   :  { %v4944_v11 = vpop.f32.mrf.mxu0 }
 0x372   :  { %v4984_v30 = vadd.f32 %v4983_v16, %v4943_v38  ;;  %v4945_v1 = vadd.f32 %v4944_v11, %v4904_v14  ;;  %v4985_v17 = vpop.f32.mrf.mxu1 }
 0x373   :  { %v4946_v4 = vpop.f32.mrf.mxu0 }
 0x374   :  { %v4986_v5 = vadd.f32 %v4985_v17, %v4945_v1  ;;  %v4987_v6 = vpop.f32.mrf.mxu1  ;;  %v4992_v34 = vmax.f32 %v4984_v30, 0.0 }
 0x375   :  { %v4947_v19 = vpop.f32.mrf.mxu0 }
 0x376   :  { %v4993_v7 = vmax.f32 %v4986_v5, 0.0  ;;  %v4988_v21 = vpop.f32.mrf.mxu1  ;;  %v4996_v24 = vpack.c.bf16 %v4992_v34, %v4992_v34 }
 0x378   :  { %v4997_v8 = vpack.c.bf16 %v4993_v7, %v4993_v7 }
 0x37a   :  { %5333 = vmatprep.mubr.bf16.mxu1 %v4997_v8 }
 0x37b   :  { %5334 = vmatmul.mubr.bf16.vlgmr.msra.gmra.mxu1 %v4996_v24 }
 0x38f   :  { %v6035_v18 = vpop.f32.mrf.mxu0 }
 0x391   :  { %v6036_v12 = vpop.f32.mrf.mxu0 }
 0x392   :  { %v6037_v13 = vadd.f32 %v6036_v12, %v6035_v18 }
 0x393   :  { %v6038_v20 = vpop.f32.mrf.mxu0 }
 0x394   :  { %v5296_v10 = vadd.f32 %v6037_v13, %v5986_v52 }
 0x395   :  { %v6039_v54 = vpop.f32.mrf.mxu0 }
 0x43b   :  { %v6057_v15 = vpop.f32.mrf.mxu1 }
 0x43d   :  { %v6058_v60 = vpop.f32.mrf.mxu1 }
 0x43e   :  { %v6059_v63 = vadd.f32 %v6058_v60, %v6057_v15 }
 0x43f   :  { %v6060_v9 = vpop.f32.mrf.mxu1 }
 0x440   :  { %v5336_v22 = vadd.f32 %v6059_v63, %v5296_v10 }
 0x441   :  { %v6061_v43 = vpop.f32.mrf.mxu1 }
 0x442   :  { %5341 = vst [vmem:[%s9149_s7] sm:$0xff] %v5336_v22 }

</bundles_post_ra>
